<compile_context>
chip_gen: v6e
topology: v6e:2x2x1
jax: 0.10.0
libtpu: 0.0.40
codegen_flags: <defaults>
</compile_context>

<pallas_src>
import jax
import jax.numpy as jnp
from jax.experimental import pallas as pl
from jax.experimental.pallas import tpu as pltpu

T_DIM = 768
C_DIM = 512
H_DIM = 2 * C_DIM            # 1024
LR_MUL = 0.01
NEG_SLOPE = 0.2
FUSED_SCALE = 2.0 ** 0.5     # fused_leaky_relu output scale
MAX_TM = 256                 # batch tile: fills the 256-wide MXU on v6e/v7x


def _ca_net_kernel(x_ref,
                   w1_ref, b1_ref,
                   w2_ref, b2_ref,
                   w3_ref, b3_ref,
                   w4_ref, b4_ref,
                   eps_ref,
                   c_ref, mu_ref, logvar_ref):
    """One batch tile: 4 fused-lrelu linears + reparametrization."""

    def layer(h, w_ref, b_ref, out_scale):
        # bf16 x bf16 -> f32 on the MXU; bias / leaky-relu in f32 on the VPU.
        y = jnp.dot(h.astype(jnp.bfloat16), w_ref[...],
                    preferred_element_type=jnp.float32)
        y = y + b_ref[...]
        y = jnp.maximum(y, NEG_SLOPE * y)        # leaky_relu(0.2), single VALU op
        return y * out_scale if out_scale != 1.0 else y

    h = x_ref[...]
    # sqrt(2) of layers 1..3 is pre-folded into the NEXT layer's weights, so
    # only the last layer applies an explicit scale.
    h = layer(h, w1_ref, b1_ref, 1.0)
    h = layer(h, w2_ref, b2_ref, 1.0)
    h = layer(h, w3_ref, b3_ref, 1.0)
    h = layer(h, w4_ref, b4_ref, FUSED_SCALE)

    mu = h[:, :C_DIM]                 # lane-aligned split (512 = 4*128)
    logvar = h[:, C_DIM:]
    std = jnp.exp(0.5 * logvar)       # f32 EUP
    c_ref[...] = eps_ref[...].astype(jnp.float32) * std + mu
    mu_ref[...] = mu
    logvar_ref[...] = logvar


def init_ca_net_params(key):
    """EqualLinear-style init (torch: W=randn(out,in)/lr_mul, bias=0), with the
    runtime scale (1/sqrt(in))*lr_mul folded into the effective [in,out] weight.
    Returned in f32 (the 'mathematical' parameters, used by the reference)."""
    dims = [(T_DIM, H_DIM), (H_DIM, H_DIM), (H_DIM, H_DIM), (H_DIM, H_DIM)]
    params = []
    for i, (din, dout) in enumerate(dims):
        k = jax.random.fold_in(key, i)
        w_raw = jax.random.normal(k, (dout, din), jnp.float32) / LR_MUL
        b_raw = jnp.zeros((dout,), jnp.float32)
        scale = (1.0 / (din ** 0.5)) * LR_MUL
        w_eff = (w_raw * scale).T            # [in, out]
        b_eff = (b_raw * LR_MUL)[None, :]    # [1, out]
        params.append((w_eff, b_eff))
    return params


def prepare_kernel_params(params):
    """Fold the fused-lrelu sqrt(2) of layers 1..3 into the following layer's
    weights and cast weights to bf16 (biases stay f32)."""
    out = []
    for i, (w, b) in enumerate(params):
        w_k = w * FUSED_SCALE if i > 0 else w
        out.append((w_k.astype(jnp.bfloat16), b.astype(jnp.float32)))
    return out


@jax.jit
def ca_net_forward(text_embedding, eps, kparams):
    b = text_embedding.shape[0]
    (w1, b1), (w2, b2), (w3, b3), (w4, b4) = kparams

    # Batch tile:
    #   b <= 256 -> one full-array block (tm = b), no padding, no partial block.
    #   b  > 256 -> 256-row tiles; the last block may be partial (no wrapper
    #               padded copies: OOB input rows are garbage but rows never
    #               interact, and OOB output writes are clipped by Pallas).
    tm = b if b <= MAX_TM else MAX_TM
    grid = (pl.cdiv(b, tm),)

    # Weights/biases: full-array blocks whose index_map is constant, so they
    # are DMA'd once and stay resident in VMEM across all batch tiles.
    w_spec_1 = pl.BlockSpec((T_DIM, H_DIM), lambda i: (0, 0))
    w_spec_h = pl.BlockSpec((H_DIM, H_DIM), lambda i: (0, 0))
    b_spec = pl.BlockSpec((1, H_DIM), lambda i: (0, 0))
    x_spec = pl.BlockSpec((tm, T_DIM), lambda i: (i, 0))
    eps_spec = pl.BlockSpec((tm, C_DIM), lambda i: (i, 0))
    out_spec = pl.BlockSpec((tm, C_DIM), lambda i: (i, 0))

    c_code, mu, logvar = pl.pallas_call(
        _ca_net_kernel,
        out_shape=(
            jax.ShapeDtypeStruct((b, C_DIM), jnp.float32),
            jax.ShapeDtypeStruct((b, C_DIM), jnp.float32),
            jax.ShapeDtypeStruct((b, C_DIM), jnp.float32),
        ),
        grid=grid,
        in_specs=[x_spec,
                  w_spec_1, b_spec,
                  w_spec_h, b_spec,
                  w_spec_h, b_spec,
                  w_spec_h, b_spec,
                  eps_spec],
        out_specs=(out_spec, out_spec, out_spec),
        compiler_params=pltpu.CompilerParams(
            # Batch tiles are independent -> shard across v7x's 2 TensorCores.
            dimension_semantics=("parallel",),
            # ~15 MiB double-buffered bf16 weights + ~6 MiB of 256-row tiles;
            # above v5e's 16 MiB scoped default, below v7x's 64 MiB physical.
            vmem_limit_bytes=40 << 20,
        ),
    )(text_embedding, w1, b1, w2, b2, w3, b3, w4, b4, eps)

    return c_code, mu, logvar


def _reference_f32(text_embedding, eps, params):
    """Pure-JAX f32 reference with the ORIGINAL (unfolded) semantics."""
    h = text_embedding
    for w, b in params:
        y = h @ w + b
        y = jnp.where(y >= 0, y, NEG_SLOPE * y) * FUSED_SCALE
        h = y
    mu = h[:, :C_DIM]
    logvar = h[:, C_DIM:]
    c_code = eps * jnp.exp(0.5 * logvar) + mu
    return c_code, mu, logvar


def _reference_bf16(text_embedding, eps, kparams):
    """Pure-JAX reference matching the kernel arithmetic (folded bf16 weights)."""
    h = text_embedding
    for i, (w, b) in enumerate(kparams):
        y = jnp.dot(h.astype(jnp.bfloat16), w,
                    preferred_element_type=jnp.float32) + b
        y = jnp.where(y >= 0, y, NEG_SLOPE * y)
        if i == 3:
            y = y * FUSED_SCALE
        h = y
    mu = h[:, :C_DIM]
    logvar = h[:, C_DIM:]
    c_code = eps * jnp.exp(0.5 * logvar) + mu
    return c_code, mu, logvar


if __name__ == "__main__":
    key = jax.random.PRNGKey(0)
    k_param, k_x, k_eps = jax.random.split(key, 3)

    batch = 2
    text_embedding = jax.random.normal(k_x, (batch, T_DIM), jnp.float32)
    # eps ~ N(0,1): replaces torch.cuda.FloatTensor(std.size()).normal_().
    eps = jax.random.normal(k_eps, (batch, C_DIM), jnp.float32)

    params = init_ca_net_params(k_param)        # f32 "mathematical" params
    kparams = prepare_kernel_params(params)     # folded bf16 kernel params

    c_code, mu, logvar = ca_net_forward(text_embedding, eps, kparams)
    jax.block_until_ready((c_code, mu, logvar))

    assert c_code.shape == (batch, C_DIM)
    assert mu.shape == (batch, C_DIM)
    assert logvar.shape == (batch, C_DIM)

    # 1) Check against a reference that uses the same bf16 folded weights
    #    (isolates kernel plumbing from quantization).
    c_b, mu_b, lv_b = _reference_bf16(text_embedding, eps, kparams)
    assert jnp.allclose(mu, mu_b, atol=2e-2, rtol=2e-2)
    assert jnp.allclose(logvar, lv_b, atol=2e-2, rtol=2e-2)
    assert jnp.allclose(c_code, c_b, atol=2e-2, rtol=2e-2)

    # 2) Semantic check against the original full-f32 CA_NET math
    #    (looser tolerance: bf16 weight quantization over 4 layers).
    c_f, mu_f, lv_f = _reference_f32(text_embedding, eps, params)
    assert jnp.allclose(mu, mu_f, atol=1e-1, rtol=1e-1)
    assert jnp.allclose(logvar, lv_f, atol=1e-1, rtol=1e-1)
    assert jnp.allclose(c_code, c_f, atol=1e-1, rtol=1e-1)

    print("KERNEL_OK")
</pallas_src>

<mosaic_0001>
module attributes {stable_mosaic.version = 11 : i64} {
  func.func @_ca_net_kernel(%arg0: i32, %arg1: memref<2x768xf32, #tpu.memory_space<vmem>>, %arg2: memref<768x1024xbf16, #tpu.memory_space<vmem>>, %arg3: memref<1x1024xf32, #tpu.memory_space<vmem>>, %arg4: memref<1024x1024xbf16, #tpu.memory_space<vmem>>, %arg5: memref<1x1024xf32, #tpu.memory_space<vmem>>, %arg6: memref<1024x1024xbf16, #tpu.memory_space<vmem>>, %arg7: memref<1x1024xf32, #tpu.memory_space<vmem>>, %arg8: memref<1024x1024xbf16, #tpu.memory_space<vmem>>, %arg9: memref<1x1024xf32, #tpu.memory_space<vmem>>, %arg10: memref<2x512xf32, #tpu.memory_space<vmem>>, %arg11: memref<2x512xf32, #tpu.memory_space<vmem>>, %arg12: memref<2x512xf32, #tpu.memory_space<vmem>>, %arg13: memref<2x512xf32, #tpu.memory_space<vmem>>) attributes {dimension_semantics = [#tpu.dimension_semantics<parallel>], iteration_bounds = array<i64: 1>, scalar_prefetch = 0 : i64, scratch_operands = 0 : i64, tpu.core_type = #tpu.core_type<tc>, window_params = [{transform_indices = @transform_0, window_bounds = array<i64: 2, 768>}, {pipeline_mode = #tpu.pipeline_mode<synchronous>, transform_indices = @transform_1, window_bounds = array<i64: 768, 1024>}, {pipeline_mode = #tpu.pipeline_mode<synchronous>, transform_indices = @transform_2, window_bounds = array<i64: 1, 1024>}, {pipeline_mode = #tpu.pipeline_mode<synchronous>, transform_indices = @transform_3, window_bounds = array<i64: 1024, 1024>}, {pipeline_mode = #tpu.pipeline_mode<synchronous>, transform_indices = @transform_4, window_bounds = array<i64: 1, 1024>}, {pipeline_mode = #tpu.pipeline_mode<synchronous>, transform_indices = @transform_5, window_bounds = array<i64: 1024, 1024>}, {pipeline_mode = #tpu.pipeline_mode<synchronous>, transform_indices = @transform_6, window_bounds = array<i64: 1, 1024>}, {pipeline_mode = #tpu.pipeline_mode<synchronous>, transform_indices = @transform_7, window_bounds = array<i64: 1024, 1024>}, {pipeline_mode = #tpu.pipeline_mode<synchronous>, transform_indices = @transform_8, window_bounds = array<i64: 1, 1024>}, {transform_indices = @transform_9, window_bounds = array<i64: 2, 512>}, {transform_indices = @transform_10, window_bounds = array<i64: 2, 512>}, {transform_indices = @transform_11, window_bounds = array<i64: 2, 512>}, {transform_indices = @transform_12, window_bounds = array<i64: 2, 512>}]} {
    %c0 = arith.constant 0 : index
    %c0_0 = arith.constant 0 : index
    %0 = vector.load %arg1[%c0, %c0_0] : memref<2x768xf32, #tpu.memory_space<vmem>>, vector<2x768xf32>
    %1 = arith.truncf %0 : vector<2x768xf32> to vector<2x768xbf16>
    %c0_1 = arith.constant 0 : index
    %c0_2 = arith.constant 0 : index
    %2 = vector.load %arg2[%c0_1, %c0_2] : memref<768x1024xbf16, #tpu.memory_space<vmem>>, vector<768x1024xbf16>
    %cst = arith.constant dense<0.000000e+00> : vector<2x1024xf32>
    %3 = tpu.matmul %1, %2, %cst {dimension_numbers = #tpu.dot_dimension_numbers<[1], [0], [0], [1], [0, 0, 1, 1], [], []>} : vector<2x768xbf16>, vector<768x1024xbf16>, vector<2x1024xf32> -> vector<2x1024xf32>
    %c0_3 = arith.constant 0 : index
    %c0_4 = arith.constant 0 : index
    %4 = vector.load %arg3[%c0_3, %c0_4] : memref<1x1024xf32, #tpu.memory_space<vmem>>, vector<1x1024xf32>
    %5 = vector.broadcast %4 : vector<1x1024xf32> to vector<2x1024xf32>
    %6 = arith.addf %3, %5 : vector<2x1024xf32>
    %cst_5 = arith.constant 2.000000e-01 : f32
    %7 = vector.broadcast %cst_5 : f32 to vector<2x1024xf32>
    %8 = arith.mulf %7, %6 : vector<2x1024xf32>
    %9 = arith.maximumf %6, %8 : vector<2x1024xf32>
    %10 = arith.truncf %9 : vector<2x1024xf32> to vector<2x1024xbf16>
    %c0_6 = arith.constant 0 : index
    %c0_7 = arith.constant 0 : index
    %11 = vector.load %arg4[%c0_6, %c0_7] : memref<1024x1024xbf16, #tpu.memory_space<vmem>>, vector<1024x1024xbf16>
    %cst_8 = arith.constant dense<0.000000e+00> : vector<2x1024xf32>
    %12 = tpu.matmul %10, %11, %cst_8 {dimension_numbers = #tpu.dot_dimension_numbers<[1], [0], [0], [1], [0, 0, 1, 1], [], []>} : vector<2x1024xbf16>, vector<1024x1024xbf16>, vector<2x1024xf32> -> vector<2x1024xf32>
    %c0_9 = arith.constant 0 : index
    %c0_10 = arith.constant 0 : index
    %13 = vector.load %arg5[%c0_9, %c0_10] : memref<1x1024xf32, #tpu.memory_space<vmem>>, vector<1x1024xf32>
    %14 = vector.broadcast %13 : vector<1x1024xf32> to vector<2x1024xf32>
    %15 = arith.addf %12, %14 : vector<2x1024xf32>
    %cst_11 = arith.constant 2.000000e-01 : f32
    %16 = vector.broadcast %cst_11 : f32 to vector<2x1024xf32>
    %17 = arith.mulf %16, %15 : vector<2x1024xf32>
    %18 = arith.maximumf %15, %17 : vector<2x1024xf32>
    %19 = arith.truncf %18 : vector<2x1024xf32> to vector<2x1024xbf16>
    %c0_12 = arith.constant 0 : index
    %c0_13 = arith.constant 0 : index
    %20 = vector.load %arg6[%c0_12, %c0_13] : memref<1024x1024xbf16, #tpu.memory_space<vmem>>, vector<1024x1024xbf16>
    %cst_14 = arith.constant dense<0.000000e+00> : vector<2x1024xf32>
    %21 = tpu.matmul %19, %20, %cst_14 {dimension_numbers = #tpu.dot_dimension_numbers<[1], [0], [0], [1], [0, 0, 1, 1], [], []>} : vector<2x1024xbf16>, vector<1024x1024xbf16>, vector<2x1024xf32> -> vector<2x1024xf32>
    %c0_15 = arith.constant 0 : index
    %c0_16 = arith.constant 0 : index
    %22 = vector.load %arg7[%c0_15, %c0_16] : memref<1x1024xf32, #tpu.memory_space<vmem>>, vector<1x1024xf32>
    %23 = vector.broadcast %22 : vector<1x1024xf32> to vector<2x1024xf32>
    %24 = arith.addf %21, %23 : vector<2x1024xf32>
    %cst_17 = arith.constant 2.000000e-01 : f32
    %25 = vector.broadcast %cst_17 : f32 to vector<2x1024xf32>
    %26 = arith.mulf %25, %24 : vector<2x1024xf32>
    %27 = arith.maximumf %24, %26 : vector<2x1024xf32>
    %28 = arith.truncf %27 : vector<2x1024xf32> to vector<2x1024xbf16>
    %c0_18 = arith.constant 0 : index
    %c0_19 = arith.constant 0 : index
    %29 = vector.load %arg8[%c0_18, %c0_19] : memref<1024x1024xbf16, #tpu.memory_space<vmem>>, vector<1024x1024xbf16>
    %cst_20 = arith.constant dense<0.000000e+00> : vector<2x1024xf32>
    %30 = tpu.matmul %28, %29, %cst_20 {dimension_numbers = #tpu.dot_dimension_numbers<[1], [0], [0], [1], [0, 0, 1, 1], [], []>} : vector<2x1024xbf16>, vector<1024x1024xbf16>, vector<2x1024xf32> -> vector<2x1024xf32>
    %c0_21 = arith.constant 0 : index
    %c0_22 = arith.constant 0 : index
    %31 = vector.load %arg9[%c0_21, %c0_22] : memref<1x1024xf32, #tpu.memory_space<vmem>>, vector<1x1024xf32>
    %32 = vector.broadcast %31 : vector<1x1024xf32> to vector<2x1024xf32>
    %33 = arith.addf %30, %32 : vector<2x1024xf32>
    %cst_23 = arith.constant 2.000000e-01 : f32
    %34 = vector.broadcast %cst_23 : f32 to vector<2x1024xf32>
    %35 = arith.mulf %34, %33 : vector<2x1024xf32>
    %36 = arith.maximumf %33, %35 : vector<2x1024xf32>
    %cst_24 = arith.constant 1.41421354 : f32
    %37 = vector.broadcast %cst_24 : f32 to vector<2x1024xf32>
    %38 = arith.mulf %36, %37 : vector<2x1024xf32>
    %39 = vector.extract_strided_slice %38 {offsets = [0, 0], sizes = [2, 512], strides = [1, 1]} : vector<2x1024xf32> to vector<2x512xf32>
    %40 = vector.extract_strided_slice %38 {offsets = [0, 512], sizes = [2, 512], strides = [1, 1]} : vector<2x1024xf32> to vector<2x512xf32>
    %cst_25 = arith.constant 5.000000e-01 : f32
    %41 = vector.broadcast %cst_25 : f32 to vector<2x512xf32>
    %42 = arith.mulf %41, %40 : vector<2x512xf32>
    %43 = math.exp %42 : vector<2x512xf32>
    %c0_26 = arith.constant 0 : index
    %c0_27 = arith.constant 0 : index
    %44 = vector.load %arg10[%c0_26, %c0_27] : memref<2x512xf32, #tpu.memory_space<vmem>>, vector<2x512xf32>
    %45 = arith.mulf %44, %43 : vector<2x512xf32>
    %46 = arith.addf %45, %39 : vector<2x512xf32>
    %c0_28 = arith.constant 0 : index
    %c0_29 = arith.constant 0 : index
    %47 = vector.load %arg11[%c0_28, %c0_29] : memref<2x512xf32, #tpu.memory_space<vmem>>, vector<2x512xf32>
    tpu.vector_store %arg11[%c0_28, %c0_29], %46 {strides = array<i32>} : memref<2x512xf32, #tpu.memory_space<vmem>>, vector<2x512xf32>,
    %c0_30 = arith.constant 0 : index
    %c0_31 = arith.constant 0 : index
    %48 = vector.load %arg12[%c0_30, %c0_31] : memref<2x512xf32, #tpu.memory_space<vmem>>, vector<2x512xf32>
    tpu.vector_store %arg12[%c0_30, %c0_31], %39 {strides = array<i32>} : memref<2x512xf32, #tpu.memory_space<vmem>>, vector<2x512xf32>,
    %c0_32 = arith.constant 0 : index
    %c0_33 = arith.constant 0 : index
    %49 = vector.load %arg13[%c0_32, %c0_33] : memref<2x512xf32, #tpu.memory_space<vmem>>, vector<2x512xf32>
    tpu.vector_store %arg13[%c0_32, %c0_33], %40 {strides = array<i32>} : memref<2x512xf32, #tpu.memory_space<vmem>>, vector<2x512xf32>,
    return
  }
  func.func @transform_0(%arg0: i32) -> (i32, i32) {
    %c0_i32 = arith.constant 0 : i32
    %c0_i32_0 = arith.constant 0 : i32
    return %arg0, %c0_i32 : i32, i32
  }
  func.func @transform_1(%arg0: i32) -> (i32, i32) {
    %c0_i32 = arith.constant 0 : i32
    %c0_i32_0 = arith.constant 0 : i32
    %c0_i32_1 = arith.constant 0 : i32
    return %c0_i32, %c0_i32_0 : i32, i32
  }
  func.func @transform_2(%arg0: i32) -> (i32, i32) {
    %c0_i32 = arith.constant 0 : i32
    %c0_i32_0 = arith.constant 0 : i32
    %c0_i32_1 = arith.constant 0 : i32
    return %c0_i32, %c0_i32_0 : i32, i32
  }
  func.func @transform_3(%arg0: i32) -> (i32, i32) {
    %c0_i32 = arith.constant 0 : i32
    %c0_i32_0 = arith.constant 0 : i32
    %c0_i32_1 = arith.constant 0 : i32
    return %c0_i32, %c0_i32_0 : i32, i32
  }
  func.func @transform_4(%arg0: i32) -> (i32, i32) {
    %c0_i32 = arith.constant 0 : i32
    %c0_i32_0 = arith.constant 0 : i32
    %c0_i32_1 = arith.constant 0 : i32
    return %c0_i32, %c0_i32_0 : i32, i32
  }
  func.func @transform_5(%arg0: i32) -> (i32, i32) {
    %c0_i32 = arith.constant 0 : i32
    %c0_i32_0 = arith.constant 0 : i32
    %c0_i32_1 = arith.constant 0 : i32
    return %c0_i32, %c0_i32_0 : i32, i32
  }
  func.func @transform_6(%arg0: i32) -> (i32, i32) {
    %c0_i32 = arith.constant 0 : i32
    %c0_i32_0 = arith.constant 0 : i32
    %c0_i32_1 = arith.constant 0 : i32
    return %c0_i32, %c0_i32_0 : i32, i32
  }
  func.func @transform_7(%arg0: i32) -> (i32, i32) {
    %c0_i32 = arith.constant 0 : i32
    %c0_i32_0 = arith.constant 0 : i32
    %c0_i32_1 = arith.constant 0 : i32
    return %c0_i32, %c0_i32_0 : i32, i32
  }
  func.func @transform_8(%arg0: i32) -> (i32, i32) {
    %c0_i32 = arith.constant 0 : i32
    %c0_i32_0 = arith.constant 0 : i32
    %c0_i32_1 = arith.constant 0 : i32
    return %c0_i32, %c0_i32_0 : i32, i32
  }
  func.func @transform_9(%arg0: i32) -> (i32, i32) {
    %c0_i32 = arith.constant 0 : i32
    %c0_i32_0 = arith.constant 0 : i32
    return %arg0, %c0_i32 : i32, i32
  }
  func.func @transform_10(%arg0: i32) -> (i32, i32) {
    %c0_i32 = arith.constant 0 : i32
    %c0_i32_0 = arith.constant 0 : i32
    return %arg0, %c0_i32 : i32, i32
  }
  func.func @transform_11(%arg0: i32) -> (i32, i32) {
    %c0_i32 = arith.constant 0 : i32
    %c0_i32_0 = arith.constant 0 : i32
    return %arg0, %c0_i32 : i32, i32
  }
  func.func @transform_12(%arg0: i32) -> (i32, i32) {
    %c0_i32 = arith.constant 0 : i32
    %c0_i32_0 = arith.constant 0 : i32
    return %arg0, %c0_i32 : i32, i32
  }
}

</mosaic_0001>

<bundles_post_ra>
// kernel: ca_net_forward.1
= control target key start
LH: loop header
LB: loop body
LE: loop exit
PB: predicated region body
PF: predicated region fallthrough
CT: control target
= control target key end

     0   :  { %18 = vsyncpa [#allocation3], 0  ;;  %s17532_s0 = inlined_call_operand.hbm [shape: f32[2,768], index: 0, kind: input, shape index: {}]   ;;  %s17533_s1 = inlined_call_operand.hbm [shape: bf16[768,1024], index: 1, kind: input, shape index: {}]   ;;  %s17534_s2 = inlined_call_operand.hbm [shape: f32[1,1024], index: 2, kind: input, shape index: {}]   ;;  %s17535_s3 = inlined_call_operand.hbm [shape: bf16[1024,1024], index: 3, kind: input, shape index: {}]   ;;  %s17536_s4 = inlined_call_operand.hbm [shape: f32[1,1024], index: 4, kind: input, shape index: {}]   ;;  %s17537_s5 = inlined_call_operand.hbm [shape: bf16[1024,1024], index: 5, kind: input, shape index: {}]   ;;  %s17538_s6 = inlined_call_operand.hbm [shape: f32[1,1024], index: 6, kind: input, shape index: {}]   ;;  %s17539_s7 = inlined_call_operand.hbm [shape: bf16[1024,1024], index: 7, kind: input, shape index: {}]   ;;  %s17540_s8 = inlined_call_operand.hbm [shape: f32[1,1024], index: 8, kind: input, shape index: {}]   ;;  %s17541_s9 = inlined_call_operand.hbm [shape: f32[2,512], index: 9, kind: input, shape index: {}]   ;;  %s17542_s10 = inlined_call_operand.hbm [shape: f32[2,512], index: 10, kind: output, shape index: {0}]   ;;  %s17543_s11 = inlined_call_operand.hbm [shape: f32[2,512], index: 11, kind: output, shape index: {1}]   ;;  %s17544_s12 = inlined_call_operand.hbm [shape: f32[2,512], index: 12, kind: output, shape index: {2}]  }
   0x1   :  { %19 = vsyncpa [#allocation6], 0 }
   0x2   :  { %20 = vsyncpa [#allocation9], 0 }
   0x3   :  { %21 = vsyncpa [#allocation12], 0 }
   0x4   :  { %22 = vsyncpa [#allocation15], 0 }
   0x5   :  { %23 = vsyncpa [#allocation18], 0 }
   0x6   :  { %24 = vsyncpa [#allocation4], 0 }
   0x7   :  { %25 = vsyncpa [#allocation21], 0  ;;  %s16808_s21 = smov [#allocation5]  }
   0x8   :  { %s41_s22 = sshll.u32 %s16808_s21, 4  ;;  %s42_s22 = int_to_ptr.vmem [resolvable:$true] %s41_s22 }
   0x9   :  { %s16540_s23 = scalar_lea.vmem %s42_s22, 49152  ;;  %p16545_p1 = scmp.lt.s32.totalorder %s42_s22, %s42_s22 }
   0xa   :  { %p16541_p0 = scmp.ne.s32.totalorder %s42_s22, %s16540_s23  ;;  %p16546_p2 = scmp.lt.s32.totalorder %s16540_s23, %s16540_s23 }
   0xc   :  { %p16547_p3 = por %p16546_p2, %p16545_p1 }
   0xe   :  { %p16548_p4 = pnand %p16547_p3, %p16541_p0 }
  0x10   :  { %16551 = shalt.err (!%p16548_p4)
}
  0x11   :  { %s16809_s24 = smov 512   ;;  %s16810_s25 = smov 32  }
  0x12   :  { %47 = dma.hbm_to_vmem [thread:$0]  %s17533_s1, 49152, %s42_s22, [#allocation6], %s16809_s24, %s16809_s24, %s16810_s25  }
  0x13   :  { %s16811_s28 = smov [#allocation8]   ;;  %s16812_s30 = smov [#allocation11]  }
  0x14   :  { %s63_s29 = sshll.u32 %s16811_s28, 4  ;;  %s85_s13 = sshll.u32 %s16812_s30, 4  ;;  %s64_s29 = int_to_ptr.vmem [resolvable:$true] %s63_s29  ;;  %s86_s13 = int_to_ptr.vmem [resolvable:$true] %s85_s13 }
  0x15   :  { %s16560_s14 = scalar_lea.vmem %s64_s29, 65536  ;;  %p16565_p6 = scmp.lt.s32.totalorder %s64_s29, %s64_s29 }
  0x16   :  { %p16561_p5 = scmp.ne.s32.totalorder %s64_s29, %s16560_s14  ;;  %p16566_p7 = scmp.lt.s32.totalorder %s16560_s14, %s16560_s14 }
  0x18   :  { %p16567_p8 = por %p16566_p7, %p16565_p6 }
  0x1a   :  { %p16568_p9 = pnand %p16567_p8, %p16561_p5 }
  0x1c   :  { %16571 = shalt.err (!%p16568_p9)
}
  0x1d   :  { %69 = dma.hbm_to_vmem [thread:$0]  %s17535_s3, 65536, %s64_s29, [#allocation9], %s16809_s24, %s16809_s24, %s16810_s25  }
  0x1e   :  { %s16580_s1 = scalar_lea.vmem %s86_s13, 65536  ;;  %p16585_p11 = scmp.lt.s32.totalorder %s86_s13, %s86_s13 }
  0x1f   :  { %p16581_p10 = scmp.ne.s32.totalorder %s86_s13, %s16580_s1  ;;  %p16586_p12 = scmp.lt.s32.totalorder %s16580_s1, %s16580_s1 }
  0x21   :  { %p16587_p13 = por %p16586_p12, %p16585_p11 }
  0x23   :  { %p16588_p0 = pnand %p16587_p13, %p16581_p10 }
  0x25   :  { %16591 = shalt.err (!%p16588_p0)
}
  0x26   :  { %91 = dma.hbm_to_vmem [thread:$0]  %s17537_s5, 65536, %s86_s13, [#allocation12], %s16809_s24, %s16809_s24, %s16810_s25  }
  0x27   :  { %s16813_s19 = smov [#allocation14]   ;;  %s16814_s21 = smov [#allocation2]  }
  0x28   :  { %s107_s20 = sshll.u32 %s16813_s19, 4  ;;  %s32_s3 = sshll.u32 %s16814_s21, 4  ;;  %s108_s20 = int_to_ptr.vmem [resolvable:$true] %s107_s20  ;;  %s33_s3 = int_to_ptr.vmem [resolvable:$true] %s32_s3 }
  0x29   :  { %s16600_s22 = scalar_lea.vmem %s108_s20, 65536  ;;  %p16605_p2 = scmp.lt.s32.totalorder %s108_s20, %s108_s20 }
  0x2a   :  { %p16601_p1 = scmp.ne.s32.totalorder %s108_s20, %s16600_s22  ;;  %p16606_p3 = scmp.lt.s32.totalorder %s16600_s22, %s16600_s22 }
  0x2c   :  { %p16607_p4 = por %p16606_p3, %p16605_p2 }
  0x2e   :  { %p16608_p5 = pnand %p16607_p4, %p16601_p1 }
  0x30   :  { %16611 = shalt.err (!%p16608_p5)
}
  0x31   :  { %113 = dma.hbm_to_vmem [thread:$0]  %s17539_s7, 65536, %s108_s20, [#allocation15], %s16809_s24, %s16809_s24, %s16810_s25  }
  0x32   :  { %s16620_s5 = scalar_lea.vmem %s33_s3, 192  ;;  %p16625_p7 = scmp.lt.s32.totalorder %s33_s3, %s33_s3 }
  0x33   :  { %p16621_p6 = scmp.ne.s32.totalorder %s33_s3, %s16620_s5  ;;  %p16626_p8 = scmp.lt.s32.totalorder %s16620_s5, %s16620_s5 }
  0x35   :  { %p16627_p9 = por %p16626_p8, %p16625_p7 }
  0x37   :  { %p16628_p10 = pnand %p16627_p9, %p16621_p6 }
  0x39   :  { %16631 = shalt.err (!%p16628_p10)
}
  0x3a   :  { %35 = dma.hbm_to_vmem [thread:$0]  %s17532_s0, 192, %s33_s3, [#allocation3]  }
  0x3b   :  { %s16815_s29 = smov [#allocation7]   ;;  %s16816_s13 = smov [#allocation10]  }
  0x3c   :  { %s54_s30 = sshll.u32 %s16815_s29, 4  ;;  %s76_s14 = sshll.u32 %s16816_s13, 4  ;;  %s55_s30 = int_to_ptr.vmem [resolvable:$true] %s54_s30  ;;  %s77_s14 = int_to_ptr.vmem [resolvable:$true] %s76_s14 }
  0x3d   :  { %s16640_s15 = scalar_lea.vmem %s55_s30, 128  ;;  %p16645_p12 = scmp.lt.s32.totalorder %s55_s30, %s55_s30 }
  0x3e   :  { %p16641_p11 = scmp.ne.s32.totalorder %s55_s30, %s16640_s15  ;;  %p16646_p13 = scmp.lt.s32.totalorder %s16640_s15, %s16640_s15 }
  0x40   :  { %p16647_p0 = por %p16646_p13, %p16645_p12 }
  0x42   :  { %p16648_p1 = pnand %p16647_p0, %p16641_p11 }
  0x44   :  { %16651 = shalt.err (!%p16648_p1)
}
  0x45   :  { %57 = dma.hbm_to_vmem [thread:$0]  %s17534_s2, 128, %s55_s30, [#allocation6]  }
  0x46   :  { %s16660_s25 = scalar_lea.vmem %s77_s14, 128  ;;  %p16665_p3 = scmp.lt.s32.totalorder %s77_s14, %s77_s14 }
  0x47   :  { %p16661_p2 = scmp.ne.s32.totalorder %s77_s14, %s16660_s25  ;;  %p16666_p4 = scmp.lt.s32.totalorder %s16660_s25, %s16660_s25 }
  0x49   :  { %p16667_p5 = por %p16666_p4, %p16665_p3 }
  0x4b   :  { %p16668_p6 = pnand %p16667_p5, %p16661_p2 }
  0x4d   :  { %16671 = shalt.err (!%p16668_p6)
}
  0x4e   :  { %79 = dma.hbm_to_vmem [thread:$0]  %s17536_s4, 128, %s77_s14, [#allocation9]  }
  0x4f   :  { %s16817_s1 = smov [#allocation13]   ;;  %s16818_s18 = smov [#allocation16]  }
  0x50   :  { %s98_s17 = sshll.u32 %s16817_s1, 4  ;;  %s120_s19 = sshll.u32 %s16818_s18, 4  ;;  %s99_s17 = int_to_ptr.vmem [resolvable:$true] %s98_s17  ;;  %s121_s19 = int_to_ptr.vmem [resolvable:$true] %s120_s19 }
  0x51   :  { %s16680_s20 = scalar_lea.vmem %s99_s17, 128  ;;  %p16685_p8 = scmp.lt.s32.totalorder %s99_s17, %s99_s17 }
  0x52   :  { %p16681_p7 = scmp.ne.s32.totalorder %s99_s17, %s16680_s20  ;;  %p16686_p9 = scmp.lt.s32.totalorder %s16680_s20, %s16680_s20 }
  0x54   :  { %p16687_p10 = por %p16686_p9, %p16685_p8 }
  0x56   :  { %p16688_p11 = pnand %p16687_p10, %p16681_p7 }
  0x58   :  { %16691 = shalt.err (!%p16688_p11)
}
  0x59   :  { %101 = dma.hbm_to_vmem [thread:$0]  %s17538_s6, 128, %s99_s17, [#allocation12]  }
  0x5a   :  { %s16700_s3 = scalar_lea.vmem %s121_s19, 128  ;;  %p16705_p13 = scmp.lt.s32.totalorder %s121_s19, %s121_s19 }
  0x5b   :  { %p16701_p12 = scmp.ne.s32.totalorder %s121_s19, %s16700_s3  ;;  %p16706_p0 = scmp.lt.s32.totalorder %s16700_s3, %s16700_s3 }
  0x5d   :  { %p16707_p1 = por %p16706_p0, %p16705_p13 }
  0x5f   :  { %p16708_p2 = pnand %p16707_p1, %p16701_p12 }
  0x61   :  { %16711 = shalt.err (!%p16708_p2)
}
  0x62   :  { %123 = dma.hbm_to_vmem [thread:$0]  %s17540_s8, 128, %s121_s19, [#allocation15]  }
  0x63   :  { %s16819_s23 = smov [#allocation17]  }
  0x64   :  { %s130_s26 = sshll.u32 %s16819_s23, 4  ;;  %s131_s26 = int_to_ptr.vmem [resolvable:$true] %s130_s26 }
  0x65   :  { %s16720_s5 = scalar_lea.vmem %s131_s26, 128  ;;  %p16725_p4 = scmp.lt.s32.totalorder %s131_s26, %s131_s26 }
  0x66   :  { %p16721_p3 = scmp.ne.s32.totalorder %s131_s26, %s16720_s5  ;;  %p16726_p5 = scmp.lt.s32.totalorder %s16720_s5, %s16720_s5 }
  0x68   :  { %p16727_p6 = por %p16726_p5, %p16725_p4 }
  0x6a   :  { %p16728_p7 = pnand %p16727_p6, %p16721_p3 }
  0x6c   :  { %16731 = shalt.err (!%p16728_p7)
}
  0x6d   :  { %133 = dma.hbm_to_vmem [thread:$0]  %s17541_s9, 128, %s131_s26, [#allocation18]  }
  0x6e   :  { %16792 = dma.done.wait [#allocation3], 192  }
  0x6f   :  { %16793 = vsyncadd [#allocation3], 4294967104 }
  0x70   :  { %16794 = dma.done.wait [#allocation6], 49280  }
  0x71   :  { %16795 = vsyncadd [#allocation6], 4294918016 }
  0x72   :  { %16796 = dma.done.wait [#allocation9], 65664  }
  0x73   :  { %16797 = vsyncadd [#allocation9], 4294901632 }
  0x74   :  { %16798 = dma.done.wait [#allocation12], 65664  }
  0x75   :  { %16799 = vsyncadd [#allocation12], 4294901632 }
  0x76   :  { %16800 = dma.done.wait [#allocation15], 65664  }
  0x77   :  { %16801 = vsyncadd [#allocation15], 4294901632 }
  0x78   :  { %16802 = dma.done.wait [#allocation18], 128  }
  0x79   :  { %16803 = vsyncadd [#allocation18], 4294967168  ;;  %v261_v0 = vld [vmem:[#allocation5 + $0x1c0] sm:$0xff]  ;;  %v16820_v32 = vmov 1983009808   ;;  %v172_v34 = vlaneseq  ;;  %v164_v59 = vld [vmem:[#allocation2] sm:$0xff] }
  0x7a   :  { %v265_v1 = vld [vmem:[#allocation5 + $0x1e0] sm:$0xff]  ;;  %v170_v33 = vunpack.c.l.s4 %v16820_v32  ;;  %s16821_s8 = smov [#allocation20]  }
  0x7b   :  { %v389_v2 = vld [vmem:[#allocation5 + $0x5c0] sm:$0xff]  ;;  %v14638_v3 = vcombine.high %v261_v0, %v265_v1  ;;  %v14637_v5 = vcombine.low %v261_v0, %v265_v1  ;;  %v16931_v44 = vshrl.u32 %v172_v34, 7  ;;  %v168_v0 = vcombine.high %v164_v59, %v164_v59  ;;  %s14549_s9 = sshll.u32 %s16821_s8, 4  ;;  %s14550_s9 = int_to_ptr.vmem [resolvable:$true] %s14549_s9 }
  0x7c   :  { %v393_v4 = vld [vmem:[#allocation5 + $0x5e0] sm:$0xff]  ;;  %v171_v43 = vunpack.c.0.s8 %v170_v33  ;;  %s16732_s28 = scalar_lea.vmem %s14550_s9, 128  ;;  %p16737_p9 = scmp.lt.s32.totalorder %s14550_s9, %s14550_s9 }
  0x7d   :  { %v253_v6 = vld [vmem:[#allocation5 + $0x180] sm:$0xff]  ;;  %v14766_v8 = vcombine.high %v389_v2, %v393_v4  ;;  %v14765_v9 = vcombine.low %v389_v2, %v393_v4  ;;  %2551 = vmatprep.subr.bf16.mxu0 %v14638_v3  ;;  %p16733_p8 = scmp.ne.s32.totalorder %s14550_s9, %s16732_s28  ;;  %p16738_p10 = scmp.lt.s32.totalorder %s16732_s28, %s16732_s28 }
  0x7e   :  { %v257_v7 = vld [vmem:[#allocation5 + $0x1a0] sm:$0xff]  ;;  %2552 = vmatpush1.bf16.msra.mxu0 %v14637_v5  ;;  %v16934_v53 = vsub.s32 %v171_v43, %v16931_v44 }
  0x7f   :  { %v14630_v10 = vcombine.high %v253_v6, %v257_v7  ;;  %v381_v11 = vld [vmem:[#allocation5 + $0x580] sm:$0xff]  ;;  %2592 = vmatprep.subr.bf16.mxu1 %v14766_v8  ;;  %v14629_v18 = vcombine.low %v253_v6, %v257_v7  ;;  %p16739_p11 = por %p16738_p10, %p16737_p9 }
  0x80   :  { %v385_v12 = vld [vmem:[#allocation5 + $0x5a0] sm:$0xff]  ;;  %2593 = vmatpush1.bf16.msra.mxu1 %v14765_v9  ;;  %v16937_v63 = vrot.slane %v164_v59, %v16934_v53  ;;  %v16942_v5 = vrot.slane %v168_v0, %v16934_v53 }
  0x81   :  { %v245_v13 = vld [vmem:[#allocation5 + $0x140] sm:$0xff]  ;;  %v14758_v14 = vcombine.high %v381_v11, %v385_v12  ;;  %2553 = vmatprep.subr.bf16.mxu0 %v14630_v10  ;;  %v14757_v19 = vcombine.low %v381_v11, %v385_v12  ;;  %p16740_p12 = pnand %p16739_p11, %p16733_p8 }
  0x82   :  { %v249_v15 = vld [vmem:[#allocation5 + $0x160] sm:$0xff]  ;;  %2554 = vmatpush1.bf16.msra.mxu0 %v14629_v18  ;;  %v183_v4 = vcombine.high %v16937_v63, %v16937_v63  ;;  %v184_v12 = vcombine.high %v16942_v5, %v16942_v5 }
  0x83   :  { %v373_v16 = vld [vmem:[#allocation5 + $0x540] sm:$0xff]  ;;  %v14622_v20 = vcombine.high %v245_v13, %v249_v15  ;;  %2594 = vmatprep.subr.bf16.mxu1 %v14758_v14  ;;  %v14621_v26 = vcombine.low %v245_v13, %v249_v15 }
  0x84   :  { %v377_v17 = vld [vmem:[#allocation5 + $0x560] sm:$0xff]  ;;  %2595 = vmatpush1.bf16.msra.mxu1 %v14757_v19  ;;  %v16944_v11 = vpack.c.bf16 %v183_v4, %v183_v4 }
  0x85   :  { %v14750_v21 = vcombine.high %v373_v16, %v377_v17  ;;  %v237_v22 = vld [vmem:[#allocation5 + $0x100] sm:$0xff]  ;;  %2555 = vmatprep.subr.bf16.mxu0 %v14622_v20  ;;  %v14749_v27 = vcombine.low %v373_v16, %v377_v17  ;;  %v16949_v16 = vpack.c.bf16 %v184_v12, %v184_v12 }
  0x86   :  { %v241_v23 = vld [vmem:[#allocation5 + $0x120] sm:$0xff]  ;;  %2556 = vmatpush1.bf16.msra.mxu0 %v14621_v26  ;;  %2583 = vmatprep.mubr.bf16.mxu0 %v16944_v11 }
  0x87   :  { %v365_v24 = vld [vmem:[#allocation5 + $0x500] sm:$0xff]  ;;  %v14614_v28 = vcombine.high %v237_v22, %v241_v23  ;;  %2596 = vmatprep.subr.bf16.mxu1 %v14750_v21  ;;  %v14613_v37 = vcombine.low %v237_v22, %v241_v23  ;;  %2624 = vmatprep.mubr.bf16.mxu1 %v16949_v16 }
  0x88   :  { %v369_v25 = vld [vmem:[#allocation5 + $0x520] sm:$0xff]  ;;  %2597 = vmatpush1.bf16.msra.mxu1 %v14749_v27 }
  0x89   :  { %v14742_v29 = vcombine.high %v365_v24, %v369_v25  ;;  %v229_v30 = vld [vmem:[#allocation5 + $0xc0] sm:$0xff]  ;;  %2557 = vmatprep.subr.bf16.mxu0 %v14614_v28  ;;  %v14741_v38 = vcombine.low %v365_v24, %v369_v25 }
  0x8a   :  { %v233_v31 = vld [vmem:[#allocation5 + $0xe0] sm:$0xff]  ;;  %2558 = vmatpush1.bf16.msra.mxu0 %v14613_v37 }
  0x8b   :  { %v357_v35 = vld [vmem:[#allocation5 + $0x4c0] sm:$0xff]  ;;  %v14606_v39 = vcombine.high %v229_v30, %v233_v31  ;;  %2598 = vmatprep.subr.bf16.mxu1 %v14742_v29  ;;  %v14605_v47 = vcombine.low %v229_v30, %v233_v31 }
  0x8c   :  { %v361_v36 = vld [vmem:[#allocation5 + $0x4e0] sm:$0xff]  ;;  %2599 = vmatpush1.bf16.msra.mxu1 %v14741_v38 }
  0x8d   :  { %v14734_v40 = vcombine.high %v357_v35, %v361_v36  ;;  %v221_v41 = vld [vmem:[#allocation5 + $0x80] sm:$0xff]  ;;  %2559 = vmatprep.subr.bf16.mxu0 %v14606_v39  ;;  %v14733_v48 = vcombine.low %v357_v35, %v361_v36 }
  0x8e   :  { %v225_v42 = vld [vmem:[#allocation5 + $0xa0] sm:$0xff]  ;;  %2560 = vmatpush1.bf16.msra.mxu0 %v14605_v47 }
  0x8f   :  { %v349_v45 = vld [vmem:[#allocation5 + $0x480] sm:$0xff]  ;;  %v14598_v49 = vcombine.high %v221_v41, %v225_v42  ;;  %2600 = vmatprep.subr.bf16.mxu1 %v14734_v40  ;;  %v14597_v56 = vcombine.low %v221_v41, %v225_v42 }
  0x90   :  { %v353_v46 = vld [vmem:[#allocation5 + $0x4a0] sm:$0xff]  ;;  %2601 = vmatpush1.bf16.msra.mxu1 %v14733_v48 }
  0x91   :  { %v14726_v50 = vcombine.high %v349_v45, %v353_v46  ;;  %v213_v51 = vld [vmem:[#allocation5 + $0x40] sm:$0xff]  ;;  %2561 = vmatprep.subr.bf16.mxu0 %v14598_v49  ;;  %v14725_v57 = vcombine.low %v349_v45, %v353_v46 }
  0x92   :  { %v217_v52 = vld [vmem:[#allocation5 + $0x60] sm:$0xff]  ;;  %2562 = vmatpush1.bf16.msra.mxu0 %v14597_v56 }
  0x93   :  { %v341_v54 = vld [vmem:[#allocation5 + $0x440] sm:$0xff]  ;;  %v14590_v58 = vcombine.high %v213_v51, %v217_v52  ;;  %2602 = vmatprep.subr.bf16.mxu1 %v14726_v50  ;;  %v14589_v3 = vcombine.low %v213_v51, %v217_v52 }
  0x94   :  { %v345_v55 = vld [vmem:[#allocation5 + $0x460] sm:$0xff]  ;;  %2603 = vmatpush1.bf16.msra.mxu1 %v14725_v57 }
  0x95   :  { %v14718_v60 = vcombine.high %v341_v54, %v345_v55  ;;  %v205_v61 = vld [vmem:[#allocation5] sm:$0xff]  ;;  %2563 = vmatprep.subr.bf16.mxu0 %v14590_v58  ;;  %v14717_v6 = vcombine.low %v341_v54, %v345_v55 }
  0x96   :  { %v209_v62 = vld [vmem:[#allocation5 + $0x20] sm:$0xff]  ;;  %2564 = vmatpush1.bf16.msra.mxu0 %v14589_v3 }
  0x97   :  { %v333_v1 = vld [vmem:[#allocation5 + $0x400] sm:$0xff]  ;;  %v14582_v7 = vcombine.high %v205_v61, %v209_v62  ;;  %2604 = vmatprep.subr.bf16.mxu1 %v14718_v60  ;;  %v14581_v15 = vcombine.low %v205_v61, %v209_v62 }
  0x98   :  { %v337_v2 = vld [vmem:[#allocation5 + $0x420] sm:$0xff]  ;;  %2605 = vmatpush1.bf16.msra.mxu1 %v14717_v6 }
  0x99   :  { %v14710_v8 = vcombine.high %v333_v1, %v337_v2  ;;  %v325_v9 = vld [vmem:[#allocation5 + $0x3c0] sm:$0xff]  ;;  %2565 = vmatprep.subr.bf16.mxu0 %v14582_v7  ;;  %v14709_v17 = vcombine.low %v333_v1, %v337_v2 }
  0x9a   :  { %v329_v10 = vld [vmem:[#allocation5 + $0x3e0] sm:$0xff]  ;;  %2566 = vmatpush1.bf16.msra.mxu0 %v14581_v15 }
  0x9b   :  { %v453_v13 = vld [vmem:[#allocation5 + $0x7c0] sm:$0xff]  ;;  %v14702_v18 = vcombine.high %v325_v9, %v329_v10  ;;  %2606 = vmatprep.subr.bf16.mxu1 %v14710_v8  ;;  %v14701_v24 = vcombine.low %v325_v9, %v329_v10 }
  0x9c   :  { %v457_v14 = vld [vmem:[#allocation5 + $0x7e0] sm:$0xff]  ;;  %2607 = vmatpush1.bf16.msra.mxu1 %v14709_v17 }
  0x9d   :  { %v14830_v19 = vcombine.high %v453_v13, %v457_v14  ;;  %v317_v20 = vld [vmem:[#allocation5 + $0x380] sm:$0xff]  ;;  %2567 = vmatprep.subr.bf16.mxu0 %v14702_v18  ;;  %v14829_v25 = vcombine.low %v453_v13, %v457_v14 }
  0x9e   :  { %v321_v21 = vld [vmem:[#allocation5 + $0x3a0] sm:$0xff]  ;;  %2568 = vmatpush2.bf16.msra.mxu0 %v14701_v24 }
  0x9f   :  { %v445_v22 = vld [vmem:[#allocation5 + $0x780] sm:$0xff]  ;;  %v14694_v26 = vcombine.high %v317_v20, %v321_v21  ;;  %2608 = vmatprep.subr.bf16.mxu1 %v14830_v19  ;;  %v14693_v32 = vcombine.low %v317_v20, %v321_v21  ;;  %v262_v20 = vld [vmem:[#allocation5 + $0x1c8] sm:$0xff] }
  0xa0   :  { %v449_v23 = vld [vmem:[#allocation5 + $0x7a0] sm:$0xff]  ;;  %2609 = vmatpush2.bf16.msra.mxu1 %v14829_v25  ;;  %v266_v21 = vld [vmem:[#allocation5 + $0x1e8] sm:$0xff] }
  0xa1   :  { %v14822_v27 = vcombine.high %v445_v22, %v449_v23  ;;  %v309_v28 = vld [vmem:[#allocation5 + $0x340] sm:$0xff]  ;;  %2569 = vmatprep.subr.bf16.mxu0 %v14694_v26  ;;  %v14821_v33 = vcombine.low %v445_v22, %v449_v23  ;;  %v16952_v22 = vld.sshfl [vmem:[#allocation2 + $0x8] sm:$0x33 pattern:$0x76325410]  ;;  %v14640_v26 = vcombine.high %v262_v20, %v266_v21 }
  0xa2   :  { %v313_v29 = vld [vmem:[#allocation5 + $0x360] sm:$0xff]  ;;  %2570 = vmatpush2.bf16.msra.mxu0 %v14693_v32  ;;  %v258_v32 = vld [vmem:[#allocation5 + $0x1a8] sm:$0xff] }
  0xa3   :  { %v437_v30 = vld [vmem:[#allocation5 + $0x740] sm:$0xff]  ;;  %v14686_v34 = vcombine.high %v309_v28, %v313_v29  ;;  %2610 = vmatprep.subr.bf16.mxu1 %v14822_v27  ;;  %v14685_v40 = vcombine.low %v309_v28, %v313_v29  ;;  %v192_v29 = vcombine.high %v16952_v22, %v16952_v22 }
  0xa4   :  { %v441_v31 = vld [vmem:[#allocation5 + $0x760] sm:$0xff]  ;;  %2611 = vmatpush2.bf16.msra.mxu1 %v14821_v33  ;;  %v16962_v33 = vpack.c.bf16 %v16942_v5, %v16942_v5 }
  0xa5   :  { %v14814_v35 = vcombine.high %v437_v30, %v441_v31  ;;  %v301_v36 = vld [vmem:[#allocation5 + $0x300] sm:$0xff]  ;;  %2571 = vmatprep.subr.bf16.mxu0 %v14686_v34  ;;  %v14813_v41 = vcombine.low %v437_v30, %v441_v31  ;;  %v16958_v30 = vpack.c.bf16 %v16937_v63, %v16937_v63  ;;  %v254_v31 = vld [vmem:[#allocation5 + $0x188] sm:$0xff] }
  0xa6   :  { %v305_v37 = vld [vmem:[#allocation5 + $0x320] sm:$0xff]  ;;  %2572 = vmatpush2.bf16.msra.mxu0 %v14685_v40  ;;  %v16964_v40 = vpack.c.bf16 %v192_v29, %v192_v29  ;;  %v246_v63 = vld [vmem:[#allocation5 + $0x148] sm:$0xff] }
  0xa7   :  { %v429_v38 = vld [vmem:[#allocation5 + $0x700] sm:$0xff]  ;;  %v14678_v42 = vcombine.high %v301_v36, %v305_v37  ;;  %2612 = vmatprep.subr.bf16.mxu1 %v14814_v35  ;;  %v14677_v49 = vcombine.low %v301_v36, %v305_v37  ;;  %v14639_v35 = vcombine.low %v262_v20, %v266_v21  ;;  %v14632_v37 = vcombine.high %v254_v31, %v258_v32  ;;  %v206_v21 = vld [vmem:[#allocation5 + $0x8] sm:$0xff] }
  0xa8   :  { %v433_v39 = vld [vmem:[#allocation5 + $0x720] sm:$0xff]  ;;  %2613 = vmatpush2.bf16.msra.mxu1 %v14813_v41  ;;  %v250_v41 = vld [vmem:[#allocation5 + $0x168] sm:$0xff] }
  0xa9   :  { %v14806_v43 = vcombine.high %v429_v38, %v433_v39  ;;  %v293_v45 = vld [vmem:[#allocation5 + $0x2c0] sm:$0xff]  ;;  %2573 = vmatprep.subr.bf16.mxu0 %v14678_v42  ;;  %v14805_v50 = vcombine.low %v429_v38, %v433_v39  ;;  %v14631_v42 = vcombine.low %v254_v31, %v258_v32  ;;  %v326_v31 = vld [vmem:[#allocation5 + $0x3c8] sm:$0xff] }
  0xaa   :  { %v297_v46 = vld [vmem:[#allocation5 + $0x2e0] sm:$0xff]  ;;  %2574 = vmatpush2.bf16.msra.mxu0 %v14677_v49  ;;  %v242_v49 = vld [vmem:[#allocation5 + $0x128] sm:$0xff] }
  0xab   :  { %v421_v47 = vld [vmem:[#allocation5 + $0x6c0] sm:$0xff]  ;;  %v14670_v51 = vcombine.high %v293_v45, %v297_v46  ;;  %2614 = vmatprep.subr.bf16.mxu1 %v14806_v43  ;;  %v14669_v58 = vcombine.low %v293_v45, %v297_v46  ;;  %v14624_v45 = vcombine.high %v246_v63, %v250_v41  ;;  %v330_v32 = vld [vmem:[#allocation5 + $0x3e8] sm:$0xff] }
  0xac   :  { %v425_v48 = vld [vmem:[#allocation5 + $0x6e0] sm:$0xff]  ;;  %2615 = vmatpush2.bf16.msra.mxu1 %v14805_v50 }
  0xad   :  { %v14798_v52 = vcombine.high %v421_v47, %v425_v48  ;;  %v285_v54 = vld [vmem:[#allocation5 + $0x280] sm:$0xff]  ;;  %2575 = vmatprep.subr.bf16.mxu0 %v14670_v51  ;;  %v14797_v59 = vcombine.low %v421_v47, %v425_v48  ;;  %v238_v48 = vld [vmem:[#allocation5 + $0x108] sm:$0xff]  ;;  %v14623_v51 = vcombine.low %v246_v63, %v250_v41 }
  0xae   :  { %v289_v55 = vld [vmem:[#allocation5 + $0x2a0] sm:$0xff]  ;;  %2576 = vmatpush2.bf16.msra.mxu0 %v14669_v58  ;;  %v234_v58 = vld [vmem:[#allocation5 + $0xe8] sm:$0xff] }
  0xaf   :  { %v413_v56 = vld [vmem:[#allocation5 + $0x680] sm:$0xff]  ;;  %v14662_v60 = vcombine.high %v285_v54, %v289_v55  ;;  %2616 = vmatprep.subr.bf16.mxu1 %v14798_v52  ;;  %v14661_v3 = vcombine.low %v285_v54, %v289_v55  ;;  %v14616_v54 = vcombine.high %v238_v48, %v242_v49  ;;  %v318_v63 = vld [vmem:[#allocation5 + $0x388] sm:$0xff] }
  0xb0   :  { %v417_v57 = vld [vmem:[#allocation5 + $0x6a0] sm:$0xff]  ;;  %2617 = vmatpush2.bf16.msra.mxu1 %v14797_v59  ;;  %v322_v41 = vld [vmem:[#allocation5 + $0x3a8] sm:$0xff] }
  0xb1   :  { %v14790_v61 = vcombine.high %v413_v56, %v417_v57  ;;  %v277_v62 = vld [vmem:[#allocation5 + $0x240] sm:$0xff]  ;;  %2577 = vmatprep.subr.bf16.mxu0 %v14662_v60  ;;  %v14789_v4 = vcombine.low %v413_v56, %v417_v57  ;;  %v230_v57 = vld [vmem:[#allocation5 + $0xc8] sm:$0xff]  ;;  %v14615_v60 = vcombine.low %v238_v48, %v242_v49 }
  0xb2   :  { %v281_v0 = vld [vmem:[#allocation5 + $0x260] sm:$0xff]  ;;  %2578 = vmatpush2.bf16.msra.mxu0 %v14661_v3  ;;  %v226_v3 = vld [vmem:[#allocation5 + $0xa8] sm:$0xff] }
  0xb3   :  { %v405_v1 = vld [vmem:[#allocation5 + $0x640] sm:$0xff]  ;;  %v14654_v6 = vcombine.high %v277_v62, %v281_v0  ;;  %2618 = vmatprep.subr.bf16.mxu1 %v14790_v61  ;;  %v14653_v13 = vcombine.low %v277_v62, %v281_v0  ;;  %v14608_v62 = vcombine.high %v230_v57, %v234_v58  ;;  %v310_v48 = vld [vmem:[#allocation5 + $0x348] sm:$0xff] }
  0xb4   :  { %v409_v2 = vld [vmem:[#allocation5 + $0x660] sm:$0xff]  ;;  %2619 = vmatpush2.bf16.msra.mxu1 %v14789_v4  ;;  %v314_v49 = vld [vmem:[#allocation5 + $0x368] sm:$0xff] }
  0xb5   :  { %v14782_v7 = vcombine.high %v405_v1, %v409_v2  ;;  %v269_v8 = vld [vmem:[#allocation5 + $0x200] sm:$0xff]  ;;  %2579 = vmatprep.subr.bf16.mxu0 %v14654_v6  ;;  %v14781_v14 = vcombine.low %v405_v1, %v409_v2  ;;  %v222_v2 = vld [vmem:[#allocation5 + $0x88] sm:$0xff]  ;;  %v14607_v6 = vcombine.low %v230_v57, %v234_v58 }
  0xb6   :  { %v273_v9 = vld [vmem:[#allocation5 + $0x220] sm:$0xff]  ;;  %2580 = vmatpush2.bf16.msra.mxu0 %v14653_v13  ;;  %v218_v13 = vld [vmem:[#allocation5 + $0x68] sm:$0xff] }
  0xb7   :  { %v397_v10 = vld [vmem:[#allocation5 + $0x600] sm:$0xff]  ;;  %v14646_v15 = vcombine.high %v269_v8, %v273_v9  ;;  %2620 = vmatprep.subr.bf16.mxu1 %v14782_v7  ;;  %v14645_v23 = vcombine.low %v269_v8, %v273_v9  ;;  %v14600_v8 = vcombine.high %v222_v2, %v226_v3  ;;  %v302_v57 = vld [vmem:[#allocation5 + $0x308] sm:$0xff] }
  0xb8   :  { %v401_v12 = vld [vmem:[#allocation5 + $0x620] sm:$0xff]  ;;  %2621 = vmatpush2.bf16.msra.mxu1 %v14781_v14  ;;  %v306_v58 = vld [vmem:[#allocation5 + $0x328] sm:$0xff] }
  0xb9   :  { %v14774_v17 = vcombine.high %v397_v10, %v401_v12  ;;  %v517_v18 = vld [vmem:[#allocation5 + $0x9c0] sm:$0xff]  ;;  %2581 = vmatprep.subr.bf16.mxu0 %v14646_v15  ;;  %v14773_v24 = vcombine.low %v397_v10, %v401_v12  ;;  %v214_v12 = vld [vmem:[#allocation5 + $0x48] sm:$0xff]  ;;  %v14599_v15 = vcombine.low %v222_v2, %v226_v3 }
  0xba   :  { %v521_v19 = vld [vmem:[#allocation5 + $0x9e0] sm:$0xff]  ;;  %2582 = vmatpush2.bf16.msra.mxu0 %v14645_v23  ;;  %v210_v23 = vld [vmem:[#allocation5 + $0x28] sm:$0xff] }
  0xbb   :  { %v14894_v25 = vcombine.high %v517_v18, %v521_v19  ;;  %2622 = vmatprep.subr.bf16.mxu1 %v14774_v17  ;;  %v509_v27 = vld [vmem:[#allocation5 + $0x980] sm:$0xff]  ;;  %v14893_v34 = vcombine.low %v517_v18, %v521_v19  ;;  %v14592_v18 = vcombine.high %v214_v12, %v218_v13  ;;  %v294_v2 = vld [vmem:[#allocation5 + $0x2c8] sm:$0xff] }
  0xbc   :  { %v513_v28 = vld [vmem:[#allocation5 + $0x9a0] sm:$0xff]  ;;  %2623 = vmatpush2.bf16.msra.mxu1 %v14773_v24  ;;  %v298_v3 = vld [vmem:[#allocation5 + $0x2e8] sm:$0xff] }
  0xbd   :  { %2633 = vmatprep.subr.bf16.mxu0 %v14894_v25  ;;  %v14886_v36 = vcombine.high %v509_v27, %v513_v28  ;;  %2674 = vmatprep.subr.bf16.mxu1 %v14640_v26  ;;  %v501_v38 = vld [vmem:[#allocation5 + $0x940] sm:$0xff]  ;;  %v14885_v5 = vcombine.low %v509_v27, %v513_v28  ;;  %v14591_v25 = vcombine.low %v214_v12, %v218_v13  ;;  %v286_v12 = vld [vmem:[#allocation5 + $0x288] sm:$0xff] }
  0xbe   :  { %v505_v39 = vld [vmem:[#allocation5 + $0x960] sm:$0xff]  ;;  %2584 = vmatmul.mubr.bf16.vlgmr.msra.gmra.mxu0 %v16958_v30  ;;  %v14584_v27 = vcombine.high %v206_v21, %v210_v23  ;;  %v290_v13 = vld [vmem:[#allocation5 + $0x2a8] sm:$0xff] }
  0xbf   :  { %2625 = vmatmul.mubr.bf16.vlgmr.msra.gmra.mxu1 %v16962_v33  ;;  %2634 = vmatpush1.bf16.msra.mxu0 %v14893_v34  ;;  %v14878_v43 = vcombine.high %v501_v38, %v505_v39  ;;  %v493_v46 = vld [vmem:[#allocation5 + $0x900] sm:$0xff]  ;;  %v14877_v50 = vcombine.low %v501_v38, %v505_v39 }
  0xc0   :  { %2675 = vmatpush1.bf16.msra.mxu1 %v14639_v35  ;;  %2635 = vmatprep.subr.bf16.mxu0 %v14886_v36  ;;  %v497_v47 = vld [vmem:[#allocation5 + $0x920] sm:$0xff]  ;;  %v14583_v35 = vcombine.low %v206_v21, %v210_v23  ;;  %v278_v21 = vld [vmem:[#allocation5 + $0x248] sm:$0xff] }
  0xc1   :  { %2676 = vmatprep.subr.bf16.mxu1 %v14632_v37  ;;  %2665 = vmatprep.mubr.bf16.mxu0 %v16964_v40  ;;  %v14870_v52 = vcombine.high %v493_v46, %v497_v47  ;;  %v485_v55 = vld [vmem:[#allocation5 + $0x8c0] sm:$0xff]  ;;  %v14869_v59 = vcombine.low %v493_v46, %v497_v47  ;;  %v14704_v37 = vcombine.high %v326_v31, %v330_v32  ;;  %v282_v23 = vld [vmem:[#allocation5 + $0x268] sm:$0xff] }
  0xc2   :  { %2706 = vmatprep.mubr.bf16.mxu1 %v16944_v11  ;;  %v489_v56 = vld [vmem:[#allocation5 + $0x8e0] sm:$0xff] }
  0xc3   :  { %2636 = vmatpush1.bf16.msra.mxu0 %v14885_v5  ;;  %v14862_v61 = vcombine.high %v485_v55, %v489_v56  ;;  %v477_v0 = vld [vmem:[#allocation5 + $0x880] sm:$0xff]  ;;  %v14861_v4 = vcombine.low %v485_v55, %v489_v56 }
  0xc4   :  { %2677 = vmatpush1.bf16.msra.mxu1 %v14631_v42  ;;  %2637 = vmatprep.subr.bf16.mxu0 %v14878_v43  ;;  %v481_v1 = vld [vmem:[#allocation5 + $0x8a0] sm:$0xff]  ;;  %v14703_v42 = vcombine.low %v326_v31, %v330_v32  ;;  %v270_v31 = vld [vmem:[#allocation5 + $0x208] sm:$0xff] }
  0xc5   :  { %2678 = vmatprep.subr.bf16.mxu1 %v14624_v45  ;;  %v14854_v7 = vcombine.high %v477_v0, %v481_v1  ;;  %v469_v9 = vld [vmem:[#allocation5 + $0x840] sm:$0xff]  ;;  %v14853_v14 = vcombine.low %v477_v0, %v481_v1  ;;  %v14696_v45 = vcombine.high %v318_v63, %v322_v41  ;;  %v274_v32 = vld [vmem:[#allocation5 + $0x228] sm:$0xff] }
  0xc6   :  { %v473_v10 = vld [vmem:[#allocation5 + $0x860] sm:$0xff] }
  0xc7   :  { %2638 = vmatpush1.bf16.msra.mxu0 %v14877_v50  ;;  %v14846_v17 = vcombine.high %v469_v9, %v473_v10  ;;  %v461_v19 = vld [vmem:[#allocation5 + $0x800] sm:$0xff]  ;;  %v14845_v24 = vcombine.low %v469_v9, %v473_v10 }
  0xc8   :  { %2679 = vmatpush1.bf16.msra.mxu1 %v14623_v51  ;;  %2639 = vmatprep.subr.bf16.mxu0 %v14870_v52  ;;  %v465_v20 = vld [vmem:[#allocation5 + $0x820] sm:$0xff]  ;;  %v14695_v51 = vcombine.low %v318_v63, %v322_v41  ;;  %v518_v63 = vld [vmem:[#allocation5 + $0x9c8] sm:$0xff] }
  0xc9   :  { %2680 = vmatprep.subr.bf16.mxu1 %v14616_v54  ;;  %v14838_v26 = vcombine.high %v461_v19, %v465_v20  ;;  %v581_v28 = vld [vmem:[#allocation5 + $0xbc0] sm:$0xff]  ;;  %v14837_v34 = vcombine.low %v461_v19, %v465_v20  ;;  %v14688_v54 = vcombine.high %v310_v48, %v314_v49  ;;  %v522_v41 = vld [vmem:[#allocation5 + $0x9e8] sm:$0xff] }
  0xca   :  { %v585_v29 = vld [vmem:[#allocation5 + $0xbe0] sm:$0xff] }
  0xcb   :  { %2640 = vmatpush1.bf16.msra.mxu0 %v14869_v59  ;;  %v14958_v36 = vcombine.high %v581_v28, %v585_v29  ;;  %v573_v38 = vld [vmem:[#allocation5 + $0xb80] sm:$0xff]  ;;  %v14957_v5 = vcombine.low %v581_v28, %v585_v29 }
  0xcc   :  { %2681 = vmatpush1.bf16.msra.mxu1 %v14615_v60  ;;  %2641 = vmatprep.subr.bf16.mxu0 %v14862_v61  ;;  %v577_v39 = vld [vmem:[#allocation5 + $0xba0] sm:$0xff]  ;;  %v14687_v60 = vcombine.low %v310_v48, %v314_v49  ;;  %v16972_v48 = vpack.c.bf16 %v16952_v22, %v16952_v22  ;;  %v510_v49 = vld [vmem:[#allocation5 + $0x988] sm:$0xff] }
  0xcd   :  { %2682 = vmatprep.subr.bf16.mxu1 %v14608_v62  ;;  %v14950_v43 = vcombine.high %v573_v38, %v577_v39  ;;  %v565_v46 = vld [vmem:[#allocation5 + $0xb40] sm:$0xff]  ;;  %v14949_v50 = vcombine.low %v573_v38, %v577_v39  ;;  %v14680_v62 = vcombine.high %v302_v57, %v306_v58  ;;  %v390_v38 = vld [vmem:[#allocation5 + $0x5c8] sm:$0xff] }
  0xce   :  { %v569_v47 = vld [vmem:[#allocation5 + $0xb60] sm:$0xff]  ;;  %v394_v39 = vld [vmem:[#allocation5 + $0x5e8] sm:$0xff] }
  0xcf   :  { %2642 = vmatpush1.bf16.msra.mxu0 %v14861_v4  ;;  %v14942_v52 = vcombine.high %v565_v46, %v569_v47  ;;  %v557_v55 = vld [vmem:[#allocation5 + $0xb00] sm:$0xff]  ;;  %v14941_v59 = vcombine.low %v565_v46, %v569_v47  ;;  %v382_v46 = vld [vmem:[#allocation5 + $0x588] sm:$0xff] }
  0xd0   :  { %2683 = vmatpush1.bf16.msra.mxu1 %v14607_v6  ;;  %2643 = vmatprep.subr.bf16.mxu0 %v14854_v7  ;;  %v561_v56 = vld [vmem:[#allocation5 + $0xb20] sm:$0xff]  ;;  %v14679_v6 = vcombine.low %v302_v57, %v306_v58  ;;  %v386_v47 = vld [vmem:[#allocation5 + $0x5a8] sm:$0xff] }
  0xd1   :  { %2684 = vmatprep.subr.bf16.mxu1 %v14600_v8  ;;  %v14934_v61 = vcombine.high %v557_v55, %v561_v56  ;;  %v549_v0 = vld [vmem:[#allocation5 + $0xac0] sm:$0xff]  ;;  %v14933_v4 = vcombine.low %v557_v55, %v561_v56  ;;  %v14672_v8 = vcombine.high %v294_v2, %v298_v3  ;;  %v374_v56 = vld [vmem:[#allocation5 + $0x548] sm:$0xff]  ;;  %v14759_v22 = vcombine.low %v382_v46, %v386_v47 }
  0xd2   :  { %v553_v1 = vld [vmem:[#allocation5 + $0xae0] sm:$0xff]  ;;  %v378_v57 = vld [vmem:[#allocation5 + $0x568] sm:$0xff] }
  0xd3   :  { %2644 = vmatpush1.bf16.msra.mxu0 %v14853_v14  ;;  %v14926_v7 = vcombine.high %v549_v0, %v553_v1  ;;  %v541_v9 = vld [vmem:[#allocation5 + $0xa80] sm:$0xff]  ;;  %v14925_v14 = vcombine.low %v549_v0, %v553_v1  ;;  %v502_v58 = vld [vmem:[#allocation5 + $0x948] sm:$0xff] }
  0xd4   :  { %2685 = vmatpush1.bf16.msra.mxu1 %v14599_v15  ;;  %2645 = vmatprep.subr.bf16.mxu0 %v14846_v17  ;;  %v545_v10 = vld [vmem:[#allocation5 + $0xaa0] sm:$0xff]  ;;  %v14671_v15 = vcombine.low %v294_v2, %v298_v3  ;;  %v366_v0 = vld [vmem:[#allocation5 + $0x508] sm:$0xff] }
  0xd5   :  { %2686 = vmatprep.subr.bf16.mxu1 %v14592_v18  ;;  %v14918_v17 = vcombine.high %v541_v9, %v545_v10  ;;  %v14664_v18 = vcombine.high %v286_v12, %v290_v13  ;;  %v533_v19 = vld [vmem:[#allocation5 + $0xa40] sm:$0xff]  ;;  %v370_v1 = vld [vmem:[#allocation5 + $0x528] sm:$0xff] }
  0xd6   :  { %v537_v20 = vld [vmem:[#allocation5 + $0xa60] sm:$0xff]  ;;  %v494_v2 = vld [vmem:[#allocation5 + $0x908] sm:$0xff] }
  0xd7   :  { %2646 = vmatpush1.bf16.msra.mxu0 %v14845_v24  ;;  %v14917_v24 = vcombine.low %v541_v9, %v545_v10  ;;  %v525_v28 = vld [vmem:[#allocation5 + $0xa00] sm:$0xff]  ;;  %v498_v3 = vld [vmem:[#allocation5 + $0x928] sm:$0xff] }
  0xd8   :  { %2687 = vmatpush1.bf16.msra.mxu1 %v14591_v25  ;;  %2647 = vmatprep.subr.bf16.mxu0 %v14838_v26  ;;  %v14663_v25 = vcombine.low %v286_v12, %v290_v13  ;;  %v14910_v26 = vcombine.high %v533_v19, %v537_v20  ;;  %v529_v29 = vld [vmem:[#allocation5 + $0xa20] sm:$0xff]  ;;  %v358_v9 = vld [vmem:[#allocation5 + $0x4c8] sm:$0xff] }
  0xd9   :  { %2688 = vmatprep.subr.bf16.mxu1 %v14584_v27  ;;  %v14656_v27 = vcombine.high %v278_v21, %v282_v23  ;;  %v362_v10 = vld [vmem:[#allocation5 + $0x4e8] sm:$0xff] }
  0xda   :  { %v486_v12 = vld [vmem:[#allocation5 + $0x8c8] sm:$0xff] }
  0xdb   :  { %2648 = vmatpush1.bf16.msra.mxu0 %v14837_v34  ;;  %v14909_v34 = vcombine.low %v533_v19, %v537_v20  ;;  %v490_v13 = vld [vmem:[#allocation5 + $0x8e8] sm:$0xff] }
  0xdc   :  { %2689 = vmatpush1.bf16.msra.mxu1 %v14583_v35  ;;  %2649 = vmatprep.subr.bf16.mxu0 %v14958_v36  ;;  %v14655_v35 = vcombine.low %v278_v21, %v282_v23  ;;  %v14902_v36 = vcombine.high %v525_v28, %v529_v29  ;;  %v350_v19 = vld [vmem:[#allocation5 + $0x488] sm:$0xff] }
  0xdd   :  { %2690 = vmatprep.subr.bf16.mxu1 %v14704_v37  ;;  %v14648_v37 = vcombine.high %v270_v31, %v274_v32  ;;  %v354_v20 = vld [vmem:[#allocation5 + $0x4a8] sm:$0xff] }
  0xde   :  { %v478_v21 = vld [vmem:[#allocation5 + $0x888] sm:$0xff] }
  0xdf   :  { %2650 = vmatpush2.bf16.msra.mxu0 %v14957_v5  ;;  %v14901_v5 = vcombine.low %v525_v28, %v529_v29  ;;  %v482_v23 = vld [vmem:[#allocation5 + $0x8a8] sm:$0xff] }
  0xe0   :  { %2691 = vmatpush2.bf16.msra.mxu1 %v14703_v42  ;;  %2651 = vmatprep.subr.bf16.mxu0 %v14950_v43  ;;  %v14647_v42 = vcombine.low %v270_v31, %v274_v32  ;;  %v14768_v43 = vcombine.high %v390_v38, %v394_v39  ;;  %v342_v28 = vld [vmem:[#allocation5 + $0x448] sm:$0xff] }
  0xe1   :  { %2692 = vmatprep.subr.bf16.mxu1 %v14696_v45  ;;  %v14896_v45 = vcombine.high %v518_v63, %v522_v41  ;;  %v346_v29 = vld [vmem:[#allocation5 + $0x468] sm:$0xff] }
  0xe2   :  { %v470_v31 = vld [vmem:[#allocation5 + $0x848] sm:$0xff] }
  0xe3   :  { %2652 = vmatpush2.bf16.msra.mxu0 %v14949_v50  ;;  %v514_v50 = vld [vmem:[#allocation5 + $0x9a8] sm:$0xff] }
  0xe4   :  { %2693 = vmatpush2.bf16.msra.mxu1 %v14695_v51  ;;  %2653 = vmatprep.subr.bf16.mxu0 %v14942_v52  ;;  %v14767_v51 = vcombine.low %v390_v38, %v394_v39  ;;  %v14895_v52 = vcombine.low %v518_v63, %v522_v41  ;;  %v14888_v55 = vcombine.high %v510_v49, %v514_v50  ;;  %v474_v32 = vld [vmem:[#allocation5 + $0x868] sm:$0xff] }
  0xe5   :  { %2694 = vmatprep.subr.bf16.mxu1 %v14688_v54  ;;  %v14760_v54 = vcombine.high %v382_v46, %v386_v47  ;;  %v334_v38 = vld [vmem:[#allocation5 + $0x408] sm:$0xff] }
  0xe6   :  { %v338_v39 = vld [vmem:[#allocation5 + $0x428] sm:$0xff] }
  0xe7   :  { %2654 = vmatpush2.bf16.msra.mxu0 %v14941_v59  ;;  %v506_v59 = vld [vmem:[#allocation5 + $0x968] sm:$0xff] }
  0xe8   :  { %2695 = vmatpush2.bf16.msra.mxu1 %v14687_v60  ;;  %2655 = vmatprep.subr.bf16.mxu0 %v14934_v61  ;;  %v14887_v60 = vcombine.low %v510_v49, %v514_v50  ;;  %v14752_v61 = vcombine.high %v374_v56, %v378_v57  ;;  %v462_v63 = vld [vmem:[#allocation5 + $0x808] sm:$0xff] }
  0xe9   :  { %2696 = vmatprep.subr.bf16.mxu1 %v14680_v62  ;;  %v14880_v62 = vcombine.high %v502_v58, %v506_v59  ;;  %v466_v41 = vld [vmem:[#allocation5 + $0x828] sm:$0xff] }
  0xea   :  { %v454_v46 = vld [vmem:[#allocation5 + $0x7c8] sm:$0xff] }
  0xeb   :  { %2656 = vmatpush2.bf16.msra.mxu0 %v14933_v4  ;;  %v14751_v4 = vcombine.low %v374_v56, %v378_v57  ;;  %v458_v47 = vld [vmem:[#allocation5 + $0x7e8] sm:$0xff] }
  0xec   :  { %2697 = vmatpush2.bf16.msra.mxu1 %v14679_v6  ;;  %2657 = vmatprep.subr.bf16.mxu0 %v14926_v7  ;;  %v14879_v6 = vcombine.low %v502_v58, %v506_v59  ;;  %v14744_v7 = vcombine.high %v366_v0, %v370_v1  ;;  %v582_v49 = vld [vmem:[#allocation5 + $0xbc8] sm:$0xff] }
  0xed   :  { %2698 = vmatprep.subr.bf16.mxu1 %v14672_v8  ;;  %v14872_v8 = vcombine.high %v494_v2, %v498_v3  ;;  %v586_v50 = vld [vmem:[#allocation5 + $0xbe8] sm:$0xff] }
  0xee   :  { %v446_v56 = vld [vmem:[#allocation5 + $0x788] sm:$0xff] }
  0xef   :  { %2658 = vmatpush2.bf16.msra.mxu0 %v14925_v14  ;;  %v14743_v14 = vcombine.low %v366_v0, %v370_v1  ;;  %v450_v57 = vld [vmem:[#allocation5 + $0x7a8] sm:$0xff] }
  0xf0   :  { %2699 = vmatpush2.bf16.msra.mxu1 %v14671_v15  ;;  %2659 = vmatprep.subr.bf16.mxu0 %v14918_v17  ;;  %v14871_v15 = vcombine.low %v494_v2, %v498_v3  ;;  %v14736_v17 = vcombine.high %v358_v9, %v362_v10  ;;  %v574_v58 = vld [vmem:[#allocation5 + $0xb88] sm:$0xff] }
  0xf1   :  { %2700 = vmatprep.subr.bf16.mxu1 %v14664_v18  ;;  %v14864_v18 = vcombine.high %v486_v12, %v490_v13  ;;  %v578_v59 = vld [vmem:[#allocation5 + $0xba8] sm:$0xff] }
  0xf2   :  { %v438_v0 = vld [vmem:[#allocation5 + $0x748] sm:$0xff] }
  0xf3   :  { %2660 = vmatpush2.bf16.msra.mxu0 %v14917_v24  ;;  %v14735_v24 = vcombine.low %v358_v9, %v362_v10  ;;  %v442_v1 = vld [vmem:[#allocation5 + $0x768] sm:$0xff] }
  0xf4   :  { %2701 = vmatpush2.bf16.msra.mxu1 %v14663_v25  ;;  %2661 = vmatprep.subr.bf16.mxu0 %v14910_v26  ;;  %v14863_v25 = vcombine.low %v486_v12, %v490_v13  ;;  %v14728_v26 = vcombine.high %v350_v19, %v354_v20  ;;  %v566_v2 = vld [vmem:[#allocation5 + $0xb48] sm:$0xff] }
  0xf5   :  { %2702 = vmatprep.subr.bf16.mxu1 %v14656_v27  ;;  %v14856_v27 = vcombine.high %v478_v21, %v482_v23  ;;  %v570_v3 = vld [vmem:[#allocation5 + $0xb68] sm:$0xff] }
  0xf6   :  { %v430_v9 = vld [vmem:[#allocation5 + $0x708] sm:$0xff] }
  0xf7   :  { %2662 = vmatpush2.bf16.msra.mxu0 %v14909_v34  ;;  %v14727_v34 = vcombine.low %v350_v19, %v354_v20  ;;  %v434_v10 = vld [vmem:[#allocation5 + $0x728] sm:$0xff] }
  0xf8   :  { %2703 = vmatpush2.bf16.msra.mxu1 %v14655_v35  ;;  %2663 = vmatprep.subr.bf16.mxu0 %v14902_v36  ;;  %v14855_v35 = vcombine.low %v478_v21, %v482_v23  ;;  %v14720_v36 = vcombine.high %v342_v28, %v346_v29  ;;  %v558_v12 = vld [vmem:[#allocation5 + $0xb08] sm:$0xff] }
  0xf9   :  { %2704 = vmatprep.subr.bf16.mxu1 %v14648_v37  ;;  %v14848_v37 = vcombine.high %v470_v31, %v474_v32  ;;  %v562_v13 = vld [vmem:[#allocation5 + $0xb28] sm:$0xff] }
  0xfa   :  { %v422_v19 = vld [vmem:[#allocation5 + $0x6c8] sm:$0xff] }
  0xfb   :  { %2664 = vmatpush2.bf16.msra.mxu0 %v14901_v5  ;;  %v14719_v5 = vcombine.low %v342_v28, %v346_v29  ;;  %v426_v20 = vld [vmem:[#allocation5 + $0x6e8] sm:$0xff] }
  0xfc   :  { %2705 = vmatpush2.bf16.msra.mxu1 %v14647_v42  ;;  %2715 = vmatprep.subr.bf16.mxu0 %v14768_v43  ;;  %v14847_v42 = vcombine.low %v470_v31, %v474_v32  ;;  %v14712_v43 = vcombine.high %v334_v38, %v338_v39  ;;  %v550_v21 = vld [vmem:[#allocation5 + $0xac8] sm:$0xff] }
  0xfd   :  { %2756 = vmatprep.subr.bf16.mxu1 %v14896_v45  ;;  %v14840_v45 = vcombine.high %v462_v63, %v466_v41  ;;  %v554_v23 = vld [vmem:[#allocation5 + $0xae8] sm:$0xff] }
  0xfe   :  { %2666 = vmatmul.mubr.bf16.vlgmr.msra.gmra.mxu0 %v16972_v48  ;;  %v414_v28 = vld [vmem:[#allocation5 + $0x688] sm:$0xff] }
  0xff   :  { %2707 = vmatmul.mubr.bf16.vlgmr.msra.gmra.mxu1 %v16958_v30  ;;  %2716 = vmatpush1.bf16.msra.mxu0 %v14767_v51  ;;  %v14711_v51 = vcombine.low %v334_v38, %v338_v39  ;;  %v418_v29 = vld [vmem:[#allocation5 + $0x6a8] sm:$0xff] }
 0x100   :  { %2757 = vmatpush1.bf16.msra.mxu1 %v14895_v52  ;;  %2717 = vmatprep.subr.bf16.mxu0 %v14760_v54  ;;  %v14839_v52 = vcombine.low %v462_v63, %v466_v41  ;;  %v14832_v54 = vcombine.high %v454_v46, %v458_v47  ;;  %v542_v31 = vld [vmem:[#allocation5 + $0xa88] sm:$0xff] }
 0x101   :  { %2758 = vmatprep.subr.bf16.mxu1 %v14888_v55  ;;  %2747 = vmatprep.mubr.bf16.mxu0 %v16949_v16  ;;  %v14960_v55 = vcombine.high %v582_v49, %v586_v50  ;;  %v546_v32 = vld [vmem:[#allocation5 + $0xaa8] sm:$0xff] }
 0x102   :  { %2788 = vmatprep.mubr.bf16.mxu1 %v16964_v40  ;;  %v406_v38 = vld [vmem:[#allocation5 + $0x648] sm:$0xff] }
 0x103   :  { %2718 = vmatpush1.bf16.msra.mxu0 %v14759_v22  ;;  %v14831_v22 = vcombine.low %v454_v46, %v458_v47  ;;  %v410_v39 = vld [vmem:[#allocation5 + $0x668] sm:$0xff] }
 0x104   :  { %2759 = vmatpush1.bf16.msra.mxu1 %v14887_v60  ;;  %2719 = vmatprep.subr.bf16.mxu0 %v14752_v61  ;;  %v14959_v60 = vcombine.low %v582_v49, %v586_v50  ;;  %v14824_v61 = vcombine.high %v446_v56, %v450_v57  ;;  %v534_v63 = vld [vmem:[#allocation5 + $0xa48] sm:$0xff] }
 0x105   :  { %2760 = vmatprep.subr.bf16.mxu1 %v14880_v62  ;;  %v14952_v62 = vcombine.high %v574_v58, %v578_v59  ;;  %v538_v41 = vld [vmem:[#allocation5 + $0xa68] sm:$0xff] }
 0x106   :  { %v398_v46 = vld [vmem:[#allocation5 + $0x608] sm:$0xff] }
 0x107   :  { %2720 = vmatpush1.bf16.msra.mxu0 %v14751_v4  ;;  %v14823_v4 = vcombine.low %v446_v56, %v450_v57  ;;  %v402_v47 = vld [vmem:[#allocation5 + $0x628] sm:$0xff]  ;;  %v263_v56 = vld [vmem:[#allocation5 + $0x1d0] sm:$0xff] }
 0x108   :  { %2761 = vmatpush1.bf16.msra.mxu1 %v14879_v6  ;;  %2721 = vmatprep.subr.bf16.mxu0 %v14744_v7  ;;  %v14951_v6 = vcombine.low %v574_v58, %v578_v59  ;;  %v14816_v7 = vcombine.high %v438_v0, %v442_v1  ;;  %v526_v49 = vld [vmem:[#allocation5 + $0xa08] sm:$0xff]  ;;  %v267_v57 = vld [vmem:[#allocation5 + $0x1f0] sm:$0xff] }
 0x109   :  { %2762 = vmatprep.subr.bf16.mxu1 %v14872_v8  ;;  %v14944_v8 = vcombine.high %v566_v2, %v570_v3  ;;  %v530_v50 = vld [vmem:[#allocation5 + $0xa28] sm:$0xff]  ;;  %v391_v58 = vld [vmem:[#allocation5 + $0x5d0] sm:$0xff] }
 0x10a   :  { %v395_v59 = vld [vmem:[#allocation5 + $0x5f0] sm:$0xff] }
 0x10b   :  { %2722 = vmatpush1.bf16.msra.mxu0 %v14743_v14  ;;  %v14815_v14 = vcombine.low %v438_v0, %v442_v1  ;;  %v255_v0 = vld [vmem:[#allocation5 + $0x190] sm:$0xff] }
 0x10c   :  { %2763 = vmatpush1.bf16.msra.mxu1 %v14871_v15  ;;  %2723 = vmatprep.subr.bf16.mxu0 %v14736_v17  ;;  %v14943_v15 = vcombine.low %v566_v2, %v570_v3  ;;  %v14808_v17 = vcombine.high %v430_v9, %v434_v10  ;;  %v259_v1 = vld [vmem:[#allocation5 + $0x1b0] sm:$0xff] }
 0x10d   :  { %2764 = vmatprep.subr.bf16.mxu1 %v14864_v18  ;;  %v14936_v18 = vcombine.high %v558_v12, %v562_v13  ;;  %v383_v2 = vld [vmem:[#allocation5 + $0x590] sm:$0xff] }
 0x10e   :  { %v387_v3 = vld [vmem:[#allocation5 + $0x5b0] sm:$0xff] }
 0x10f   :  { %2724 = vmatpush1.bf16.msra.mxu0 %v14735_v24  ;;  %v14807_v24 = vcombine.low %v430_v9, %v434_v10  ;;  %v247_v9 = vld [vmem:[#allocation5 + $0x150] sm:$0xff] }
 0x110   :  { %2765 = vmatpush1.bf16.msra.mxu1 %v14863_v25  ;;  %2725 = vmatprep.subr.bf16.mxu0 %v14728_v26  ;;  %v14935_v25 = vcombine.low %v558_v12, %v562_v13  ;;  %v14800_v26 = vcombine.high %v422_v19, %v426_v20  ;;  %v251_v10 = vld [vmem:[#allocation5 + $0x170] sm:$0xff] }
 0x111   :  { %2766 = vmatprep.subr.bf16.mxu1 %v14856_v27  ;;  %v14928_v27 = vcombine.high %v550_v21, %v554_v23  ;;  %v375_v12 = vld [vmem:[#allocation5 + $0x550] sm:$0xff] }
 0x112   :  { %v379_v13 = vld [vmem:[#allocation5 + $0x570] sm:$0xff] }
 0x113   :  { %2726 = vmatpush1.bf16.msra.mxu0 %v14727_v34  ;;  %v14799_v34 = vcombine.low %v422_v19, %v426_v20  ;;  %v239_v19 = vld [vmem:[#allocation5 + $0x110] sm:$0xff] }
 0x114   :  { %2767 = vmatpush1.bf16.msra.mxu1 %v14855_v35  ;;  %2727 = vmatprep.subr.bf16.mxu0 %v14720_v36  ;;  %v14927_v35 = vcombine.low %v550_v21, %v554_v23  ;;  %v14792_v36 = vcombine.high %v414_v28, %v418_v29  ;;  %v243_v20 = vld [vmem:[#allocation5 + $0x130] sm:$0xff] }
 0x115   :  { %2768 = vmatprep.subr.bf16.mxu1 %v14848_v37  ;;  %v14920_v37 = vcombine.high %v542_v31, %v546_v32  ;;  %v367_v21 = vld [vmem:[#allocation5 + $0x510] sm:$0xff] }
 0x116   :  { %v371_v23 = vld [vmem:[#allocation5 + $0x530] sm:$0xff] }
 0x117   :  { %2728 = vmatpush1.bf16.msra.mxu0 %v14719_v5  ;;  %v14791_v5 = vcombine.low %v414_v28, %v418_v29  ;;  %v231_v28 = vld [vmem:[#allocation5 + $0xd0] sm:$0xff] }
 0x118   :  { %2769 = vmatpush1.bf16.msra.mxu1 %v14847_v42  ;;  %2729 = vmatprep.subr.bf16.mxu0 %v14712_v43  ;;  %v14919_v42 = vcombine.low %v542_v31, %v546_v32  ;;  %v14784_v43 = vcombine.high %v406_v38, %v410_v39  ;;  %v235_v29 = vld [vmem:[#allocation5 + $0xf0] sm:$0xff] }
 0x119   :  { %2770 = vmatprep.subr.bf16.mxu1 %v14840_v45  ;;  %v14912_v45 = vcombine.high %v534_v63, %v538_v41  ;;  %v359_v31 = vld [vmem:[#allocation5 + $0x4d0] sm:$0xff] }
 0x11a   :  { %v363_v32 = vld [vmem:[#allocation5 + $0x4f0] sm:$0xff] }
 0x11b   :  { %2730 = vmatpush1.bf16.msra.mxu0 %v14711_v51  ;;  %v14783_v51 = vcombine.low %v406_v38, %v410_v39  ;;  %v223_v38 = vld [vmem:[#allocation5 + $0x90] sm:$0xff] }
 0x11c   :  { %2771 = vmatpush1.bf16.msra.mxu1 %v14839_v52  ;;  %2731 = vmatprep.subr.bf16.mxu0 %v14832_v54  ;;  %v14911_v52 = vcombine.low %v534_v63, %v538_v41  ;;  %v14776_v54 = vcombine.high %v398_v46, %v402_v47  ;;  %v227_v39 = vld [vmem:[#allocation5 + $0xb0] sm:$0xff] }
 0x11d   :  { %2772 = vmatprep.subr.bf16.mxu1 %v14960_v55  ;;  %v14904_v55 = vcombine.high %v526_v49, %v530_v50  ;;  %v351_v63 = vld [vmem:[#allocation5 + $0x490] sm:$0xff] }
 0x11e   :  { %v355_v41 = vld [vmem:[#allocation5 + $0x4b0] sm:$0xff] }
 0x11f   :  { %2732 = vmatpush2.bf16.msra.mxu0 %v14831_v22  ;;  %v14775_v22 = vcombine.low %v398_v46, %v402_v47  ;;  %v215_v46 = vld [vmem:[#allocation5 + $0x50] sm:$0xff] }
 0x120   :  { %2773 = vmatpush2.bf16.msra.mxu1 %v14959_v60  ;;  %2733 = vmatprep.subr.bf16.mxu0 %v14824_v61  ;;  %v14903_v60 = vcombine.low %v526_v49, %v530_v50  ;;  %v14642_v61 = vcombine.high %v263_v56, %v267_v57  ;;  %v219_v47 = vld [vmem:[#allocation5 + $0x70] sm:$0xff] }
 0x121   :  { %2774 = vmatprep.subr.bf16.mxu1 %v14952_v62  ;;  %v14770_v62 = vcombine.high %v391_v58, %v395_v59  ;;  %v343_v49 = vld [vmem:[#allocation5 + $0x450] sm:$0xff] }
 0x122   :  { %v347_v50 = vld [vmem:[#allocation5 + $0x470] sm:$0xff] }
 0x123   :  { %2734 = vmatpush2.bf16.msra.mxu0 %v14823_v4  ;;  %v14641_v4 = vcombine.low %v263_v56, %v267_v57  ;;  %v207_v56 = vld [vmem:[#allocation5 + $0x10] sm:$0xff] }
 0x124   :  { %2775 = vmatpush2.bf16.msra.mxu1 %v14951_v6  ;;  %2735 = vmatprep.subr.bf16.mxu0 %v14816_v7  ;;  %v14769_v6 = vcombine.low %v391_v58, %v395_v59  ;;  %v14634_v7 = vcombine.high %v255_v0, %v259_v1  ;;  %v211_v57 = vld [vmem:[#allocation5 + $0x30] sm:$0xff] }
 0x125   :  { %2776 = vmatprep.subr.bf16.mxu1 %v14944_v8  ;;  %v14762_v8 = vcombine.high %v383_v2, %v387_v3  ;;  %v335_v58 = vld [vmem:[#allocation5 + $0x410] sm:$0xff] }
 0x126   :  { %v339_v59 = vld [vmem:[#allocation5 + $0x430] sm:$0xff] }
 0x127   :  { %2736 = vmatpush2.bf16.msra.mxu0 %v14815_v14  ;;  %v14633_v14 = vcombine.low %v255_v0, %v259_v1  ;;  %v327_v0 = vld [vmem:[#allocation5 + $0x3d0] sm:$0xff] }
 0x128   :  { %2777 = vmatpush2.bf16.msra.mxu1 %v14943_v15  ;;  %2737 = vmatprep.subr.bf16.mxu0 %v14808_v17  ;;  %v14761_v15 = vcombine.low %v383_v2, %v387_v3  ;;  %v14626_v17 = vcombine.high %v247_v9, %v251_v10  ;;  %v331_v1 = vld [vmem:[#allocation5 + $0x3f0] sm:$0xff] }
 0x129   :  { %2778 = vmatprep.subr.bf16.mxu1 %v14936_v18  ;;  %v14754_v18 = vcombine.high %v375_v12, %v379_v13  ;;  %v455_v2 = vld [vmem:[#allocation5 + $0x7d0] sm:$0xff] }
 0x12a   :  { %v459_v3 = vld [vmem:[#allocation5 + $0x7f0] sm:$0xff] }
 0x12b   :  { %2738 = vmatpush2.bf16.msra.mxu0 %v14807_v24  ;;  %v14625_v24 = vcombine.low %v247_v9, %v251_v10  ;;  %v319_v9 = vld [vmem:[#allocation5 + $0x390] sm:$0xff] }
 0x12c   :  { %2779 = vmatpush2.bf16.msra.mxu1 %v14935_v25  ;;  %2739 = vmatprep.subr.bf16.mxu0 %v14800_v26  ;;  %v14753_v25 = vcombine.low %v375_v12, %v379_v13  ;;  %v14618_v26 = vcombine.high %v239_v19, %v243_v20  ;;  %v323_v10 = vld [vmem:[#allocation5 + $0x3b0] sm:$0xff] }
 0x12d   :  { %2780 = vmatprep.subr.bf16.mxu1 %v14928_v27  ;;  %v14746_v27 = vcombine.high %v367_v21, %v371_v23  ;;  %v447_v12 = vld [vmem:[#allocation5 + $0x790] sm:$0xff] }
 0x12e   :  { %v451_v13 = vld [vmem:[#allocation5 + $0x7b0] sm:$0xff] }
 0x12f   :  { %2740 = vmatpush2.bf16.msra.mxu0 %v14799_v34  ;;  %v14617_v34 = vcombine.low %v239_v19, %v243_v20  ;;  %v311_v19 = vld [vmem:[#allocation5 + $0x350] sm:$0xff] }
 0x130   :  { %2781 = vmatpush2.bf16.msra.mxu1 %v14927_v35  ;;  %2741 = vmatprep.subr.bf16.mxu0 %v14792_v36  ;;  %v14745_v35 = vcombine.low %v367_v21, %v371_v23  ;;  %v14610_v36 = vcombine.high %v231_v28, %v235_v29  ;;  %v315_v20 = vld [vmem:[#allocation5 + $0x370] sm:$0xff] }
 0x131   :  { %2782 = vmatprep.subr.bf16.mxu1 %v14920_v37  ;;  %v14738_v37 = vcombine.high %v359_v31, %v363_v32  ;;  %v439_v21 = vld [vmem:[#allocation5 + $0x750] sm:$0xff] }
 0x132   :  { %v443_v23 = vld [vmem:[#allocation5 + $0x770] sm:$0xff] }
 0x133   :  { %2742 = vmatpush2.bf16.msra.mxu0 %v14791_v5  ;;  %v14609_v5 = vcombine.low %v231_v28, %v235_v29  ;;  %v303_v28 = vld [vmem:[#allocation5 + $0x310] sm:$0xff] }
 0x134   :  { %2783 = vmatpush2.bf16.msra.mxu1 %v14919_v42  ;;  %2743 = vmatprep.subr.bf16.mxu0 %v14784_v43  ;;  %v14737_v42 = vcombine.low %v359_v31, %v363_v32  ;;  %v14602_v43 = vcombine.high %v223_v38, %v227_v39  ;;  %v307_v29 = vld [vmem:[#allocation5 + $0x330] sm:$0xff] }
 0x135   :  { %2784 = vmatprep.subr.bf16.mxu1 %v14912_v45  ;;  %v14730_v45 = vcombine.high %v351_v63, %v355_v41  ;;  %v431_v31 = vld [vmem:[#allocation5 + $0x710] sm:$0xff] }
 0x136   :  { %v435_v32 = vld [vmem:[#allocation5 + $0x730] sm:$0xff] }
 0x137   :  { %2744 = vmatpush2.bf16.msra.mxu0 %v14783_v51  ;;  %v14601_v51 = vcombine.low %v223_v38, %v227_v39  ;;  %v295_v38 = vld [vmem:[#allocation5 + $0x2d0] sm:$0xff] }
 0x138   :  { %2785 = vmatpush2.bf16.msra.mxu1 %v14911_v52  ;;  %2745 = vmatprep.subr.bf16.mxu0 %v14776_v54  ;;  %v14729_v52 = vcombine.low %v351_v63, %v355_v41  ;;  %v14594_v54 = vcombine.high %v215_v46, %v219_v47  ;;  %v299_v39 = vld [vmem:[#allocation5 + $0x2f0] sm:$0xff] }
 0x139   :  { %2786 = vmatprep.subr.bf16.mxu1 %v14904_v55  ;;  %v14722_v55 = vcombine.high %v343_v49, %v347_v50  ;;  %v423_v63 = vld [vmem:[#allocation5 + $0x6d0] sm:$0xff] }
 0x13a   :  { %v427_v41 = vld [vmem:[#allocation5 + $0x6f0] sm:$0xff] }
 0x13b   :  { %2746 = vmatpush2.bf16.msra.mxu0 %v14775_v22  ;;  %v14593_v22 = vcombine.low %v215_v46, %v219_v47  ;;  %v287_v46 = vld [vmem:[#allocation5 + $0x290] sm:$0xff] }
 0x13c   :  { %2787 = vmatpush2.bf16.msra.mxu1 %v14903_v60  ;;  %2797 = vmatprep.subr.bf16.mxu0 %v14642_v61  ;;  %v14721_v60 = vcombine.low %v343_v49, %v347_v50  ;;  %v14586_v61 = vcombine.high %v207_v56, %v211_v57  ;;  %v291_v47 = vld [vmem:[#allocation5 + $0x2b0] sm:$0xff] }
 0x13d   :  { %2838 = vmatprep.subr.bf16.mxu1 %v14770_v62  ;;  %v14714_v62 = vcombine.high %v335_v58, %v339_v59  ;;  %v415_v49 = vld [vmem:[#allocation5 + $0x690] sm:$0xff] }
 0x13e   :  { %2748 = vmatmul.mubr.bf16.vlgmr.msra.gmra.mxu0 %v16962_v33  ;;  %v419_v50 = vld [vmem:[#allocation5 + $0x6b0] sm:$0xff] }
 0x13f   :  { %2789 = vmatmul.mubr.bf16.vlgmr.msra.gmra.mxu1 %v16972_v48  ;;  %2798 = vmatpush1.bf16.msra.mxu0 %v14641_v4  ;;  %v14585_v4 = vcombine.low %v207_v56, %v211_v57  ;;  %v279_v56 = vld [vmem:[#allocation5 + $0x250] sm:$0xff] }
 0x140   :  { %2839 = vmatpush1.bf16.msra.mxu1 %v14769_v6  ;;  %2799 = vmatprep.subr.bf16.mxu0 %v14634_v7  ;;  %v14713_v6 = vcombine.low %v335_v58, %v339_v59  ;;  %v14706_v7 = vcombine.high %v327_v0, %v331_v1  ;;  %v283_v57 = vld [vmem:[#allocation5 + $0x270] sm:$0xff] }
 0x141   :  { %2840 = vmatprep.subr.bf16.mxu1 %v14762_v8  ;;  %2829 = vmatprep.mubr.bf16.mxu0 %v16944_v11  ;;  %v14834_v8 = vcombine.high %v455_v2, %v459_v3  ;;  %v407_v58 = vld [vmem:[#allocation5 + $0x650] sm:$0xff] }
 0x142   :  { %2870 = vmatprep.mubr.bf16.mxu1 %v16949_v16  ;;  %v411_v59 = vld [vmem:[#allocation5 + $0x670] sm:$0xff] }
 0x143   :  { %2800 = vmatpush1.bf16.msra.mxu0 %v14633_v14  ;;  %v14705_v14 = vcombine.low %v327_v0, %v331_v1  ;;  %v271_v0 = vld [vmem:[#allocation5 + $0x210] sm:$0xff] }
 0x144   :  { %2841 = vmatpush1.bf16.msra.mxu1 %v14761_v15  ;;  %2801 = vmatprep.subr.bf16.mxu0 %v14626_v17  ;;  %v14833_v15 = vcombine.low %v455_v2, %v459_v3  ;;  %v14698_v17 = vcombine.high %v319_v9, %v323_v10  ;;  %v275_v1 = vld [vmem:[#allocation5 + $0x230] sm:$0xff] }
 0x145   :  { %2842 = vmatprep.subr.bf16.mxu1 %v14754_v18  ;;  %v14826_v18 = vcombine.high %v447_v12, %v451_v13  ;;  %v399_v2 = vld [vmem:[#allocation5 + $0x610] sm:$0xff] }
 0x146   :  { %v403_v3 = vld [vmem:[#allocation5 + $0x630] sm:$0xff] }
 0x147   :  { %2802 = vmatpush1.bf16.msra.mxu0 %v14625_v24  ;;  %v14697_v24 = vcombine.low %v319_v9, %v323_v10  ;;  %v519_v9 = vld [vmem:[#allocation5 + $0x9d0] sm:$0xff] }
 0x148   :  { %2843 = vmatpush1.bf16.msra.mxu1 %v14753_v25  ;;  %2803 = vmatprep.subr.bf16.mxu0 %v14618_v26  ;;  %v14825_v25 = vcombine.low %v447_v12, %v451_v13  ;;  %v14690_v26 = vcombine.high %v311_v19, %v315_v20  ;;  %v523_v10 = vld [vmem:[#allocation5 + $0x9f0] sm:$0xff]  ;;  %v264_v12 = vld [vmem:[#allocation5 + $0x1d8] sm:$0xff] }
 0x149   :  { %2844 = vmatprep.subr.bf16.mxu1 %v14746_v27  ;;  %v14818_v27 = vcombine.high %v439_v21, %v443_v23  ;;  %v268_v13 = vld [vmem:[#allocation5 + $0x1f8] sm:$0xff] }
 0x14b   :  { %2804 = vmatpush1.bf16.msra.mxu0 %v14617_v34  ;;  %v14689_v34 = vcombine.low %v311_v19, %v315_v20  ;;  %v14898_v19 = vcombine.high %v519_v9, %v523_v10  ;;  %v14644_v20 = vcombine.high %v264_v12, %v268_v13 }
 0x14c   :  { %2845 = vmatpush1.bf16.msra.mxu1 %v14745_v35  ;;  %2805 = vmatprep.subr.bf16.mxu0 %v14610_v36  ;;  %v14817_v35 = vcombine.low %v439_v21, %v443_v23  ;;  %v14682_v36 = vcombine.high %v303_v28, %v307_v29  ;;  %v16988_v21 = vsub.s32 1, %v16931_v44  ;;  %v511_v23 = vld [vmem:[#allocation5 + $0x990] sm:$0xff] }
 0x14d   :  { %2846 = vmatprep.subr.bf16.mxu1 %v14738_v37  ;;  %v14810_v37 = vcombine.high %v431_v31, %v435_v32 }
 0x14f   :  { %2806 = vmatpush1.bf16.msra.mxu0 %v14609_v5  ;;  %v14681_v5 = vcombine.low %v303_v28, %v307_v29  ;;  %v14897_v28 = vcombine.low %v519_v9, %v523_v10  ;;  %v14643_v29 = vcombine.low %v264_v12, %v268_v13  ;;  %v479_v9 = vld [vmem:[#allocation5 + $0x890] sm:$0xff]  ;;  %v224_v12 = vld [vmem:[#allocation5 + $0x98] sm:$0xff] }
 0x150   :  { %2847 = vmatpush1.bf16.msra.mxu1 %v14737_v42  ;;  %2807 = vmatprep.subr.bf16.mxu0 %v14602_v43  ;;  %v14809_v42 = vcombine.low %v431_v31, %v435_v32  ;;  %v14674_v43 = vcombine.high %v295_v38, %v299_v39  ;;  %v483_v10 = vld [vmem:[#allocation5 + $0x8b0] sm:$0xff]  ;;  %v228_v13 = vld [vmem:[#allocation5 + $0xb8] sm:$0xff] }
 0x151   :  { %2848 = vmatprep.subr.bf16.mxu1 %v14730_v45  ;;  %v14802_v45 = vcombine.high %v423_v63, %v427_v41 }
 0x153   :  { %2808 = vmatpush1.bf16.msra.mxu0 %v14601_v51  ;;  %v14673_v51 = vcombine.low %v295_v38, %v299_v39  ;;  %v248_v38 = vld [vmem:[#allocation5 + $0x158] sm:$0xff] }
 0x154   :  { %2849 = vmatpush1.bf16.msra.mxu1 %v14729_v52  ;;  %2809 = vmatprep.subr.bf16.mxu0 %v14594_v54  ;;  %v14801_v52 = vcombine.low %v423_v63, %v427_v41  ;;  %v14666_v54 = vcombine.high %v287_v46, %v291_v47  ;;  %v252_v39 = vld [vmem:[#allocation5 + $0x178] sm:$0xff] }
 0x155   :  { %2850 = vmatprep.subr.bf16.mxu1 %v14722_v55  ;;  %v14794_v55 = vcombine.high %v415_v49, %v419_v50 }
 0x157   :  { %2810 = vmatpush1.bf16.msra.mxu0 %v14593_v22  ;;  %v14665_v22 = vcombine.low %v287_v46, %v291_v47 }
 0x158   :  { %2851 = vmatpush1.bf16.msra.mxu1 %v14721_v60  ;;  %2811 = vmatprep.subr.bf16.mxu0 %v14586_v61  ;;  %v14793_v60 = vcombine.low %v415_v49, %v419_v50  ;;  %v14658_v61 = vcombine.high %v279_v56, %v283_v57  ;;  %v14628_v50 = vcombine.high %v248_v38, %v252_v39 }
 0x159   :  { %2852 = vmatprep.subr.bf16.mxu1 %v14714_v62  ;;  %v14786_v62 = vcombine.high %v407_v58, %v411_v59 }
 0x15b   :  { %2812 = vmatpush1.bf16.msra.mxu0 %v14585_v4  ;;  %v14657_v4 = vcombine.low %v279_v56, %v283_v57  ;;  %v244_v56 = vld [vmem:[#allocation5 + $0x138] sm:$0xff] }
 0x15c   :  { %2853 = vmatpush1.bf16.msra.mxu1 %v14713_v6  ;;  %2813 = vmatprep.subr.bf16.mxu0 %v14706_v7  ;;  %v14785_v6 = vcombine.low %v407_v58, %v411_v59  ;;  %v14650_v7 = vcombine.high %v271_v0, %v275_v1 }
 0x15d   :  { %2854 = vmatprep.subr.bf16.mxu1 %v14834_v8  ;;  %v14778_v8 = vcombine.high %v399_v2, %v403_v3 }
 0x15f   :  { %2814 = vmatpush2.bf16.msra.mxu0 %v14705_v14  ;;  %v14649_v14 = vcombine.low %v271_v0, %v275_v1  ;;  %v487_v1 = vld [vmem:[#allocation5 + $0x8d0] sm:$0xff] }
 0x160   :  { %2855 = vmatpush2.bf16.msra.mxu1 %v14833_v15  ;;  %2815 = vmatprep.subr.bf16.mxu0 %v14698_v17  ;;  %v16983_v15 = vsub.s32 0, %v16931_v44  ;;  %v14777_v17 = vcombine.low %v399_v2, %v403_v3  ;;  %v491_v2 = vld [vmem:[#allocation5 + $0x8f0] sm:$0xff]  ;;  %v232_v3 = vld [vmem:[#allocation5 + $0xd8] sm:$0xff] }
 0x161   :  { %2856 = vmatprep.subr.bf16.mxu1 %v14826_v18  ;;  %v16985_v18 = vld [vmem:[#allocation7] sm:$0xff] }
 0x162   :  { %v598_v32 = vrot.slane %v16985_v18, %v16988_v21 }
 0x163   :  { %2816 = vmatpush2.bf16.msra.mxu0 %v14697_v24  ;;  %v515_v24 = vld [vmem:[#allocation5 + $0x9b0] sm:$0xff] }
 0x164   :  { %2857 = vmatpush2.bf16.msra.mxu1 %v14825_v25  ;;  %2817 = vmatprep.subr.bf16.mxu0 %v14690_v26  ;;  %v256_v25 = vld [vmem:[#allocation5 + $0x198] sm:$0xff]  ;;  %v14890_v31 = vcombine.high %v511_v23, %v515_v24 }
 0x165   :  { %2858 = vmatprep.subr.bf16.mxu1 %v14818_v27  ;;  %v260_v26 = vld [vmem:[#allocation5 + $0x1b8] sm:$0xff]  ;;  %v594_v27 = vrot.slane %v16985_v18, %v16983_v15 }
 0x167   :  { %2818 = vmatpush2.bf16.msra.mxu0 %v14689_v34  ;;  %v14636_v34 = vcombine.high %v256_v25, %v260_v26 }
 0x168   :  { %2859 = vmatpush2.bf16.msra.mxu1 %v14817_v35  ;;  %2819 = vmatprep.subr.bf16.mxu0 %v14682_v36  ;;  %v503_v35 = vld [vmem:[#allocation5 + $0x950] sm:$0xff] }
 0x169   :  { %2860 = vmatprep.subr.bf16.mxu1 %v14810_v37  ;;  %v507_v36 = vld [vmem:[#allocation5 + $0x970] sm:$0xff] }
 0x16a   :  { %v14881_v59 = vcombine.low %v503_v35, %v507_v36 }
 0x16b   :  { %2820 = vmatpush2.bf16.msra.mxu0 %v14681_v5  ;;  %v14889_v5 = vcombine.low %v511_v23, %v515_v24  ;;  %v471_v23 = vld [vmem:[#allocation5 + $0x850] sm:$0xff] }
 0x16c   :  { %2861 = vmatpush2.bf16.msra.mxu1 %v14809_v42  ;;  %2821 = vmatprep.subr.bf16.mxu0 %v14674_v43  ;;  %v14635_v43 = vcombine.low %v256_v25, %v260_v26  ;;  %v475_v24 = vld [vmem:[#allocation5 + $0x870] sm:$0xff]  ;;  %v216_v25 = vld [vmem:[#allocation5 + $0x58] sm:$0xff] }
 0x16d   :  { %2862 = vmatprep.subr.bf16.mxu1 %v14802_v45  ;;  %v14882_v45 = vcombine.high %v503_v35, %v507_v36  ;;  %v220_v26 = vld [vmem:[#allocation5 + $0x78] sm:$0xff] }
 0x16e   :  { %v208_v35 = vld [vmem:[#allocation5 + $0x18] sm:$0xff] }
 0x16f   :  { %2822 = vmatpush2.bf16.msra.mxu0 %v14673_v51  ;;  %v495_v51 = vld [vmem:[#allocation5 + $0x910] sm:$0xff]  ;;  %v212_v36 = vld [vmem:[#allocation5 + $0x38] sm:$0xff] }
 0x170   :  { %2863 = vmatpush2.bf16.msra.mxu1 %v14801_v52  ;;  %2823 = vmatprep.subr.bf16.mxu0 %v14666_v54  ;;  %v499_v52 = vld [vmem:[#allocation5 + $0x930] sm:$0xff] }
 0x171   :  { %2864 = vmatprep.subr.bf16.mxu1 %v14794_v55  ;;  %v240_v55 = vld [vmem:[#allocation5 + $0x118] sm:$0xff] }
 0x172   :  { %v14620_v0 = vcombine.high %v240_v55, %v244_v56 }
 0x173   :  { %2824 = vmatpush2.bf16.msra.mxu0 %v14665_v22 }
 0x174   :  { %2865 = vmatpush2.bf16.msra.mxu1 %v14793_v60  ;;  %2825 = vmatprep.subr.bf16.mxu0 %v14658_v61  ;;  %v14627_v60 = vcombine.low %v248_v38, %v252_v39  ;;  %v14874_v61 = vcombine.high %v495_v51, %v499_v52  ;;  %v14595_v38 = vcombine.low %v216_v25, %v220_v26 }
 0x175   :  { %2866 = vmatprep.subr.bf16.mxu1 %v14786_v62 }
 0x177   :  { %2826 = vmatpush2.bf16.msra.mxu0 %v14657_v4  ;;  %v236_v4 = vld [vmem:[#allocation5 + $0xf8] sm:$0xff] }
 0x178   :  { %2867 = vmatpush2.bf16.msra.mxu1 %v14785_v6  ;;  %2827 = vmatprep.subr.bf16.mxu0 %v14650_v7  ;;  %v14873_v6 = vcombine.low %v495_v51, %v499_v52  ;;  %v14866_v7 = vcombine.high %v487_v1, %v491_v2  ;;  %v575_v51 = vld [vmem:[#allocation5 + $0xb90] sm:$0xff] }
 0x179   :  { %2868 = vmatprep.subr.bf16.mxu1 %v14778_v8  ;;  %v14612_v8 = vcombine.high %v232_v3, %v236_v4  ;;  %v579_v52 = vld [vmem:[#allocation5 + $0xbb0] sm:$0xff] }
 0x17b   :  { %2828 = vmatpush2.bf16.msra.mxu0 %v14649_v14  ;;  %v14865_v14 = vcombine.low %v487_v1, %v491_v2  ;;  %v14953_v1 = vcombine.low %v575_v51, %v579_v52 }
 0x17c   :  { %2869 = vmatpush2.bf16.msra.mxu1 %v14777_v17  ;;  %2879 = vmatprep.subr.bf16.mxu0 %v14898_v19  ;;  %v14611_v17 = vcombine.low %v232_v3, %v236_v4  ;;  %v14858_v19 = vcombine.high %v479_v9, %v483_v10 }
 0x17d   :  { %2920 = vmatprep.subr.bf16.mxu1 %v14644_v20  ;;  %v14604_v20 = vcombine.high %v224_v12, %v228_v13 }
 0x17e   :  { %v2585_v37 = vpop.f32.mrf.mxu0  ;;  %2830 = vmatmul.mubr.bf16.vlgmr.msra.gmra.mxu0 %v16958_v30 }
 0x17f   :  { %v2586_v63 = vadd.f32 %v2585_v37, %v594_v27  ;;  %v2626_v41 = vpop.f32.mrf.mxu1  ;;  %2871 = vmatmul.mubr.bf16.vlgmr.msra.gmra.mxu1 %v16962_v33  ;;  %2880 = vmatpush1.bf16.msra.mxu0 %v14897_v28  ;;  %v14857_v27 = vcombine.low %v479_v9, %v483_v10  ;;  %v14603_v28 = vcombine.low %v224_v12, %v228_v13 }
 0x180   :  { %2921 = vmatpush1.bf16.msra.mxu1 %v14643_v29  ;;  %v2587_v42 = vpop.f32.mrf.mxu0  ;;  %2881 = vmatprep.subr.bf16.mxu0 %v14890_v31  ;;  %v14850_v29 = vcombine.high %v471_v23, %v475_v24  ;;  %v14596_v31 = vcombine.high %v216_v25, %v220_v26  ;;  %v14849_v37 = vcombine.low %v471_v23, %v475_v24 }
 0x181   :  { %v16996_v46 = vadd.f32 %v2626_v41, %v2586_v63  ;;  %v2588_v47 = vadd.f32 %v2587_v42, %v598_v32  ;;  %v2628_v49 = vpop.f32.mrf.mxu1  ;;  %2922 = vmatprep.subr.bf16.mxu1 %v14636_v34  ;;  %2911 = vmatprep.mubr.bf16.mxu0 %v16964_v40  ;;  %v463_v32 = vld [vmem:[#allocation5 + $0x810] sm:$0xff]  ;;  %v14588_v63 = vcombine.high %v208_v35, %v212_v36  ;;  %v328_v42 = vld [vmem:[#allocation5 + $0x3d8] sm:$0xff] }
 0x182   :  { %v2589_v54 = vpop.f32.mrf.mxu0  ;;  %2952 = vmatprep.mubr.bf16.mxu1 %v16944_v11  ;;  %v14619_v11 = vcombine.low %v240_v55, %v244_v56  ;;  %v467_v34 = vld [vmem:[#allocation5 + $0x830] sm:$0xff]  ;;  %v324_v55 = vld [vmem:[#allocation5 + $0x3b8] sm:$0xff] }
 0x183   :  { %v17000_v57 = vadd.f32 %v2628_v49, %v2588_v47  ;;  %v2630_v58 = vpop.f32.mrf.mxu1  ;;  %2882 = vmatpush1.bf16.msra.mxu0 %v14889_v5  ;;  %v14842_v39 = vcombine.high %v463_v32, %v467_v34  ;;  %v583_v41 = vld [vmem:[#allocation5 + $0xbd0] sm:$0xff]  ;;  %v14587_v47 = vcombine.low %v208_v35, %v212_v36  ;;  %v320_v54 = vld [vmem:[#allocation5 + $0x398] sm:$0xff] }
 0x184   :  { %2923 = vmatpush1.bf16.msra.mxu1 %v14635_v43  ;;  %v2590_v22 = vpop.f32.mrf.mxu0  ;;  %2883 = vmatprep.subr.bf16.mxu0 %v14882_v45  ;;  %v587_v5 = vld [vmem:[#allocation5 + $0xbf0] sm:$0xff]  ;;  %v332_v43 = vld [vmem:[#allocation5 + $0x3f8] sm:$0xff]  ;;  %v14841_v45 = vcombine.low %v463_v32, %v467_v34  ;;  %v14699_v2 = vcombine.low %v320_v54, %v324_v55 }
 0x185   :  { %v2631_v62 = vpop.f32.mrf.mxu1  ;;  %2924 = vmatprep.subr.bf16.mxu1 %v14628_v50  ;;  %v14962_v49 = vcombine.high %v583_v41, %v587_v5  ;;  %v14708_v50 = vcombine.high %v328_v42, %v332_v43  ;;  %v14961_v56 = vcombine.low %v583_v41, %v587_v5  ;;  %v14707_v58 = vcombine.low %v328_v42, %v332_v43 }
 0x186   :  { %v14700_v22 = vcombine.high %v320_v54, %v324_v55  ;;  %v312_v62 = vld [vmem:[#allocation5 + $0x358] sm:$0xff] }
 0x187   :  { %2884 = vmatpush1.bf16.msra.mxu0 %v14881_v59  ;;  %v14954_v59 = vcombine.high %v575_v51, %v579_v52 }
 0x188   :  { %2925 = vmatpush1.bf16.msra.mxu1 %v14627_v60  ;;  %2885 = vmatprep.subr.bf16.mxu0 %v14874_v61  ;;  %v567_v60 = vld [vmem:[#allocation5 + $0xb50] sm:$0xff] }
 0x189   :  { %2926 = vmatprep.subr.bf16.mxu1 %v14620_v0  ;;  %v571_v61 = vld [vmem:[#allocation5 + $0xb70] sm:$0xff]  ;;  %v316_v0 = vld [vmem:[#allocation5 + $0x378] sm:$0xff] }
 0x18a   :  { %v14946_v3 = vcombine.high %v567_v60, %v571_v61  ;;  %v14692_v4 = vcombine.high %v312_v62, %v316_v0  ;;  %v14945_v9 = vcombine.low %v567_v60, %v571_v61  ;;  %v14691_v10 = vcombine.low %v312_v62, %v316_v0 }
 0x18b   :  { %2886 = vmatpush1.bf16.msra.mxu0 %v14873_v6  ;;  %v559_v6 = vld [vmem:[#allocation5 + $0xb10] sm:$0xff] }
 0x18c   :  { %2927 = vmatpush1.bf16.msra.mxu1 %v14619_v11  ;;  %2887 = vmatprep.subr.bf16.mxu0 %v14866_v7  ;;  %v563_v11 = vld [vmem:[#allocation5 + $0xb30] sm:$0xff]  ;;  %v304_v7 = vld [vmem:[#allocation5 + $0x318] sm:$0xff] }
 0x18d   :  { %2928 = vmatprep.subr.bf16.mxu1 %v14612_v8  ;;  %v308_v8 = vld [vmem:[#allocation5 + $0x338] sm:$0xff]  ;;  %v14938_v12 = vcombine.high %v559_v6, %v563_v11  ;;  %v14937_v23 = vcombine.low %v559_v6, %v563_v11 }
 0x18e   :  { %v14684_v13 = vcombine.high %v304_v7, %v308_v8  ;;  %v14683_v24 = vcombine.low %v304_v7, %v308_v8 }
 0x18f   :  { %2888 = vmatpush1.bf16.msra.mxu0 %v14865_v14  ;;  %v551_v14 = vld [vmem:[#allocation5 + $0xad0] sm:$0xff] }
 0x190   :  { %2929 = vmatpush1.bf16.msra.mxu1 %v14611_v17  ;;  %2889 = vmatprep.subr.bf16.mxu0 %v14858_v19  ;;  %v555_v17 = vld [vmem:[#allocation5 + $0xaf0] sm:$0xff]  ;;  %v296_v19 = vld [vmem:[#allocation5 + $0x2d8] sm:$0xff] }
 0x191   :  { %2930 = vmatprep.subr.bf16.mxu1 %v14604_v20  ;;  %v300_v20 = vld [vmem:[#allocation5 + $0x2f8] sm:$0xff]  ;;  %v14930_v25 = vcombine.high %v551_v14, %v555_v17  ;;  %v14929_v32 = vcombine.low %v551_v14, %v555_v17 }
 0x192   :  { %v14676_v26 = vcombine.high %v296_v19, %v300_v20  ;;  %v14675_v34 = vcombine.low %v296_v19, %v300_v20  ;;  %v508_v14 = vld [vmem:[#allocation5 + $0x978] sm:$0xff] }
 0x193   :  { %2890 = vmatpush1.bf16.msra.mxu0 %v14857_v27  ;;  %v543_v27 = vld [vmem:[#allocation5 + $0xa90] sm:$0xff] }
 0x194   :  { %2931 = vmatpush1.bf16.msra.mxu1 %v14603_v28  ;;  %2891 = vmatprep.subr.bf16.mxu0 %v14850_v29  ;;  %v547_v28 = vld [vmem:[#allocation5 + $0xab0] sm:$0xff]  ;;  %v288_v29 = vld [vmem:[#allocation5 + $0x298] sm:$0xff] }
 0x195   :  { %2932 = vmatprep.subr.bf16.mxu1 %v14596_v31  ;;  %v292_v31 = vld [vmem:[#allocation5 + $0x2b8] sm:$0xff]  ;;  %v14922_v35 = vcombine.high %v543_v27, %v547_v28  ;;  %v14921_v41 = vcombine.low %v543_v27, %v547_v28 }
 0x196   :  { %v14668_v36 = vcombine.high %v288_v29, %v292_v31  ;;  %v14667_v5 = vcombine.low %v288_v29, %v292_v31  ;;  %v368_v28 = vld [vmem:[#allocation5 + $0x518] sm:$0xff] }
 0x197   :  { %2892 = vmatpush1.bf16.msra.mxu0 %v14849_v37  ;;  %v535_v37 = vld [vmem:[#allocation5 + $0xa50] sm:$0xff]  ;;  %v372_v29 = vld [vmem:[#allocation5 + $0x538] sm:$0xff] }
 0x198   :  { %2933 = vmatpush1.bf16.msra.mxu1 %v14595_v38  ;;  %2893 = vmatprep.subr.bf16.mxu0 %v14842_v39  ;;  %v539_v38 = vld [vmem:[#allocation5 + $0xa70] sm:$0xff]  ;;  %v280_v39 = vld [vmem:[#allocation5 + $0x258] sm:$0xff] }
 0x199   :  { %2934 = vmatprep.subr.bf16.mxu1 %v14588_v63  ;;  %v284_v63 = vld [vmem:[#allocation5 + $0x278] sm:$0xff]  ;;  %v14914_v42 = vcombine.high %v535_v37, %v539_v38  ;;  %v14913_v51 = vcombine.low %v535_v37, %v539_v38  ;;  %v14748_v37 = vcombine.high %v368_v28, %v372_v29 }
 0x19a   :  { %v14660_v43 = vcombine.high %v280_v39, %v284_v63  ;;  %v14659_v52 = vcombine.low %v280_v39, %v284_v63  ;;  %v496_v31 = vld [vmem:[#allocation5 + $0x918] sm:$0xff] }
 0x19b   :  { %2894 = vmatpush1.bf16.msra.mxu0 %v14841_v45  ;;  %v527_v45 = vld [vmem:[#allocation5 + $0xa10] sm:$0xff]  ;;  %v360_v63 = vld [vmem:[#allocation5 + $0x4d8] sm:$0xff] }
 0x19c   :  { %2935 = vmatpush1.bf16.msra.mxu1 %v14587_v47  ;;  %2895 = vmatprep.subr.bf16.mxu0 %v14962_v49  ;;  %v531_v47 = vld [vmem:[#allocation5 + $0xa30] sm:$0xff]  ;;  %v272_v49 = vld [vmem:[#allocation5 + $0x218] sm:$0xff] }
 0x19d   :  { %2936 = vmatprep.subr.bf16.mxu1 %v14708_v50  ;;  %v276_v50 = vld [vmem:[#allocation5 + $0x238] sm:$0xff]  ;;  %v14906_v54 = vcombine.high %v527_v45, %v531_v47  ;;  %v14905_v60 = vcombine.low %v527_v45, %v531_v47 }
 0x19e   :  { %v14652_v55 = vcombine.high %v272_v49, %v276_v50  ;;  %v14651_v61 = vcombine.low %v272_v49, %v276_v50  ;;  %v352_v47 = vld [vmem:[#allocation5 + $0x498] sm:$0xff] }
 0x19f   :  { %2896 = vmatpush2.bf16.msra.mxu0 %v14961_v56  ;;  %v392_v56 = vld [vmem:[#allocation5 + $0x5d8] sm:$0xff] }
 0x1a0   :  { %2937 = vmatpush2.bf16.msra.mxu1 %v14707_v58  ;;  %2897 = vmatprep.subr.bf16.mxu0 %v14954_v59  ;;  %v396_v58 = vld [vmem:[#allocation5 + $0x5f8] sm:$0xff] }
 0x1a1   :  { %2938 = vmatprep.subr.bf16.mxu1 %v14700_v22  ;;  %v520_v59 = vld [vmem:[#allocation5 + $0x9d8] sm:$0xff]  ;;  %v14772_v62 = vcombine.high %v392_v56, %v396_v58  ;;  %v14771_v6 = vcombine.low %v392_v56, %v396_v58 }
 0x1a2   :  { %v524_v22 = vld [vmem:[#allocation5 + $0x9f8] sm:$0xff] }
 0x1a3   :  { %2898 = vmatpush2.bf16.msra.mxu0 %v14953_v1  ;;  %v14900_v0 = vcombine.high %v520_v59, %v524_v22  ;;  %v384_v1 = vld [vmem:[#allocation5 + $0x598] sm:$0xff]  ;;  %v14899_v11 = vcombine.low %v520_v59, %v524_v22 }
 0x1a4   :  { %2939 = vmatpush2.bf16.msra.mxu1 %v14699_v2  ;;  %2899 = vmatprep.subr.bf16.mxu0 %v14946_v3  ;;  %v388_v2 = vld [vmem:[#allocation5 + $0x5b8] sm:$0xff] }
 0x1a5   :  { %2940 = vmatprep.subr.bf16.mxu1 %v14692_v4  ;;  %v512_v3 = vld [vmem:[#allocation5 + $0x998] sm:$0xff]  ;;  %v14764_v7 = vcombine.high %v384_v1, %v388_v2  ;;  %v14763_v20 = vcombine.low %v384_v1, %v388_v2 }
 0x1a6   :  { %v516_v4 = vld [vmem:[#allocation5 + $0x9b8] sm:$0xff] }
 0x1a7   :  { %2900 = vmatpush2.bf16.msra.mxu0 %v14945_v9  ;;  %v14892_v8 = vcombine.high %v512_v3, %v516_v4  ;;  %v376_v9 = vld [vmem:[#allocation5 + $0x558] sm:$0xff] }
 0x1a8   :  { %2941 = vmatpush2.bf16.msra.mxu1 %v14691_v10  ;;  %2901 = vmatprep.subr.bf16.mxu0 %v14938_v12  ;;  %v380_v10 = vld [vmem:[#allocation5 + $0x578] sm:$0xff] }
 0x1a9   :  { %2942 = vmatprep.subr.bf16.mxu1 %v14684_v13  ;;  %v504_v13 = vld [vmem:[#allocation5 + $0x958] sm:$0xff] }
 0x1aa   :  { %v14884_v27 = vcombine.high %v504_v13, %v508_v14  ;;  %v356_v49 = vld [vmem:[#allocation5 + $0x4b8] sm:$0xff] }
 0x1ab   :  { %2902 = vmatpush2.bf16.msra.mxu0 %v14937_v23  ;;  %v480_v50 = vld [vmem:[#allocation5 + $0x898] sm:$0xff] }
 0x1ac   :  { %2943 = vmatpush2.bf16.msra.mxu1 %v14683_v24  ;;  %2903 = vmatprep.subr.bf16.mxu0 %v14930_v25  ;;  %v14891_v24 = vcombine.low %v512_v3, %v516_v4  ;;  %v14756_v25 = vcombine.high %v376_v9, %v380_v10  ;;  %v344_v58 = vld [vmem:[#allocation5 + $0x458] sm:$0xff] }
 0x1ad   :  { %2944 = vmatprep.subr.bf16.mxu1 %v14676_v26  ;;  %v348_v59 = vld [vmem:[#allocation5 + $0x478] sm:$0xff] }
 0x1ae   :  { %v472_v22 = vld [vmem:[#allocation5 + $0x858] sm:$0xff] }
 0x1af   :  { %2904 = vmatpush2.bf16.msra.mxu0 %v14929_v32  ;;  %v500_v32 = vld [vmem:[#allocation5 + $0x938] sm:$0xff] }
 0x1b0   :  { %2945 = vmatpush2.bf16.msra.mxu1 %v14675_v34  ;;  %2905 = vmatprep.subr.bf16.mxu0 %v14922_v35  ;;  %v14755_v34 = vcombine.low %v376_v9, %v380_v10  ;;  %v14876_v39 = vcombine.high %v496_v31, %v500_v32  ;;  %v336_v2 = vld [vmem:[#allocation5 + $0x418] sm:$0xff] }
 0x1b1   :  { %2946 = vmatprep.subr.bf16.mxu1 %v14668_v36  ;;  %v14883_v36 = vcombine.low %v504_v13, %v508_v14  ;;  %v340_v3 = vld [vmem:[#allocation5 + $0x438] sm:$0xff] }
 0x1b2   :  { %v464_v4 = vld [vmem:[#allocation5 + $0x818] sm:$0xff] }
 0x1b3   :  { %2906 = vmatpush2.bf16.msra.mxu0 %v14921_v41  ;;  %v364_v41 = vld [vmem:[#allocation5 + $0x4f8] sm:$0xff] }
 0x1b4   :  { %2947 = vmatpush2.bf16.msra.mxu1 %v14667_v5  ;;  %2907 = vmatprep.subr.bf16.mxu0 %v14914_v42  ;;  %v488_v5 = vld [vmem:[#allocation5 + $0x8d8] sm:$0xff]  ;;  %v14747_v42 = vcombine.low %v368_v28, %v372_v29 }
 0x1b5   :  { %2948 = vmatprep.subr.bf16.mxu1 %v14660_v43  ;;  %v14740_v43 = vcombine.high %v360_v63, %v364_v41  ;;  %v456_v10 = vld [vmem:[#allocation5 + $0x7d8] sm:$0xff] }
 0x1b6   :  { %v584_v13 = vld [vmem:[#allocation5 + $0xbd8] sm:$0xff] }
 0x1b7   :  { %2908 = vmatpush2.bf16.msra.mxu0 %v14913_v51  ;;  %v484_v51 = vld [vmem:[#allocation5 + $0x8b8] sm:$0xff] }
 0x1b8   :  { %2949 = vmatpush2.bf16.msra.mxu1 %v14659_v52  ;;  %2909 = vmatprep.subr.bf16.mxu0 %v14906_v54  ;;  %v14739_v52 = vcombine.low %v360_v63, %v364_v41  ;;  %v14860_v56 = vcombine.high %v480_v50, %v484_v51  ;;  %v588_v14 = vld [vmem:[#allocation5 + $0xbf8] sm:$0xff] }
 0x1b9   :  { %2950 = vmatprep.subr.bf16.mxu1 %v14652_v55  ;;  %v14732_v55 = vcombine.high %v352_v47, %v356_v49  ;;  %v448_v28 = vld [vmem:[#allocation5 + $0x798] sm:$0xff] }
 0x1ba   :  { %v452_v29 = vld [vmem:[#allocation5 + $0x7b8] sm:$0xff] }
 0x1bb   :  { %2910 = vmatpush2.bf16.msra.mxu0 %v14905_v60  ;;  %v476_v60 = vld [vmem:[#allocation5 + $0x878] sm:$0xff]  ;;  %v14827_v63 = vcombine.low %v448_v28, %v452_v29 }
 0x1bc   :  { %2951 = vmatpush2.bf16.msra.mxu1 %v14651_v61  ;;  %2961 = vmatprep.subr.bf16.mxu0 %v14772_v62  ;;  %v14731_v61 = vcombine.low %v352_v47, %v356_v49  ;;  %v14859_v62 = vcombine.low %v480_v50, %v484_v51  ;;  %v14852_v1 = vcombine.high %v472_v22, %v476_v60 }
 0x1bd   :  { %3002 = vmatprep.subr.bf16.mxu1 %v14900_v0  ;;  %v14724_v0 = vcombine.high %v344_v58, %v348_v59 }
 0x1be   :  { %v2667_v12 = vpop.f32.mrf.mxu0  ;;  %2912 = vmatmul.mubr.bf16.vlgmr.msra.gmra.mxu0 %v16972_v48 }
 0x1bf   :  { %v17004_v17 = vadd.f32 %v2667_v12, %v16996_v46  ;;  %v17006_v19 = vpop.f32.mrf.mxu1  ;;  %2953 = vmatmul.mubr.bf16.vlgmr.msra.gmra.mxu1 %v16958_v30  ;;  %2962 = vmatpush1.bf16.msra.mxu0 %v14771_v6  ;;  %v468_v6 = vld [vmem:[#allocation5 + $0x838] sm:$0xff] }
 0x1c0   :  { %3003 = vmatpush1.bf16.msra.mxu1 %v14899_v11  ;;  %v17009_v23 = vpop.f32.mrf.mxu0  ;;  %2963 = vmatprep.subr.bf16.mxu0 %v14764_v7  ;;  %v14723_v11 = vcombine.low %v344_v58, %v348_v59  ;;  %v14851_v7 = vcombine.low %v472_v22, %v476_v60  ;;  %v14844_v9 = vcombine.high %v464_v4, %v468_v6  ;;  %v460_v12 = vld [vmem:[#allocation5 + $0x7f8] sm:$0xff] }
 0x1c1   :  { %v17011_v26 = vpop.f32.mrf.mxu1  ;;  %3004 = vmatprep.subr.bf16.mxu1 %v14892_v8  ;;  %2993 = vmatprep.mubr.bf16.mxu0 %v16949_v16  ;;  %v492_v16 = vld [vmem:[#allocation5 + $0x8f8] sm:$0xff]  ;;  %v14716_v8 = vcombine.high %v336_v2, %v340_v3 }
 0x1c2   :  { %v2671_v46 = vpop.f32.mrf.mxu0  ;;  %3034 = vmatprep.mubr.bf16.mxu1 %v16964_v40  ;;  %v14875_v40 = vcombine.low %v496_v31, %v500_v32  ;;  %v14868_v45 = vcombine.high %v488_v5, %v492_v16  ;;  %v14867_v54 = vcombine.low %v488_v5, %v492_v16  ;;  %v580_v31 = vld [vmem:[#allocation5 + $0xbb8] sm:$0xff]  ;;  %v14835_v32 = vcombine.low %v456_v10, %v460_v12 }
 0x1c3   :  { %v2712_v30 = vpop.f32.mrf.mxu1  ;;  %2964 = vmatpush1.bf16.msra.mxu0 %v14763_v20  ;;  %v14715_v20 = vcombine.low %v336_v2, %v340_v3  ;;  %v576_v46 = vld [vmem:[#allocation5 + $0xb98] sm:$0xff] }
 0x1c4   :  { %3005 = vmatpush1.bf16.msra.mxu1 %v14891_v24  ;;  %v2672_v35 = vpop.f32.mrf.mxu0  ;;  %2965 = vmatprep.subr.bf16.mxu0 %v14756_v25  ;;  %v14843_v24 = vcombine.low %v464_v4, %v468_v6  ;;  %v14836_v25 = vcombine.high %v456_v10, %v460_v12  ;;  %v14963_v30 = vcombine.low %v584_v13, %v588_v14 }
 0x1c5   :  { %v2713_v38 = vpop.f32.mrf.mxu1  ;;  %3006 = vmatprep.subr.bf16.mxu1 %v14884_v27  ;;  %v14964_v27 = vcombine.high %v584_v13, %v588_v14  ;;  %v14956_v35 = vcombine.high %v576_v46, %v580_v31  ;;  %v14955_v41 = vcombine.low %v576_v46, %v580_v31 }
 0x1c6   :  { %v568_v38 = vld [vmem:[#allocation5 + $0xb58] sm:$0xff] }
 0x1c7   :  { %2966 = vmatpush1.bf16.msra.mxu0 %v14755_v34  ;;  %v14828_v34 = vcombine.high %v448_v28, %v452_v29  ;;  %v532_v28 = vld [vmem:[#allocation5 + $0xa38] sm:$0xff] }
 0x1c8   :  { %3007 = vmatpush1.bf16.msra.mxu1 %v14883_v36  ;;  %2967 = vmatprep.subr.bf16.mxu0 %v14748_v37  ;;  %v440_v36 = vld [vmem:[#allocation5 + $0x758] sm:$0xff] }
 0x1c9   :  { %3008 = vmatprep.subr.bf16.mxu1 %v14876_v39  ;;  %v444_v37 = vld [vmem:[#allocation5 + $0x778] sm:$0xff] }
 0x1ca   :  { %v572_v39 = vld [vmem:[#allocation5 + $0xb78] sm:$0xff]  ;;  %v14820_v5 = vcombine.high %v440_v36, %v444_v37  ;;  %v14819_v47 = vcombine.low %v440_v36, %v444_v37  ;;  %v3251_v36 = vld [vmem:[#allocation8 + $0x5c0] sm:$0xff] }
 0x1cb   :  { %2968 = vmatpush1.bf16.msra.mxu0 %v14747_v42  ;;  %v14948_v16 = vcombine.high %v568_v38, %v572_v39  ;;  %v432_v42 = vld [vmem:[#allocation5 + $0x718] sm:$0xff]  ;;  %v14947_v49 = vcombine.low %v568_v38, %v572_v39  ;;  %v3255_v37 = vld [vmem:[#allocation8 + $0x5e0] sm:$0xff]  ;;  %v17018_v38 = vsub.s32 3, %v16931_v44 }
 0x1cc   :  { %3009 = vmatpush1.bf16.msra.mxu1 %v14875_v40  ;;  %2969 = vmatprep.subr.bf16.mxu0 %v14740_v43  ;;  %v436_v40 = vld [vmem:[#allocation5 + $0x738] sm:$0xff] }
 0x1cd   :  { %3010 = vmatprep.subr.bf16.mxu1 %v14868_v45  ;;  %v560_v43 = vld [vmem:[#allocation5 + $0xb18] sm:$0xff]  ;;  %v14812_v50 = vcombine.high %v432_v42, %v436_v40  ;;  %v14811_v58 = vcombine.low %v432_v42, %v436_v40  ;;  %v3243_v42 = vld [vmem:[#allocation8 + $0x580] sm:$0xff] }
 0x1ce   :  { %v564_v45 = vld [vmem:[#allocation5 + $0xb38] sm:$0xff]  ;;  %v3247_v40 = vld [vmem:[#allocation8 + $0x5a0] sm:$0xff] }
 0x1cf   :  { %2970 = vmatpush1.bf16.msra.mxu0 %v14739_v52  ;;  %v14940_v51 = vcombine.high %v560_v43, %v564_v45  ;;  %v424_v52 = vld [vmem:[#allocation5 + $0x6d8] sm:$0xff]  ;;  %v14939_v59 = vcombine.low %v560_v43, %v564_v45  ;;  %v606_v43 = vrot.slane %v16985_v18, %v17018_v38 }
 0x1d0   :  { %3011 = vmatpush1.bf16.msra.mxu1 %v14867_v54  ;;  %2971 = vmatprep.subr.bf16.mxu0 %v14732_v55  ;;  %v428_v54 = vld [vmem:[#allocation5 + $0x6f8] sm:$0xff] }
 0x1d1   :  { %3012 = vmatprep.subr.bf16.mxu1 %v14860_v56  ;;  %v552_v55 = vld [vmem:[#allocation5 + $0xad8] sm:$0xff]  ;;  %v14804_v22 = vcombine.high %v424_v52, %v428_v54  ;;  %v14803_v2 = vcombine.low %v424_v52, %v428_v54  ;;  %v3111_v52 = vld [vmem:[#allocation8 + $0x160] sm:$0xff]  ;;  %v2711_v18 = vadd.f32 %v17011_v26, %v606_v43 }
 0x1d2   :  { %v556_v56 = vld [vmem:[#allocation5 + $0xaf8] sm:$0xff] }
 0x1d3   :  { %2972 = vmatpush1.bf16.msra.mxu0 %v14731_v61  ;;  %v14932_v60 = vcombine.high %v552_v55, %v556_v56  ;;  %v416_v61 = vld [vmem:[#allocation5 + $0x698] sm:$0xff]  ;;  %v14931_v3 = vcombine.low %v552_v55, %v556_v56  ;;  %v3235_v56 = vld [vmem:[#allocation8 + $0x540] sm:$0xff] }
 0x1d4   :  { %3013 = vmatpush1.bf16.msra.mxu1 %v14859_v62  ;;  %2973 = vmatprep.subr.bf16.mxu0 %v14724_v0  ;;  %v420_v62 = vld [vmem:[#allocation5 + $0x6b8] sm:$0xff] }
 0x1d5   :  { %3014 = vmatprep.subr.bf16.mxu1 %v14852_v1  ;;  %v544_v0 = vld [vmem:[#allocation5 + $0xa98] sm:$0xff]  ;;  %v14796_v4 = vcombine.high %v416_v61, %v420_v62  ;;  %v14795_v10 = vcombine.low %v416_v61, %v420_v62  ;;  %v15141_v61 = vcombine.low %v3243_v42, %v3247_v40 }
 0x1d6   :  { %v548_v1 = vld [vmem:[#allocation5 + $0xab8] sm:$0xff] }
 0x1d7   :  { %2974 = vmatpush1.bf16.msra.mxu0 %v14723_v11  ;;  %v14924_v6 = vcombine.high %v544_v0, %v548_v1  ;;  %v408_v11 = vld [vmem:[#allocation5 + $0x658] sm:$0xff]  ;;  %v14923_v12 = vcombine.low %v544_v0, %v548_v1 }
 0x1d8   :  { %3015 = vmatpush1.bf16.msra.mxu1 %v14851_v7  ;;  %2975 = vmatprep.subr.bf16.mxu0 %v14716_v8  ;;  %v412_v7 = vld [vmem:[#allocation5 + $0x678] sm:$0xff] }
 0x1d9   :  { %3016 = vmatprep.subr.bf16.mxu1 %v14844_v9  ;;  %v536_v8 = vld [vmem:[#allocation5 + $0xa58] sm:$0xff]  ;;  %v14788_v13 = vcombine.high %v408_v11, %v412_v7  ;;  %v14787_v29 = vcombine.low %v408_v11, %v412_v7 }
 0x1da   :  { %v540_v9 = vld [vmem:[#allocation5 + $0xa78] sm:$0xff] }
 0x1db   :  { %2976 = vmatpush1.bf16.msra.mxu0 %v14715_v20  ;;  %v14916_v14 = vcombine.high %v536_v8, %v540_v9  ;;  %v400_v20 = vld [vmem:[#allocation5 + $0x618] sm:$0xff]  ;;  %v14915_v46 = vcombine.low %v536_v8, %v540_v9 }
 0x1dc   :  { %3017 = vmatpush1.bf16.msra.mxu1 %v14843_v24  ;;  %2977 = vmatprep.subr.bf16.mxu0 %v14836_v25  ;;  %v404_v24 = vld [vmem:[#allocation5 + $0x638] sm:$0xff]  ;;  %v2670_v25 = vadd.f32 %v17009_v23, %v17000_v57 }
 0x1dd   :  { %3018 = vmatprep.subr.bf16.mxu1 %v14964_v27  ;;  %v528_v27 = vld [vmem:[#allocation5 + $0xa18] sm:$0xff]  ;;  %v14780_v31 = vcombine.high %v400_v20, %v404_v24  ;;  %v14779_v57 = vcombine.low %v400_v20, %v404_v24  ;;  %v3091_v20 = vld [vmem:[#allocation8 + $0xc0] sm:$0xff] }
 0x1de   :  { %v14907_v23 = vcombine.low %v528_v27, %v532_v28  ;;  %v3095_v24 = vld [vmem:[#allocation8 + $0xe0] sm:$0xff] }
 0x1df   :  { %2978 = vmatpush2.bf16.msra.mxu0 %v14835_v32  ;;  %v14908_v32 = vcombine.high %v528_v27, %v532_v28  ;;  %v3223_v27 = vld [vmem:[#allocation8 + $0x4e0] sm:$0xff] }
 0x1e0   :  { %3019 = vmatpush2.bf16.msra.mxu1 %v14963_v30  ;;  %2979 = vmatprep.subr.bf16.mxu0 %v14828_v34  ;;  %v3123_v30 = vld [vmem:[#allocation8 + $0x1c0] sm:$0xff] }
 0x1e1   :  { %3020 = vmatprep.subr.bf16.mxu1 %v14956_v35  ;;  %v3127_v34 = vld [vmem:[#allocation8 + $0x1e0] sm:$0xff]  ;;  %v3044_v35 = vmul.f32 0.2, %v2670_v25 }
 0x1e2   :  { %v15022_v39 = vcombine.high %v3123_v30, %v3127_v34  ;;  %v15021_v45 = vcombine.low %v3123_v30, %v3127_v34  ;;  %v3083_v34 = vld [vmem:[#allocation8 + $0x80] sm:$0xff] }
 0x1e3   :  { %2980 = vmatpush2.bf16.msra.mxu0 %v14827_v63  ;;  %v15150_v63 = vcombine.high %v3251_v36, %v3255_v37 }
 0x1e4   :  { %3021 = vmatpush2.bf16.msra.mxu1 %v14955_v41  ;;  %2981 = vmatprep.subr.bf16.mxu0 %v14820_v5  ;;  %v3115_v41 = vld [vmem:[#allocation8 + $0x180] sm:$0xff]  ;;  %v3052_v5 = vmax.f32 %v2670_v25, %v3044_v35 }
 0x1e5   :  { %3022 = vmatprep.subr.bf16.mxu1 %v14948_v16  ;;  %v3119_v16 = vld [vmem:[#allocation8 + $0x1a0] sm:$0xff] }
 0x1e6   :  { %v17022_v54 = vpack.c.bf16 %v3052_v5, %v3052_v5  ;;  %v3219_v25 = vld [vmem:[#allocation8 + $0x4c0] sm:$0xff] }
 0x1e7   :  { %2982 = vmatpush2.bf16.msra.mxu0 %v14819_v47  ;;  %v15149_v47 = vcombine.low %v3251_v36, %v3255_v37  ;;  %v15118_v30 = vcombine.high %v3219_v25, %v3223_v27  ;;  %v3087_v35 = vld [vmem:[#allocation8 + $0xa0] sm:$0xff] }
 0x1e8   :  { %3023 = vmatpush2.bf16.msra.mxu1 %v14947_v49  ;;  %2983 = vmatprep.subr.bf16.mxu0 %v14812_v50  ;;  %v15014_v49 = vcombine.high %v3115_v41, %v3119_v16  ;;  %v15142_v50 = vcombine.high %v3243_v42, %v3247_v40  ;;  %v3211_v36 = vld [vmem:[#allocation8 + $0x480] sm:$0xff]  ;;  %v14981_v40 = vcombine.low %v3083_v34, %v3087_v35 }
 0x1e9   :  { %3024 = vmatprep.subr.bf16.mxu1 %v14940_v51  ;;  %v3107_v51 = vld [vmem:[#allocation8 + $0x140] sm:$0xff] }
 0x1ea   :  { %v15006_v62 = vcombine.high %v3107_v51, %v3111_v52  ;;  %v15005_v7 = vcombine.low %v3107_v51, %v3111_v52  ;;  %v3215_v37 = vld [vmem:[#allocation8 + $0x4a0] sm:$0xff] }
 0x1eb   :  { %2984 = vmatpush2.bf16.msra.mxu0 %v14811_v58  ;;  %v3239_v58 = vld [vmem:[#allocation8 + $0x560] sm:$0xff]  ;;  %v15109_v43 = vcombine.low %v3211_v36, %v3215_v37 }
 0x1ec   :  { %3025 = vmatpush2.bf16.msra.mxu1 %v14939_v59  ;;  %2985 = vmatprep.subr.bf16.mxu0 %v14804_v22  ;;  %v15013_v22 = vcombine.low %v3115_v41, %v3119_v16  ;;  %v15133_v9 = vcombine.low %v3235_v56, %v3239_v58  ;;  %v3075_v41 = vld [vmem:[#allocation8 + $0x40] sm:$0xff] }
 0x1ed   :  { %3026 = vmatprep.subr.bf16.mxu1 %v14932_v60  ;;  %v3079_v5 = vld [vmem:[#allocation8 + $0x60] sm:$0xff] }
 0x1ee   :  { %v3203_v16 = vld [vmem:[#allocation8 + $0x440] sm:$0xff] }
 0x1ef   :  { %2986 = vmatpush2.bf16.msra.mxu0 %v14803_v2  ;;  %v3099_v2 = vld [vmem:[#allocation8 + $0x100] sm:$0xff] }
 0x1f0   :  { %3027 = vmatpush2.bf16.msra.mxu1 %v14931_v3  ;;  %2987 = vmatprep.subr.bf16.mxu0 %v14796_v4  ;;  %v3103_v3 = vld [vmem:[#allocation8 + $0x120] sm:$0xff] }
 0x1f1   :  { %3028 = vmatprep.subr.bf16.mxu1 %v14924_v6  ;;  %v3227_v4 = vld [vmem:[#allocation8 + $0x500] sm:$0xff] }
 0x1f2   :  { %v3231_v6 = vld [vmem:[#allocation8 + $0x520] sm:$0xff] }
 0x1f3   :  { %2988 = vmatpush2.bf16.msra.mxu0 %v14795_v10  ;;  %v14998_v10 = vcombine.high %v3099_v2, %v3103_v3  ;;  %v3207_v42 = vld [vmem:[#allocation8 + $0x460] sm:$0xff] }
 0x1f4   :  { %3029 = vmatpush2.bf16.msra.mxu1 %v14923_v12  ;;  %2989 = vmatprep.subr.bf16.mxu0 %v14788_v13  ;;  %v3195_v51 = vld [vmem:[#allocation8 + $0x400] sm:$0xff] }
 0x1f5   :  { %3030 = vmatprep.subr.bf16.mxu1 %v14916_v14  ;;  %v15126_v14 = vcombine.high %v3227_v4, %v3231_v6  ;;  %v3199_v52 = vld [vmem:[#allocation8 + $0x420] sm:$0xff] }
 0x1f7   :  { %2990 = vmatpush2.bf16.msra.mxu0 %v14787_v29  ;;  %v14997_v29 = vcombine.low %v3099_v2, %v3103_v3 }
 0x1f8   :  { %3031 = vmatpush2.bf16.msra.mxu1 %v14915_v46  ;;  %2991 = vmatprep.subr.bf16.mxu0 %v14780_v31  ;;  %v15125_v46 = vcombine.low %v3227_v4, %v3231_v6  ;;  %v14990_v31 = vcombine.high %v3091_v20, %v3095_v24  ;;  %v3183_v4 = vld [vmem:[#allocation8 + $0x3a0] sm:$0xff] }
 0x1f9   :  { %3032 = vmatprep.subr.bf16.mxu1 %v14908_v32  ;;  %v3307_v6 = vld [vmem:[#allocation8 + $0x780] sm:$0xff] }
 0x1fb   :  { %2992 = vmatpush2.bf16.msra.mxu0 %v14779_v57  ;;  %v14989_v57 = vcombine.low %v3091_v20, %v3095_v24 }
 0x1fc   :  { %3033 = vmatpush2.bf16.msra.mxu1 %v14907_v23  ;;  %6181 = vmatprep.subr.bf16.mxu0 %v15022_v39  ;;  %v15117_v23 = vcombine.low %v3219_v25, %v3223_v27  ;;  %v14982_v39 = vcombine.high %v3083_v34, %v3087_v35 }
 0x1fd   :  { %6222 = vmatprep.subr.bf16.mxu1 %v15150_v63  ;;  %v15110_v63 = vcombine.high %v3211_v36, %v3215_v37 }
 0x1fe   :  { %v17024_v55 = vpop.f32.mrf.mxu0  ;;  %2994 = vmatmul.mubr.bf16.vlgmr.msra.gmra.mxu0 %v16962_v33  ;;  %v15134_v33 = vcombine.high %v3235_v56, %v3239_v58  ;;  %v14973_v56 = vcombine.low %v3075_v41, %v3079_v5  ;;  %v15101_v58 = vcombine.low %v3203_v16, %v3207_v42 }
 0x1ff   :  { %v17028_v59 = vpop.f32.mrf.mxu1  ;;  %3035 = vmatmul.mubr.bf16.vlgmr.msra.gmra.mxu1 %v16972_v48  ;;  %6182 = vmatpush1.bf16.msra.mxu0 %v15021_v45  ;;  %v14974_v45 = vcombine.high %v3075_v41, %v3079_v5  ;;  %v17038_v41 = vld [vmem:[#allocation7] sm:$0xff] }
 0x200   :  { %6213 = vmatprep.mubr.bf16.mxu0 %v17022_v54  ;;  %6223 = vmatpush1.bf16.msra.mxu1 %v15149_v47  ;;  %v2751_v60 = vpop.f32.mrf.mxu0  ;;  %v15102_v47 = vcombine.high %v3203_v16, %v3207_v42 }
 0x201   :  { %v2752_v0 = vadd.f32 %v2751_v60, %v2711_v18  ;;  %v2792_v1 = vpop.f32.mrf.mxu1  ;;  %6183 = vmatprep.subr.bf16.mxu0 %v15014_v49  ;;  %6224 = vmatprep.subr.bf16.mxu1 %v15142_v50  ;;  %v3067_v49 = vld [vmem:[#allocation8] sm:$0xff] }
 0x202   :  { %v2753_v26 = vpop.f32.mrf.mxu0  ;;  %v3071_v50 = vld [vmem:[#allocation8 + $0x20] sm:$0xff] }
 0x203   :  { %v2793_v11 = vadd.f32 %v2792_v1, %v2752_v0  ;;  %v2794_v48 = vpop.f32.mrf.mxu1  ;;  %6184 = vmatpush1.bf16.msra.mxu0 %v15013_v22  ;;  %v14966_v18 = vcombine.high %v3067_v49, %v3071_v50  ;;  %v15094_v22 = vcombine.high %v3195_v51, %v3199_v52  ;;  %v3187_v60 = vld [vmem:[#allocation8 + $0x3c0] sm:$0xff]  ;;  %v14965_v1 = vcombine.low %v3067_v49, %v3071_v50 }
 0x204   :  { %6225 = vmatpush1.bf16.msra.mxu1 %v15141_v61  ;;  %v2754_v8 = vpop.f32.mrf.mxu0  ;;  %6185 = vmatprep.subr.bf16.mxu0 %v15006_v62  ;;  %v3191_v61 = vld [vmem:[#allocation8 + $0x3e0] sm:$0xff] }
 0x205   :  { %v3046_v12 = vmul.f32 0.2, %v2793_v11  ;;  %v2795_v13 = vpop.f32.mrf.mxu1  ;;  %6226 = vmatprep.subr.bf16.mxu1 %v15134_v33  ;;  %v3315_v62 = vld [vmem:[#allocation8 + $0x7c0] sm:$0xff]  ;;  %v15093_v33 = vcombine.low %v3195_v51, %v3199_v52  ;;  %v15086_v2 = vcombine.high %v3187_v60, %v3191_v61  ;;  %v15085_v48 = vcombine.low %v3187_v60, %v3191_v61 }
 0x206   :  { %v3319_v0 = vld [vmem:[#allocation8 + $0x7e0] sm:$0xff] }
 0x207   :  { %v3054_v28 = vmax.f32 %v2793_v11, %v3046_v12  ;;  %6186 = vmatpush1.bf16.msra.mxu0 %v15005_v7  ;;  %v15214_v3 = vcombine.high %v3315_v62, %v3319_v0  ;;  %v3179_v26 = vld [vmem:[#allocation8 + $0x380] sm:$0xff]  ;;  %v15213_v7 = vcombine.low %v3315_v62, %v3319_v0 }
 0x208   :  { %6227 = vmatpush1.bf16.msra.mxu1 %v15133_v9  ;;  %6187 = vmatprep.subr.bf16.mxu0 %v14998_v10  ;;  %v3311_v11 = vld [vmem:[#allocation8 + $0x7a0] sm:$0xff]  ;;  %v15078_v8 = vcombine.high %v3179_v26, %v3183_v4  ;;  %v15077_v20 = vcombine.low %v3179_v26, %v3183_v4 }
 0x209   :  { %v17032_v32 = vpack.c.bf16 %v3054_v28, %v3054_v28  ;;  %6228 = vmatprep.subr.bf16.mxu1 %v15126_v14  ;;  %v15206_v9 = vcombine.high %v3307_v6, %v3311_v11  ;;  %v3171_v10 = vld [vmem:[#allocation8 + $0x340] sm:$0xff]  ;;  %v15205_v24 = vcombine.low %v3307_v6, %v3311_v11 }
 0x20a   :  { %v3175_v12 = vld [vmem:[#allocation8 + $0x360] sm:$0xff] }
 0x20b   :  { %6188 = vmatpush1.bf16.msra.mxu0 %v14997_v29  ;;  %6254 = vmatprep.mubr.bf16.mxu1 %v17032_v32  ;;  %v3299_v13 = vld [vmem:[#allocation8 + $0x740] sm:$0xff]  ;;  %v15070_v25 = vcombine.high %v3171_v10, %v3175_v12  ;;  %v15069_v34 = vcombine.low %v3171_v10, %v3175_v12 }
 0x20c   :  { %6229 = vmatpush1.bf16.msra.mxu1 %v15125_v46  ;;  %6189 = vmatprep.subr.bf16.mxu0 %v14990_v31  ;;  %v3303_v14 = vld [vmem:[#allocation8 + $0x760] sm:$0xff] }
 0x20d   :  { %6230 = vmatprep.subr.bf16.mxu1 %v15118_v30  ;;  %v15198_v27 = vcombine.high %v3299_v13, %v3303_v14  ;;  %v3163_v28 = vld [vmem:[#allocation8 + $0x300] sm:$0xff]  ;;  %v17036_v30 = vsub.s32 2, %v16931_v44  ;;  %v15197_v35 = vcombine.low %v3299_v13, %v3303_v14 }
 0x20e   :  { %v3167_v29 = vld [vmem:[#allocation8 + $0x320] sm:$0xff] }
 0x20f   :  { %6190 = vmatpush1.bf16.msra.mxu0 %v14989_v57  ;;  %v3291_v46 = vld [vmem:[#allocation8 + $0x700] sm:$0xff]  ;;  %v15062_v36 = vcombine.high %v3163_v28, %v3167_v29  ;;  %v602_v5 = vrot.slane %v17038_v41, %v17036_v30  ;;  %v15061_v16 = vcombine.low %v3163_v28, %v3167_v29 }
 0x210   :  { %6231 = vmatpush1.bf16.msra.mxu1 %v15117_v23  ;;  %6191 = vmatprep.subr.bf16.mxu0 %v14982_v39  ;;  %v3295_v31 = vld [vmem:[#allocation8 + $0x720] sm:$0xff] }
 0x211   :  { %6232 = vmatprep.subr.bf16.mxu1 %v15110_v63  ;;  %v15190_v37 = vcombine.high %v3291_v46, %v3295_v31  ;;  %v3155_v57 = vld [vmem:[#allocation8 + $0x2c0] sm:$0xff]  ;;  %v15189_v42 = vcombine.low %v3291_v46, %v3295_v31  ;;  %v2709_v51 = vadd.f32 %v17006_v19, %v602_v5 }
 0x212   :  { %v3159_v23 = vld [vmem:[#allocation8 + $0x2e0] sm:$0xff] }
 0x213   :  { %6192 = vmatpush1.bf16.msra.mxu0 %v14981_v40  ;;  %v3283_v39 = vld [vmem:[#allocation8 + $0x6c0] sm:$0xff]  ;;  %v15054_v40 = vcombine.high %v3155_v57, %v3159_v23  ;;  %v15053_v52 = vcombine.low %v3155_v57, %v3159_v23 }
 0x214   :  { %6233 = vmatpush1.bf16.msra.mxu1 %v15109_v43  ;;  %6193 = vmatprep.subr.bf16.mxu0 %v14974_v45  ;;  %v3287_v63 = vld [vmem:[#allocation8 + $0x6e0] sm:$0xff] }
 0x215   :  { %6234 = vmatprep.subr.bf16.mxu1 %v15102_v47  ;;  %v15182_v43 = vcombine.high %v3283_v39, %v3287_v63  ;;  %v3147_v45 = vld [vmem:[#allocation8 + $0x280] sm:$0xff] }
 0x216   :  { %v3151_v47 = vld [vmem:[#allocation8 + $0x2a0] sm:$0xff] }
 0x217   :  { %6194 = vmatpush1.bf16.msra.mxu0 %v14973_v56  ;;  %v3275_v49 = vld [vmem:[#allocation8 + $0x680] sm:$0xff]  ;;  %v15181_v56 = vcombine.low %v3283_v39, %v3287_v63 }
 0x218   :  { %6235 = vmatpush1.bf16.msra.mxu1 %v15101_v58  ;;  %6195 = vmatprep.subr.bf16.mxu0 %v14966_v18  ;;  %v3279_v50 = vld [vmem:[#allocation8 + $0x6a0] sm:$0xff]  ;;  %v15046_v58 = vcombine.high %v3147_v45, %v3151_v47  ;;  %v2750_v18 = vadd.f32 %v17024_v55, %v2709_v51 }
 0x219   :  { %6236 = vmatprep.subr.bf16.mxu1 %v15094_v22  ;;  %v15174_v22 = vcombine.high %v3275_v49, %v3279_v50  ;;  %v3139_v60 = vld [vmem:[#allocation8 + $0x240] sm:$0xff] }
 0x21a   :  { %v3143_v61 = vld [vmem:[#allocation8 + $0x260] sm:$0xff] }
 0x21b   :  { %6196 = vmatpush1.bf16.msra.mxu0 %v14965_v1  ;;  %v3267_v62 = vld [vmem:[#allocation8 + $0x640] sm:$0xff]  ;;  %v15045_v1 = vcombine.low %v3147_v45, %v3151_v47  ;;  %v15038_v19 = vcombine.high %v3139_v60, %v3143_v61  ;;  %v15037_v11 = vcombine.low %v3139_v60, %v3143_v61 }
 0x21c   :  { %6237 = vmatpush1.bf16.msra.mxu1 %v15093_v33  ;;  %6197 = vmatprep.subr.bf16.mxu0 %v15086_v2  ;;  %v3271_v0 = vld [vmem:[#allocation8 + $0x660] sm:$0xff]  ;;  %v15173_v33 = vcombine.low %v3275_v49, %v3279_v50  ;;  %v2791_v2 = vadd.f32 %v17028_v59, %v2750_v18 }
 0x21d   :  { %6238 = vmatprep.subr.bf16.mxu1 %v15214_v3  ;;  %v15166_v3 = vcombine.high %v3267_v62, %v3271_v0  ;;  %v3131_v26 = vld [vmem:[#allocation8 + $0x200] sm:$0xff] }
 0x21e   :  { %v3135_v4 = vld [vmem:[#allocation8 + $0x220] sm:$0xff] }
 0x21f   :  { %6198 = vmatpush2.bf16.msra.mxu0 %v15085_v48  ;;  %v3259_v6 = vld [vmem:[#allocation8 + $0x600] sm:$0xff]  ;;  %v3043_v48 = vmul.f32 0.2, %v17004_v17 }
 0x220   :  { %6239 = vmatpush2.bf16.msra.mxu1 %v15213_v7  ;;  %6199 = vmatprep.subr.bf16.mxu0 %v15078_v8  ;;  %v3263_v55 = vld [vmem:[#allocation8 + $0x620] sm:$0xff]  ;;  %v15165_v7 = vcombine.low %v3267_v62, %v3271_v0  ;;  %v15030_v8 = vcombine.high %v3131_v26, %v3135_v4 }
 0x221   :  { %6240 = vmatprep.subr.bf16.mxu1 %v15206_v9  ;;  %v3045_v9 = vmul.f32 0.2, %v2791_v2  ;;  %v15158_v10 = vcombine.high %v3259_v6, %v3263_v55  ;;  %v3379_v12 = vld [vmem:[#allocation8 + $0x9c0] sm:$0xff] }
 0x222   :  { %v3383_v13 = vld [vmem:[#allocation8 + $0x9e0] sm:$0xff] }
 0x223   :  { %6200 = vmatpush2.bf16.msra.mxu0 %v15077_v20  ;;  %v3507_v59 = vld [vmem:[#allocation8 + $0xdc0] sm:$0xff]  ;;  %v15029_v20 = vcombine.low %v3131_v26, %v3135_v4  ;;  %v3053_v28 = vmax.f32 %v2791_v2, %v3045_v9 }
 0x224   :  { %6241 = vmatpush2.bf16.msra.mxu1 %v15205_v24  ;;  %6201 = vmatprep.subr.bf16.mxu0 %v15070_v25  ;;  %v3511_v14 = vld [vmem:[#allocation8 + $0xde0] sm:$0xff]  ;;  %v3051_v24 = vmax.f32 %v17004_v17, %v3043_v48  ;;  %v15157_v25 = vcombine.low %v3259_v6, %v3263_v55 }
 0x225   :  { %6242 = vmatprep.subr.bf16.mxu1 %v15198_v27  ;;  %v15278_v27 = vcombine.high %v3379_v12, %v3383_v13  ;;  %v3371_v29 = vld [vmem:[#allocation8 + $0x980] sm:$0xff]  ;;  %v15406_v31 = vcombine.high %v3507_v59, %v3511_v14  ;;  %v15405_v23 = vcombine.low %v3507_v59, %v3511_v14  ;;  %v17049_v17 = vpack.c.bf16 %v3053_v28, %v3053_v28 }
 0x226   :  { %v3375_v46 = vld [vmem:[#allocation8 + $0x9a0] sm:$0xff] }
 0x227   :  { %6202 = vmatpush2.bf16.msra.mxu0 %v15069_v34  ;;  %v3499_v34 = vld [vmem:[#allocation8 + $0xd80] sm:$0xff]  ;;  %v15270_v57 = vcombine.high %v3371_v29, %v3375_v46  ;;  %v15269_v45 = vcombine.low %v3371_v29, %v3375_v46 }
 0x228   :  { %6243 = vmatpush2.bf16.msra.mxu1 %v15197_v35  ;;  %6203 = vmatprep.subr.bf16.mxu0 %v15062_v36  ;;  %v3503_v35 = vld [vmem:[#allocation8 + $0xda0] sm:$0xff]  ;;  %v15277_v36 = vcombine.low %v3379_v12, %v3383_v13  ;;  %v17063_v12 = vld [vmem:[#allocation8 + $0x5e8] sm:$0xff] }
 0x229   :  { %6244 = vmatprep.subr.bf16.mxu1 %v15190_v37  ;;  %v17047_v37 = vpack.c.bf16 %v3051_v24, %v3051_v24  ;;  %v3363_v39 = vld [vmem:[#allocation8 + $0x940] sm:$0xff]  ;;  %v15398_v5 = vcombine.high %v3499_v34, %v3503_v35  ;;  %v15397_v50 = vcombine.low %v3499_v34, %v3503_v35 }
 0x22a   :  { %v3367_v63 = vld [vmem:[#allocation8 + $0x960] sm:$0xff] }
 0x22b   :  { %6204 = vmatpush2.bf16.msra.mxu0 %v15061_v16  ;;  %v15262_v49 = vcombine.high %v3363_v39, %v3367_v63  ;;  %v3487_v60 = vld [vmem:[#allocation8 + $0xd20] sm:$0xff]  ;;  %v15261_v62 = vcombine.low %v3363_v39, %v3367_v63 }
 0x22c   :  { %6245 = vmatpush2.bf16.msra.mxu1 %v15189_v42  ;;  %6205 = vmatprep.subr.bf16.mxu0 %v15054_v40  ;;  %v3491_v42 = vld [vmem:[#allocation8 + $0xd40] sm:$0xff] }
 0x22d   :  { %6246 = vmatprep.subr.bf16.mxu1 %v15182_v43  ;;  %v3495_v40 = vld [vmem:[#allocation8 + $0xd60] sm:$0xff] }
 0x22e   :  { %v3347_v2 = vld [vmem:[#allocation8 + $0x8c0] sm:$0xff] }
 0x22f   :  { %6206 = vmatpush2.bf16.msra.mxu0 %v15053_v52  ;;  %v3355_v52 = vld [vmem:[#allocation8 + $0x900] sm:$0xff] }
 0x230   :  { %6247 = vmatpush2.bf16.msra.mxu1 %v15181_v56  ;;  %6207 = vmatprep.subr.bf16.mxu0 %v15046_v58  ;;  %v3359_v56 = vld [vmem:[#allocation8 + $0x920] sm:$0xff]  ;;  %v15390_v58 = vcombine.high %v3491_v42, %v3495_v40 }
 0x231   :  { %6248 = vmatprep.subr.bf16.mxu1 %v15174_v22  ;;  %v3483_v22 = vld [vmem:[#allocation8 + $0xd00] sm:$0xff]  ;;  %v15253_v55 = vcombine.low %v3355_v52, %v3359_v56 }
 0x232   :  { %v15382_v26 = vcombine.high %v3483_v22, %v3487_v60  ;;  %v3475_v4 = vld [vmem:[#allocation8 + $0xcc0] sm:$0xff] }
 0x233   :  { %6208 = vmatpush2.bf16.msra.mxu0 %v15045_v1  ;;  %v15254_v1 = vcombine.high %v3355_v52, %v3359_v56  ;;  %v3479_v6 = vld [vmem:[#allocation8 + $0xce0] sm:$0xff] }
 0x234   :  { %6249 = vmatpush2.bf16.msra.mxu1 %v15173_v33  ;;  %6209 = vmatprep.subr.bf16.mxu0 %v15038_v19  ;;  %v15389_v33 = vcombine.low %v3491_v42, %v3495_v40  ;;  %v3339_v48 = vld [vmem:[#allocation8 + $0x880] sm:$0xff]  ;;  %v15374_v9 = vcombine.high %v3475_v4, %v3479_v6 }
 0x235   :  { %6250 = vmatprep.subr.bf16.mxu1 %v15166_v3  ;;  %v3351_v3 = vld [vmem:[#allocation8 + $0x8e0] sm:$0xff] }
 0x236   :  { %v3467_v13 = vld [vmem:[#allocation8 + $0xc80] sm:$0xff]  ;;  %v15245_v14 = vcombine.low %v3347_v2, %v3351_v3 }
 0x237   :  { %6210 = vmatpush2.bf16.msra.mxu0 %v15037_v11  ;;  %v15246_v11 = vcombine.high %v3347_v2, %v3351_v3  ;;  %v3471_v59 = vld [vmem:[#allocation8 + $0xca0] sm:$0xff] }
 0x238   :  { %6251 = vmatpush2.bf16.msra.mxu1 %v15165_v7  ;;  %6211 = vmatprep.subr.bf16.mxu0 %v15030_v8  ;;  %v15381_v7 = vcombine.low %v3483_v22, %v3487_v60  ;;  %v3343_v8 = vld [vmem:[#allocation8 + $0x8a0] sm:$0xff]  ;;  %v15366_v29 = vcombine.high %v3467_v13, %v3471_v59 }
 0x239   :  { %6252 = vmatprep.subr.bf16.mxu1 %v15158_v10  ;;  %v17061_v10 = vld [vmem:[#allocation8 + $0x5c8] sm:$0xff]  ;;  %v15238_v24 = vcombine.high %v3339_v48, %v3343_v8  ;;  %v3335_v28 = vld [vmem:[#allocation8 + $0x860] sm:$0xff]  ;;  %v15237_v34 = vcombine.low %v3339_v48, %v3343_v8 }
 0x23a   :  { %v3459_v46 = vld [vmem:[#allocation8 + $0xc40] sm:$0xff] }
 0x23b   :  { %6212 = vmatpush2.bf16.msra.mxu0 %v15029_v20  ;;  %v15151_v20 = vcombine.low %v17061_v10, %v17063_v12  ;;  %v3451_v63 = vld [vmem:[#allocation8 + $0xc00] sm:$0xff] }
 0x23c   :  { %6253 = vmatpush2.bf16.msra.mxu1 %v15157_v25  ;;  %6263 = vmatprep.subr.bf16.mxu0 %v15278_v27  ;;  %v15373_v25 = vcombine.low %v3475_v4, %v3479_v6  ;;  %v3331_v27 = vld [vmem:[#allocation8 + $0x840] sm:$0xff] }
 0x23d   :  { %6304 = vmatprep.subr.bf16.mxu1 %v15406_v31  ;;  %v3463_v31 = vld [vmem:[#allocation8 + $0xc60] sm:$0xff]  ;;  %v15230_v35 = vcombine.high %v3331_v27, %v3335_v28  ;;  %v15229_v42 = vcombine.low %v3331_v27, %v3335_v28 }
 0x23e   :  { %v17051_v16 = vpop.f32.mrf.mxu0  ;;  %6214 = vmatmul.mubr.bf16.vlgmr.msra.gmra.mxu0 %v17047_v37  ;;  %v15358_v39 = vcombine.high %v3459_v46, %v3463_v31  ;;  %v3571_v56 = vld [vmem:[#allocation8 + $0xfc0] sm:$0xff] }
 0x23f   :  { %v17054_v43 = vpop.f32.mrf.mxu1  ;;  %6255 = vmatmul.mubr.bf16.vlgmr.msra.gmra.mxu1 %v17049_v17  ;;  %6264 = vmatpush1.bf16.msra.mxu0 %v15277_v36  ;;  %v15365_v36 = vcombine.low %v3467_v13, %v3471_v59  ;;  %v3431_v4 = vld [vmem:[#allocation8 + $0xb60] sm:$0xff] }
 0x240   :  { %v17057_v47 = vpop.f32.mrf.mxu0  ;;  %6265 = vmatprep.subr.bf16.mxu0 %v15270_v57  ;;  %6305 = vmatpush1.bf16.msra.mxu1 %v15405_v23  ;;  %v3323_v57 = vld [vmem:[#allocation8 + $0x800] sm:$0xff] }
 0x241   :  { %v17059_v51 = vpop.f32.mrf.mxu1  ;;  %6306 = vmatprep.subr.bf16.mxu1 %v15398_v5  ;;  %v3327_v23 = vld [vmem:[#allocation8 + $0x820] sm:$0xff] }
 0x242   :  { %v2835_v18 = vpop.f32.mrf.mxu0  ;;  %v3455_v5 = vld [vmem:[#allocation8 + $0xc20] sm:$0xff]  ;;  %v15222_v40 = vcombine.high %v3323_v57, %v3327_v23 }
 0x243   :  { %v2876_v61 = vpop.f32.mrf.mxu1  ;;  %6266 = vmatpush1.bf16.msra.mxu0 %v15269_v45  ;;  %v15357_v45 = vcombine.low %v3459_v46, %v3463_v31  ;;  %v15350_v52 = vcombine.high %v3451_v63, %v3455_v5  ;;  %v15221_v18 = vcombine.low %v3323_v57, %v3327_v23  ;;  %v15349_v60 = vcombine.low %v3451_v63, %v3455_v5  ;;  %v3423_v13 = vld [vmem:[#allocation8 + $0xb20] sm:$0xff] }
 0x244   :  { %v2836_v0 = vpop.f32.mrf.mxu0  ;;  %6267 = vmatprep.subr.bf16.mxu0 %v15262_v49  ;;  %6307 = vmatpush1.bf16.msra.mxu1 %v15397_v50  ;;  %v3443_v49 = vld [vmem:[#allocation8 + $0xbc0] sm:$0xff] }
 0x245   :  { %v2877_v19 = vpop.f32.mrf.mxu1  ;;  %6308 = vmatprep.subr.bf16.mxu1 %v15390_v58  ;;  %v3447_v50 = vld [vmem:[#allocation8 + $0xbe0] sm:$0xff] }
 0x246   :  { %v3575_v58 = vld [vmem:[#allocation8 + $0xfe0] sm:$0xff]  ;;  %v15342_v22 = vcombine.high %v3443_v49, %v3447_v50  ;;  %v15341_v19 = vcombine.low %v3443_v49, %v3447_v50 }
 0x247   :  { %6268 = vmatpush1.bf16.msra.mxu0 %v15261_v62  ;;  %v3435_v61 = vld [vmem:[#allocation8 + $0xb80] sm:$0xff]  ;;  %v15470_v0 = vcombine.high %v3571_v56, %v3575_v58  ;;  %v15469_v3 = vcombine.low %v3571_v56, %v3575_v58 }
 0x248   :  { %6269 = vmatprep.subr.bf16.mxu0 %v15254_v1  ;;  %6309 = vmatpush1.bf16.msra.mxu1 %v15389_v33  ;;  %v3439_v62 = vld [vmem:[#allocation8 + $0xba0] sm:$0xff] }
 0x249   :  { %6310 = vmatprep.subr.bf16.mxu1 %v15382_v26  ;;  %v3563_v1 = vld [vmem:[#allocation8 + $0xf80] sm:$0xff]  ;;  %v15334_v2 = vcombine.high %v3435_v61, %v3439_v62  ;;  %v15333_v48 = vcombine.low %v3435_v61, %v3439_v62 }
 0x24a   :  { %v3567_v33 = vld [vmem:[#allocation8 + $0xfa0] sm:$0xff] }
 0x24b   :  { %6270 = vmatpush1.bf16.msra.mxu0 %v15253_v55  ;;  %v3427_v26 = vld [vmem:[#allocation8 + $0xb40] sm:$0xff]  ;;  %v15462_v6 = vcombine.high %v3563_v1, %v3567_v33  ;;  %v15461_v8 = vcombine.low %v3563_v1, %v3567_v33 }
 0x24c   :  { %6271 = vmatprep.subr.bf16.mxu0 %v15246_v11  ;;  %6311 = vmatpush1.bf16.msra.mxu1 %v15381_v7  ;;  %v3555_v55 = vld [vmem:[#allocation8 + $0xf40] sm:$0xff]  ;;  %v15326_v7 = vcombine.high %v3427_v26, %v3431_v4 }
 0x24d   :  { %6312 = vmatprep.subr.bf16.mxu1 %v15374_v9  ;;  %v3559_v11 = vld [vmem:[#allocation8 + $0xf60] sm:$0xff] }
 0x24e   :  { %v3419_v9 = vld [vmem:[#allocation8 + $0xb00] sm:$0xff]  ;;  %v15454_v59 = vcombine.high %v3555_v55, %v3559_v11  ;;  %v15453_v28 = vcombine.low %v3555_v55, %v3559_v11 }
 0x24f   :  { %6272 = vmatpush1.bf16.msra.mxu0 %v15245_v14  ;;  %v3547_v14 = vld [vmem:[#allocation8 + $0xf00] sm:$0xff]  ;;  %v15318_v27 = vcombine.high %v3419_v9, %v3423_v13 }
 0x250   :  { %6273 = vmatprep.subr.bf16.mxu0 %v15238_v24  ;;  %6313 = vmatpush1.bf16.msra.mxu1 %v15373_v25  ;;  %v3551_v24 = vld [vmem:[#allocation8 + $0xf20] sm:$0xff]  ;;  %v15325_v25 = vcombine.low %v3427_v26, %v3431_v4  ;;  %v17071_v26 = vsub.s32 5, %v16931_v44 }
 0x251   :  { %6314 = vmatprep.subr.bf16.mxu1 %v15366_v29  ;;  %v3411_v29 = vld [vmem:[#allocation8 + $0xac0] sm:$0xff]  ;;  %v15446_v31 = vcombine.high %v3547_v14, %v3551_v24  ;;  %v15445_v23 = vcombine.low %v3547_v14, %v3551_v24 }
 0x252   :  { %v3415_v46 = vld [vmem:[#allocation8 + $0xae0] sm:$0xff] }
 0x253   :  { %6274 = vmatpush1.bf16.msra.mxu0 %v15237_v34  ;;  %v3539_v34 = vld [vmem:[#allocation8 + $0xec0] sm:$0xff]  ;;  %v15310_v57 = vcombine.high %v3411_v29, %v3415_v46 }
 0x254   :  { %6275 = vmatprep.subr.bf16.mxu0 %v15230_v35  ;;  %6315 = vmatpush1.bf16.msra.mxu1 %v15365_v36  ;;  %v3543_v35 = vld [vmem:[#allocation8 + $0xee0] sm:$0xff]  ;;  %v15317_v36 = vcombine.low %v3419_v9, %v3423_v13  ;;  %v614_v9 = vrot.slane %v17038_v41, %v17071_v26 }
 0x255   :  { %6316 = vmatprep.subr.bf16.mxu1 %v15358_v39  ;;  %v3403_v39 = vld [vmem:[#allocation8 + $0xa80] sm:$0xff]  ;;  %v15438_v5 = vcombine.high %v3539_v34, %v3543_v35  ;;  %v15437_v50 = vcombine.low %v3539_v34, %v3543_v35 }
 0x256   :  { %v3407_v63 = vld [vmem:[#allocation8 + $0xaa0] sm:$0xff] }
 0x257   :  { %6276 = vmatpush1.bf16.msra.mxu0 %v15229_v42  ;;  %v3531_v42 = vld [vmem:[#allocation8 + $0xe80] sm:$0xff]  ;;  %v15302_v49 = vcombine.high %v3403_v39, %v3407_v63 }
 0x258   :  { %6277 = vmatprep.subr.bf16.mxu0 %v15222_v40  ;;  %6317 = vmatpush1.bf16.msra.mxu1 %v15357_v45  ;;  %v3535_v40 = vld [vmem:[#allocation8 + $0xea0] sm:$0xff]  ;;  %v15309_v45 = vcombine.low %v3411_v29, %v3415_v46 }
 0x259   :  { %6318 = vmatprep.subr.bf16.mxu1 %v15350_v52  ;;  %v3395_v52 = vld [vmem:[#allocation8 + $0xa40] sm:$0xff]  ;;  %v15430_v58 = vcombine.high %v3531_v42, %v3535_v40  ;;  %v15429_v62 = vcombine.low %v3531_v42, %v3535_v40 }
 0x25a   :  { %v3399_v56 = vld [vmem:[#allocation8 + $0xa60] sm:$0xff] }
 0x25b   :  { %6278 = vmatpush1.bf16.msra.mxu0 %v15221_v18  ;;  %v3523_v18 = vld [vmem:[#allocation8 + $0xe40] sm:$0xff]  ;;  %v15294_v61 = vcombine.high %v3395_v52, %v3399_v56  ;;  %v15293_v4 = vcombine.low %v3395_v52, %v3399_v56  ;;  %v3108_v56 = vld [vmem:[#allocation8 + $0x148] sm:$0xff] }
 0x25c   :  { %6279 = vmatprep.subr.bf16.mxu0 %v15342_v22  ;;  %6319 = vmatpush1.bf16.msra.mxu1 %v15349_v60  ;;  %v3527_v22 = vld [vmem:[#allocation8 + $0xe60] sm:$0xff]  ;;  %v15301_v60 = vcombine.low %v3403_v39, %v3407_v63 }
 0x25d   :  { %6320 = vmatprep.subr.bf16.mxu1 %v15470_v0  ;;  %v17068_v0 = vsub.s32 4, %v16931_v44  ;;  %v3387_v1 = vld [vmem:[#allocation8 + $0xa00] sm:$0xff]  ;;  %v15421_v55 = vcombine.low %v3523_v18, %v3527_v22 }
 0x25e   :  { %v3391_v33 = vld [vmem:[#allocation8 + $0xa20] sm:$0xff] }
 0x25f   :  { %6280 = vmatpush2.bf16.msra.mxu0 %v15341_v19  ;;  %v15422_v19 = vcombine.high %v3523_v18, %v3527_v22  ;;  %v610_v11 = vrot.slane %v17038_v41, %v17068_v0  ;;  %v15285_v13 = vcombine.low %v3387_v1, %v3391_v33 }
 0x260   :  { %6281 = vmatprep.subr.bf16.mxu0 %v15334_v2  ;;  %6321 = vmatpush2.bf16.msra.mxu1 %v15469_v3  ;;  %v3515_v2 = vld [vmem:[#allocation8 + $0xe00] sm:$0xff] }
 0x261   :  { %6322 = vmatprep.subr.bf16.mxu1 %v15462_v6  ;;  %v3519_v3 = vld [vmem:[#allocation8 + $0xe20] sm:$0xff]  ;;  %v15286_v6 = vcombine.high %v3387_v1, %v3391_v33  ;;  %v2832_v24 = vadd.f32 %v17051_v16, %v610_v11  ;;  %v3092_v33 = vld [vmem:[#allocation8 + $0xc8] sm:$0xff] }
 0x262   :  { %v15413_v14 = vcombine.low %v3515_v2, %v3519_v3 }
 0x263   :  { %6282 = vmatpush2.bf16.msra.mxu0 %v15333_v48  ;;  %v3124_v48 = vld [vmem:[#allocation8 + $0x1c8] sm:$0xff] }
 0x264   :  { %6283 = vmatprep.subr.bf16.mxu0 %v15326_v7  ;;  %6323 = vmatpush2.bf16.msra.mxu1 %v15461_v8  ;;  %v3128_v7 = vld [vmem:[#allocation8 + $0x1e8] sm:$0xff]  ;;  %v15414_v8 = vcombine.high %v3515_v2, %v3519_v3 }
 0x265   :  { %6324 = vmatprep.subr.bf16.mxu1 %v15454_v59  ;;  %v15024_v59 = vcombine.high %v3124_v48, %v3128_v7 }
 0x267   :  { %6284 = vmatpush2.bf16.msra.mxu0 %v15325_v25  ;;  %v15152_v25 = vcombine.high %v17061_v10, %v17063_v12 }
 0x268   :  { %6285 = vmatprep.subr.bf16.mxu0 %v15318_v27  ;;  %6325 = vmatpush2.bf16.msra.mxu1 %v15453_v28  ;;  %v2834_v27 = vadd.f32 %v17057_v47, %v614_v9  ;;  %v2873_v28 = vadd.f32 %v17054_v43, %v2832_v24  ;;  %v3116_v43 = vld [vmem:[#allocation8 + $0x188] sm:$0xff] }
 0x269   :  { %6326 = vmatprep.subr.bf16.mxu1 %v15446_v31 }
 0x26a   :  { %v2875_v46 = vadd.f32 %v17059_v51, %v2834_v27  ;;  %v15023_v51 = vcombine.low %v3124_v48, %v3128_v7  ;;  %v3076_v48 = vld [vmem:[#allocation8 + $0x48] sm:$0xff] }
 0x26b   :  { %6286 = vmatpush2.bf16.msra.mxu0 %v15317_v36  ;;  %v3080_v7 = vld [vmem:[#allocation8 + $0x68] sm:$0xff] }
 0x26c   :  { %6287 = vmatprep.subr.bf16.mxu0 %v15310_v57  ;;  %6327 = vmatpush2.bf16.msra.mxu1 %v15445_v23  ;;  %v14976_v9 = vcombine.high %v3076_v48, %v3080_v7  ;;  %v3192_v27 = vld [vmem:[#allocation8 + $0x3e8] sm:$0xff] }
 0x26d   :  { %6328 = vmatprep.subr.bf16.mxu1 %v15438_v5 }
 0x26f   :  { %6288 = vmatpush2.bf16.msra.mxu0 %v15309_v45  ;;  %v3120_v45 = vld [vmem:[#allocation8 + $0x1a8] sm:$0xff] }
 0x270   :  { %6289 = vmatprep.subr.bf16.mxu0 %v15302_v49  ;;  %6329 = vmatpush2.bf16.msra.mxu1 %v15437_v50  ;;  %v15016_v52 = vcombine.high %v3116_v43, %v3120_v45  ;;  %v15015_v18 = vcombine.low %v3116_v43, %v3120_v45  ;;  %v3156_v43 = vld [vmem:[#allocation8 + $0x2c8] sm:$0xff] }
 0x271   :  { %6330 = vmatprep.subr.bf16.mxu1 %v15430_v58  ;;  %v3112_v58 = vld [vmem:[#allocation8 + $0x168] sm:$0xff] }
 0x272   :  { %v15008_v22 = vcombine.high %v3108_v56, %v3112_v58  ;;  %v3160_v45 = vld [vmem:[#allocation8 + $0x2e8] sm:$0xff] }
 0x273   :  { %6290 = vmatpush2.bf16.msra.mxu0 %v15301_v60  ;;  %v3100_v60 = vld [vmem:[#allocation8 + $0x108] sm:$0xff] }
 0x274   :  { %6291 = vmatprep.subr.bf16.mxu0 %v15294_v61  ;;  %6331 = vmatpush2.bf16.msra.mxu1 %v15429_v62  ;;  %v3104_v61 = vld [vmem:[#allocation8 + $0x128] sm:$0xff]  ;;  %v15007_v62 = vcombine.low %v3108_v56, %v3112_v58  ;;  %v17095_v56 = vsub.s32 6, %v16931_v44 }
 0x275   :  { %6332 = vmatprep.subr.bf16.mxu1 %v15422_v19  ;;  %v15000_v1 = vcombine.high %v3100_v60, %v3104_v61  ;;  %v3096_v19 = vld [vmem:[#allocation8 + $0xe8] sm:$0xff]  ;;  %v14999_v2 = vcombine.low %v3100_v60, %v3104_v61  ;;  %v15055_v60 = vcombine.low %v3156_v43, %v3160_v45 }
 0x276   :  { %v14992_v3 = vcombine.high %v3092_v33, %v3096_v19  ;;  %v3148_v58 = vld [vmem:[#allocation8 + $0x288] sm:$0xff] }
 0x277   :  { %6292 = vmatpush2.bf16.msra.mxu0 %v15293_v4  ;;  %v3084_v4 = vld [vmem:[#allocation8 + $0x88] sm:$0xff] }
 0x278   :  { %6293 = vmatprep.subr.bf16.mxu0 %v15286_v6  ;;  %6333 = vmatpush2.bf16.msra.mxu1 %v15421_v55  ;;  %v3088_v6 = vld [vmem:[#allocation8 + $0xa8] sm:$0xff]  ;;  %v14991_v55 = vcombine.low %v3092_v33, %v3096_v19 }
 0x279   :  { %6334 = vmatprep.subr.bf16.mxu1 %v15414_v8  ;;  %v14984_v11 = vcombine.high %v3084_v4, %v3088_v6  ;;  %v14983_v8 = vcombine.low %v3084_v4, %v3088_v6  ;;  %v3144_v33 = vld [vmem:[#allocation8 + $0x268] sm:$0xff] }
 0x27a   :  { %v3136_v6 = vld [vmem:[#allocation8 + $0x228] sm:$0xff] }
 0x27b   :  { %6294 = vmatpush2.bf16.msra.mxu0 %v15285_v13  ;;  %v3068_v13 = vld [vmem:[#allocation8 + $0x8] sm:$0xff] }
 0x27c   :  { %6345 = vmatprep.subr.bf16.mxu0 %v15024_v59  ;;  %6335 = vmatpush2.bf16.msra.mxu1 %v15413_v14  ;;  %v3072_v59 = vld [vmem:[#allocation8 + $0x28] sm:$0xff]  ;;  %v14975_v14 = vcombine.low %v3076_v48, %v3080_v7 }
 0x27d   :  { %6386 = vmatprep.subr.bf16.mxu1 %v15152_v25  ;;  %v14968_v24 = vcombine.high %v3068_v13, %v3072_v59  ;;  %v3188_v25 = vld [vmem:[#allocation8 + $0x3c8] sm:$0xff] }
 0x27e   :  { %v2913_v29 = vpop.f32.mrf.mxu0 }
 0x27f   :  { %v2914_v31 = vadd.f32 %v2913_v29, %v2873_v28  ;;  %v17083_v34 = vpop.f32.mrf.mxu1  ;;  %v14967_v28 = vcombine.low %v3068_v13, %v3072_v59  ;;  %v15088_v29 = vcombine.high %v3188_v25, %v3192_v27 }
 0x280   :  { %v2915_v35 = vpop.f32.mrf.mxu0 }
 0x281   :  { %v3047_v16 = vmul.f32 0.2, %v2914_v31  ;;  %v2916_v36 = vadd.f32 %v2915_v35, %v2875_v46  ;;  %v17085_v57 = vpop.f32.mrf.mxu1  ;;  %v3180_v46 = vld [vmem:[#allocation8 + $0x388] sm:$0xff]  ;;  %v15087_v35 = vcombine.low %v3188_v25, %v3192_v27 }
 0x282   :  { %v2917_v23 = vpop.f32.mrf.mxu0  ;;  %v3384_v25 = vld [vmem:[#allocation8 + $0x9e8] sm:$0xff] }
 0x283   :  { %v3048_v39 = vmul.f32 0.2, %v2916_v36  ;;  %v2958_v47 = vpop.f32.mrf.mxu1  ;;  %v3055_v63 = vmax.f32 %v2914_v31, %v3047_v16  ;;  %v3184_v31 = vld [vmem:[#allocation8 + $0x3a8] sm:$0xff] }
 0x284   :  { %v2918_v5 = vpop.f32.mrf.mxu0  ;;  %v15080_v16 = vcombine.high %v3180_v46, %v3184_v31  ;;  %v3176_v23 = vld [vmem:[#allocation8 + $0x368] sm:$0xff] }
 0x285   :  { %v3056_v42 = vmax.f32 %v2916_v36, %v3048_v39  ;;  %v2959_v40 = vpop.f32.mrf.mxu1  ;;  %v17089_v50 = vpack.c.bf16 %v3055_v63, %v3055_v63  ;;  %v3172_v36 = vld [vmem:[#allocation8 + $0x348] sm:$0xff]  ;;  %v15079_v39 = vcombine.low %v3180_v46, %v3184_v31 }
 0x286   :  { %v15072_v47 = vcombine.high %v3172_v36, %v3176_v23  ;;  %v3164_v63 = vld [vmem:[#allocation8 + $0x308] sm:$0xff] }
 0x287   :  { %v17087_v49 = vpack.c.bf16 %v3056_v42, %v3056_v42  ;;  %v3168_v5 = vld [vmem:[#allocation8 + $0x328] sm:$0xff]  ;;  %v15071_v42 = vcombine.low %v3172_v36, %v3176_v23 }
 0x288   :  { %v15064_v40 = vcombine.high %v3164_v63, %v3168_v5  ;;  %v3372_v36 = vld [vmem:[#allocation8 + $0x988] sm:$0xff] }
 0x289   :  { %6295 = vmatprep.mubr.bf16.mxu0 %v17087_v49  ;;  %v3376_v23 = vld [vmem:[#allocation8 + $0x9a8] sm:$0xff] }
 0x28a   :  { %6296 = vmatmul.mubr.bf16.vlgmr.msra.gmra.mxu0 %v17089_v50 }
 0x28b   :  { %6346 = vmatpush1.bf16.msra.mxu0 %v15023_v51  ;;  %6377 = vmatprep.mubr.bf16.mxu0 %v17022_v54  ;;  %v15063_v51 = vcombine.low %v3164_v63, %v3168_v5  ;;  %v15272_v5 = vcombine.high %v3372_v36, %v3376_v23 }
 0x28c   :  { %6347 = vmatprep.subr.bf16.mxu0 %v15016_v52  ;;  %v15056_v52 = vcombine.high %v3156_v43, %v3160_v45  ;;  %v3364_v45 = vld [vmem:[#allocation8 + $0x948] sm:$0xff] }
 0x28f   :  { %6348 = vmatpush1.bf16.msra.mxu0 %v15015_v18  ;;  %v3152_v18 = vld [vmem:[#allocation8 + $0x2a8] sm:$0xff] }
 0x290   :  { %6349 = vmatprep.subr.bf16.mxu0 %v15008_v22  ;;  %v17098_v22 = vsub.s32 7, %v16931_v44  ;;  %v15048_v61 = vcombine.high %v3148_v58, %v3152_v18  ;;  %v3132_v44 = vld [vmem:[#allocation8 + $0x208] sm:$0xff] }
 0x291   :  { %v15032_v13 = vcombine.high %v3132_v44, %v3136_v6  ;;  %v15031_v46 = vcombine.low %v3132_v44, %v3136_v6  ;;  %v3228_v44 = vld [vmem:[#allocation8 + $0x508] sm:$0xff] }
 0x292   :  { %v622_v19 = vrot.slane %v17038_v41, %v17098_v22  ;;  %v3232_v6 = vld [vmem:[#allocation8 + $0x528] sm:$0xff] }
 0x293   :  { %6350 = vmatpush1.bf16.msra.mxu0 %v15007_v62  ;;  %v618_v62 = vrot.slane %v17038_v41, %v17095_v56  ;;  %v15128_v10 = vcombine.high %v3228_v44, %v3232_v6 }
 0x294   :  { %6351 = vmatprep.subr.bf16.mxu0 %v15000_v1  ;;  %v3140_v1 = vld [vmem:[#allocation8 + $0x248] sm:$0xff] }
 0x295   :  { %v2955_v4 = vadd.f32 %v17083_v34, %v618_v62  ;;  %v3240_v62 = vld [vmem:[#allocation8 + $0x568] sm:$0xff] }
 0x297   :  { %6352 = vmatpush1.bf16.msra.mxu0 %v14999_v2  ;;  %v15047_v2 = vcombine.low %v3148_v58, %v3152_v18  ;;  %v15271_v58 = vcombine.low %v3372_v36, %v3376_v23  ;;  %v3324_v36 = vld [vmem:[#allocation8 + $0x808] sm:$0xff] }
 0x298   :  { %6353 = vmatprep.subr.bf16.mxu0 %v14992_v3  ;;  %v15040_v3 = vcombine.high %v3140_v1, %v3144_v33  ;;  %v3328_v23 = vld [vmem:[#allocation8 + $0x828] sm:$0xff] }
 0x29b   :  { %6354 = vmatpush1.bf16.msra.mxu0 %v14991_v55 }
 0x29c   :  { %6355 = vmatprep.subr.bf16.mxu0 %v14984_v11  ;;  %v2957_v11 = vadd.f32 %v17085_v57, %v622_v19 }
 0x29f   :  { %6356 = vmatpush1.bf16.msra.mxu0 %v14983_v8  ;;  %v15039_v8 = vcombine.low %v3140_v1, %v3144_v33  ;;  %v3356_v1 = vld [vmem:[#allocation8 + $0x908] sm:$0xff] }
 0x2a0   :  { %6357 = vmatprep.subr.bf16.mxu0 %v14976_v9  ;;  %v3360_v33 = vld [vmem:[#allocation8 + $0x928] sm:$0xff] }
 0x2a3   :  { %6358 = vmatpush1.bf16.msra.mxu0 %v14975_v14 }
 0x2a4   :  { %6359 = vmatprep.subr.bf16.mxu0 %v14968_v24  ;;  %v3380_v24 = vld [vmem:[#allocation8 + $0x9c8] sm:$0xff] }
 0x2a5   :  { %v15280_v57 = vcombine.high %v3380_v24, %v3384_v25  ;;  %v15279_v63 = vcombine.low %v3380_v24, %v3384_v25  ;;  %v3212_v25 = vld [vmem:[#allocation8 + $0x488] sm:$0xff] }
 0x2a7   :  { %6360 = vmatpush1.bf16.msra.mxu0 %v14967_v28 }
 0x2a8   :  { %6361 = vmatprep.subr.bf16.mxu0 %v15088_v29 }
 0x2ab   :  { %6362 = vmatpush2.bf16.msra.mxu0 %v15087_v35 }
 0x2ac   :  { %6363 = vmatprep.subr.bf16.mxu0 %v15080_v16 }
 0x2af   :  { %6364 = vmatpush2.bf16.msra.mxu0 %v15079_v39 }
 0x2b0   :  { %6365 = vmatprep.subr.bf16.mxu0 %v15072_v47 }
 0x2b3   :  { %6366 = vmatpush2.bf16.msra.mxu0 %v15071_v42  ;;  %v3244_v42 = vld [vmem:[#allocation8 + $0x588] sm:$0xff] }
 0x2b4   :  { %6367 = vmatprep.subr.bf16.mxu0 %v15064_v40  ;;  %v3248_v40 = vld [vmem:[#allocation8 + $0x5a8] sm:$0xff] }
 0x2b5   :  { %v15144_v18 = vcombine.high %v3244_v42, %v3248_v40  ;;  %v15143_v19 = vcombine.low %v3244_v42, %v3248_v40  ;;  %v3196_v42 = vld [vmem:[#allocation8 + $0x408] sm:$0xff] }
 0x2b6   :  { %v3200_v40 = vld [vmem:[#allocation8 + $0x428] sm:$0xff] }
 0x2b7   :  { %6368 = vmatpush2.bf16.msra.mxu0 %v15063_v51  ;;  %v3368_v51 = vld [vmem:[#allocation8 + $0x968] sm:$0xff] }
 0x2b8   :  { %6369 = vmatprep.subr.bf16.mxu0 %v15056_v52 }
 0x2bb   :  { %6370 = vmatpush2.bf16.msra.mxu0 %v15055_v60  ;;  %v15264_v60 = vcombine.high %v3364_v45, %v3368_v51 }
 0x2bc   :  { %6371 = vmatprep.subr.bf16.mxu0 %v15048_v61  ;;  %v3236_v61 = vld [vmem:[#allocation8 + $0x548] sm:$0xff] }
 0x2be   :  { %v2995_v55 = vpop.f32.mrf.mxu0 }
 0x2bf   :  { %v2996_v48 = vadd.f32 %v2995_v55, %v2955_v4  ;;  %v3036_v7 = vpop.f32.mrf.mxu1  ;;  %6372 = vmatpush2.bf16.msra.mxu0 %v15047_v2  ;;  %v15263_v2 = vcombine.low %v3364_v45, %v3368_v51  ;;  %v15256_v4 = vcombine.high %v3356_v1, %v3360_v33  ;;  %v3348_v55 = vld [vmem:[#allocation8 + $0x8c8] sm:$0xff] }
 0x2c0   :  { %v2997_v9 = vpop.f32.mrf.mxu0  ;;  %6373 = vmatprep.subr.bf16.mxu0 %v15040_v3  ;;  %v15136_v3 = vcombine.high %v3236_v61, %v3240_v62  ;;  %v3444_v45 = vld [vmem:[#allocation8 + $0xbc8] sm:$0xff] }
 0x2c1   :  { %v3037_v59 = vadd.f32 %v3036_v7, %v2996_v48  ;;  %v2998_v41 = vadd.f32 %v2997_v9, %v2957_v11  ;;  %v3038_v14 = vpop.f32.mrf.mxu1  ;;  %v3352_v11 = vld [vmem:[#allocation8 + $0x8e8] sm:$0xff]  ;;  %v15135_v48 = vcombine.low %v3236_v61, %v3240_v62  ;;  %v15255_v7 = vcombine.low %v3356_v1, %v3360_v33 }
 0x2c2   :  { %v2999_v27 = vpop.f32.mrf.mxu0  ;;  %v15248_v12 = vcombine.high %v3348_v55, %v3352_v11  ;;  %v3340_v9 = vld [vmem:[#allocation8 + $0x888] sm:$0xff] }
 0x2c3   :  { %v3049_v28 = vmul.f32 0.2, %v3037_v59  ;;  %v3039_v34 = vadd.f32 %v3038_v14, %v2998_v41  ;;  %v3040_v29 = vpop.f32.mrf.mxu1  ;;  %6374 = vmatpush2.bf16.msra.mxu0 %v15039_v8  ;;  %v3224_v8 = vld [vmem:[#allocation8 + $0x4e8] sm:$0xff]  ;;  %v15247_v41 = vcombine.low %v3348_v55, %v3352_v11 }
 0x2c4   :  { %v3000_v31 = vpop.f32.mrf.mxu0  ;;  %6375 = vmatprep.subr.bf16.mxu0 %v15032_v13  ;;  %v3344_v13 = vld [vmem:[#allocation8 + $0x8a8] sm:$0xff] }
 0x2c5   :  { %v3050_v35 = vmul.f32 0.2, %v3039_v34  ;;  %v3041_v16 = vpop.f32.mrf.mxu1  ;;  %v3057_v39 = vmax.f32 %v3037_v59, %v3049_v28  ;;  %v15127_v59 = vcombine.low %v3228_v44, %v3232_v6  ;;  %v15240_v24 = vcombine.high %v3340_v9, %v3344_v13  ;;  %v3216_v27 = vld [vmem:[#allocation8 + $0x4a8] sm:$0xff] }
 0x2c6   :  { %v3332_v28 = vld [vmem:[#allocation8 + $0x848] sm:$0xff]  ;;  %v15112_v31 = vcombine.high %v3212_v25, %v3216_v27 }
 0x2c7   :  { %v3058_v47 = vmax.f32 %v3039_v34, %v3050_v35  ;;  %6376 = vmatpush2.bf16.msra.mxu0 %v15031_v46  ;;  %v17109_v52 = vpack.c.bf16 %v3057_v39, %v3057_v39  ;;  %v3336_v34 = vld [vmem:[#allocation8 + $0x868] sm:$0xff]  ;;  %v15239_v46 = vcombine.low %v3340_v9, %v3344_v13  ;;  %v15111_v39 = vcombine.low %v3212_v25, %v3216_v27 }
 0x2c8   :  { %6427 = vmatprep.subr.bf16.mxu0 %v15280_v57  ;;  %v15232_v57 = vcombine.high %v3332_v28, %v3336_v34  ;;  %v3204_v35 = vld [vmem:[#allocation8 + $0x448] sm:$0xff] }
 0x2c9   :  { %v17106_v43 = vpack.c.bf16 %v3058_v47, %v3058_v47  ;;  %v3208_v16 = vld [vmem:[#allocation8 + $0x468] sm:$0xff]  ;;  %v15231_v47 = vcombine.low %v3332_v28, %v3336_v34 }
 0x2ca   :  { %6378 = vmatmul.mubr.bf16.vlgmr.msra.gmra.mxu0 %v17047_v37  ;;  %v3448_v51 = vld [vmem:[#allocation8 + $0xbe8] sm:$0xff] }
 0x2cb   :  { %6428 = vmatpush1.bf16.msra.mxu0 %v15279_v63  ;;  %6459 = vmatprep.mubr.bf16.mxu0 %v17087_v49  ;;  %v15104_v63 = vcombine.high %v3204_v35, %v3208_v16  ;;  %v15344_v61 = vcombine.high %v3444_v45, %v3448_v51  ;;  %v3316_v62 = vld [vmem:[#allocation8 + $0x7c8] sm:$0xff] }
 0x2cc   :  { %6336 = vmatprep.mubr.bf16.mxu1 %v17106_v43  ;;  %6429 = vmatprep.subr.bf16.mxu0 %v15272_v5  ;;  %v15224_v5 = vcombine.high %v3324_v36, %v3328_v23  ;;  %v3320_v1 = vld [vmem:[#allocation8 + $0x7e8] sm:$0xff] }
 0x2cd   :  { %6337 = vmatmul.mubr.bf16.vlgmr.msra.gmra.mxu1 %v17109_v52  ;;  %v3436_v33 = vld [vmem:[#allocation8 + $0xb88] sm:$0xff] }
 0x2ce   :  { %6387 = vmatpush1.bf16.msra.mxu1 %v15151_v20  ;;  %6418 = vmatprep.mubr.bf16.mxu1 %v17032_v32  ;;  %v3220_v20 = vld [vmem:[#allocation8 + $0x4c8] sm:$0xff] }
 0x2cf   :  { %6430 = vmatpush1.bf16.msra.mxu0 %v15271_v58  ;;  %6388 = vmatprep.subr.bf16.mxu1 %v15144_v18  ;;  %v15120_v14 = vcombine.high %v3220_v20, %v3224_v8  ;;  %v15119_v29 = vcombine.low %v3220_v20, %v3224_v8  ;;  %v15103_v58 = vcombine.low %v3204_v35, %v3208_v16  ;;  %v3308_v6 = vld [vmem:[#allocation8 + $0x788] sm:$0xff] }
 0x2d0   :  { %6431 = vmatprep.subr.bf16.mxu0 %v15264_v60  ;;  %v15223_v18 = vcombine.low %v3324_v36, %v3328_v23  ;;  %v15096_v60 = vcombine.high %v3196_v42, %v3200_v40  ;;  %v3312_v55 = vld [vmem:[#allocation8 + $0x7a8] sm:$0xff] }
 0x2d1   :  { %v3428_v11 = vld [vmem:[#allocation8 + $0xb48] sm:$0xff] }
 0x2d2   :  { %6389 = vmatpush1.bf16.msra.mxu1 %v15143_v19  ;;  %v3440_v19 = vld [vmem:[#allocation8 + $0xba8] sm:$0xff] }
 0x2d3   :  { %6432 = vmatpush1.bf16.msra.mxu0 %v15263_v2  ;;  %6390 = vmatprep.subr.bf16.mxu1 %v15136_v3  ;;  %v15095_v2 = vcombine.low %v3196_v42, %v3200_v40  ;;  %v15343_v3 = vcombine.low %v3444_v45, %v3448_v51  ;;  %v15336_v44 = vcombine.high %v3436_v33, %v3440_v19  ;;  %v3300_v8 = vld [vmem:[#allocation8 + $0x748] sm:$0xff]  ;;  %v3579_v40 = vld [vmem:[#allocation10] sm:$0xff] }
 0x2d4   :  { %6433 = vmatprep.subr.bf16.mxu0 %v15256_v4  ;;  %v15216_v4 = vcombine.high %v3316_v62, %v3320_v1  ;;  %v3304_v9 = vld [vmem:[#allocation8 + $0x768] sm:$0xff] }
 0x2d5   :  { %v3420_v13 = vld [vmem:[#allocation8 + $0xb08] sm:$0xff] }
 0x2d6   :  { %6391 = vmatpush1.bf16.msra.mxu1 %v15135_v48  ;;  %v3432_v48 = vld [vmem:[#allocation8 + $0xb68] sm:$0xff] }
 0x2d7   :  { %6434 = vmatpush1.bf16.msra.mxu0 %v15255_v7  ;;  %6392 = vmatprep.subr.bf16.mxu1 %v15128_v10  ;;  %v15215_v7 = vcombine.low %v3316_v62, %v3320_v1  ;;  %v15335_v10 = vcombine.low %v3436_v33, %v3440_v19  ;;  %v15328_v20 = vcombine.high %v3428_v11, %v3432_v48  ;;  %v3292_v27 = vld [vmem:[#allocation8 + $0x708] sm:$0xff] }
 0x2d8   :  { %6435 = vmatprep.subr.bf16.mxu0 %v15248_v12  ;;  %v15208_v12 = vcombine.high %v3308_v6, %v3312_v55  ;;  %v3296_v28 = vld [vmem:[#allocation8 + $0x728] sm:$0xff]  ;;  %v3584_v62 = vrot.slane %v3579_v40, %v16983_v15 }
 0x2d9   :  { %v3412_v34 = vld [vmem:[#allocation8 + $0xac8] sm:$0xff] }
 0x2da   :  { %6393 = vmatpush1.bf16.msra.mxu1 %v15127_v59  ;;  %v3424_v59 = vld [vmem:[#allocation8 + $0xb28] sm:$0xff] }
 0x2db   :  { %6436 = vmatpush1.bf16.msra.mxu0 %v15247_v41  ;;  %6394 = vmatprep.subr.bf16.mxu1 %v15120_v14  ;;  %v15207_v41 = vcombine.low %v3308_v6, %v3312_v55  ;;  %v15327_v14 = vcombine.low %v3428_v11, %v3432_v48  ;;  %v15320_v25 = vcombine.high %v3420_v13, %v3424_v59  ;;  %v3284_v16 = vld [vmem:[#allocation8 + $0x6c8] sm:$0xff] }
 0x2dc   :  { %6437 = vmatprep.subr.bf16.mxu0 %v15240_v24  ;;  %v15200_v24 = vcombine.high %v3300_v8, %v3304_v9  ;;  %v3288_v36 = vld [vmem:[#allocation8 + $0x6e8] sm:$0xff] }
 0x2dd   :  { %v3404_v23 = vld [vmem:[#allocation8 + $0xa88] sm:$0xff] }
 0x2de   :  { %6395 = vmatpush1.bf16.msra.mxu1 %v15119_v29  ;;  %v3416_v29 = vld [vmem:[#allocation8 + $0xae8] sm:$0xff] }
 0x2df   :  { %6438 = vmatpush1.bf16.msra.mxu0 %v15239_v46  ;;  %6396 = vmatprep.subr.bf16.mxu1 %v15112_v31  ;;  %v15199_v46 = vcombine.low %v3300_v8, %v3304_v9  ;;  %v15319_v31 = vcombine.low %v3420_v13, %v3424_v59  ;;  %v15312_v35 = vcombine.high %v3412_v34, %v3416_v29  ;;  %v3276_v45 = vld [vmem:[#allocation8 + $0x688] sm:$0xff] }
 0x2e0   :  { %6439 = vmatprep.subr.bf16.mxu0 %v15232_v57  ;;  %v15192_v57 = vcombine.high %v3292_v27, %v3296_v28  ;;  %v3280_v51 = vld [vmem:[#allocation8 + $0x6a8] sm:$0xff] }
 0x2e1   :  { %v15176_v1 = vcombine.high %v3276_v45, %v3280_v51  ;;  %v3268_v19 = vld [vmem:[#allocation8 + $0x648] sm:$0xff]  ;;  %v15175_v55 = vcombine.low %v3276_v45, %v3280_v51  ;;  %v3109_v51 = vld [vmem:[#allocation8 + $0x150] sm:$0xff] }
 0x2e2   :  { %6397 = vmatpush1.bf16.msra.mxu1 %v15111_v39  ;;  %v3408_v39 = vld [vmem:[#allocation8 + $0xaa8] sm:$0xff] }
 0x2e3   :  { %6440 = vmatpush1.bf16.msra.mxu0 %v15231_v47  ;;  %6398 = vmatprep.subr.bf16.mxu1 %v15104_v63  ;;  %v15191_v47 = vcombine.low %v3292_v27, %v3296_v28  ;;  %v15311_v63 = vcombine.low %v3412_v34, %v3416_v29  ;;  %v15304_v42 = vcombine.high %v3404_v23, %v3408_v39  ;;  %v3260_v8 = vld [vmem:[#allocation8 + $0x608] sm:$0xff] }
 0x2e4   :  { %6441 = vmatprep.subr.bf16.mxu0 %v15224_v5  ;;  %v15184_v5 = vcombine.high %v3284_v16, %v3288_v36  ;;  %v3264_v9 = vld [vmem:[#allocation8 + $0x628] sm:$0xff] }
 0x2e5   :  { %v3504_v45 = vld [vmem:[#allocation8 + $0xda8] sm:$0xff] }
 0x2e6   :  { %6399 = vmatpush1.bf16.msra.mxu1 %v15103_v58  ;;  %v3396_v58 = vld [vmem:[#allocation8 + $0xa48] sm:$0xff] }
 0x2e7   :  { %6442 = vmatpush1.bf16.msra.mxu0 %v15223_v18  ;;  %6400 = vmatprep.subr.bf16.mxu1 %v15096_v60  ;;  %v3400_v18 = vld [vmem:[#allocation8 + $0xa68] sm:$0xff]  ;;  %v15183_v60 = vcombine.low %v3284_v16, %v3288_v36 }
 0x2e8   :  { %6443 = vmatprep.subr.bf16.mxu0 %v15344_v61  ;;  %v15303_v61 = vcombine.low %v3404_v23, %v3408_v39  ;;  %v15296_v33 = vcombine.high %v3396_v58, %v3400_v18  ;;  %v3512_v36 = vld [vmem:[#allocation8 + $0xde8] sm:$0xff]  ;;  %v3117_v23 = vld [vmem:[#allocation8 + $0x190] sm:$0xff] }
 0x2e9   :  { %v3121_v39 = vld [vmem:[#allocation8 + $0x1b0] sm:$0xff] }
 0x2ea   :  { %6401 = vmatpush1.bf16.msra.mxu1 %v15095_v2  ;;  %v3272_v2 = vld [vmem:[#allocation8 + $0x668] sm:$0xff] }
 0x2eb   :  { %6444 = vmatpush2.bf16.msra.mxu0 %v15343_v3  ;;  %6402 = vmatprep.subr.bf16.mxu1 %v15216_v4  ;;  %v3588_v3 = vrot.slane %v3579_v40, %v16988_v21  ;;  %v3388_v4 = vld [vmem:[#allocation8 + $0xa08] sm:$0xff]  ;;  %v15167_v27 = vcombine.low %v3268_v19, %v3272_v2 }
 0x2ec   :  { %6445 = vmatprep.subr.bf16.mxu0 %v15336_v44  ;;  %v3392_v44 = vld [vmem:[#allocation8 + $0xa28] sm:$0xff] }
 0x2ed   :  { %v15287_v29 = vcombine.low %v3388_v4, %v3392_v44  ;;  %v3500_v40 = vld [vmem:[#allocation8 + $0xd88] sm:$0xff] }
 0x2ee   :  { %6403 = vmatpush2.bf16.msra.mxu1 %v15215_v7  ;;  %v15295_v7 = vcombine.low %v3396_v58, %v3400_v18  ;;  %v3113_v58 = vld [vmem:[#allocation8 + $0x170] sm:$0xff] }
 0x2ef   :  { %6446 = vmatpush2.bf16.msra.mxu0 %v15335_v10  ;;  %6404 = vmatprep.subr.bf16.mxu1 %v15208_v12  ;;  %v15168_v10 = vcombine.high %v3268_v19, %v3272_v2  ;;  %v3101_v19 = vld [vmem:[#allocation8 + $0x110] sm:$0xff] }
 0x2f0   :  { %6447 = vmatprep.subr.bf16.mxu0 %v15328_v20  ;;  %v15288_v20 = vcombine.high %v3388_v4, %v3392_v44  ;;  %v3105_v2 = vld [vmem:[#allocation8 + $0x130] sm:$0xff]  ;;  %v15009_v4 = vcombine.low %v3109_v51, %v3113_v58 }
 0x2f2   :  { %6405 = vmatpush2.bf16.msra.mxu1 %v15207_v41 }
 0x2f3   :  { %6448 = vmatpush2.bf16.msra.mxu0 %v15327_v14  ;;  %6406 = vmatprep.subr.bf16.mxu1 %v15200_v24  ;;  %v3125_v14 = vld [vmem:[#allocation8 + $0x1d0] sm:$0xff] }
 0x2f4   :  { %6449 = vmatprep.subr.bf16.mxu0 %v15320_v25  ;;  %v3129_v24 = vld [vmem:[#allocation8 + $0x1f0] sm:$0xff] }
 0x2f6   :  { %6407 = vmatpush2.bf16.msra.mxu1 %v15199_v46  ;;  %v15160_v46 = vcombine.high %v3260_v8, %v3264_v9 }
 0x2f7   :  { %6450 = vmatpush2.bf16.msra.mxu0 %v15319_v31  ;;  %6408 = vmatprep.subr.bf16.mxu1 %v15192_v57  ;;  %v15026_v57 = vcombine.high %v3125_v14, %v3129_v24 }
 0x2f8   :  { %6451 = vmatprep.subr.bf16.mxu0 %v15312_v35  ;;  %v3508_v35 = vld [vmem:[#allocation8 + $0xdc8] sm:$0xff] }
 0x2f9   :  { %v15407_v18 = vcombine.low %v3508_v35, %v3512_v36 }
 0x2fa   :  { %6409 = vmatpush2.bf16.msra.mxu1 %v15191_v47  ;;  %v15159_v47 = vcombine.low %v3260_v8, %v3264_v9  ;;  %v3476_v9 = vld [vmem:[#allocation8 + $0xcc8] sm:$0xff] }
 0x2fb   :  { %6452 = vmatpush2.bf16.msra.mxu0 %v15311_v63  ;;  %6410 = vmatprep.subr.bf16.mxu1 %v15184_v5  ;;  %v15025_v63 = vcombine.low %v3125_v14, %v3129_v24  ;;  %v15408_v5 = vcombine.high %v3508_v35, %v3512_v36  ;;  %v3089_v14 = vld [vmem:[#allocation8 + $0xb0] sm:$0xff] }
 0x2fc   :  { %6453 = vmatprep.subr.bf16.mxu0 %v15304_v42  ;;  %v15018_v42 = vcombine.high %v3117_v23, %v3121_v39 }
 0x2fe   :  { %6411 = vmatpush2.bf16.msra.mxu1 %v15183_v60  ;;  %v6215_v6 = vpop.f32.mrf.mxu0  ;;  %v15017_v60 = vcombine.low %v3117_v23, %v3121_v39  ;;  %v3460_v39 = vld [vmem:[#allocation8 + $0xc48] sm:$0xff] }
 0x2ff   :  { %v6216_v11 = vadd.f32 %v6215_v6, %v3584_v62  ;;  %v6256_v48 = vpop.f32.mrf.mxu1  ;;  %6454 = vmatpush2.bf16.msra.mxu0 %v15303_v61  ;;  %6412 = vmatprep.subr.bf16.mxu1 %v15176_v1  ;;  %v15400_v61 = vcombine.high %v3500_v40, %v3504_v45  ;;  %v15010_v62 = vcombine.high %v3109_v51, %v3113_v58  ;;  %v3492_v1 = vld [vmem:[#allocation8 + $0xd48] sm:$0xff] }
 0x300   :  { %v6217_v12 = vpop.f32.mrf.mxu0  ;;  %6455 = vmatprep.subr.bf16.mxu0 %v15296_v33  ;;  %v3496_v33 = vld [vmem:[#allocation8 + $0xd68] sm:$0xff]  ;;  %v15002_v6 = vcombine.high %v3101_v19, %v3105_v2 }
 0x301   :  { %v17120_v13 = vadd.f32 %v6256_v48, %v6216_v11  ;;  %v6218_v59 = vadd.f32 %v6217_v12, %v3588_v3  ;;  %v6258_v41 = vpop.f32.mrf.mxu1  ;;  %v15399_v3 = vcombine.low %v3500_v40, %v3504_v45  ;;  %v15392_v44 = vcombine.high %v3492_v1, %v3496_v33  ;;  %v3488_v11 = vld [vmem:[#allocation8 + $0xd28] sm:$0xff]  ;;  %v3093_v48 = vld [vmem:[#allocation8 + $0xd0] sm:$0xff] }
 0x302   :  { %6413 = vmatpush2.bf16.msra.mxu1 %v15175_v55  ;;  %v6219_v25 = vpop.f32.mrf.mxu0  ;;  %v3484_v55 = vld [vmem:[#allocation8 + $0xd08] sm:$0xff]  ;;  %v15001_v12 = vcombine.low %v3101_v19, %v3105_v2 }
 0x303   :  { %v17122_v28 = vadd.f32 %v6258_v41, %v6218_v59  ;;  %v6260_v34 = vpop.f32.mrf.mxu1  ;;  %6456 = vmatpush2.bf16.msra.mxu0 %v15295_v7  ;;  %6414 = vmatprep.subr.bf16.mxu1 %v15168_v10  ;;  %v3097_v7 = vld [vmem:[#allocation8 + $0xf0] sm:$0xff]  ;;  %v15391_v10 = vcombine.low %v3492_v1, %v3496_v33  ;;  %v3480_v59 = vld [vmem:[#allocation8 + $0xce8] sm:$0xff]  ;;  %v15383_v24 = vcombine.low %v3484_v55, %v3488_v11 }
 0x304   :  { %v6220_v31 = vpop.f32.mrf.mxu0  ;;  %6457 = vmatprep.subr.bf16.mxu0 %v15288_v20  ;;  %v15384_v20 = vcombine.high %v3484_v55, %v3488_v11  ;;  %v14994_v8 = vcombine.high %v3093_v48, %v3097_v7  ;;  %v3085_v41 = vld [vmem:[#allocation8 + $0x90] sm:$0xff]  ;;  %v14993_v25 = vcombine.low %v3093_v48, %v3097_v7  ;;  %v15375_v35 = vcombine.low %v3476_v9, %v3480_v59  ;;  %v3452_v58 = vld [vmem:[#allocation8 + $0xc08] sm:$0xff] }
 0x305   :  { %v6261_v16 = vpop.f32.mrf.mxu1  ;;  %v14986_v34 = vcombine.high %v3085_v41, %v3089_v14  ;;  %v3077_v31 = vld [vmem:[#allocation8 + $0x50] sm:$0xff]  ;;  %v3572_v2 = vld [vmem:[#allocation8 + $0xfc8] sm:$0xff] }
 0x306   :  { %6415 = vmatpush2.bf16.msra.mxu1 %v15167_v27  ;;  %v15376_v27 = vcombine.high %v3476_v9, %v3480_v59  ;;  %v14985_v16 = vcombine.low %v3085_v41, %v3089_v14  ;;  %v3564_v7 = vld [vmem:[#allocation8 + $0xf88] sm:$0xff] }
 0x307   :  { %6458 = vmatpush2.bf16.msra.mxu0 %v15287_v29  ;;  %6416 = vmatprep.subr.bf16.mxu1 %v15160_v46  ;;  %v3468_v29 = vld [vmem:[#allocation8 + $0xc88] sm:$0xff] }
 0x308   :  { %6509 = vmatprep.subr.bf16.mxu0 %v15026_v57  ;;  %v3472_v46 = vld [vmem:[#allocation8 + $0xca8] sm:$0xff]  ;;  %v3081_v57 = vld [vmem:[#allocation8 + $0x70] sm:$0xff] }
 0x309   :  { %v15368_v36 = vcombine.high %v3468_v29, %v3472_v46  ;;  %v14978_v23 = vcombine.high %v3077_v31, %v3081_v57  ;;  %v14977_v40 = vcombine.low %v3077_v31, %v3081_v57  ;;  %v3556_v14 = vld [vmem:[#allocation8 + $0xf48] sm:$0xff] }
 0x30a   :  { %6417 = vmatpush2.bf16.msra.mxu1 %v15159_v47  ;;  %6460 = vmatmul.mubr.bf16.vlgmr.msra.gmra.mxu0 %v17089_v50  ;;  %v3464_v47 = vld [vmem:[#allocation8 + $0xc68] sm:$0xff] }
 0x30b   :  { %6510 = vmatpush1.bf16.msra.mxu0 %v15025_v63  ;;  %6541 = vmatprep.mubr.bf16.mxu0 %v17022_v54  ;;  %v3069_v63 = vld [vmem:[#allocation8 + $0x10] sm:$0xff]  ;;  %v15360_v45 = vcombine.high %v3460_v39, %v3464_v47  ;;  %v3548_v57 = vld [vmem:[#allocation8 + $0xf08] sm:$0xff] }
 0x30c   :  { %6468 = vmatprep.subr.bf16.mxu1 %v15408_v5  ;;  %6511 = vmatprep.subr.bf16.mxu0 %v15018_v42  ;;  %v3073_v5 = vld [vmem:[#allocation8 + $0x30] sm:$0xff]  ;;  %v15367_v42 = vcombine.low %v3468_v29, %v3472_v46 }
 0x30d   :  { %6419 = vmatmul.mubr.bf16.vlgmr.msra.gmra.mxu1 %v17049_v17  ;;  %v14970_v51 = vcombine.high %v3069_v63, %v3073_v5  ;;  %v14969_v1 = vcombine.low %v3069_v63, %v3073_v5  ;;  %v3540_v5 = vld [vmem:[#allocation8 + $0xec8] sm:$0xff] }
 0x30e   :  { %6469 = vmatpush1.bf16.msra.mxu1 %v15407_v18  ;;  %6500 = vmatprep.mubr.bf16.mxu1 %v17106_v43  ;;  %v3456_v18 = vld [vmem:[#allocation8 + $0xc28] sm:$0xff] }
 0x30f   :  { %6512 = vmatpush1.bf16.msra.mxu0 %v15017_v60  ;;  %6470 = vmatprep.subr.bf16.mxu1 %v15400_v61  ;;  %v3189_v60 = vld [vmem:[#allocation8 + $0x3d0] sm:$0xff]  ;;  %v15352_v33 = vcombine.high %v3452_v58, %v3456_v18 }
 0x310   :  { %6513 = vmatprep.subr.bf16.mxu0 %v15010_v62  ;;  %v3193_v61 = vld [vmem:[#allocation8 + $0x3f0] sm:$0xff]  ;;  %v15359_v62 = vcombine.low %v3460_v39, %v3464_v47 }
 0x311   :  { %v15090_v19 = vcombine.high %v3189_v60, %v3193_v61  ;;  %v15089_v55 = vcombine.low %v3189_v60, %v3193_v61  ;;  %v3532_v61 = vld [vmem:[#allocation8 + $0xe88] sm:$0xff] }
 0x312   :  { %6471 = vmatpush1.bf16.msra.mxu1 %v15399_v3  ;;  %v3576_v3 = vld [vmem:[#allocation8 + $0xfe8] sm:$0xff] }
 0x313   :  { %6514 = vmatpush1.bf16.msra.mxu0 %v15009_v4  ;;  %6472 = vmatprep.subr.bf16.mxu1 %v15392_v44  ;;  %v3181_v4 = vld [vmem:[#allocation8 + $0x390] sm:$0xff]  ;;  %v15472_v11 = vcombine.high %v3572_v2, %v3576_v3 }
 0x314   :  { %6515 = vmatprep.subr.bf16.mxu0 %v15002_v6  ;;  %v3185_v44 = vld [vmem:[#allocation8 + $0x3b0] sm:$0xff]  ;;  %v15351_v6 = vcombine.low %v3452_v58, %v3456_v18 }
 0x315   :  { %v15082_v48 = vcombine.high %v3181_v4, %v3185_v44  ;;  %v15081_v9 = vcombine.low %v3181_v4, %v3185_v44  ;;  %v3524_v44 = vld [vmem:[#allocation8 + $0xe48] sm:$0xff] }
 0x316   :  { %6473 = vmatpush1.bf16.msra.mxu1 %v15391_v10  ;;  %v3568_v10 = vld [vmem:[#allocation8 + $0xfa8] sm:$0xff] }
 0x317   :  { %6516 = vmatpush1.bf16.msra.mxu0 %v15001_v12  ;;  %6474 = vmatprep.subr.bf16.mxu1 %v15384_v20  ;;  %v3173_v12 = vld [vmem:[#allocation8 + $0x350] sm:$0xff]  ;;  %v15464_v59 = vcombine.high %v3564_v7, %v3568_v10 }
 0x318   :  { %6517 = vmatprep.subr.bf16.mxu0 %v14994_v8  ;;  %v3177_v20 = vld [vmem:[#allocation8 + $0x370] sm:$0xff]  ;;  %v15471_v8 = vcombine.low %v3572_v2, %v3576_v3 }
 0x319   :  { %v15074_v41 = vcombine.high %v3173_v12, %v3177_v20  ;;  %v15073_v29 = vcombine.low %v3173_v12, %v3177_v20  ;;  %v3516_v20 = vld [vmem:[#allocation8 + $0xe08] sm:$0xff] }
 0x31a   :  { %6475 = vmatpush1.bf16.msra.mxu1 %v15383_v24  ;;  %v3560_v24 = vld [vmem:[#allocation8 + $0xf68] sm:$0xff] }
 0x31b   :  { %6518 = vmatpush1.bf16.msra.mxu0 %v14993_v25  ;;  %6476 = vmatprep.subr.bf16.mxu1 %v15376_v27  ;;  %v3165_v25 = vld [vmem:[#allocation8 + $0x310] sm:$0xff]  ;;  %v15456_v46 = vcombine.high %v3556_v14, %v3560_v24 }
 0x31c   :  { %6519 = vmatprep.subr.bf16.mxu0 %v14986_v34  ;;  %v3169_v27 = vld [vmem:[#allocation8 + $0x330] sm:$0xff]  ;;  %v15463_v34 = vcombine.low %v3564_v7, %v3568_v10 }
 0x31d   :  { %v15066_v31 = vcombine.high %v3165_v25, %v3169_v27  ;;  %v15065_v39 = vcombine.low %v3165_v25, %v3169_v27  ;;  %v3253_v27 = vld [vmem:[#allocation8 + $0x5d0] sm:$0xff] }
 0x31e   :  { %6477 = vmatpush1.bf16.msra.mxu1 %v15375_v35  ;;  %v3552_v35 = vld [vmem:[#allocation8 + $0xf28] sm:$0xff] }
 0x31f   :  { %6520 = vmatpush1.bf16.msra.mxu0 %v14985_v16  ;;  %6478 = vmatprep.subr.bf16.mxu1 %v15368_v36  ;;  %v3157_v16 = vld [vmem:[#allocation8 + $0x2d0] sm:$0xff]  ;;  %v15448_v47 = vcombine.high %v3548_v57, %v3552_v35 }
 0x320   :  { %6521 = vmatprep.subr.bf16.mxu0 %v14978_v23  ;;  %v3161_v36 = vld [vmem:[#allocation8 + $0x2f0] sm:$0xff]  ;;  %v15455_v23 = vcombine.low %v3556_v14, %v3560_v24 }
 0x321   :  { %v15058_v63 = vcombine.high %v3157_v16, %v3161_v36  ;;  %v15057_v58 = vcombine.low %v3157_v16, %v3161_v36  ;;  %v3245_v36 = vld [vmem:[#allocation8 + $0x590] sm:$0xff] }
 0x322   :  { %6479 = vmatpush1.bf16.msra.mxu1 %v15367_v42  ;;  %v3544_v42 = vld [vmem:[#allocation8 + $0xee8] sm:$0xff] }
 0x323   :  { %6522 = vmatpush1.bf16.msra.mxu0 %v14977_v40  ;;  %6480 = vmatprep.subr.bf16.mxu1 %v15360_v45  ;;  %v3149_v40 = vld [vmem:[#allocation8 + $0x290] sm:$0xff]  ;;  %v15440_v18 = vcombine.high %v3540_v5, %v3544_v42 }
 0x324   :  { %6523 = vmatprep.subr.bf16.mxu0 %v14970_v51  ;;  %v3153_v45 = vld [vmem:[#allocation8 + $0x2b0] sm:$0xff]  ;;  %v15447_v51 = vcombine.low %v3548_v57, %v3552_v35 }
 0x325   :  { %v15050_v60 = vcombine.high %v3149_v40, %v3153_v45  ;;  %v15049_v2 = vcombine.low %v3149_v40, %v3153_v45 }
 0x326   :  { %6481 = vmatpush1.bf16.msra.mxu1 %v15359_v62  ;;  %v3536_v62 = vld [vmem:[#allocation8 + $0xea8] sm:$0xff] }
 0x327   :  { %6524 = vmatpush1.bf16.msra.mxu0 %v14969_v1  ;;  %6482 = vmatprep.subr.bf16.mxu1 %v15352_v33  ;;  %v3141_v1 = vld [vmem:[#allocation8 + $0x250] sm:$0xff]  ;;  %v15432_v3 = vcombine.high %v3532_v61, %v3536_v62 }
 0x328   :  { %6525 = vmatprep.subr.bf16.mxu0 %v15090_v19  ;;  %v3145_v33 = vld [vmem:[#allocation8 + $0x270] sm:$0xff]  ;;  %v15439_v19 = vcombine.low %v3540_v5, %v3544_v42 }
 0x329   :  { %v15042_v4 = vcombine.high %v3141_v1, %v3145_v33  ;;  %v15041_v7 = vcombine.low %v3141_v1, %v3145_v33  ;;  %v3361_v1 = vld [vmem:[#allocation8 + $0x930] sm:$0xff] }
 0x32a   :  { %6483 = vmatpush1.bf16.msra.mxu1 %v15351_v6  ;;  %v3528_v6 = vld [vmem:[#allocation8 + $0xe68] sm:$0xff] }
 0x32b   :  { %6526 = vmatpush2.bf16.msra.mxu0 %v15089_v55  ;;  %6484 = vmatprep.subr.bf16.mxu1 %v15472_v11  ;;  %v3133_v55 = vld [vmem:[#allocation8 + $0x210] sm:$0xff]  ;;  %v15424_v10 = vcombine.high %v3524_v44, %v3528_v6 }
 0x32c   :  { %6527 = vmatprep.subr.bf16.mxu0 %v15082_v48  ;;  %v3137_v11 = vld [vmem:[#allocation8 + $0x230] sm:$0xff]  ;;  %v15431_v48 = vcombine.low %v3532_v61, %v3536_v62 }
 0x32d   :  { %v15034_v12 = vcombine.high %v3133_v55, %v3137_v11  ;;  %v15033_v14 = vcombine.low %v3133_v55, %v3137_v11  ;;  %v3357_v62 = vld [vmem:[#allocation8 + $0x910] sm:$0xff] }
 0x32e   :  { %6485 = vmatpush2.bf16.msra.mxu1 %v15471_v8  ;;  %v3520_v8 = vld [vmem:[#allocation8 + $0xe28] sm:$0xff]  ;;  %v3349_v55 = vld [vmem:[#allocation8 + $0x8d0] sm:$0xff] }
 0x32f   :  { %6528 = vmatpush2.bf16.msra.mxu0 %v15081_v9  ;;  %6486 = vmatprep.subr.bf16.mxu1 %v15464_v59  ;;  %v3381_v9 = vld [vmem:[#allocation8 + $0x9d0] sm:$0xff]  ;;  %v15416_v24 = vcombine.high %v3516_v20, %v3520_v8 }
 0x330   :  { %6529 = vmatprep.subr.bf16.mxu0 %v15074_v41  ;;  %v3385_v59 = vld [vmem:[#allocation8 + $0x9f0] sm:$0xff]  ;;  %v15423_v41 = vcombine.low %v3524_v44, %v3528_v6 }
 0x331   :  { %v15282_v25 = vcombine.high %v3381_v9, %v3385_v59  ;;  %v15281_v57 = vcombine.low %v3381_v9, %v3385_v59  ;;  %v3229_v44 = vld [vmem:[#allocation8 + $0x510] sm:$0xff] }
 0x332   :  { %6487 = vmatpush2.bf16.msra.mxu1 %v15463_v34  ;;  %v3257_v34 = vld [vmem:[#allocation8 + $0x5f0] sm:$0xff] }
 0x333   :  { %6530 = vmatpush2.bf16.msra.mxu0 %v15073_v29  ;;  %6488 = vmatprep.subr.bf16.mxu1 %v15456_v46  ;;  %v3373_v29 = vld [vmem:[#allocation8 + $0x990] sm:$0xff]  ;;  %v15154_v35 = vcombine.high %v3253_v27, %v3257_v34  ;;  %v15153_v5 = vcombine.low %v3253_v27, %v3257_v34 }
 0x334   :  { %6531 = vmatprep.subr.bf16.mxu0 %v15066_v31  ;;  %v3377_v46 = vld [vmem:[#allocation8 + $0x9b0] sm:$0xff]  ;;  %v15415_v31 = vcombine.low %v3516_v20, %v3520_v8 }
 0x335   :  { %v15274_v16 = vcombine.high %v3373_v29, %v3377_v46  ;;  %v15273_v40 = vcombine.low %v3373_v29, %v3377_v46  ;;  %v3233_v6 = vld [vmem:[#allocation8 + $0x530] sm:$0xff] }
 0x336   :  { %6489 = vmatpush2.bf16.msra.mxu1 %v15455_v23  ;;  %v3249_v23 = vld [vmem:[#allocation8 + $0x5b0] sm:$0xff]  ;;  %v15129_v59 = vcombine.low %v3229_v44, %v3233_v6 }
 0x337   :  { %6532 = vmatpush2.bf16.msra.mxu0 %v15065_v39  ;;  %6490 = vmatprep.subr.bf16.mxu1 %v15448_v47  ;;  %v3365_v39 = vld [vmem:[#allocation8 + $0x950] sm:$0xff]  ;;  %v15146_v45 = vcombine.high %v3245_v36, %v3249_v23  ;;  %v15145_v33 = vcombine.low %v3245_v36, %v3249_v23 }
 0x338   :  { %6533 = vmatprep.subr.bf16.mxu0 %v15058_v63  ;;  %v3369_v47 = vld [vmem:[#allocation8 + $0x970] sm:$0xff] }
 0x339   :  { %v3353_v11 = vld [vmem:[#allocation8 + $0x8f0] sm:$0xff] }
 0x33a   :  { %6491 = vmatpush2.bf16.msra.mxu1 %v15447_v51  ;;  %v3225_v20 = vld [vmem:[#allocation8 + $0x4f0] sm:$0xff] }
 0x33b   :  { %6534 = vmatpush2.bf16.msra.mxu0 %v15057_v58  ;;  %6492 = vmatprep.subr.bf16.mxu1 %v15440_v18  ;;  %v15266_v58 = vcombine.high %v3365_v39, %v3369_v47  ;;  %v3237_v18 = vld [vmem:[#allocation8 + $0x550] sm:$0xff] }
 0x33c   :  { %6535 = vmatprep.subr.bf16.mxu0 %v15050_v60  ;;  %v3241_v60 = vld [vmem:[#allocation8 + $0x570] sm:$0xff] }
 0x33d   :  { %v3341_v8 = vld [vmem:[#allocation8 + $0x890] sm:$0xff] }
 0x33e   :  { %6493 = vmatpush2.bf16.msra.mxu1 %v15439_v19  ;;  %v15265_v19 = vcombine.low %v3365_v39, %v3369_v47  ;;  %v3345_v9 = vld [vmem:[#allocation8 + $0x8b0] sm:$0xff] }
 0x33f   :  { %6536 = vmatpush2.bf16.msra.mxu0 %v15049_v2  ;;  %6494 = vmatprep.subr.bf16.mxu1 %v15432_v3  ;;  %v15138_v2 = vcombine.high %v3237_v18, %v3241_v60  ;;  %v3217_v27 = vld [vmem:[#allocation8 + $0x4b0] sm:$0xff] }
 0x340   :  { %6537 = vmatprep.subr.bf16.mxu0 %v15042_v4  ;;  %v15258_v4 = vcombine.high %v3357_v62, %v3361_v1  ;;  %v3333_v34 = vld [vmem:[#allocation8 + $0x850] sm:$0xff] }
 0x341   :  { %v3337_v29 = vld [vmem:[#allocation8 + $0x870] sm:$0xff] }
 0x342   :  { %6495 = vmatpush2.bf16.msra.mxu1 %v15431_v48  ;;  %v15257_v48 = vcombine.low %v3357_v62, %v3361_v1  ;;  %v3209_v36 = vld [vmem:[#allocation8 + $0x470] sm:$0xff] }
 0x343   :  { %6538 = vmatpush2.bf16.msra.mxu0 %v15041_v7  ;;  %6496 = vmatprep.subr.bf16.mxu1 %v15424_v10  ;;  %v15130_v7 = vcombine.high %v3229_v44, %v3233_v6  ;;  %v15250_v10 = vcombine.high %v3349_v55, %v3353_v11  ;;  %v3325_v23 = vld [vmem:[#allocation8 + $0x810] sm:$0xff] }
 0x344   :  { %6539 = vmatprep.subr.bf16.mxu0 %v15034_v12  ;;  %v3221_v12 = vld [vmem:[#allocation8 + $0x4d0] sm:$0xff] }
 0x345   :  { %v15121_v46 = vcombine.low %v3221_v12, %v3225_v20  ;;  %v3329_v39 = vld [vmem:[#allocation8 + $0x830] sm:$0xff] }
 0x346   :  { %6497 = vmatpush2.bf16.msra.mxu1 %v15423_v41  ;;  %v15249_v41 = vcombine.low %v3349_v55, %v3353_v11  ;;  %v15225_v62 = vcombine.low %v3325_v23, %v3329_v39  ;;  %v3309_v11 = vld [vmem:[#allocation8 + $0x790] sm:$0xff] }
 0x347   :  { %6540 = vmatpush2.bf16.msra.mxu0 %v15033_v14  ;;  %6498 = vmatprep.subr.bf16.mxu1 %v15416_v24  ;;  %v15122_v14 = vcombine.high %v3221_v12, %v3225_v20  ;;  %v15242_v24 = vcombine.high %v3341_v8, %v3345_v9 }
 0x348   :  { %6591 = vmatprep.subr.bf16.mxu0 %v15282_v25  ;;  %v3213_v25 = vld [vmem:[#allocation8 + $0x490] sm:$0xff] }
 0x349   :  { %v15113_v47 = vcombine.low %v3213_v25, %v3217_v27 }
 0x34a   :  { %6499 = vmatpush2.bf16.msra.mxu1 %v15415_v31  ;;  %6542 = vmatmul.mubr.bf16.vlgmr.msra.gmra.mxu0 %v17047_v37  ;;  %v6297_v63 = vpop.f32.mrf.mxu0  ;;  %v15241_v31 = vcombine.low %v3341_v8, %v3345_v9  ;;  %v3301_v9 = vld [vmem:[#allocation8 + $0x750] sm:$0xff] }
 0x34b   :  { %v17130_v42 = vadd.f32 %v6297_v63, %v17120_v13  ;;  %6592 = vmatpush1.bf16.msra.mxu0 %v15281_v57  ;;  %6623 = vmatprep.mubr.bf16.mxu0 %v17087_v49  ;;  %v15114_v57 = vcombine.high %v3213_v25, %v3217_v27  ;;  %v15233_v63 = vcombine.low %v3333_v34, %v3337_v29 }
 0x34c   :  { %6550 = vmatprep.subr.bf16.mxu1 %v15154_v35  ;;  %v6299_v51 = vpop.f32.mrf.mxu0  ;;  %6593 = vmatprep.subr.bf16.mxu0 %v15274_v16  ;;  %v15234_v35 = vcombine.high %v3333_v34, %v3337_v29  ;;  %v3205_v16 = vld [vmem:[#allocation8 + $0x450] sm:$0xff] }
 0x34d   :  { %6501 = vmatmul.mubr.bf16.vlgmr.msra.gmra.mxu1 %v17109_v52  ;;  %v17135_v61 = vadd.f32 %v6299_v51, %v17122_v28  ;;  %v15137_v28 = vcombine.low %v3237_v18, %v3241_v60  ;;  %v3201_v51 = vld [vmem:[#allocation8 + $0x430] sm:$0xff]  ;;  %v15105_v60 = vcombine.low %v3205_v16, %v3209_v36 }
 0x34e   :  { %6551 = vmatpush1.bf16.msra.mxu1 %v15153_v5  ;;  %6582 = vmatprep.mubr.bf16.mxu1 %v17032_v32  ;;  %v6301_v13 = vpop.f32.mrf.mxu0  ;;  %v15106_v5 = vcombine.high %v3205_v16, %v3209_v36  ;;  %v3449_v18 = vld [vmem:[#allocation8 + $0xbf0] sm:$0xff] }
 0x34f   :  { %6594 = vmatpush1.bf16.msra.mxu0 %v15273_v40  ;;  %6552 = vmatprep.subr.bf16.mxu1 %v15146_v45  ;;  %v15226_v40 = vcombine.high %v3325_v23, %v3329_v39  ;;  %v3197_v45 = vld [vmem:[#allocation8 + $0x410] sm:$0xff] }
 0x350   :  { %v6302_v3 = vpop.f32.mrf.mxu0  ;;  %6595 = vmatprep.subr.bf16.mxu0 %v15266_v58  ;;  %v3445_v58 = vld [vmem:[#allocation8 + $0xbd0] sm:$0xff]  ;;  %v15098_v1 = vcombine.high %v3197_v45, %v3201_v51 }
 0x351   :  { %v15346_v13 = vcombine.high %v3445_v58, %v3449_v18  ;;  %v3441_v3 = vld [vmem:[#allocation8 + $0xbb0] sm:$0xff]  ;;  %v15345_v44 = vcombine.low %v3445_v58, %v3449_v18 }
 0x352   :  { %6553 = vmatpush1.bf16.msra.mxu1 %v15145_v33  ;;  %v3317_v33 = vld [vmem:[#allocation8 + $0x7d0] sm:$0xff] }
 0x353   :  { %6596 = vmatpush1.bf16.msra.mxu0 %v15265_v19  ;;  %6554 = vmatprep.subr.bf16.mxu1 %v15138_v2  ;;  %v3321_v19 = vld [vmem:[#allocation8 + $0x7f0] sm:$0xff] }
 0x354   :  { %6597 = vmatprep.subr.bf16.mxu0 %v15258_v4  ;;  %v3437_v2 = vld [vmem:[#allocation8 + $0xb90] sm:$0xff]  ;;  %v15097_v4 = vcombine.low %v3197_v45, %v3201_v51  ;;  %v15218_v6 = vcombine.high %v3317_v33, %v3321_v19 }
 0x355   :  { %v15338_v55 = vcombine.high %v3437_v2, %v3441_v3  ;;  %v15337_v12 = vcombine.low %v3437_v2, %v3441_v3  ;;  %v3293_v29 = vld [vmem:[#allocation8 + $0x710] sm:$0xff] }
 0x356   :  { %6555 = vmatpush1.bf16.msra.mxu1 %v15137_v28  ;;  %v3313_v28 = vld [vmem:[#allocation8 + $0x7b0] sm:$0xff] }
 0x357   :  { %6598 = vmatpush1.bf16.msra.mxu0 %v15257_v48  ;;  %6556 = vmatprep.subr.bf16.mxu1 %v15130_v7  ;;  %v3429_v48 = vld [vmem:[#allocation8 + $0xb50] sm:$0xff]  ;;  %v15210_v20 = vcombine.high %v3309_v11, %v3313_v28 }
 0x358   :  { %6599 = vmatprep.subr.bf16.mxu0 %v15250_v10  ;;  %v3433_v7 = vld [vmem:[#allocation8 + $0xb70] sm:$0xff]  ;;  %v15217_v10 = vcombine.low %v3317_v33, %v3321_v19 }
 0x359   :  { %v15330_v8 = vcombine.high %v3429_v48, %v3433_v7  ;;  %v15329_v25 = vcombine.low %v3429_v48, %v3433_v7  ;;  %v3285_v39 = vld [vmem:[#allocation8 + $0x6d0] sm:$0xff] }
 0x35a   :  { %6557 = vmatpush1.bf16.msra.mxu1 %v15129_v59  ;;  %v3305_v59 = vld [vmem:[#allocation8 + $0x770] sm:$0xff] }
 0x35b   :  { %6600 = vmatpush1.bf16.msra.mxu0 %v15249_v41  ;;  %6558 = vmatprep.subr.bf16.mxu1 %v15122_v14  ;;  %v3421_v41 = vld [vmem:[#allocation8 + $0xb10] sm:$0xff]  ;;  %v15202_v27 = vcombine.high %v3301_v9, %v3305_v59 }
 0x35c   :  { %6601 = vmatprep.subr.bf16.mxu0 %v15242_v24  ;;  %v3425_v14 = vld [vmem:[#allocation8 + $0xb30] sm:$0xff]  ;;  %v15209_v24 = vcombine.low %v3309_v11, %v3313_v28 }
 0x35d   :  { %v15322_v34 = vcombine.high %v3421_v41, %v3425_v14  ;;  %v15321_v16 = vcombine.low %v3421_v41, %v3425_v14  ;;  %v3277_v18 = vld [vmem:[#allocation8 + $0x690] sm:$0xff] }
 0x35e   :  { %6559 = vmatpush1.bf16.msra.mxu1 %v15121_v46  ;;  %v3297_v46 = vld [vmem:[#allocation8 + $0x730] sm:$0xff] }
 0x35f   :  { %6602 = vmatpush1.bf16.msra.mxu0 %v15241_v31  ;;  %6560 = vmatprep.subr.bf16.mxu1 %v15114_v57  ;;  %v3413_v31 = vld [vmem:[#allocation8 + $0xad0] sm:$0xff]  ;;  %v15194_v36 = vcombine.high %v3293_v29, %v3297_v46 }
 0x360   :  { %6603 = vmatprep.subr.bf16.mxu0 %v15234_v35  ;;  %v3417_v57 = vld [vmem:[#allocation8 + $0xaf0] sm:$0xff]  ;;  %v15201_v35 = vcombine.low %v3301_v9, %v3305_v59 }
 0x361   :  { %v15314_v23 = vcombine.high %v3413_v31, %v3417_v57  ;;  %v15313_v45 = vcombine.low %v3413_v31, %v3417_v57  ;;  %v3269_v3 = vld [vmem:[#allocation8 + $0x650] sm:$0xff] }
 0x362   :  { %6561 = vmatpush1.bf16.msra.mxu1 %v15113_v47  ;;  %v3289_v47 = vld [vmem:[#allocation8 + $0x6f0] sm:$0xff] }
 0x363   :  { %6604 = vmatpush1.bf16.msra.mxu0 %v15233_v63  ;;  %6562 = vmatprep.subr.bf16.mxu1 %v15106_v5  ;;  %v3405_v63 = vld [vmem:[#allocation8 + $0xa90] sm:$0xff]  ;;  %v15186_v51 = vcombine.high %v3285_v39, %v3289_v47 }
 0x364   :  { %6605 = vmatprep.subr.bf16.mxu0 %v15226_v40  ;;  %v3409_v5 = vld [vmem:[#allocation8 + $0xab0] sm:$0xff]  ;;  %v15193_v40 = vcombine.low %v3293_v29, %v3297_v46 }
 0x365   :  { %v15306_v58 = vcombine.high %v3405_v63, %v3409_v5  ;;  %v15305_v33 = vcombine.low %v3405_v63, %v3409_v5  ;;  %v3261_v7 = vld [vmem:[#allocation8 + $0x610] sm:$0xff] }
 0x366   :  { %6563 = vmatpush1.bf16.msra.mxu1 %v15105_v60  ;;  %v3281_v60 = vld [vmem:[#allocation8 + $0x6b0] sm:$0xff] }
 0x367   :  { %6606 = vmatpush1.bf16.msra.mxu0 %v15225_v62  ;;  %6564 = vmatprep.subr.bf16.mxu1 %v15098_v1  ;;  %v3397_v62 = vld [vmem:[#allocation8 + $0xa50] sm:$0xff]  ;;  %v15178_v19 = vcombine.high %v3277_v18, %v3281_v60 }
 0x368   :  { %6607 = vmatprep.subr.bf16.mxu0 %v15346_v13  ;;  %v3401_v1 = vld [vmem:[#allocation8 + $0xa70] sm:$0xff]  ;;  %v15185_v13 = vcombine.low %v3285_v39, %v3289_v47 }
 0x369   :  { %v15298_v2 = vcombine.high %v3397_v62, %v3401_v1  ;;  %v15297_v11 = vcombine.low %v3397_v62, %v3401_v1  ;;  %v3509_v14 = vld [vmem:[#allocation8 + $0xdd0] sm:$0xff] }
 0x36a   :  { %6565 = vmatpush1.bf16.msra.mxu1 %v15097_v4  ;;  %v3273_v4 = vld [vmem:[#allocation8 + $0x670] sm:$0xff] }
 0x36b   :  { %6608 = vmatpush2.bf16.msra.mxu0 %v15345_v44  ;;  %6566 = vmatprep.subr.bf16.mxu1 %v15218_v6  ;;  %v3389_v44 = vld [vmem:[#allocation8 + $0xa10] sm:$0xff]  ;;  %v15170_v28 = vcombine.high %v3269_v3, %v3273_v4 }
 0x36c   :  { %6609 = vmatprep.subr.bf16.mxu0 %v15338_v55  ;;  %v3393_v6 = vld [vmem:[#allocation8 + $0xa30] sm:$0xff]  ;;  %v15177_v55 = vcombine.low %v3277_v18, %v3281_v60  ;;  %v3102_v18 = vld [vmem:[#allocation8 + $0x118] sm:$0xff] }
 0x36d   :  { %v15290_v48 = vcombine.high %v3389_v44, %v3393_v6  ;;  %v15289_v9 = vcombine.low %v3389_v44, %v3393_v6  ;;  %v3501_v57 = vld [vmem:[#allocation8 + $0xd90] sm:$0xff]  ;;  %v3106_v60 = vld [vmem:[#allocation8 + $0x138] sm:$0xff] }
 0x36e   :  { %6567 = vmatpush2.bf16.msra.mxu1 %v15217_v10  ;;  %v3265_v10 = vld [vmem:[#allocation8 + $0x630] sm:$0xff] }
 0x36f   :  { %6610 = vmatpush2.bf16.msra.mxu0 %v15337_v12  ;;  %6568 = vmatprep.subr.bf16.mxu1 %v15210_v20  ;;  %v3126_v12 = vld [vmem:[#allocation8 + $0x1d8] sm:$0xff]  ;;  %v15162_v59 = vcombine.high %v3261_v7, %v3265_v10  ;;  %v3485_v44 = vld [vmem:[#allocation8 + $0xd10] sm:$0xff] }
 0x370   :  { %6611 = vmatprep.subr.bf16.mxu0 %v15330_v8  ;;  %v3130_v20 = vld [vmem:[#allocation8 + $0x1f8] sm:$0xff]  ;;  %v15169_v8 = vcombine.low %v3269_v3, %v3273_v4  ;;  %v15004_v4 = vcombine.high %v3102_v18, %v3106_v60  ;;  %v3489_v6 = vld [vmem:[#allocation8 + $0xd30] sm:$0xff] }
 0x371   :  { %v15028_v41 = vcombine.high %v3126_v12, %v3130_v20  ;;  %v15027_v29 = vcombine.low %v3126_v12, %v3130_v20  ;;  %v3477_v20 = vld [vmem:[#allocation8 + $0xcd0] sm:$0xff] }
 0x372   :  { %6569 = vmatpush2.bf16.msra.mxu1 %v15209_v24  ;;  %v3513_v24 = vld [vmem:[#allocation8 + $0xdf0] sm:$0xff] }
 0x373   :  { %6612 = vmatpush2.bf16.msra.mxu0 %v15329_v25  ;;  %6570 = vmatprep.subr.bf16.mxu1 %v15202_v27  ;;  %v3118_v25 = vld [vmem:[#allocation8 + $0x198] sm:$0xff]  ;;  %v15410_v46 = vcombine.high %v3509_v14, %v3513_v24  ;;  %v15409_v39 = vcombine.low %v3509_v14, %v3513_v24 }
 0x374   :  { %6613 = vmatprep.subr.bf16.mxu0 %v15322_v34  ;;  %v3122_v27 = vld [vmem:[#allocation8 + $0x1b8] sm:$0xff]  ;;  %v15161_v34 = vcombine.low %v3261_v7, %v3265_v10  ;;  %v15003_v7 = vcombine.low %v3102_v18, %v3106_v60  ;;  %v15386_v10 = vcombine.high %v3485_v44, %v3489_v6  ;;  %v3457_v18 = vld [vmem:[#allocation8 + $0xc30] sm:$0xff] }
 0x375   :  { %v15020_v31 = vcombine.high %v3118_v25, %v3122_v27  ;;  %v15019_v47 = vcombine.low %v3118_v25, %v3122_v27  ;;  %v3469_v25 = vld [vmem:[#allocation8 + $0xc90] sm:$0xff]  ;;  %v3190_v60 = vld [vmem:[#allocation8 + $0x3d8] sm:$0xff] }
 0x376   :  { %6571 = vmatpush2.bf16.msra.mxu1 %v15201_v35  ;;  %v3505_v35 = vld [vmem:[#allocation8 + $0xdb0] sm:$0xff] }
 0x377   :  { %6614 = vmatpush2.bf16.msra.mxu0 %v15321_v16  ;;  %6572 = vmatprep.subr.bf16.mxu1 %v15194_v36  ;;  %v3110_v16 = vld [vmem:[#allocation8 + $0x158] sm:$0xff]  ;;  %v15402_v63 = vcombine.high %v3501_v57, %v3505_v35  ;;  %v15401_v1 = vcombine.low %v3501_v57, %v3505_v35  ;;  %v3473_v27 = vld [vmem:[#allocation8 + $0xcb0] sm:$0xff] }
 0x378   :  { %6615 = vmatprep.subr.bf16.mxu0 %v15314_v23  ;;  %v3114_v36 = vld [vmem:[#allocation8 + $0x178] sm:$0xff]  ;;  %v15370_v57 = vcombine.high %v3469_v25, %v3473_v27 }
 0x37a   :  { %6573 = vmatpush2.bf16.msra.mxu1 %v15193_v40  ;;  %v15012_v40 = vcombine.high %v3110_v16, %v3114_v36 }
 0x37b   :  { %6616 = vmatpush2.bf16.msra.mxu0 %v15313_v45  ;;  %6574 = vmatprep.subr.bf16.mxu1 %v15186_v51  ;;  %v3493_v45 = vld [vmem:[#allocation8 + $0xd50] sm:$0xff] }
 0x37c   :  { %6617 = vmatprep.subr.bf16.mxu0 %v15306_v58  ;;  %v3497_v51 = vld [vmem:[#allocation8 + $0xd70] sm:$0xff] }
 0x37e   :  { %6575 = vmatpush2.bf16.msra.mxu1 %v15185_v13 }
 0x37f   :  { %6618 = vmatpush2.bf16.msra.mxu0 %v15305_v33  ;;  %6576 = vmatprep.subr.bf16.mxu1 %v15178_v19  ;;  %v15011_v33 = vcombine.low %v3110_v16, %v3114_v36  ;;  %v15394_v19 = vcombine.high %v3493_v45, %v3497_v51  ;;  %v3461_v16 = vld [vmem:[#allocation8 + $0xc50] sm:$0xff] }
 0x380   :  { %6619 = vmatprep.subr.bf16.mxu0 %v15298_v2  ;;  %v3465_v36 = vld [vmem:[#allocation8 + $0xc70] sm:$0xff] }
 0x382   :  { %6577 = vmatpush2.bf16.msra.mxu1 %v15177_v55  ;;  %v3094_v55 = vld [vmem:[#allocation8 + $0xd8] sm:$0xff] }
 0x383   :  { %6620 = vmatpush2.bf16.msra.mxu0 %v15297_v11  ;;  %6578 = vmatprep.subr.bf16.mxu1 %v15170_v28  ;;  %v3098_v11 = vld [vmem:[#allocation8 + $0xf8] sm:$0xff]  ;;  %v15393_v28 = vcombine.low %v3493_v45, %v3497_v51  ;;  %v15362_v45 = vcombine.high %v3461_v16, %v3465_v36 }
 0x384   :  { %6621 = vmatprep.subr.bf16.mxu0 %v15290_v48  ;;  %v14996_v12 = vcombine.high %v3094_v55, %v3098_v11 }
 0x386   :  { %6579 = vmatpush2.bf16.msra.mxu1 %v15169_v8  ;;  %v3086_v8 = vld [vmem:[#allocation8 + $0x98] sm:$0xff] }
 0x387   :  { %6622 = vmatpush2.bf16.msra.mxu0 %v15289_v9  ;;  %6580 = vmatprep.subr.bf16.mxu1 %v15162_v59  ;;  %v3090_v9 = vld [vmem:[#allocation8 + $0xb8] sm:$0xff]  ;;  %v15385_v59 = vcombine.low %v3485_v44, %v3489_v6 }
 0x388   :  { %6673 = vmatprep.subr.bf16.mxu0 %v15028_v41  ;;  %v14995_v41 = vcombine.low %v3094_v55, %v3098_v11  ;;  %v14988_v24 = vcombine.high %v3086_v8, %v3090_v9  ;;  %v3182_v44 = vld [vmem:[#allocation8 + $0x398] sm:$0xff] }
 0x389   :  { %v3186_v6 = vld [vmem:[#allocation8 + $0x3b8] sm:$0xff] }
 0x38a   :  { %6581 = vmatpush2.bf16.msra.mxu1 %v15161_v34  ;;  %v17138_v23 = vpop.f32.mrf.mxu0  ;;  %6624 = vmatmul.mubr.bf16.vlgmr.msra.gmra.mxu0 %v17089_v50  ;;  %v3078_v34 = vld [vmem:[#allocation8 + $0x58] sm:$0xff] }
 0x38b   :  { %6674 = vmatpush1.bf16.msra.mxu0 %v15027_v29  ;;  %6705 = vmatprep.mubr.bf16.mxu0 %v17022_v54  ;;  %v3082_v29 = vld [vmem:[#allocation8 + $0x78] sm:$0xff] }
 0x38c   :  { %v17142_v5 = vpop.f32.mrf.mxu0  ;;  %6632 = vmatprep.subr.bf16.mxu1 %v15410_v46  ;;  %6675 = vmatprep.subr.bf16.mxu0 %v15020_v31  ;;  %v14987_v31 = vcombine.low %v3086_v8, %v3090_v9  ;;  %v14980_v35 = vcombine.high %v3078_v34, %v3082_v29 }
 0x38d   :  { %6583 = vmatmul.mubr.bf16.vlgmr.msra.gmra.mxu1 %v17049_v17  ;;  %v6338_v58 = vpop.f32.mrf.mxu1 }
 0x38e   :  { %v17146_v62 = vadd.f32 %v6338_v58, %v17130_v42  ;;  %6633 = vmatpush1.bf16.msra.mxu1 %v15409_v39  ;;  %6664 = vmatprep.mubr.bf16.mxu1 %v17106_v43  ;;  %v6383_v54 = vpop.f32.mrf.mxu0  ;;  %v3070_v39 = vld [vmem:[#allocation8 + $0x18] sm:$0xff]  ;;  %v3453_v58 = vld [vmem:[#allocation8 + $0xc10] sm:$0xff] }
 0x38f   :  { %v6340_v13 = vpop.f32.mrf.mxu1  ;;  %6676 = vmatpush1.bf16.msra.mxu0 %v15019_v47  ;;  %6634 = vmatprep.subr.bf16.mxu1 %v15402_v63  ;;  %v3074_v47 = vld [vmem:[#allocation8 + $0x38] sm:$0xff]  ;;  %v15369_v63 = vcombine.low %v3469_v25, %v3473_v27 }
 0x390   :  { %v17150_v2 = vadd.f32 %v6340_v13, %v17135_v61  ;;  %v6384_v3 = vpop.f32.mrf.mxu0  ;;  %6677 = vmatprep.subr.bf16.mxu0 %v15012_v40  ;;  %v3481_v61 = vld [vmem:[#allocation8 + $0xcf0] sm:$0xff]  ;;  %v14979_v40 = vcombine.low %v3078_v34, %v3082_v29  ;;  %v14972_v51 = vcombine.high %v3070_v39, %v3074_v47  ;;  %v3194_v54 = vld [vmem:[#allocation8 + $0x3f8] sm:$0xff]  ;;  %v14971_v13 = vcombine.low %v3070_v39, %v3074_v47 }
 0x391   :  { %v6342_v42 = vpop.f32.mrf.mxu1  ;;  %v15378_v14 = vcombine.high %v3477_v20, %v3481_v61  ;;  %v15377_v46 = vcombine.low %v3477_v20, %v3481_v61  ;;  %v3573_v3 = vld [vmem:[#allocation8 + $0xfd0] sm:$0xff]  ;;  %v15091_v55 = vcombine.low %v3190_v60, %v3194_v54  ;;  %v15083_v61 = vcombine.low %v3182_v44, %v3186_v6 }
 0x392   :  { %6635 = vmatpush1.bf16.msra.mxu1 %v15401_v1  ;;  %v15361_v1 = vcombine.low %v3461_v16, %v3465_v36  ;;  %v15353_v42 = vcombine.low %v3453_v58, %v3457_v18 }
 0x393   :  { %v6343_v48 = vpop.f32.mrf.mxu1  ;;  %6678 = vmatpush1.bf16.msra.mxu0 %v15011_v33  ;;  %6636 = vmatprep.subr.bf16.mxu1 %v15394_v19  ;;  %v15354_v33 = vcombine.high %v3453_v58, %v3457_v18  ;;  %v15092_v19 = vcombine.high %v3190_v60, %v3194_v54 }
 0x394   :  { %6679 = vmatprep.subr.bf16.mxu0 %v15004_v4  ;;  %v3577_v4 = vld [vmem:[#allocation8 + $0xff0] sm:$0xff] }
 0x395   :  { %v15474_v11 = vcombine.high %v3573_v3, %v3577_v4  ;;  %v3565_v48 = vld [vmem:[#allocation8 + $0xf90] sm:$0xff]  ;;  %v15473_v20 = vcombine.low %v3573_v3, %v3577_v4 }
 0x396   :  { %6637 = vmatpush1.bf16.msra.mxu1 %v15393_v28  ;;  %v15084_v28 = vcombine.high %v3182_v44, %v3186_v6 }
 0x397   :  { %6680 = vmatpush1.bf16.msra.mxu0 %v15003_v7  ;;  %6638 = vmatprep.subr.bf16.mxu1 %v15386_v10  ;;  %v3569_v7 = vld [vmem:[#allocation8 + $0xfb0] sm:$0xff]  ;;  %v3174_v10 = vld [vmem:[#allocation8 + $0x358] sm:$0xff] }
 0x398   :  { %6681 = vmatprep.subr.bf16.mxu0 %v14996_v12  ;;  %v3178_v12 = vld [vmem:[#allocation8 + $0x378] sm:$0xff]  ;;  %v15466_v8 = vcombine.high %v3565_v48, %v3569_v7  ;;  %v15465_v25 = vcombine.low %v3565_v48, %v3569_v7 }
 0x399   :  { %v15076_v9 = vcombine.high %v3174_v10, %v3178_v12  ;;  %v15075_v27 = vcombine.low %v3174_v10, %v3178_v12 }
 0x39a   :  { %6639 = vmatpush1.bf16.msra.mxu1 %v15385_v59  ;;  %v3557_v59 = vld [vmem:[#allocation8 + $0xf50] sm:$0xff] }
 0x39b   :  { %6682 = vmatpush1.bf16.msra.mxu0 %v14995_v41  ;;  %6640 = vmatprep.subr.bf16.mxu1 %v15378_v14  ;;  %v3561_v41 = vld [vmem:[#allocation8 + $0xf70] sm:$0xff]  ;;  %v3166_v14 = vld [vmem:[#allocation8 + $0x318] sm:$0xff] }
 0x39c   :  { %6683 = vmatprep.subr.bf16.mxu0 %v14988_v24  ;;  %v3170_v24 = vld [vmem:[#allocation8 + $0x338] sm:$0xff]  ;;  %v15458_v34 = vcombine.high %v3557_v59, %v3561_v41  ;;  %v15457_v16 = vcombine.low %v3557_v59, %v3561_v41 }
 0x39d   :  { %v15068_v29 = vcombine.high %v3166_v14, %v3170_v24  ;;  %v15067_v36 = vcombine.low %v3166_v14, %v3170_v24 }
 0x39e   :  { %6641 = vmatpush1.bf16.msra.mxu1 %v15377_v46  ;;  %v3549_v46 = vld [vmem:[#allocation8 + $0xf10] sm:$0xff] }
 0x39f   :  { %6684 = vmatpush1.bf16.msra.mxu0 %v14987_v31  ;;  %6642 = vmatprep.subr.bf16.mxu1 %v15370_v57  ;;  %v3553_v31 = vld [vmem:[#allocation8 + $0xf30] sm:$0xff]  ;;  %v3158_v57 = vld [vmem:[#allocation8 + $0x2d8] sm:$0xff] }
 0x3a0   :  { %6685 = vmatprep.subr.bf16.mxu0 %v14980_v35  ;;  %v3162_v35 = vld [vmem:[#allocation8 + $0x2f8] sm:$0xff]  ;;  %v15450_v39 = vcombine.high %v3549_v46, %v3553_v31  ;;  %v15449_v58 = vcombine.low %v3549_v46, %v3553_v31 }
 0x3a1   :  { %v15060_v47 = vcombine.high %v3158_v57, %v3162_v35  ;;  %v15059_v18 = vcombine.low %v3158_v57, %v3162_v35  ;;  %v17152_v57 = vld [vmem:[#allocation10] sm:$0xff] }
 0x3a2   :  { %6643 = vmatpush1.bf16.msra.mxu1 %v15369_v63  ;;  %v3541_v63 = vld [vmem:[#allocation8 + $0xed0] sm:$0xff]  ;;  %v3592_v35 = vrot.slane %v17152_v57, %v17036_v30 }
 0x3a3   :  { %6686 = vmatpush1.bf16.msra.mxu0 %v14979_v40  ;;  %6644 = vmatprep.subr.bf16.mxu1 %v15362_v45  ;;  %v3545_v40 = vld [vmem:[#allocation8 + $0xef0] sm:$0xff]  ;;  %v3150_v45 = vld [vmem:[#allocation8 + $0x298] sm:$0xff] }
 0x3a4   :  { %6687 = vmatprep.subr.bf16.mxu0 %v14972_v51  ;;  %v3154_v51 = vld [vmem:[#allocation8 + $0x2b8] sm:$0xff]  ;;  %v15442_v60 = vcombine.high %v3541_v63, %v3545_v40  ;;  %v15441_v3 = vcombine.low %v3541_v63, %v3545_v40 }
 0x3a5   :  { %v15052_v54 = vcombine.high %v3150_v45, %v3154_v51  ;;  %v15051_v4 = vcombine.low %v3150_v45, %v3154_v51  ;;  %v3366_v63 = vld [vmem:[#allocation8 + $0x958] sm:$0xff]  ;;  %v3596_v45 = vrot.slane %v17152_v57, %v17018_v38 }
 0x3a6   :  { %6645 = vmatpush1.bf16.msra.mxu1 %v15361_v1  ;;  %v3533_v1 = vld [vmem:[#allocation8 + $0xe90] sm:$0xff]  ;;  %v3370_v40 = vld [vmem:[#allocation8 + $0x978] sm:$0xff] }
 0x3a7   :  { %6688 = vmatpush1.bf16.msra.mxu0 %v14971_v13  ;;  %6646 = vmatprep.subr.bf16.mxu1 %v15354_v33  ;;  %v3537_v13 = vld [vmem:[#allocation8 + $0xeb0] sm:$0xff]  ;;  %v3142_v33 = vld [vmem:[#allocation8 + $0x258] sm:$0xff] }
 0x3a8   :  { %6689 = vmatprep.subr.bf16.mxu0 %v15092_v19  ;;  %v3146_v19 = vld [vmem:[#allocation8 + $0x278] sm:$0xff]  ;;  %v15434_v44 = vcombine.high %v3533_v1, %v3537_v13  ;;  %v15433_v48 = vcombine.low %v3533_v1, %v3537_v13  ;;  %v15268_v13 = vcombine.high %v3366_v63, %v3370_v40 }
 0x3a9   :  { %v15044_v6 = vcombine.high %v3142_v33, %v3146_v19  ;;  %v15043_v7 = vcombine.low %v3142_v33, %v3146_v19  ;;  %v3238_v33 = vld [vmem:[#allocation8 + $0x558] sm:$0xff] }
 0x3aa   :  { %6647 = vmatpush1.bf16.msra.mxu1 %v15353_v42  ;;  %v3525_v42 = vld [vmem:[#allocation8 + $0xe50] sm:$0xff]  ;;  %v3242_v19 = vld [vmem:[#allocation8 + $0x578] sm:$0xff] }
 0x3ab   :  { %6690 = vmatpush2.bf16.msra.mxu0 %v15091_v55  ;;  %6648 = vmatprep.subr.bf16.mxu1 %v15474_v11  ;;  %v3529_v55 = vld [vmem:[#allocation8 + $0xe70] sm:$0xff]  ;;  %v3134_v11 = vld [vmem:[#allocation8 + $0x218] sm:$0xff] }
 0x3ac   :  { %6691 = vmatprep.subr.bf16.mxu0 %v15084_v28  ;;  %v3138_v28 = vld [vmem:[#allocation8 + $0x238] sm:$0xff]  ;;  %v15426_v10 = vcombine.high %v3525_v42, %v3529_v55  ;;  %v15425_v59 = vcombine.low %v3525_v42, %v3529_v55  ;;  %v15267_v55 = vcombine.low %v3366_v63, %v3370_v40 }
 0x3ad   :  { %v15036_v12 = vcombine.high %v3134_v11, %v3138_v28  ;;  %v15035_v41 = vcombine.low %v3134_v11, %v3138_v28  ;;  %v15140_v11 = vcombine.high %v3238_v33, %v3242_v19  ;;  %v3338_v63 = vld [vmem:[#allocation8 + $0x878] sm:$0xff] }
 0x3ae   :  { %6649 = vmatpush2.bf16.msra.mxu1 %v15473_v20  ;;  %v3517_v20 = vld [vmem:[#allocation8 + $0xe10] sm:$0xff] }
 0x3af   :  { %6692 = vmatpush2.bf16.msra.mxu0 %v15083_v61  ;;  %6650 = vmatprep.subr.bf16.mxu1 %v15466_v8  ;;  %v3521_v61 = vld [vmem:[#allocation8 + $0xe30] sm:$0xff]  ;;  %v3382_v8 = vld [vmem:[#allocation8 + $0x9d8] sm:$0xff] }
 0x3b0   :  { %6693 = vmatprep.subr.bf16.mxu0 %v15076_v9  ;;  %v3386_v9 = vld [vmem:[#allocation8 + $0x9f8] sm:$0xff]  ;;  %v15418_v14 = vcombine.high %v3517_v20, %v3521_v61  ;;  %v15417_v46 = vcombine.low %v3517_v20, %v3521_v61 }
 0x3b1   :  { %v15284_v24 = vcombine.high %v3382_v8, %v3386_v9  ;;  %v15283_v31 = vcombine.low %v3382_v8, %v3386_v9  ;;  %v3350_v61 = vld [vmem:[#allocation8 + $0x8d8] sm:$0xff] }
 0x3b2   :  { %6651 = vmatpush2.bf16.msra.mxu1 %v15465_v25  ;;  %v3254_v25 = vld [vmem:[#allocation8 + $0x5d8] sm:$0xff] }
 0x3b3   :  { %6694 = vmatpush2.bf16.msra.mxu0 %v15075_v27  ;;  %6652 = vmatprep.subr.bf16.mxu1 %v15458_v34  ;;  %v3258_v27 = vld [vmem:[#allocation8 + $0x5f8] sm:$0xff] }
 0x3b4   :  { %6695 = vmatprep.subr.bf16.mxu0 %v15068_v29  ;;  %v3374_v34 = vld [vmem:[#allocation8 + $0x998] sm:$0xff] }
 0x3b5   :  { %v3378_v29 = vld [vmem:[#allocation8 + $0x9b8] sm:$0xff] }
 0x3b6   :  { %6653 = vmatpush2.bf16.msra.mxu1 %v15457_v16  ;;  %v15156_v16 = vcombine.high %v3254_v25, %v3258_v27  ;;  %v3354_v8 = vld [vmem:[#allocation8 + $0x8f8] sm:$0xff] }
 0x3b7   :  { %6696 = vmatpush2.bf16.msra.mxu0 %v15067_v36  ;;  %6654 = vmatprep.subr.bf16.mxu1 %v15450_v39  ;;  %v15276_v36 = vcombine.high %v3374_v34, %v3378_v29  ;;  %v3246_v39 = vld [vmem:[#allocation8 + $0x598] sm:$0xff] }
 0x3b8   :  { %6697 = vmatprep.subr.bf16.mxu0 %v15060_v47  ;;  %v3250_v47 = vld [vmem:[#allocation8 + $0x5b8] sm:$0xff] }
 0x3b9   :  { %v15147_v42 = vcombine.low %v3246_v39, %v3250_v47 }
 0x3ba   :  { %6655 = vmatpush2.bf16.msra.mxu1 %v15449_v58  ;;  %v15155_v58 = vcombine.low %v3254_v25, %v3258_v27  ;;  %v3222_v25 = vld [vmem:[#allocation8 + $0x4d8] sm:$0xff] }
 0x3bb   :  { %6698 = vmatpush2.bf16.msra.mxu0 %v15059_v18  ;;  %6656 = vmatprep.subr.bf16.mxu1 %v15442_v60  ;;  %v15275_v18 = vcombine.low %v3374_v34, %v3378_v29  ;;  %v15148_v60 = vcombine.high %v3246_v39, %v3250_v47  ;;  %v3226_v27 = vld [vmem:[#allocation8 + $0x4f8] sm:$0xff] }
 0x3bc   :  { %6699 = vmatprep.subr.bf16.mxu0 %v15052_v54  ;;  %v6380_v54 = vadd.f32 %v17138_v23, %v3592_v35  ;;  %v3342_v34 = vld [vmem:[#allocation8 + $0x898] sm:$0xff]  ;;  %v15124_v35 = vcombine.high %v3222_v25, %v3226_v27  ;;  %v15123_v40 = vcombine.low %v3222_v25, %v3226_v27 }
 0x3bd   :  { %v3346_v29 = vld [vmem:[#allocation8 + $0x8b8] sm:$0xff] }
 0x3be   :  { %6657 = vmatpush2.bf16.msra.mxu1 %v15441_v3  ;;  %v3218_v39 = vld [vmem:[#allocation8 + $0x4b8] sm:$0xff] }
 0x3bf   :  { %6700 = vmatpush2.bf16.msra.mxu0 %v15051_v4  ;;  %6658 = vmatprep.subr.bf16.mxu1 %v15434_v44  ;;  %v3358_v4 = vld [vmem:[#allocation8 + $0x918] sm:$0xff] }
 0x3c0   :  { %6701 = vmatprep.subr.bf16.mxu0 %v15044_v6  ;;  %v3362_v44 = vld [vmem:[#allocation8 + $0x938] sm:$0xff] }
 0x3c1   :  { %v3334_v47 = vld [vmem:[#allocation8 + $0x858] sm:$0xff] }
 0x3c2   :  { %6659 = vmatpush2.bf16.msra.mxu1 %v15433_v48 }
 0x3c3   :  { %6702 = vmatpush2.bf16.msra.mxu0 %v15043_v7  ;;  %6660 = vmatprep.subr.bf16.mxu1 %v15426_v10  ;;  %v15260_v7 = vcombine.high %v3358_v4, %v3362_v44  ;;  %v3230_v10 = vld [vmem:[#allocation8 + $0x518] sm:$0xff] }
 0x3c4   :  { %6703 = vmatprep.subr.bf16.mxu0 %v15036_v12  ;;  %v3234_v12 = vld [vmem:[#allocation8 + $0x538] sm:$0xff] }
 0x3c6   :  { %6661 = vmatpush2.bf16.msra.mxu1 %v15425_v59 }
 0x3c7   :  { %6704 = vmatpush2.bf16.msra.mxu0 %v15035_v41  ;;  %6662 = vmatprep.subr.bf16.mxu1 %v15418_v14  ;;  %v15259_v41 = vcombine.low %v3358_v4, %v3362_v44  ;;  %v15132_v14 = vcombine.high %v3230_v10, %v3234_v12  ;;  %v3198_v4 = vld [vmem:[#allocation8 + $0x418] sm:$0xff] }
 0x3c8   :  { %6755 = vmatprep.subr.bf16.mxu0 %v15284_v24  ;;  %v15252_v24 = vcombine.high %v3350_v61, %v3354_v8  ;;  %v3202_v44 = vld [vmem:[#allocation8 + $0x438] sm:$0xff] }
 0x3ca   :  { %6663 = vmatpush2.bf16.msra.mxu1 %v15417_v46  ;;  %v6461_v51 = vpop.f32.mrf.mxu0  ;;  %6706 = vmatmul.mubr.bf16.vlgmr.msra.gmra.mxu0 %v17047_v37  ;;  %v6382_v37 = vadd.f32 %v17142_v5, %v3596_v45  ;;  %v15131_v46 = vcombine.low %v3230_v10, %v3234_v12  ;;  %v15243_v45 = vcombine.low %v3342_v34, %v3346_v29 }
 0x3cb   :  { %6756 = vmatpush1.bf16.msra.mxu0 %v15283_v31  ;;  %6787 = vmatprep.mubr.bf16.mxu0 %v17087_v49  ;;  %v15251_v31 = vcombine.low %v3350_v61, %v3354_v8  ;;  %v15099_v10 = vcombine.low %v3198_v4, %v3202_v44  ;;  %v3310_v8 = vld [vmem:[#allocation8 + $0x798] sm:$0xff] }
 0x3cc   :  { %v6463_v1 = vpop.f32.mrf.mxu0  ;;  %6714 = vmatprep.subr.bf16.mxu1 %v15156_v16  ;;  %6757 = vmatprep.subr.bf16.mxu0 %v15276_v36  ;;  %v15244_v16 = vcombine.high %v3342_v34, %v3346_v29  ;;  %v3214_v36 = vld [vmem:[#allocation8 + $0x498] sm:$0xff] }
 0x3cd   :  { %v6420_v3 = vpop.f32.mrf.mxu1  ;;  %6665 = vmatmul.mubr.bf16.vlgmr.msra.gmra.mxu1 %v17109_v52  ;;  %v3302_v34 = vld [vmem:[#allocation8 + $0x758] sm:$0xff] }
 0x3ce   :  { %v6421_v6 = vadd.f32 %v6420_v3, %v6380_v54  ;;  %6715 = vmatpush1.bf16.msra.mxu1 %v15155_v58  ;;  %6746 = vmatprep.mubr.bf16.mxu1 %v17032_v32  ;;  %v6465_v49 = vpop.f32.mrf.mxu0  ;;  %v15139_v32 = vcombine.low %v3238_v33, %v3242_v19  ;;  %v15236_v58 = vcombine.high %v3334_v47, %v3338_v63  ;;  %v3326_v54 = vld [vmem:[#allocation8 + $0x818] sm:$0xff] }
 0x3cf   :  { %v6422_v23 = vpop.f32.mrf.mxu1  ;;  %6758 = vmatpush1.bf16.msra.mxu0 %v15275_v18  ;;  %6716 = vmatprep.subr.bf16.mxu1 %v15148_v60  ;;  %v3206_v18 = vld [vmem:[#allocation8 + $0x458] sm:$0xff]  ;;  %v15235_v33 = vcombine.low %v3334_v47, %v3338_v63 }
 0x3d0   :  { %v6423_v28 = vadd.f32 %v6422_v23, %v6382_v37  ;;  %v6466_v48 = vpop.f32.mrf.mxu0  ;;  %6759 = vmatprep.subr.bf16.mxu0 %v15268_v13  ;;  %v17164_v20 = vadd.f32 %v6461_v51, %v6421_v6  ;;  %v15116_v51 = vcombine.high %v3214_v36, %v3218_v39  ;;  %v3210_v60 = vld [vmem:[#allocation8 + $0x478] sm:$0xff]  ;;  %v15115_v13 = vcombine.low %v3214_v36, %v3218_v39 }
 0x3d1   :  { %v6424_v5 = vpop.f32.mrf.mxu1  ;;  %v15108_v19 = vcombine.high %v3206_v18, %v3210_v60  ;;  %v3446_v37 = vld [vmem:[#allocation8 + $0xbd8] sm:$0xff]  ;;  %v15107_v49 = vcombine.low %v3206_v18, %v3210_v60  ;;  %v15100_v23 = vcombine.high %v3198_v4, %v3202_v44 }
 0x3d2   :  { %6717 = vmatpush1.bf16.msra.mxu1 %v15147_v42  ;;  %v17166_v9 = vadd.f32 %v6463_v1, %v6423_v28  ;;  %v3330_v1 = vld [vmem:[#allocation8 + $0x838] sm:$0xff] }
 0x3d3   :  { %v6425_v59 = vpop.f32.mrf.mxu1  ;;  %6760 = vmatpush1.bf16.msra.mxu0 %v15267_v55  ;;  %6718 = vmatprep.subr.bf16.mxu1 %v15140_v11  ;;  %v15228_v3 = vcombine.high %v3326_v54, %v3330_v1  ;;  %v3450_v6 = vld [vmem:[#allocation8 + $0xbf8] sm:$0xff]  ;;  %v15227_v42 = vcombine.low %v3326_v54, %v3330_v1 }
 0x3d4   :  { %6761 = vmatprep.subr.bf16.mxu0 %v15260_v7  ;;  %v15348_v55 = vcombine.high %v3446_v37, %v3450_v6  ;;  %v3318_v11 = vld [vmem:[#allocation8 + $0x7d8] sm:$0xff]  ;;  %v15347_v12 = vcombine.low %v3446_v37, %v3450_v6 }
 0x3d5   :  { %v3322_v28 = vld [vmem:[#allocation8 + $0x7f8] sm:$0xff] }
 0x3d6   :  { %6719 = vmatpush1.bf16.msra.mxu1 %v15139_v32  ;;  %v3438_v48 = vld [vmem:[#allocation8 + $0xb98] sm:$0xff]  ;;  %v15220_v5 = vcombine.high %v3318_v11, %v3322_v28 }
 0x3d7   :  { %6762 = vmatpush1.bf16.msra.mxu0 %v15259_v41  ;;  %6720 = vmatprep.subr.bf16.mxu1 %v15132_v14  ;;  %v3442_v7 = vld [vmem:[#allocation8 + $0xbb8] sm:$0xff]  ;;  %v15219_v14 = vcombine.low %v3318_v11, %v3322_v28 }
 0x3d8   :  { %6763 = vmatprep.subr.bf16.mxu0 %v15252_v24  ;;  %v15340_v61 = vcombine.high %v3438_v48, %v3442_v7  ;;  %v3314_v32 = vld [vmem:[#allocation8 + $0x7b8] sm:$0xff]  ;;  %v15339_v24 = vcombine.low %v3438_v48, %v3442_v7 }
 0x3d9   :  { %v3430_v59 = vld [vmem:[#allocation8 + $0xb58] sm:$0xff]  ;;  %v15212_v25 = vcombine.high %v3310_v8, %v3314_v32 }
 0x3da   :  { %6721 = vmatpush1.bf16.msra.mxu1 %v15131_v46  ;;  %v3434_v41 = vld [vmem:[#allocation8 + $0xb78] sm:$0xff] }
 0x3db   :  { %6764 = vmatpush1.bf16.msra.mxu0 %v15251_v31  ;;  %6722 = vmatprep.subr.bf16.mxu1 %v15124_v35  ;;  %v15332_v27 = vcombine.high %v3430_v59, %v3434_v41  ;;  %v3306_v29 = vld [vmem:[#allocation8 + $0x778] sm:$0xff]  ;;  %v15211_v35 = vcombine.low %v3310_v8, %v3314_v32 }
 0x3dc   :  { %6765 = vmatprep.subr.bf16.mxu0 %v15244_v16  ;;  %v3422_v46 = vld [vmem:[#allocation8 + $0xb18] sm:$0xff]  ;;  %v15331_v16 = vcombine.low %v3430_v59, %v3434_v41  ;;  %v15204_v36 = vcombine.high %v3302_v34, %v3306_v29 }
 0x3dd   :  { %v3426_v31 = vld [vmem:[#allocation8 + $0xb38] sm:$0xff] }
 0x3de   :  { %6723 = vmatpush1.bf16.msra.mxu1 %v15123_v40  ;;  %v15324_v39 = vcombine.high %v3422_v46, %v3426_v31  ;;  %v3294_v47 = vld [vmem:[#allocation8 + $0x718] sm:$0xff] }
 0x3df   :  { %6766 = vmatpush1.bf16.msra.mxu0 %v15243_v45  ;;  %6724 = vmatprep.subr.bf16.mxu1 %v15116_v51  ;;  %v3298_v63 = vld [vmem:[#allocation8 + $0x738] sm:$0xff]  ;;  %v15203_v51 = vcombine.low %v3302_v34, %v3306_v29 }
 0x3e0   :  { %6767 = vmatprep.subr.bf16.mxu0 %v15236_v58  ;;  %v3414_v40 = vld [vmem:[#allocation8 + $0xad8] sm:$0xff]  ;;  %v15323_v58 = vcombine.low %v3422_v46, %v3426_v31  ;;  %v15196_v18 = vcombine.high %v3294_v47, %v3298_v63 }
 0x3e1   :  { %v3418_v45 = vld [vmem:[#allocation8 + $0xaf8] sm:$0xff] }
 0x3e2   :  { %6725 = vmatpush1.bf16.msra.mxu1 %v15115_v13  ;;  %v15316_v60 = vcombine.high %v3414_v40, %v3418_v45  ;;  %v3286_v54 = vld [vmem:[#allocation8 + $0x6d8] sm:$0xff] }
 0x3e3   :  { %6768 = vmatpush1.bf16.msra.mxu0 %v15235_v33  ;;  %6726 = vmatprep.subr.bf16.mxu1 %v15108_v19  ;;  %v3290_v1 = vld [vmem:[#allocation8 + $0x6f8] sm:$0xff]  ;;  %v15195_v19 = vcombine.low %v3294_v47, %v3298_v63 }
 0x3e4   :  { %6769 = vmatprep.subr.bf16.mxu0 %v15228_v3  ;;  %v3406_v13 = vld [vmem:[#allocation8 + $0xa98] sm:$0xff]  ;;  %v15315_v3 = vcombine.low %v3414_v40, %v3418_v45  ;;  %v15188_v4 = vcombine.high %v3286_v54, %v3290_v1 }
 0x3e5   :  { %v3410_v33 = vld [vmem:[#allocation8 + $0xab8] sm:$0xff] }
 0x3e6   :  { %6727 = vmatpush1.bf16.msra.mxu1 %v15107_v49  ;;  %v15308_v44 = vcombine.high %v3406_v13, %v3410_v33  ;;  %v3278_v37 = vld [vmem:[#allocation8 + $0x698] sm:$0xff] }
 0x3e7   :  { %6770 = vmatpush1.bf16.msra.mxu0 %v15227_v42  ;;  %6728 = vmatprep.subr.bf16.mxu1 %v15100_v23  ;;  %v3282_v6 = vld [vmem:[#allocation8 + $0x6b8] sm:$0xff]  ;;  %v15187_v23 = vcombine.low %v3286_v54, %v3290_v1  ;;  %v6905_v54 = vld [vmem:[#allocation11 + $0x160] sm:$0xff] }
 0x3e8   :  { %6771 = vmatprep.subr.bf16.mxu0 %v15348_v55  ;;  %v3398_v49 = vld [vmem:[#allocation8 + $0xa58] sm:$0xff]  ;;  %v15307_v55 = vcombine.low %v3406_v13, %v3410_v33  ;;  %v15180_v11 = vcombine.high %v3278_v37, %v3282_v6 }
 0x3e9   :  { %v3402_v42 = vld [vmem:[#allocation8 + $0xa78] sm:$0xff] }
 0x3ea   :  { %6729 = vmatpush1.bf16.msra.mxu1 %v15099_v10  ;;  %v15300_v28 = vcombine.high %v3398_v49, %v3402_v42  ;;  %v3270_v48 = vld [vmem:[#allocation8 + $0x658] sm:$0xff] }
 0x3eb   :  { %6772 = vmatpush2.bf16.msra.mxu0 %v15347_v12  ;;  %6730 = vmatprep.subr.bf16.mxu1 %v15220_v5  ;;  %v3274_v7 = vld [vmem:[#allocation8 + $0x678] sm:$0xff]  ;;  %v15179_v5 = vcombine.low %v3278_v37, %v3282_v6  ;;  %v6893_v6 = vld [vmem:[#allocation11 + $0x100] sm:$0xff] }
 0x3ec   :  { %6773 = vmatprep.subr.bf16.mxu0 %v15340_v61  ;;  %v3390_v10 = vld [vmem:[#allocation8 + $0xa18] sm:$0xff]  ;;  %v15299_v61 = vcombine.low %v3398_v49, %v3402_v42  ;;  %v15172_v8 = vcombine.high %v3270_v48, %v3274_v7  ;;  %v6897_v49 = vld [vmem:[#allocation11 + $0x120] sm:$0xff] }
 0x3ed   :  { %v3394_v12 = vld [vmem:[#allocation8 + $0xa38] sm:$0xff] }
 0x3ee   :  { %6731 = vmatpush2.bf16.msra.mxu1 %v15219_v14  ;;  %v15292_v32 = vcombine.high %v3390_v10, %v3394_v12  ;;  %v3262_v59 = vld [vmem:[#allocation8 + $0x618] sm:$0xff]  ;;  %v6838_v14 = vmul.f32 0.2, %v17150_v2  ;;  %v15291_v34 = vcombine.low %v3390_v10, %v3394_v12 }
 0x3ef   :  { %6774 = vmatpush2.bf16.msra.mxu0 %v15339_v24  ;;  %6732 = vmatprep.subr.bf16.mxu1 %v15212_v25  ;;  %v3266_v41 = vld [vmem:[#allocation8 + $0x638] sm:$0xff]  ;;  %v6917_v24 = vld [vmem:[#allocation11 + $0x1c0] sm:$0xff] }
 0x3f0   :  { %6775 = vmatprep.subr.bf16.mxu0 %v15332_v27  ;;  %v6921_v25 = vld [vmem:[#allocation11 + $0x1e0] sm:$0xff]  ;;  %v15171_v27 = vcombine.low %v3270_v48, %v3274_v7  ;;  %v15164_v29 = vcombine.high %v3262_v59, %v3266_v41  ;;  %v3510_v31 = vld [vmem:[#allocation8 + $0xdd8] sm:$0xff]  ;;  %v15163_v47 = vcombine.low %v3262_v59, %v3266_v41  ;;  %v15510_v7 = vcombine.high %v6893_v6, %v6897_v49 }
 0x3f1   :  { %v15534_v46 = vcombine.high %v6917_v24, %v6921_v25  ;;  %v15533_v63 = vcombine.low %v6917_v24, %v6921_v25  ;;  %v3490_v10 = vld [vmem:[#allocation8 + $0xd38] sm:$0xff]  ;;  %v6877_v24 = vld [vmem:[#allocation11 + $0x80] sm:$0xff] }
 0x3f2   :  { %6733 = vmatpush2.bf16.msra.mxu1 %v15211_v35  ;;  %v6846_v35 = vmax.f32 %v17150_v2, %v6838_v14  ;;  %v3478_v41 = vld [vmem:[#allocation8 + $0xcd8] sm:$0xff]  ;;  %v6881_v25 = vld [vmem:[#allocation11 + $0xa0] sm:$0xff] }
 0x3f3   :  { %6776 = vmatpush2.bf16.msra.mxu0 %v15331_v16  ;;  %6734 = vmatprep.subr.bf16.mxu1 %v15204_v36  ;;  %v3514_v16 = vld [vmem:[#allocation8 + $0xdf8] sm:$0xff]  ;;  %v6909_v36 = vld [vmem:[#allocation11 + $0x180] sm:$0xff] }
 0x3f4   :  { %6777 = vmatprep.subr.bf16.mxu0 %v15324_v39  ;;  %v6913_v39 = vld [vmem:[#allocation11 + $0x1a0] sm:$0xff]  ;;  %v15412_v40 = vcombine.high %v3510_v31, %v3514_v16  ;;  %v15411_v2 = vcombine.low %v3510_v31, %v3514_v16  ;;  %v3482_v14 = vld [vmem:[#allocation8 + $0xcf8] sm:$0xff] }
 0x3f5   :  { %v15526_v45 = vcombine.high %v6909_v36, %v6913_v39  ;;  %v15525_v13 = vcombine.low %v6909_v36, %v6913_v39  ;;  %v3470_v31 = vld [vmem:[#allocation8 + $0xc98] sm:$0xff]  ;;  %v6869_v16 = vld [vmem:[#allocation11 + $0x40] sm:$0xff]  ;;  %v15379_v39 = vcombine.low %v3478_v41, %v3482_v14 }
 0x3f6   :  { %6735 = vmatpush2.bf16.msra.mxu1 %v15203_v51  ;;  %v3502_v51 = vld [vmem:[#allocation8 + $0xd98] sm:$0xff]  ;;  %v6873_v36 = vld [vmem:[#allocation11 + $0x60] sm:$0xff] }
 0x3f7   :  { %6778 = vmatpush2.bf16.msra.mxu0 %v15323_v58  ;;  %6736 = vmatprep.subr.bf16.mxu1 %v15196_v18  ;;  %v3506_v58 = vld [vmem:[#allocation8 + $0xdb8] sm:$0xff]  ;;  %v17170_v18 = vpack.c.bf16 %v6846_v35, %v6846_v35 }
 0x3f8   :  { %6779 = vmatprep.subr.bf16.mxu0 %v15316_v60  ;;  %v6901_v60 = vld [vmem:[#allocation11 + $0x140] sm:$0xff]  ;;  %v15404_v33 = vcombine.high %v3502_v51, %v3506_v58  ;;  %v3474_v35 = vld [vmem:[#allocation8 + $0xcb8] sm:$0xff] }
 0x3fa   :  { %6737 = vmatpush2.bf16.msra.mxu1 %v15195_v19 }
 0x3fb   :  { %6780 = vmatpush2.bf16.msra.mxu0 %v15315_v3  ;;  %6738 = vmatprep.subr.bf16.mxu1 %v15188_v4  ;;  %v15518_v3 = vcombine.high %v6901_v60, %v6905_v54  ;;  %v3494_v4 = vld [vmem:[#allocation8 + $0xd58] sm:$0xff] }
 0x3fc   :  { %6781 = vmatprep.subr.bf16.mxu0 %v15308_v44  ;;  %v3498_v44 = vld [vmem:[#allocation8 + $0xd78] sm:$0xff] }
 0x3fe   :  { %6739 = vmatpush2.bf16.msra.mxu1 %v15187_v23  ;;  %v15403_v23 = vcombine.low %v3502_v51, %v3506_v58  ;;  %v3466_v51 = vld [vmem:[#allocation8 + $0xc78] sm:$0xff]  ;;  %v6861_v58 = vld [vmem:[#allocation11] sm:$0xff] }
 0x3ff   :  { %6782 = vmatpush2.bf16.msra.mxu0 %v15307_v55  ;;  %6740 = vmatprep.subr.bf16.mxu1 %v15180_v11  ;;  %v15517_v11 = vcombine.low %v6901_v60, %v6905_v54  ;;  %v6865_v60 = vld [vmem:[#allocation11 + $0x20] sm:$0xff]  ;;  %v15371_v54 = vcombine.low %v3470_v31, %v3474_v35 }
 0x400   :  { %6783 = vmatprep.subr.bf16.mxu0 %v15300_v28  ;;  %v15396_v28 = vcombine.high %v3494_v4, %v3498_v44 }
 0x402   :  { %6741 = vmatpush2.bf16.msra.mxu1 %v15179_v5  ;;  %v6885_v5 = vld [vmem:[#allocation11 + $0xc0] sm:$0xff] }
 0x403   :  { %6784 = vmatpush2.bf16.msra.mxu0 %v15299_v61  ;;  %6742 = vmatprep.subr.bf16.mxu1 %v15172_v8  ;;  %v15395_v61 = vcombine.low %v3494_v4, %v3498_v44  ;;  %v3458_v4 = vld [vmem:[#allocation8 + $0xc38] sm:$0xff]  ;;  %v6981_v44 = vld [vmem:[#allocation11 + $0x3c0] sm:$0xff] }
 0x404   :  { %6785 = vmatprep.subr.bf16.mxu0 %v15292_v32 }
 0x406   :  { %6743 = vmatpush2.bf16.msra.mxu1 %v15171_v27 }
 0x407   :  { %6786 = vmatpush2.bf16.msra.mxu0 %v15291_v34  ;;  %6744 = vmatprep.subr.bf16.mxu1 %v15164_v29  ;;  %v15380_v29 = vcombine.high %v3478_v41, %v3482_v14 }
 0x408   :  { %9975 = vmatprep.subr.bf16.mxu0 %v15534_v46  ;;  %v15494_v46 = vcombine.high %v6877_v24, %v6881_v25 }
 0x40a   :  { %6745 = vmatpush2.bf16.msra.mxu1 %v15163_v47  ;;  %v17172_v1 = vpop.f32.mrf.mxu0  ;;  %6788 = vmatmul.mubr.bf16.vlgmr.msra.gmra.mxu0 %v17089_v50  ;;  %v15493_v47 = vcombine.low %v6877_v24, %v6881_v25  ;;  %v3558_v24 = vld [vmem:[#allocation8 + $0xf58] sm:$0xff] }
 0x40b   :  { %9976 = vmatpush1.bf16.msra.mxu0 %v15533_v63  ;;  %10007 = vmatprep.mubr.bf16.mxu0 %v17170_v18  ;;  %v15372_v63 = vcombine.high %v3470_v31, %v3474_v35  ;;  %v3562_v25 = vld [vmem:[#allocation8 + $0xf78] sm:$0xff] }
 0x40c   :  { %v17176_v19 = vpop.f32.mrf.mxu0  ;;  %6796 = vmatprep.subr.bf16.mxu1 %v15412_v40  ;;  %9977 = vmatprep.subr.bf16.mxu0 %v15526_v45  ;;  %v15486_v40 = vcombine.high %v6869_v16, %v6873_v36  ;;  %v3462_v45 = vld [vmem:[#allocation8 + $0xc58] sm:$0xff]  ;;  %v15460_v31 = vcombine.high %v3558_v24, %v3562_v25 }
 0x40d   :  { %v6502_v37 = vpop.f32.mrf.mxu1  ;;  %6747 = vmatmul.mubr.bf16.vlgmr.msra.gmra.mxu1 %v17049_v17  ;;  %v3486_v17 = vld [vmem:[#allocation8 + $0xd18] sm:$0xff] }
 0x40e   :  { %v17180_v50 = vadd.f32 %v6502_v37, %v17164_v20  ;;  %6797 = vmatpush1.bf16.msra.mxu1 %v15411_v2  ;;  %6828 = vmatprep.mubr.bf16.mxu1 %v17106_v43  ;;  %v6547_v42 = vpop.f32.mrf.mxu0  ;;  %v6889_v20 = vld [vmem:[#allocation11 + $0xe0] sm:$0xff]  ;;  %v15509_v43 = vcombine.low %v6893_v6, %v6897_v49  ;;  %v15388_v32 = vcombine.high %v3486_v17, %v3490_v10 }
 0x40f   :  { %v17183_v55 = vpop.f32.mrf.mxu1  ;;  %9978 = vmatpush1.bf16.msra.mxu0 %v15525_v13  ;;  %6798 = vmatprep.subr.bf16.mxu1 %v15404_v33  ;;  %v15502_v59 = vcombine.high %v6885_v5, %v6889_v20  ;;  %v15387_v27 = vcombine.low %v3486_v17, %v3490_v10  ;;  %v15501_v34 = vcombine.low %v6885_v5, %v6889_v20  ;;  %v6985_v37 = vld [vmem:[#allocation11 + $0x3e0] sm:$0xff]  ;;  %v3566_v20 = vld [vmem:[#allocation8 + $0xf98] sm:$0xff] }
 0x410   :  { %v6548_v48 = vpop.f32.mrf.mxu0  ;;  %9979 = vmatprep.subr.bf16.mxu0 %v15518_v3  ;;  %v15485_v2 = vcombine.low %v6869_v16, %v6873_v36  ;;  %v15364_v13 = vcombine.high %v3462_v45, %v3466_v51  ;;  %v15478_v33 = vcombine.high %v6861_v58, %v6865_v60  ;;  %v3454_v3 = vld [vmem:[#allocation8 + $0xc18] sm:$0xff]  ;;  %v15363_v6 = vcombine.low %v3462_v45, %v3466_v51 }
 0x411   :  { %v6506_v12 = vpop.f32.mrf.mxu1  ;;  %v15477_v49 = vcombine.low %v6861_v58, %v6865_v60  ;;  %v15356_v42 = vcombine.high %v3454_v3, %v3458_v4  ;;  %v6973_v48 = vld [vmem:[#allocation11 + $0x380] sm:$0xff]  ;;  %v15355_v17 = vcombine.low %v3454_v3, %v3458_v4  ;;  %v15597_v10 = vcombine.low %v6981_v44, %v6985_v37  ;;  %v3550_v16 = vld [vmem:[#allocation8 + $0xf18] sm:$0xff] }
 0x412   :  { %6799 = vmatpush1.bf16.msra.mxu1 %v15403_v23  ;;  %v15598_v23 = vcombine.high %v6981_v44, %v6985_v37  ;;  %v3554_v36 = vld [vmem:[#allocation8 + $0xf38] sm:$0xff] }
 0x413   :  { %v6507_v8 = vpop.f32.mrf.mxu1  ;;  %9980 = vmatpush1.bf16.msra.mxu0 %v15517_v11  ;;  %6800 = vmatprep.subr.bf16.mxu1 %v15396_v28  ;;  %v3574_v11 = vld [vmem:[#allocation8 + $0xfd8] sm:$0xff]  ;;  %v15452_v45 = vcombine.high %v3550_v16, %v3554_v36 }
 0x414   :  { %9981 = vmatprep.subr.bf16.mxu0 %v15510_v7  ;;  %v3578_v28 = vld [vmem:[#allocation8 + $0xff8] sm:$0xff]  ;;  %v6977_v7 = vld [vmem:[#allocation11 + $0x3a0] sm:$0xff] }
 0x415   :  { %v15476_v12 = vcombine.high %v3574_v11, %v3578_v28  ;;  %v15590_v5 = vcombine.high %v6973_v48, %v6977_v7  ;;  %v6965_v8 = vld [vmem:[#allocation11 + $0x340] sm:$0xff]  ;;  %v3542_v58 = vld [vmem:[#allocation8 + $0xed8] sm:$0xff] }
 0x416   :  { %6801 = vmatpush1.bf16.msra.mxu1 %v15395_v61  ;;  %v3570_v61 = vld [vmem:[#allocation8 + $0xfb8] sm:$0xff] }
 0x417   :  { %9982 = vmatpush1.bf16.msra.mxu0 %v15509_v43  ;;  %6802 = vmatprep.subr.bf16.mxu1 %v15388_v32  ;;  %v6969_v43 = vld [vmem:[#allocation11 + $0x360] sm:$0xff]  ;;  %v15475_v32 = vcombine.low %v3574_v11, %v3578_v28  ;;  %v15468_v41 = vcombine.high %v3566_v20, %v3570_v61  ;;  %v3546_v60 = vld [vmem:[#allocation8 + $0xef8] sm:$0xff] }
 0x418   :  { %9983 = vmatprep.subr.bf16.mxu0 %v15502_v59  ;;  %v15589_v59 = vcombine.low %v6973_v48, %v6977_v7  ;;  %v15582_v14 = vcombine.high %v6965_v8, %v6969_v43  ;;  %v15444_v3 = vcombine.high %v3542_v58, %v3546_v60  ;;  %v3534_v44 = vld [vmem:[#allocation8 + $0xe98] sm:$0xff] }
 0x419   :  { %v3538_v37 = vld [vmem:[#allocation8 + $0xeb8] sm:$0xff] }
 0x41a   :  { %6803 = vmatpush1.bf16.msra.mxu1 %v15387_v27  ;;  %v6957_v27 = vld [vmem:[#allocation11 + $0x300] sm:$0xff]  ;;  %v15436_v11 = vcombine.high %v3534_v44, %v3538_v37  ;;  %v3526_v48 = vld [vmem:[#allocation8 + $0xe58] sm:$0xff] }
 0x41b   :  { %9984 = vmatpush1.bf16.msra.mxu0 %v15501_v34  ;;  %6804 = vmatprep.subr.bf16.mxu1 %v15380_v29  ;;  %v6961_v34 = vld [vmem:[#allocation11 + $0x320] sm:$0xff]  ;;  %v15467_v29 = vcombine.low %v3566_v20, %v3570_v61  ;;  %v3530_v7 = vld [vmem:[#allocation8 + $0xe78] sm:$0xff]  ;;  %v6837_v61 = vmul.f32 0.2, %v17146_v62 }
 0x41c   :  { %9985 = vmatprep.subr.bf16.mxu0 %v15494_v46  ;;  %v15581_v46 = vcombine.low %v6965_v8, %v6969_v43  ;;  %v15574_v35 = vcombine.high %v6957_v27, %v6961_v34  ;;  %v15428_v20 = vcombine.high %v3526_v48, %v3530_v7  ;;  %v6505_v8 = vadd.f32 %v17183_v55, %v17166_v9  ;;  %v7165_v9 = vld [vmem:[#allocation11 + $0x980] sm:$0xff] }
 0x41d   :  { %v7169_v55 = vld [vmem:[#allocation11 + $0x9a0] sm:$0xff] }
 0x41e   :  { %6805 = vmatpush1.bf16.msra.mxu1 %v15379_v39  ;;  %v6949_v39 = vld [vmem:[#allocation11 + $0x2c0] sm:$0xff] }
 0x41f   :  { %9986 = vmatpush1.bf16.msra.mxu0 %v15493_v47  ;;  %6806 = vmatprep.subr.bf16.mxu1 %v15372_v63  ;;  %v6953_v47 = vld [vmem:[#allocation11 + $0x2e0] sm:$0xff]  ;;  %v15459_v63 = vcombine.low %v3558_v24, %v3562_v25  ;;  %v15427_v24 = vcombine.low %v3526_v48, %v3530_v7 }
 0x420   :  { %9987 = vmatprep.subr.bf16.mxu0 %v15486_v40  ;;  %v15573_v40 = vcombine.low %v6957_v27, %v6961_v34  ;;  %v15566_v51 = vcombine.high %v6949_v39, %v6953_v47  ;;  %v6845_v34 = vmax.f32 %v17146_v62, %v6837_v61  ;;  %v7037_v62 = vld [vmem:[#allocation11 + $0x580] sm:$0xff] }
 0x421   :  { %v7021_v61 = vld [vmem:[#allocation11 + $0x500] sm:$0xff] }
 0x422   :  { %6807 = vmatpush1.bf16.msra.mxu1 %v15371_v54  ;;  %v6941_v54 = vld [vmem:[#allocation11 + $0x280] sm:$0xff] }
 0x423   :  { %9988 = vmatpush1.bf16.msra.mxu0 %v15485_v2  ;;  %6808 = vmatprep.subr.bf16.mxu1 %v15364_v13  ;;  %v6945_v2 = vld [vmem:[#allocation11 + $0x2a0] sm:$0xff]  ;;  %v15451_v13 = vcombine.low %v3550_v16, %v3554_v36 }
 0x424   :  { %9989 = vmatprep.subr.bf16.mxu0 %v15478_v33  ;;  %v15565_v33 = vcombine.low %v6949_v39, %v6953_v47  ;;  %v15558_v4 = vcombine.high %v6941_v54, %v6945_v2  ;;  %v17189_v47 = vpack.c.bf16 %v6845_v34, %v6845_v34  ;;  %v7013_v34 = vld [vmem:[#allocation11 + $0x4c0] sm:$0xff] }
 0x426   :  { %6809 = vmatpush1.bf16.msra.mxu1 %v15363_v6  ;;  %v6933_v6 = vld [vmem:[#allocation11 + $0x240] sm:$0xff] }
 0x427   :  { %9990 = vmatpush1.bf16.msra.mxu0 %v15477_v49  ;;  %6810 = vmatprep.subr.bf16.mxu1 %v15356_v42  ;;  %v6937_v49 = vld [vmem:[#allocation11 + $0x260] sm:$0xff]  ;;  %v15443_v42 = vcombine.low %v3542_v58, %v3546_v60 }
 0x428   :  { %9991 = vmatprep.subr.bf16.mxu0 %v15598_v23  ;;  %v15557_v23 = vcombine.low %v6941_v54, %v6945_v2  ;;  %v15550_v28 = vcombine.high %v6933_v6, %v6937_v49  ;;  %v7157_v58 = vld [vmem:[#allocation11 + $0x940] sm:$0xff]  ;;  %v3604_v54 = vrot.slane %v17152_v57, %v17071_v26 }
 0x429   :  { %v7161_v60 = vld [vmem:[#allocation11 + $0x960] sm:$0xff] }
 0x42a   :  { %6811 = vmatpush1.bf16.msra.mxu1 %v15355_v17  ;;  %v6925_v17 = vld [vmem:[#allocation11 + $0x200] sm:$0xff] }
 0x42b   :  { %9992 = vmatpush2.bf16.msra.mxu0 %v15597_v10  ;;  %6812 = vmatprep.subr.bf16.mxu1 %v15476_v12  ;;  %v6929_v10 = vld [vmem:[#allocation11 + $0x220] sm:$0xff]  ;;  %v15435_v12 = vcombine.low %v3534_v44, %v3538_v37 }
 0x42c   :  { %9993 = vmatprep.subr.bf16.mxu0 %v15590_v5  ;;  %v15549_v5 = vcombine.low %v6933_v6, %v6937_v49  ;;  %v15542_v43 = vcombine.high %v6925_v17, %v6929_v10  ;;  %v15541_v25 = vcombine.low %v6925_v17, %v6929_v10  ;;  %v7029_v6 = vld [vmem:[#allocation11 + $0x540] sm:$0xff] }
 0x42d   :  { %v7033_v49 = vld [vmem:[#allocation11 + $0x560] sm:$0xff] }
 0x42e   :  { %6813 = vmatpush2.bf16.msra.mxu1 %v15475_v32  ;;  %v3518_v32 = vld [vmem:[#allocation8 + $0xe18] sm:$0xff]  ;;  %v15646_v10 = vcombine.high %v7029_v6, %v7033_v49 }
 0x42f   :  { %9994 = vmatpush2.bf16.msra.mxu0 %v15589_v59  ;;  %6814 = vmatprep.subr.bf16.mxu1 %v15468_v41  ;;  %v3522_v59 = vld [vmem:[#allocation8 + $0xe38] sm:$0xff]  ;;  %v7173_v41 = vld [vmem:[#allocation11 + $0x9c0] sm:$0xff] }
 0x430   :  { %9995 = vmatprep.subr.bf16.mxu0 %v15582_v14  ;;  %v7177_v14 = vld [vmem:[#allocation11 + $0x9e0] sm:$0xff]  ;;  %v15420_v27 = vcombine.high %v3518_v32, %v3522_v59  ;;  %v15419_v16 = vcombine.low %v3518_v32, %v3522_v59 }
 0x431   :  { %v15789_v39 = vcombine.low %v7173_v41, %v7177_v14  ;;  %v7141_v32 = vld [vmem:[#allocation11 + $0x8c0] sm:$0xff] }
 0x432   :  { %6815 = vmatpush2.bf16.msra.mxu1 %v15467_v29  ;;  %v6840_v29 = vmul.f32 0.2, %v6505_v8  ;;  %v7145_v59 = vld [vmem:[#allocation11 + $0x8e0] sm:$0xff] }
 0x433   :  { %9996 = vmatpush2.bf16.msra.mxu0 %v15581_v46  ;;  %6816 = vmatprep.subr.bf16.mxu1 %v15460_v31  ;;  %v7045_v46 = vld [vmem:[#allocation11 + $0x5c0] sm:$0xff] }
 0x434   :  { %9997 = vmatprep.subr.bf16.mxu0 %v15574_v35  ;;  %v7049_v31 = vld [vmem:[#allocation11 + $0x5e0] sm:$0xff]  ;;  %v15790_v35 = vcombine.high %v7173_v41, %v7177_v14  ;;  %v15645_v41 = vcombine.low %v7029_v6, %v7033_v49 }
 0x435   :  { %v15662_v36 = vcombine.high %v7045_v46, %v7049_v31  ;;  %v6989_v6 = vld [vmem:[#allocation11 + $0x400] sm:$0xff] }
 0x436   :  { %6817 = vmatpush2.bf16.msra.mxu1 %v15459_v63  ;;  %v3600_v63 = vrot.slane %v17152_v57, %v17068_v0  ;;  %v7149_v57 = vld [vmem:[#allocation11 + $0x900] sm:$0xff] }
 0x437   :  { %9998 = vmatpush2.bf16.msra.mxu0 %v15573_v40  ;;  %6818 = vmatprep.subr.bf16.mxu1 %v15452_v45  ;;  %v6848_v40 = vmax.f32 %v6505_v8, %v6840_v29  ;;  %v7041_v45 = vld [vmem:[#allocation11 + $0x5a0] sm:$0xff] }
 0x438   :  { %9999 = vmatprep.subr.bf16.mxu0 %v15566_v51  ;;  %v15782_v51 = vcombine.high %v7165_v9, %v7169_v55  ;;  %v7025_v8 = vld [vmem:[#allocation11 + $0x520] sm:$0xff] }
 0x439   :  { %v17197_v44 = vpack.c.bf16 %v6848_v40, %v6848_v40  ;;  %v7017_v29 = vld [vmem:[#allocation11 + $0x4e0] sm:$0xff] }
 0x43a   :  { %6819 = vmatpush2.bf16.msra.mxu1 %v15451_v13  ;;  %v15661_v13 = vcombine.low %v7045_v46, %v7049_v31  ;;  %v15758_v46 = vcombine.high %v7141_v32, %v7145_v59  ;;  %v7133_v31 = vld [vmem:[#allocation11 + $0x880] sm:$0xff] }
 0x43b   :  { %10000 = vmatpush2.bf16.msra.mxu0 %v15565_v33  ;;  %6820 = vmatprep.subr.bf16.mxu1 %v15444_v3  ;;  %v15654_v33 = vcombine.high %v7037_v62, %v7041_v45  ;;  %v15781_v3 = vcombine.low %v7165_v9, %v7169_v55  ;;  %v15637_v9 = vcombine.low %v7021_v61, %v7025_v8  ;;  %v7125_v40 = vld [vmem:[#allocation11 + $0x840] sm:$0xff] }
 0x43c   :  { %10001 = vmatprep.subr.bf16.mxu0 %v15558_v4  ;;  %v6544_v4 = vadd.f32 %v17172_v1, %v3600_v63  ;;  %v15653_v1 = vcombine.low %v7037_v62, %v7041_v45  ;;  %v15630_v55 = vcombine.high %v7013_v34, %v7017_v29  ;;  %v7129_v62 = vld [vmem:[#allocation11 + $0x860] sm:$0xff]  ;;  %v15629_v45 = vcombine.low %v7013_v34, %v7017_v29 }
 0x43d   :  { %v6993_v49 = vld [vmem:[#allocation11 + $0x420] sm:$0xff] }
 0x43e   :  { %6821 = vmatpush2.bf16.msra.mxu1 %v15443_v42  ;;  %v15774_v42 = vcombine.high %v7157_v58, %v7161_v60  ;;  %v7097_v34 = vld [vmem:[#allocation11 + $0x760] sm:$0xff] }
 0x43f   :  { %10002 = vmatpush2.bf16.msra.mxu0 %v15557_v23  ;;  %6822 = vmatprep.subr.bf16.mxu1 %v15436_v11  ;;  %v7153_v11 = vld [vmem:[#allocation11 + $0x920] sm:$0xff] }
 0x440   :  { %10003 = vmatprep.subr.bf16.mxu0 %v15550_v28  ;;  %v6546_v28 = vadd.f32 %v17176_v19, %v3604_v54  ;;  %v7001_v54 = vld [vmem:[#allocation11 + $0x460] sm:$0xff] }
 0x442   :  { %6823 = vmatpush2.bf16.msra.mxu1 %v15435_v12  ;;  %v15773_v12 = vcombine.low %v7157_v58, %v7161_v60  ;;  %v6997_v60 = vld [vmem:[#allocation11 + $0x440] sm:$0xff] }
 0x443   :  { %10004 = vmatpush2.bf16.msra.mxu0 %v15549_v5  ;;  %6824 = vmatprep.subr.bf16.mxu1 %v15428_v20 }
 0x444   :  { %10005 = vmatprep.subr.bf16.mxu0 %v15542_v43 }
 0x446   :  { %6825 = vmatpush2.bf16.msra.mxu1 %v15427_v24 }
 0x447   :  { %10006 = vmatpush2.bf16.msra.mxu0 %v15541_v25  ;;  %6826 = vmatprep.subr.bf16.mxu1 %v15420_v27  ;;  %v15638_v25 = vcombine.high %v7021_v61, %v7025_v8  ;;  %v15765_v27 = vcombine.low %v7149_v57, %v7153_v11  ;;  %v7101_v8 = vld [vmem:[#allocation11 + $0x780] sm:$0xff] }
 0x448   :  { %10057 = vmatprep.subr.bf16.mxu0 %v15790_v35  ;;  %v7137_v35 = vld [vmem:[#allocation11 + $0x8a0] sm:$0xff] }
 0x449   :  { %v15750_v63 = vcombine.high %v7133_v31, %v7137_v35  ;;  %v15749_v58 = vcombine.low %v7133_v31, %v7137_v35  ;;  %v7217_v31 = vld [vmem:[#allocation11 + $0xb20] sm:$0xff] }
 0x44a   :  { %6827 = vmatpush2.bf16.msra.mxu1 %v15419_v16  ;;  %v6625_v2 = vpop.f32.mrf.mxu0  ;;  %10008 = vmatmul.mubr.bf16.vlgmr.msra.gmra.mxu0 %v17189_v47  ;;  %v15757_v16 = vcombine.low %v7141_v32, %v7145_v59  ;;  %v7221_v32 = vld [vmem:[#allocation11 + $0xb40] sm:$0xff] }
 0x44b   :  { %10016 = vmatprep.subr.bf16.mxu1 %v15662_v36  ;;  %10058 = vmatpush1.bf16.msra.mxu0 %v15789_v39  ;;  %v7005_v36 = vld [vmem:[#allocation11 + $0x480] sm:$0xff] }
 0x44c   :  { %v6627_v37 = vpop.f32.mrf.mxu0  ;;  %10059 = vmatprep.subr.bf16.mxu0 %v15782_v51  ;;  %v7009_v39 = vld [vmem:[#allocation11 + $0x4a0] sm:$0xff] }
 0x44d   :  { %v6584_v23 = vpop.f32.mrf.mxu1  ;;  %6829 = vmatmul.mubr.bf16.vlgmr.msra.gmra.mxu1 %v17109_v52  ;;  %v15766_v52 = vcombine.high %v7149_v57, %v7153_v11  ;;  %v15622_v51 = vcombine.high %v7005_v36, %v7009_v39  ;;  %v7241_v57 = vld [vmem:[#allocation11 + $0xbe0] sm:$0xff]  ;;  %v15613_v11 = vcombine.low %v6997_v60, %v7001_v54 }
 0x44e   :  { %v6585_v48 = vadd.f32 %v6584_v23, %v6544_v4  ;;  %10017 = vmatpush1.bf16.msra.mxu1 %v15661_v13  ;;  %10048 = vmatprep.mubr.bf16.mxu1 %v17197_v44  ;;  %v6629_v7 = vpop.f32.mrf.mxu0  ;;  %v7117_v13 = vld [vmem:[#allocation11 + $0x800] sm:$0xff]  ;;  %v15614_v4 = vcombine.high %v6997_v60, %v7001_v54 }
 0x44f   :  { %v6586_v17 = vpop.f32.mrf.mxu1  ;;  %10018 = vmatprep.subr.bf16.mxu1 %v15654_v33  ;;  %10060 = vmatpush1.bf16.msra.mxu0 %v15781_v3  ;;  %v7121_v33 = vld [vmem:[#allocation11 + $0x820] sm:$0xff]  ;;  %v15621_v3 = vcombine.low %v7005_v36, %v7009_v39 }
 0x450   :  { %v6587_v5 = vadd.f32 %v6586_v17, %v6546_v28  ;;  %v6630_v20 = vpop.f32.mrf.mxu0  ;;  %10061 = vmatprep.subr.bf16.mxu0 %v15774_v42  ;;  %v17202_v43 = vadd.f32 %v6625_v2, %v6585_v48  ;;  %v15742_v2 = vcombine.high %v7125_v40, %v7129_v62  ;;  %v15734_v42 = vcombine.high %v7117_v13, %v7121_v33  ;;  %v7237_v23 = vld [vmem:[#allocation11 + $0xbc0] sm:$0xff] }
 0x451   :  { %v6588_v19 = vpop.f32.mrf.mxu1  ;;  %v15606_v28 = vcombine.high %v6989_v6, %v6993_v49  ;;  %v15733_v48 = vcombine.low %v7117_v13, %v7121_v33  ;;  %v7109_v7 = vld [vmem:[#allocation11 + $0x7c0] sm:$0xff]  ;;  %v15854_v17 = vcombine.high %v7237_v23, %v7241_v57  ;;  %v15853_v61 = vcombine.low %v7237_v23, %v7241_v57 }
 0x452   :  { %10019 = vmatpush1.bf16.msra.mxu1 %v15653_v1  ;;  %v17204_v14 = vadd.f32 %v6627_v37, %v6587_v5  ;;  %v15741_v37 = vcombine.low %v7125_v40, %v7129_v62  ;;  %v7113_v1 = vld [vmem:[#allocation11 + $0x7e0] sm:$0xff]  ;;  %v15605_v5 = vcombine.low %v6989_v6, %v6993_v49 }
 0x453   :  { %v6589_v24 = vpop.f32.mrf.mxu1  ;;  %10020 = vmatprep.subr.bf16.mxu1 %v15646_v10  ;;  %10062 = vmatpush1.bf16.msra.mxu0 %v15773_v12  ;;  %v7229_v10 = vld [vmem:[#allocation11 + $0xb80] sm:$0xff]  ;;  %v15726_v20 = vcombine.high %v7109_v7, %v7113_v1 }
 0x454   :  { %10063 = vmatprep.subr.bf16.mxu0 %v15766_v52  ;;  %v7233_v12 = vld [vmem:[#allocation11 + $0xba0] sm:$0xff] }
 0x455   :  { %v7105_v52 = vld [vmem:[#allocation11 + $0x7a0] sm:$0xff]  ;;  %v15846_v19 = vcombine.high %v7229_v10, %v7233_v12 }
 0x456   :  { %10021 = vmatpush1.bf16.msra.mxu1 %v15645_v41  ;;  %v7225_v59 = vld [vmem:[#allocation11 + $0xb60] sm:$0xff]  ;;  %v15725_v41 = vcombine.low %v7109_v7, %v7113_v1  ;;  %v15718_v24 = vcombine.high %v7101_v8, %v7105_v52  ;;  %v15717_v35 = vcombine.low %v7101_v8, %v7105_v52 }
 0x457   :  { %10022 = vmatprep.subr.bf16.mxu1 %v15638_v25  ;;  %10064 = vmatpush1.bf16.msra.mxu0 %v15765_v27  ;;  %v15845_v25 = vcombine.low %v7229_v10, %v7233_v12  ;;  %v7093_v27 = vld [vmem:[#allocation11 + $0x740] sm:$0xff]  ;;  %v15838_v29 = vcombine.high %v7221_v32, %v7225_v59 }
 0x458   :  { %10065 = vmatprep.subr.bf16.mxu0 %v15758_v46  ;;  %v7213_v46 = vld [vmem:[#allocation11 + $0xb00] sm:$0xff]  ;;  %v15709_v62 = vcombine.low %v7093_v27, %v7097_v34 }
 0x459   :  { %v7089_v36 = vld [vmem:[#allocation11 + $0x720] sm:$0xff]  ;;  %v15830_v39 = vcombine.high %v7213_v46, %v7217_v31 }
 0x45a   :  { %10023 = vmatpush1.bf16.msra.mxu1 %v15637_v9  ;;  %v15710_v9 = vcombine.high %v7093_v27, %v7097_v34  ;;  %v7209_v40 = vld [vmem:[#allocation11 + $0xae0] sm:$0xff] }
 0x45b   :  { %10024 = vmatprep.subr.bf16.mxu1 %v15630_v55  ;;  %10066 = vmatpush1.bf16.msra.mxu0 %v15757_v16  ;;  %v15837_v55 = vcombine.low %v7221_v32, %v7225_v59  ;;  %v7085_v16 = vld [vmem:[#allocation11 + $0x700] sm:$0xff]  ;;  %v17208_v32 = vld [vmem:[#allocation11 + $0x1e8] sm:$0xff] }
 0x45c   :  { %10067 = vmatprep.subr.bf16.mxu0 %v15750_v63  ;;  %v7205_v63 = vld [vmem:[#allocation11 + $0xac0] sm:$0xff]  ;;  %v15701_v33 = vcombine.low %v7085_v16, %v7089_v36 }
 0x45d   :  { %v7081_v60 = vld [vmem:[#allocation11 + $0x6e0] sm:$0xff]  ;;  %v15822_v54 = vcombine.high %v7205_v63, %v7209_v40 }
 0x45e   :  { %10025 = vmatpush1.bf16.msra.mxu1 %v15629_v45  ;;  %v15702_v45 = vcombine.high %v7085_v16, %v7089_v36  ;;  %v7201_v13 = vld [vmem:[#allocation11 + $0xaa0] sm:$0xff] }
 0x45f   :  { %10026 = vmatprep.subr.bf16.mxu1 %v15622_v51  ;;  %10068 = vmatpush1.bf16.msra.mxu0 %v15749_v58  ;;  %v15829_v51 = vcombine.low %v7213_v46, %v7217_v31  ;;  %v7077_v58 = vld [vmem:[#allocation11 + $0x6c0] sm:$0xff] }
 0x460   :  { %10069 = vmatprep.subr.bf16.mxu0 %v15742_v2  ;;  %v7197_v2 = vld [vmem:[#allocation11 + $0xa80] sm:$0xff]  ;;  %v15693_v57 = vcombine.low %v7077_v58, %v7081_v60 }
 0x461   :  { %v7073_v6 = vld [vmem:[#allocation11 + $0x6a0] sm:$0xff]  ;;  %v15814_v49 = vcombine.high %v7197_v2, %v7201_v13 }
 0x462   :  { %10027 = vmatpush1.bf16.msra.mxu1 %v15621_v3  ;;  %v15694_v3 = vcombine.high %v7077_v58, %v7081_v60  ;;  %v7193_v23 = vld [vmem:[#allocation11 + $0xa60] sm:$0xff] }
 0x463   :  { %10028 = vmatprep.subr.bf16.mxu1 %v15614_v4  ;;  %10070 = vmatpush1.bf16.msra.mxu0 %v15741_v37  ;;  %v15821_v4 = vcombine.low %v7205_v63, %v7209_v40  ;;  %v7069_v37 = vld [vmem:[#allocation11 + $0x680] sm:$0xff] }
 0x464   :  { %10071 = vmatprep.subr.bf16.mxu0 %v15734_v42  ;;  %v7189_v42 = vld [vmem:[#allocation11 + $0xa40] sm:$0xff]  ;;  %v15685_v12 = vcombine.low %v7069_v37, %v7073_v6 }
 0x465   :  { %v7065_v7 = vld [vmem:[#allocation11 + $0x660] sm:$0xff]  ;;  %v15806_v1 = vcombine.high %v7189_v42, %v7193_v23 }
 0x466   :  { %10029 = vmatpush1.bf16.msra.mxu1 %v15613_v11  ;;  %v15686_v11 = vcombine.high %v7069_v37, %v7073_v6  ;;  %v7185_v10 = vld [vmem:[#allocation11 + $0xa20] sm:$0xff] }
 0x467   :  { %10030 = vmatprep.subr.bf16.mxu1 %v15606_v28  ;;  %10072 = vmatpush1.bf16.msra.mxu0 %v15733_v48  ;;  %v15813_v28 = vcombine.low %v7197_v2, %v7201_v13  ;;  %v7061_v48 = vld [vmem:[#allocation11 + $0x640] sm:$0xff] }
 0x468   :  { %10073 = vmatprep.subr.bf16.mxu0 %v15854_v17  ;;  %v7181_v17 = vld [vmem:[#allocation11 + $0xa00] sm:$0xff]  ;;  %v15677_v59 = vcombine.low %v7061_v48, %v7065_v7 }
 0x469   :  { %v7057_v8 = vld [vmem:[#allocation11 + $0x620] sm:$0xff]  ;;  %v15798_v52 = vcombine.high %v7181_v17, %v7185_v10 }
 0x46a   :  { %10031 = vmatpush1.bf16.msra.mxu1 %v15605_v5  ;;  %v15678_v5 = vcombine.high %v7061_v48, %v7065_v7  ;;  %v7301_v34 = vld [vmem:[#allocation11 + $0xdc0] sm:$0xff]  ;;  %v6914_v48 = vld [vmem:[#allocation11 + $0x1a8] sm:$0xff] }
 0x46b   :  { %10032 = vmatprep.subr.bf16.mxu1 %v15726_v20  ;;  %10074 = vmatpush2.bf16.msra.mxu0 %v15853_v61  ;;  %v15805_v20 = vcombine.low %v7189_v42, %v7193_v23  ;;  %v7053_v61 = vld [vmem:[#allocation11 + $0x600] sm:$0xff] }
 0x46c   :  { %10075 = vmatprep.subr.bf16.mxu0 %v15846_v19  ;;  %v17206_v19 = vld [vmem:[#allocation11 + $0x1c8] sm:$0xff]  ;;  %v15669_v46 = vcombine.low %v7053_v61, %v7057_v8  ;;  %v7281_v37 = vld [vmem:[#allocation11 + $0xd20] sm:$0xff] }
 0x46d   :  { %v15536_v27 = vcombine.high %v17206_v19, %v17208_v32  ;;  %v7269_v7 = vld [vmem:[#allocation11 + $0xcc0] sm:$0xff] }
 0x46e   :  { %10033 = vmatpush2.bf16.msra.mxu1 %v15725_v41  ;;  %v6839_v41 = vmul.f32 0.2, %v17180_v50 }
 0x46f   :  { %10034 = vmatprep.subr.bf16.mxu1 %v15718_v24  ;;  %10076 = vmatpush2.bf16.msra.mxu0 %v15845_v25  ;;  %v15670_v24 = vcombine.high %v7053_v61, %v7057_v8  ;;  %v15797_v25 = vcombine.low %v7181_v17, %v7185_v10  ;;  %v17227_v10 = vld [vmem:[#allocation11 + $0x5c8] sm:$0xff] }
 0x470   :  { %10077 = vmatprep.subr.bf16.mxu0 %v15838_v29  ;;  %v7305_v29 = vld [vmem:[#allocation11 + $0xde0] sm:$0xff]  ;;  %v6847_v31 = vmax.f32 %v17180_v50, %v6839_v41  ;;  %v6902_v8 = vld [vmem:[#allocation11 + $0x148] sm:$0xff] }
 0x471   :  { %v15917_v36 = vcombine.low %v7301_v34, %v7305_v29 }
 0x472   :  { %10035 = vmatpush2.bf16.msra.mxu1 %v15717_v35  ;;  %v15918_v35 = vcombine.high %v7301_v34, %v7305_v29  ;;  %v6894_v34 = vld [vmem:[#allocation11 + $0x108] sm:$0xff] }
 0x473   :  { %10036 = vmatprep.subr.bf16.mxu1 %v15710_v9  ;;  %10078 = vmatpush2.bf16.msra.mxu0 %v15837_v55  ;;  %v7293_v9 = vld [vmem:[#allocation11 + $0xd80] sm:$0xff]  ;;  %v6898_v29 = vld [vmem:[#allocation11 + $0x128] sm:$0xff] }
 0x474   :  { %10079 = vmatprep.subr.bf16.mxu0 %v15830_v39  ;;  %v7297_v55 = vld [vmem:[#allocation11 + $0xda0] sm:$0xff]  ;;  %v17216_v39 = vpack.c.bf16 %v6847_v31, %v6847_v31 }
 0x475   :  { %v15910_v63 = vcombine.high %v7293_v9, %v7297_v55  ;;  %v15909_v60 = vcombine.low %v7293_v9, %v7297_v55  ;;  %v7253_v31 = vld [vmem:[#allocation11 + $0xc40] sm:$0xff]  ;;  %v15512_v55 = vcombine.high %v6894_v34, %v6898_v29 }
 0x476   :  { %10037 = vmatpush2.bf16.msra.mxu1 %v15709_v62  ;;  %v7285_v62 = vld [vmem:[#allocation11 + $0xd40] sm:$0xff] }
 0x477   :  { %10038 = vmatprep.subr.bf16.mxu1 %v15702_v45  ;;  %10080 = vmatpush2.bf16.msra.mxu0 %v15829_v51  ;;  %v7289_v45 = vld [vmem:[#allocation11 + $0xd60] sm:$0xff] }
 0x478   :  { %10081 = vmatprep.subr.bf16.mxu0 %v15822_v54  ;;  %v15902_v2 = vcombine.high %v7285_v62, %v7289_v45  ;;  %v15901_v42 = vcombine.low %v7285_v62, %v7289_v45  ;;  %v6890_v62 = vld [vmem:[#allocation11 + $0xe8] sm:$0xff] }
 0x47a   :  { %10039 = vmatpush2.bf16.msra.mxu1 %v15701_v33 }
 0x47b   :  { %10040 = vmatprep.subr.bf16.mxu1 %v15694_v3  ;;  %10082 = vmatpush2.bf16.msra.mxu0 %v15821_v4  ;;  %v7277_v4 = vld [vmem:[#allocation11 + $0xd00] sm:$0xff] }
 0x47c   :  { %10083 = vmatprep.subr.bf16.mxu0 %v15814_v49  ;;  %v15893_v61 = vcombine.low %v7277_v4, %v7281_v37 }
 0x47e   :  { %10041 = vmatpush2.bf16.msra.mxu1 %v15693_v57 }
 0x47f   :  { %10042 = vmatprep.subr.bf16.mxu1 %v15686_v11  ;;  %10084 = vmatpush2.bf16.msra.mxu0 %v15813_v28  ;;  %v6910_v28 = vld [vmem:[#allocation11 + $0x188] sm:$0xff] }
 0x480   :  { %10085 = vmatprep.subr.bf16.mxu0 %v15806_v1  ;;  %v7273_v1 = vld [vmem:[#allocation11 + $0xce0] sm:$0xff] }
 0x482   :  { %10043 = vmatpush2.bf16.msra.mxu1 %v15685_v12  ;;  %v17229_v12 = vld [vmem:[#allocation11 + $0x5e8] sm:$0xff] }
 0x483   :  { %10044 = vmatprep.subr.bf16.mxu1 %v15678_v5  ;;  %10086 = vmatpush2.bf16.msra.mxu0 %v15805_v20  ;;  %v15528_v20 = vcombine.high %v6910_v28, %v6914_v48  ;;  %v15663_v41 = vcombine.low %v17227_v10, %v17229_v12 }
 0x484   :  { %10087 = vmatprep.subr.bf16.mxu0 %v15798_v52  ;;  %v6906_v52 = vld [vmem:[#allocation11 + $0x168] sm:$0xff] }
 0x485   :  { %v15519_v9 = vcombine.low %v6902_v8, %v6906_v52 }
 0x486   :  { %10045 = vmatpush2.bf16.msra.mxu1 %v15677_v59  ;;  %v15886_v59 = vcombine.high %v7269_v7, %v7273_v1 }
 0x487   :  { %10046 = vmatprep.subr.bf16.mxu1 %v15670_v24  ;;  %10088 = vmatpush2.bf16.msra.mxu0 %v15797_v25  ;;  %v15527_v24 = vcombine.low %v6910_v28, %v6914_v48  ;;  %v15520_v25 = vcombine.high %v6902_v8, %v6906_v52  ;;  %v7353_v8 = vld [vmem:[#allocation11 + $0xf60] sm:$0xff] }
 0x488   :  { %10139 = vmatprep.subr.bf16.mxu0 %v15536_v27  ;;  %v15885_v27 = vcombine.low %v7269_v7, %v7273_v1  ;;  %v6862_v1 = vld [vmem:[#allocation11 + $0x8] sm:$0xff] }
 0x48a   :  { %10047 = vmatpush2.bf16.msra.mxu1 %v15669_v46  ;;  %v17214_v16 = vpop.f32.mrf.mxu0 }
 0x48b   :  { %10098 = vmatprep.subr.bf16.mxu1 %v15918_v35  ;;  %v7257_v35 = vld [vmem:[#allocation11 + $0xc60] sm:$0xff] }
 0x48c   :  { %v17218_v40 = vpop.f32.mrf.mxu0  ;;  %v15870_v45 = vcombine.high %v7253_v31, %v7257_v35 }
 0x48d   :  { %v6666_v51 = vpop.f32.mrf.mxu1  ;;  %10049 = vmatmul.mubr.bf16.vlgmr.msra.gmra.mxu1 %v17216_v39 }
 0x48e   :  { %v6667_v50 = vadd.f32 %v6666_v51, %v17202_v43  ;;  %v6711_v58 = vpop.f32.mrf.mxu0  ;;  %10099 = vmatpush1.bf16.msra.mxu1 %v15917_v36  ;;  %v15894_v43 = vcombine.high %v7277_v4, %v7281_v37  ;;  %v7245_v51 = vld [vmem:[#allocation11 + $0xc00] sm:$0xff] }
 0x48f   :  { %v6668_v54 = vpop.f32.mrf.mxu1  ;;  %10100 = vmatprep.subr.bf16.mxu1 %v15910_v63  ;;  %v6886_v63 = vld [vmem:[#allocation11 + $0xc8] sm:$0xff]  ;;  %v15511_v58 = vcombine.low %v6894_v34, %v6898_v29  ;;  %v7369_v4 = vld [vmem:[#allocation11 + $0xfe0] sm:$0xff] }
 0x490   :  { %v6841_v13 = vmul.f32 0.2, %v6667_v50  ;;  %v6669_v33 = vadd.f32 %v6668_v54, %v17204_v14  ;;  %v6712_v3 = vpop.f32.mrf.mxu0  ;;  %v15535_v14 = vcombine.low %v17206_v19, %v17208_v32  ;;  %v7261_v19 = vld [vmem:[#allocation11 + $0xc80] sm:$0xff]  ;;  %v15869_v54 = vcombine.low %v7253_v31, %v7257_v35  ;;  %v6974_v35 = vld [vmem:[#allocation11 + $0x388] sm:$0xff] }
 0x491   :  { %v6670_v6 = vpop.f32.mrf.mxu1  ;;  %v7265_v32 = vld [vmem:[#allocation11 + $0xca0] sm:$0xff]  ;;  %v15503_v37 = vcombine.low %v6886_v63, %v6890_v62 }
 0x492   :  { %v6842_v49 = vmul.f32 0.2, %v6669_v33  ;;  %10101 = vmatpush1.bf16.msra.mxu1 %v15909_v60  ;;  %v6849_v23 = vmax.f32 %v6667_v50, %v6841_v13  ;;  %v15878_v46 = vcombine.high %v7261_v19, %v7265_v32  ;;  %v15877_v36 = vcombine.low %v7261_v19, %v7265_v32  ;;  %v7249_v50 = vld [vmem:[#allocation11 + $0xc20] sm:$0xff]  ;;  %v6882_v13 = vld [vmem:[#allocation11 + $0xa8] sm:$0xff] }
 0x493   :  { %v6671_v57 = vpop.f32.mrf.mxu1  ;;  %10102 = vmatprep.subr.bf16.mxu1 %v15902_v2  ;;  %v15504_v60 = vcombine.high %v6886_v63, %v6890_v62  ;;  %v6878_v2 = vld [vmem:[#allocation11 + $0x88] sm:$0xff]  ;;  %v7365_v3 = vld [vmem:[#allocation11 + $0xfc0] sm:$0xff] }
 0x494   :  { %v6850_v11 = vmax.f32 %v6669_v33, %v6842_v49  ;;  %v17231_v5 = vpack.c.bf16 %v6849_v23, %v6849_v23  ;;  %v15862_v33 = vcombine.high %v7245_v51, %v7249_v50  ;;  %v15496_v6 = vcombine.high %v6878_v2, %v6882_v13  ;;  %v6874_v23 = vld [vmem:[#allocation11 + $0x68] sm:$0xff]  ;;  %v7345_v34 = vld [vmem:[#allocation11 + $0xf20] sm:$0xff] }
 0x495   :  { %v15861_v49 = vcombine.low %v7245_v51, %v7249_v50  ;;  %v15982_v57 = vcombine.high %v7365_v3, %v7369_v4  ;;  %v15495_v28 = vcombine.low %v6878_v2, %v6882_v13  ;;  %v15981_v7 = vcombine.low %v7365_v3, %v7369_v4  ;;  %v6982_v32 = vld [vmem:[#allocation11 + $0x3c8] sm:$0xff]  ;;  %v7337_v63 = vld [vmem:[#allocation11 + $0xee0] sm:$0xff] }
 0x496   :  { %v17223_v17 = vpack.c.bf16 %v6850_v11, %v6850_v11  ;;  %10103 = vmatpush1.bf16.msra.mxu1 %v15901_v42  ;;  %v6870_v42 = vld [vmem:[#allocation11 + $0x48] sm:$0xff]  ;;  %v7361_v11 = vld [vmem:[#allocation11 + $0xfa0] sm:$0xff] }
 0x497   :  { %10104 = vmatprep.subr.bf16.mxu1 %v15894_v43  ;;  %v7357_v43 = vld [vmem:[#allocation11 + $0xf80] sm:$0xff]  ;;  %v15488_v48 = vcombine.high %v6870_v42, %v6874_v23  ;;  %v15487_v52 = vcombine.low %v6870_v42, %v6874_v23  ;;  %v6966_v50 = vld [vmem:[#allocation11 + $0x348] sm:$0xff] }
 0x498   :  { %10089 = vmatprep.mubr.bf16.mxu0 %v17223_v17  ;;  %v15973_v19 = vcombine.low %v7357_v43, %v7361_v11  ;;  %v7329_v2 = vld [vmem:[#allocation11 + $0xea0] sm:$0xff]  ;;  %v6958_v4 = vld [vmem:[#allocation11 + $0x308] sm:$0xff] }
 0x499   :  { %10090 = vmatmul.mubr.bf16.vlgmr.msra.gmra.mxu0 %v17231_v5  ;;  %v7321_v42 = vld [vmem:[#allocation11 + $0xe60] sm:$0xff] }
 0x49a   :  { %10140 = vmatpush1.bf16.msra.mxu0 %v15535_v14  ;;  %10171 = vmatprep.mubr.bf16.mxu0 %v17170_v18  ;;  %v6866_v14 = vld [vmem:[#allocation11 + $0x28] sm:$0xff] }
 0x49b   :  { %10141 = vmatprep.subr.bf16.mxu0 %v15528_v20  ;;  %10105 = vmatpush1.bf16.msra.mxu1 %v15893_v61  ;;  %v15974_v20 = vcombine.high %v7357_v43, %v7361_v11  ;;  %v7349_v61 = vld [vmem:[#allocation11 + $0xf40] sm:$0xff]  ;;  %v15479_v29 = vcombine.low %v6862_v1, %v6866_v14  ;;  %v6950_v11 = vld [vmem:[#allocation11 + $0x2c8] sm:$0xff] }
 0x49c   :  { %10106 = vmatprep.subr.bf16.mxu1 %v15886_v59  ;;  %v15480_v59 = vcombine.high %v6862_v1, %v6866_v14  ;;  %v15965_v31 = vcombine.low %v7349_v61, %v7353_v8  ;;  %v7313_v1 = vld [vmem:[#allocation11 + $0xe20] sm:$0xff] }
 0x49e   :  { %10142 = vmatpush1.bf16.msra.mxu0 %v15527_v24  ;;  %v6986_v24 = vld [vmem:[#allocation11 + $0x3e8] sm:$0xff] }
 0x49f   :  { %10143 = vmatprep.subr.bf16.mxu0 %v15520_v25  ;;  %10107 = vmatpush1.bf16.msra.mxu1 %v15885_v27  ;;  %v15966_v25 = vcombine.high %v7349_v61, %v7353_v8  ;;  %v7341_v27 = vld [vmem:[#allocation11 + $0xf00] sm:$0xff]  ;;  %v15599_v62 = vcombine.low %v6982_v32, %v6986_v24  ;;  %v6942_v8 = vld [vmem:[#allocation11 + $0x288] sm:$0xff] }
 0x4a0   :  { %10108 = vmatprep.subr.bf16.mxu1 %v15878_v46  ;;  %v15600_v46 = vcombine.high %v6982_v32, %v6986_v24  ;;  %v15957_v51 = vcombine.low %v7341_v27, %v7345_v34 }
 0x4a2   :  { %10144 = vmatpush1.bf16.msra.mxu0 %v15519_v9  ;;  %v6978_v9 = vld [vmem:[#allocation11 + $0x3a8] sm:$0xff] }
 0x4a3   :  { %10145 = vmatprep.subr.bf16.mxu0 %v15512_v55  ;;  %10109 = vmatpush1.bf16.msra.mxu1 %v15877_v36  ;;  %v15958_v55 = vcombine.high %v7341_v27, %v7345_v34  ;;  %v7333_v36 = vld [vmem:[#allocation11 + $0xec0] sm:$0xff]  ;;  %v15591_v13 = vcombine.low %v6974_v35, %v6978_v9  ;;  %v6934_v34 = vld [vmem:[#allocation11 + $0x248] sm:$0xff] }
 0x4a4   :  { %10110 = vmatprep.subr.bf16.mxu1 %v15870_v45  ;;  %v15592_v45 = vcombine.high %v6974_v35, %v6978_v9  ;;  %v15949_v3 = vcombine.low %v7333_v36, %v7337_v63 }
 0x4a6   :  { %10146 = vmatpush1.bf16.msra.mxu0 %v15511_v58  ;;  %v6970_v58 = vld [vmem:[#allocation11 + $0x368] sm:$0xff] }
 0x4a7   :  { %10147 = vmatprep.subr.bf16.mxu0 %v15504_v60  ;;  %10111 = vmatpush1.bf16.msra.mxu1 %v15869_v54  ;;  %v15950_v60 = vcombine.high %v7333_v36, %v7337_v63  ;;  %v7325_v54 = vld [vmem:[#allocation11 + $0xe80] sm:$0xff]  ;;  %v15583_v23 = vcombine.low %v6966_v50, %v6970_v58 }
 0x4a8   :  { %10112 = vmatprep.subr.bf16.mxu1 %v15862_v33  ;;  %v15584_v33 = vcombine.high %v6966_v50, %v6970_v58  ;;  %v15941_v43 = vcombine.low %v7325_v54, %v7329_v2 }
 0x4aa   :  { %10148 = vmatpush1.bf16.msra.mxu0 %v15503_v37  ;;  %v6962_v37 = vld [vmem:[#allocation11 + $0x328] sm:$0xff] }
 0x4ab   :  { %10149 = vmatprep.subr.bf16.mxu0 %v15496_v6  ;;  %10113 = vmatpush1.bf16.msra.mxu1 %v15861_v49  ;;  %v15942_v6 = vcombine.high %v7325_v54, %v7329_v2  ;;  %v7317_v49 = vld [vmem:[#allocation11 + $0xe40] sm:$0xff]  ;;  %v15575_v14 = vcombine.low %v6958_v4, %v6962_v37 }
 0x4ac   :  { %10114 = vmatprep.subr.bf16.mxu1 %v15982_v57  ;;  %v15576_v57 = vcombine.high %v6958_v4, %v6962_v37  ;;  %v15933_v61 = vcombine.low %v7317_v49, %v7321_v42  ;;  %v7174_v4 = vld [vmem:[#allocation11 + $0x9c8] sm:$0xff] }
 0x4ad   :  { %v7178_v37 = vld [vmem:[#allocation11 + $0x9e8] sm:$0xff] }
 0x4ae   :  { %10150 = vmatpush1.bf16.msra.mxu0 %v15495_v28  ;;  %v6954_v28 = vld [vmem:[#allocation11 + $0x2e8] sm:$0xff] }
 0x4af   :  { %10151 = vmatprep.subr.bf16.mxu0 %v15488_v48  ;;  %10115 = vmatpush2.bf16.msra.mxu1 %v15981_v7  ;;  %v15934_v48 = vcombine.high %v7317_v49, %v7321_v42  ;;  %v7309_v7 = vld [vmem:[#allocation11 + $0xe00] sm:$0xff] }
 0x4b0   :  { %10116 = vmatprep.subr.bf16.mxu1 %v15974_v20  ;;  %v15568_v20 = vcombine.high %v6950_v11, %v6954_v28  ;;  %v15925_v24 = vcombine.low %v7309_v7, %v7313_v1 }
 0x4b2   :  { %10152 = vmatpush1.bf16.msra.mxu0 %v15487_v52  ;;  %v6946_v52 = vld [vmem:[#allocation11 + $0x2a8] sm:$0xff] }
 0x4b3   :  { %10153 = vmatprep.subr.bf16.mxu0 %v15480_v59  ;;  %10117 = vmatpush2.bf16.msra.mxu1 %v15973_v19  ;;  %v15926_v59 = vcombine.high %v7309_v7, %v7313_v1  ;;  %v15567_v19 = vcombine.low %v6950_v11, %v6954_v28  ;;  %v15560_v32 = vcombine.high %v6942_v8, %v6946_v52  ;;  %v7162_v7 = vld [vmem:[#allocation11 + $0x968] sm:$0xff] }
 0x4b4   :  { %10118 = vmatprep.subr.bf16.mxu1 %v15966_v25  ;;  %v16528_v25 = vld [vmem:[#allocation10] sm:$0xff]  ;;  %v15559_v9 = vcombine.low %v6942_v8, %v6946_v52  ;;  %v15791_v11 = vcombine.low %v7174_v4, %v7178_v37 }
 0x4b5   :  { %v3608_v27 = vrot.slane %v16528_v25, %v17095_v56 }
 0x4b6   :  { %10154 = vmatpush1.bf16.msra.mxu0 %v15479_v29  ;;  %v6938_v29 = vld [vmem:[#allocation11 + $0x268] sm:$0xff] }
 0x4b7   :  { %10155 = vmatprep.subr.bf16.mxu0 %v15600_v46  ;;  %10119 = vmatpush2.bf16.msra.mxu1 %v15965_v31  ;;  %v15664_v46 = vcombine.high %v17227_v10, %v17229_v12  ;;  %v3612_v31 = vrot.slane %v16528_v25, %v17098_v22  ;;  %v6708_v36 = vadd.f32 %v17214_v16, %v3608_v27  ;;  %v7134_v25 = vld [vmem:[#allocation11 + $0x888] sm:$0xff] }
 0x4b8   :  { %10120 = vmatprep.subr.bf16.mxu1 %v15958_v55  ;;  %v15552_v55 = vcombine.high %v6934_v34, %v6938_v29  ;;  %v15551_v54 = vcombine.low %v6934_v34, %v6938_v29  ;;  %v7138_v27 = vld [vmem:[#allocation11 + $0x8a8] sm:$0xff] }
 0x4b9   :  { %v6710_v50 = vadd.f32 %v17218_v40, %v3612_v31  ;;  %v15792_v40 = vcombine.high %v7174_v4, %v7178_v37  ;;  %v15752_v29 = vcombine.high %v7134_v25, %v7138_v27  ;;  %v7130_v31 = vld [vmem:[#allocation11 + $0x868] sm:$0xff] }
 0x4ba   :  { %10156 = vmatpush2.bf16.msra.mxu0 %v15599_v62  ;;  %v6926_v62 = vld [vmem:[#allocation11 + $0x208] sm:$0xff] }
 0x4bb   :  { %10157 = vmatprep.subr.bf16.mxu0 %v15592_v45  ;;  %10121 = vmatpush2.bf16.msra.mxu1 %v15957_v51  ;;  %v6930_v45 = vld [vmem:[#allocation11 + $0x228] sm:$0xff] }
 0x4bc   :  { %10122 = vmatprep.subr.bf16.mxu1 %v15950_v60  ;;  %v15543_v49 = vcombine.low %v6926_v62, %v6930_v45 }
 0x4be   :  { %10158 = vmatpush2.bf16.msra.mxu0 %v15591_v13  ;;  %v15544_v13 = vcombine.high %v6926_v62, %v6930_v45  ;;  %v7238_v45 = vld [vmem:[#allocation11 + $0xbc8] sm:$0xff] }
 0x4bf   :  { %10159 = vmatprep.subr.bf16.mxu0 %v15584_v33  ;;  %10123 = vmatpush2.bf16.msra.mxu1 %v15949_v3 }
 0x4c0   :  { %10124 = vmatprep.subr.bf16.mxu1 %v15942_v6 }
 0x4c2   :  { %10160 = vmatpush2.bf16.msra.mxu0 %v15583_v23 }
 0x4c3   :  { %10161 = vmatprep.subr.bf16.mxu0 %v15576_v57  ;;  %10125 = vmatpush2.bf16.msra.mxu1 %v15941_v43  ;;  %v7166_v57 = vld [vmem:[#allocation11 + $0x988] sm:$0xff] }
 0x4c4   :  { %10126 = vmatprep.subr.bf16.mxu1 %v15934_v48  ;;  %v7170_v43 = vld [vmem:[#allocation11 + $0x9a8] sm:$0xff] }
 0x4c5   :  { %v15784_v28 = vcombine.high %v7166_v57, %v7170_v43  ;;  %v7158_v48 = vld [vmem:[#allocation11 + $0x948] sm:$0xff]  ;;  %v15783_v1 = vcombine.low %v7166_v57, %v7170_v43 }
 0x4c6   :  { %10162 = vmatpush2.bf16.msra.mxu0 %v15575_v14  ;;  %v15776_v14 = vcombine.high %v7158_v48, %v7162_v7  ;;  %v15775_v8 = vcombine.low %v7158_v48, %v7162_v7  ;;  %v7206_v57 = vld [vmem:[#allocation11 + $0xac8] sm:$0xff] }
 0x4c7   :  { %10163 = vmatprep.subr.bf16.mxu0 %v15568_v20  ;;  %10127 = vmatpush2.bf16.msra.mxu1 %v15933_v61  ;;  %v7150_v20 = vld [vmem:[#allocation11 + $0x908] sm:$0xff] }
 0x4c8   :  { %10128 = vmatprep.subr.bf16.mxu1 %v15926_v59  ;;  %v7154_v61 = vld [vmem:[#allocation11 + $0x928] sm:$0xff] }
 0x4c9   :  { %v15768_v52 = vcombine.high %v7150_v20, %v7154_v61  ;;  %v7142_v59 = vld [vmem:[#allocation11 + $0x8c8] sm:$0xff] }
 0x4ca   :  { %10164 = vmatpush2.bf16.msra.mxu0 %v15567_v19  ;;  %v6789_v35 = vpop.f32.mrf.mxu0  ;;  %v7146_v19 = vld [vmem:[#allocation11 + $0x8e8] sm:$0xff] }
 0x4cb   :  { %10165 = vmatprep.subr.bf16.mxu0 %v15560_v32  ;;  %10129 = vmatpush2.bf16.msra.mxu1 %v15925_v24  ;;  %v15767_v32 = vcombine.low %v7150_v20, %v7154_v61  ;;  %v15760_v24 = vcombine.high %v7142_v59, %v7146_v19  ;;  %v15759_v34 = vcombine.low %v7142_v59, %v7146_v19  ;;  %v7210_v43 = vld [vmem:[#allocation11 + $0xae8] sm:$0xff] }
 0x4cc   :  { %v6791_v63 = vpop.f32.mrf.mxu0  ;;  %10180 = vmatprep.subr.bf16.mxu1 %v15664_v46  ;;  %v7126_v46 = vld [vmem:[#allocation11 + $0x848] sm:$0xff] }
 0x4cd   :  { %v6748_v51 = vpop.f32.mrf.mxu1  ;;  %v7198_v48 = vld [vmem:[#allocation11 + $0xa88] sm:$0xff] }
 0x4ce   :  { %v6749_v58 = vadd.f32 %v6748_v51, %v6708_v36  ;;  %10166 = vmatpush2.bf16.msra.mxu0 %v15559_v9  ;;  %v6793_v60 = vpop.f32.mrf.mxu0  ;;  %v15744_v9 = vcombine.high %v7126_v46, %v7130_v31  ;;  %v7122_v36 = vld [vmem:[#allocation11 + $0x828] sm:$0xff] }
 0x4cf   :  { %v6750_v2 = vpop.f32.mrf.mxu1  ;;  %10167 = vmatprep.subr.bf16.mxu0 %v15552_v55  ;;  %v7118_v55 = vld [vmem:[#allocation11 + $0x808] sm:$0xff] }
 0x4d0   :  { %v6751_v33 = vadd.f32 %v6750_v2, %v6710_v50  ;;  %v6794_v3 = vpop.f32.mrf.mxu0  ;;  %v17244_v6 = vadd.f32 %v6789_v35, %v6749_v58  ;;  %v15751_v35 = vcombine.low %v7134_v25, %v7138_v27  ;;  %v15736_v62 = vcombine.high %v7118_v55, %v7122_v36  ;;  %v7242_v51 = vld [vmem:[#allocation11 + $0xbe8] sm:$0xff] }
 0x4d1   :  { %v6752_v16 = vpop.f32.mrf.mxu1  ;;  %v15735_v50 = vcombine.low %v7118_v55, %v7122_v36  ;;  %v15856_v58 = vcombine.high %v7238_v45, %v7242_v51  ;;  %v7230_v60 = vld [vmem:[#allocation11 + $0xb88] sm:$0xff]  ;;  %v15855_v2 = vcombine.low %v7238_v45, %v7242_v51  ;;  %v6919_v36 = vld [vmem:[#allocation11 + $0x1d0] sm:$0xff] }
 0x4d2   :  { %10168 = vmatpush2.bf16.msra.mxu0 %v15551_v54  ;;  %v17246_v42 = vadd.f32 %v6791_v63, %v6751_v33  ;;  %v15743_v63 = vcombine.low %v7126_v46, %v7130_v31  ;;  %v7234_v54 = vld [vmem:[#allocation11 + $0xba8] sm:$0xff] }
 0x4d3   :  { %v6753_v23 = vpop.f32.mrf.mxu1  ;;  %10169 = vmatprep.subr.bf16.mxu0 %v15544_v13  ;;  %v15848_v13 = vcombine.high %v7230_v60, %v7234_v54  ;;  %v7222_v33 = vld [vmem:[#allocation11 + $0xb48] sm:$0xff]  ;;  %v15847_v4 = vcombine.low %v7230_v60, %v7234_v54 }
 0x4d4   :  { %v7226_v3 = vld [vmem:[#allocation11 + $0xb68] sm:$0xff] }
 0x4d5   :  { %v15840_v37 = vcombine.high %v7222_v33, %v7226_v3  ;;  %v7214_v16 = vld [vmem:[#allocation11 + $0xb08] sm:$0xff]  ;;  %v15839_v23 = vcombine.low %v7222_v33, %v7226_v3  ;;  %v6915_v33 = vld [vmem:[#allocation11 + $0x1b0] sm:$0xff] }
 0x4d6   :  { %10170 = vmatpush2.bf16.msra.mxu0 %v15543_v49  ;;  %v7218_v49 = vld [vmem:[#allocation11 + $0xb28] sm:$0xff] }
 0x4d7   :  { %10221 = vmatprep.subr.bf16.mxu0 %v15792_v40  ;;  %v15832_v40 = vcombine.high %v7214_v16, %v7218_v49  ;;  %v7202_v7 = vld [vmem:[#allocation11 + $0xaa8] sm:$0xff] }
 0x4d8   :  { %v7190_v20 = vld [vmem:[#allocation11 + $0xa48] sm:$0xff] }
 0x4d9   :  { %10172 = vmatmul.mubr.bf16.vlgmr.msra.gmra.mxu0 %v17189_v47  ;;  %v7194_v61 = vld [vmem:[#allocation11 + $0xa68] sm:$0xff] }
 0x4da   :  { %10222 = vmatpush1.bf16.msra.mxu0 %v15791_v11  ;;  %10253 = vmatprep.mubr.bf16.mxu0 %v17223_v17  ;;  %v15831_v11 = vcombine.low %v7214_v16, %v7218_v49  ;;  %v15808_v59 = vcombine.high %v7190_v20, %v7194_v61  ;;  %v7038_v54 = vld [vmem:[#allocation11 + $0x588] sm:$0xff] }
 0x4db   :  { %10223 = vmatprep.subr.bf16.mxu0 %v15784_v28  ;;  %v15824_v28 = vcombine.high %v7206_v57, %v7210_v43 }
 0x4de   :  { %10224 = vmatpush1.bf16.msra.mxu0 %v15783_v1  ;;  %v15823_v1 = vcombine.low %v7206_v57, %v7210_v43  ;;  %v6907_v57 = vld [vmem:[#allocation11 + $0x170] sm:$0xff] }
 0x4df   :  { %10225 = vmatprep.subr.bf16.mxu0 %v15776_v14  ;;  %v15816_v14 = vcombine.high %v7198_v48, %v7202_v7 }
 0x4e2   :  { %10226 = vmatpush1.bf16.msra.mxu0 %v15775_v8 }
 0x4e3   :  { %10227 = vmatprep.subr.bf16.mxu0 %v15768_v52  ;;  %v15815_v52 = vcombine.low %v7198_v48, %v7202_v7  ;;  %v7022_v7 = vld [vmem:[#allocation11 + $0x508] sm:$0xff] }
 0x4e6   :  { %10228 = vmatpush1.bf16.msra.mxu0 %v15767_v32  ;;  %v7182_v32 = vld [vmem:[#allocation11 + $0xa08] sm:$0xff] }
 0x4e7   :  { %10229 = vmatprep.subr.bf16.mxu0 %v15760_v24  ;;  %v7186_v24 = vld [vmem:[#allocation11 + $0xa28] sm:$0xff] }
 0x4e8   :  { %v15800_v31 = vcombine.high %v7182_v32, %v7186_v24  ;;  %v15799_v51 = vcombine.low %v7182_v32, %v7186_v24  ;;  %v6887_v32 = vld [vmem:[#allocation11 + $0xd0] sm:$0xff] }
 0x4e9   :  { %v6891_v24 = vld [vmem:[#allocation11 + $0xf0] sm:$0xff] }
 0x4ea   :  { %10230 = vmatpush1.bf16.msra.mxu0 %v15759_v34 }
 0x4eb   :  { %10231 = vmatprep.subr.bf16.mxu0 %v15752_v29  ;;  %v15807_v29 = vcombine.low %v7190_v20, %v7194_v61  ;;  %v6899_v20 = vld [vmem:[#allocation11 + $0x130] sm:$0xff] }
 0x4ee   :  { %10232 = vmatpush1.bf16.msra.mxu0 %v15751_v35 }
 0x4ef   :  { %10233 = vmatprep.subr.bf16.mxu0 %v15744_v9 }
 0x4f2   :  { %10234 = vmatpush1.bf16.msra.mxu0 %v15743_v63  ;;  %v6923_v63 = vld [vmem:[#allocation11 + $0x1f0] sm:$0xff] }
 0x4f3   :  { %10235 = vmatprep.subr.bf16.mxu0 %v15736_v62 }
 0x4f6   :  { %10236 = vmatpush1.bf16.msra.mxu0 %v15735_v50 }
 0x4f7   :  { %10237 = vmatprep.subr.bf16.mxu0 %v15856_v58 }
 0x4fa   :  { %10238 = vmatpush2.bf16.msra.mxu0 %v15855_v2  ;;  %v7042_v2 = vld [vmem:[#allocation11 + $0x5a8] sm:$0xff] }
 0x4fb   :  { %10239 = vmatprep.subr.bf16.mxu0 %v15848_v13  ;;  %v6911_v13 = vld [vmem:[#allocation11 + $0x190] sm:$0xff]  ;;  %v15656_v16 = vcombine.high %v7038_v54, %v7042_v2  ;;  %v15655_v43 = vcombine.low %v7038_v54, %v7042_v2 }
 0x4fc   :  { %v15530_v49 = vcombine.high %v6911_v13, %v6915_v33 }
 0x4fe   :  { %10240 = vmatpush2.bf16.msra.mxu0 %v15847_v4 }
 0x4ff   :  { %10241 = vmatprep.subr.bf16.mxu0 %v15840_v37  ;;  %v7030_v37 = vld [vmem:[#allocation11 + $0x548] sm:$0xff] }
 0x502   :  { %10242 = vmatpush2.bf16.msra.mxu0 %v15839_v23  ;;  %v7034_v23 = vld [vmem:[#allocation11 + $0x568] sm:$0xff] }
 0x503   :  { %10243 = vmatprep.subr.bf16.mxu0 %v15832_v40  ;;  %v6903_v40 = vld [vmem:[#allocation11 + $0x150] sm:$0xff]  ;;  %v15647_v61 = vcombine.low %v7030_v37, %v7034_v23 }
 0x504   :  { %v15522_v48 = vcombine.high %v6903_v40, %v6907_v57  ;;  %v15521_v10 = vcombine.low %v6903_v40, %v6907_v57  ;;  %v7110_v57 = vld [vmem:[#allocation11 + $0x7c8] sm:$0xff] }
 0x506   :  { %10244 = vmatpush2.bf16.msra.mxu0 %v15831_v11  ;;  %v15529_v11 = vcombine.low %v6911_v13, %v6915_v33  ;;  %v6990_v13 = vld [vmem:[#allocation11 + $0x408] sm:$0xff] }
 0x507   :  { %10245 = vmatprep.subr.bf16.mxu0 %v15824_v28  ;;  %v15648_v28 = vcombine.high %v7030_v37, %v7034_v23  ;;  %v6994_v33 = vld [vmem:[#allocation11 + $0x428] sm:$0xff]  ;;  %v6867_v37 = vld [vmem:[#allocation11 + $0x30] sm:$0xff] }
 0x508   :  { %v15608_v23 = vcombine.high %v6990_v13, %v6994_v33 }
 0x50a   :  { %10246 = vmatpush2.bf16.msra.mxu0 %v15823_v1  ;;  %v17250_v8 = vpop.f32.mrf.mxu0  ;;  %v7026_v1 = vld [vmem:[#allocation11 + $0x528] sm:$0xff] }
 0x50b   :  { %10247 = vmatprep.subr.bf16.mxu0 %v15816_v14  ;;  %v6895_v14 = vld [vmem:[#allocation11 + $0x110] sm:$0xff]  ;;  %v15640_v12 = vcombine.high %v7022_v7, %v7026_v1 }
 0x50c   :  { %v17252_v19 = vpop.f32.mrf.mxu0 }
 0x50d   :  { %v6830_v25 = vpop.f32.mrf.mxu1 }
 0x50e   :  { %v6831_v27 = vadd.f32 %v6830_v25, %v17244_v6  ;;  %10248 = vmatpush2.bf16.msra.mxu0 %v15815_v52  ;;  %v10013_v34 = vpop.f32.mrf.mxu0  ;;  %v15538_v6 = vcombine.high %v6919_v36, %v6923_v63  ;;  %v7014_v52 = vld [vmem:[#allocation11 + $0x4c8] sm:$0xff]  ;;  %v15639_v25 = vcombine.low %v7022_v7, %v7026_v1 }
 0x50f   :  { %v6832_v46 = vpop.f32.mrf.mxu1  ;;  %10249 = vmatprep.subr.bf16.mxu0 %v15808_v59  ;;  %v7018_v59 = vld [vmem:[#allocation11 + $0x4e8] sm:$0xff] }
 0x510   :  { %v6843_v35 = vmul.f32 0.2, %v6831_v27  ;;  %v6833_v9 = vadd.f32 %v6832_v46, %v17246_v42  ;;  %v10014_v55 = vpop.f32.mrf.mxu0  ;;  %v15537_v42 = vcombine.low %v6919_v36, %v6923_v63  ;;  %v15632_v34 = vcombine.high %v7014_v52, %v7018_v59  ;;  %v7006_v46 = vld [vmem:[#allocation11 + $0x488] sm:$0xff] }
 0x511   :  { %v6834_v62 = vpop.f32.mrf.mxu1  ;;  %v15631_v55 = vcombine.low %v7014_v52, %v7018_v59  ;;  %v15505_v36 = vcombine.low %v6887_v32, %v6891_v24 }
 0x512   :  { %v6844_v45 = vmul.f32 0.2, %v6833_v9  ;;  %10250 = vmatpush2.bf16.msra.mxu0 %v15807_v29  ;;  %v6851_v50 = vmax.f32 %v6831_v27, %v6843_v35  ;;  %v15513_v27 = vcombine.low %v6895_v14, %v6899_v20  ;;  %v15506_v29 = vcombine.high %v6887_v32, %v6891_v24  ;;  %v6879_v35 = vld [vmem:[#allocation11 + $0x90] sm:$0xff]  ;;  %v7094_v24 = vld [vmem:[#allocation11 + $0x748] sm:$0xff] }
 0x513   :  { %v6835_v58 = vpop.f32.mrf.mxu1  ;;  %10251 = vmatprep.subr.bf16.mxu0 %v15800_v31  ;;  %v7010_v31 = vld [vmem:[#allocation11 + $0x4a8] sm:$0xff] }
 0x514   :  { %v6852_v60 = vmax.f32 %v6833_v9, %v6844_v45  ;;  %v17258_v4 = vpack.c.bf16 %v6851_v50, %v6851_v50  ;;  %v6883_v9 = vld [vmem:[#allocation11 + $0xb0] sm:$0xff]  ;;  %v15624_v63 = vcombine.high %v7006_v46, %v7010_v31  ;;  %v6998_v45 = vld [vmem:[#allocation11 + $0x448] sm:$0xff] }
 0x515   :  { %v15498_v62 = vcombine.high %v6879_v35, %v6883_v9  ;;  %v6871_v50 = vld [vmem:[#allocation11 + $0x50] sm:$0xff] }
 0x516   :  { %v17256_v3 = vpack.c.bf16 %v6852_v60, %v6852_v60  ;;  %10252 = vmatpush2.bf16.msra.mxu0 %v15799_v51  ;;  %v7002_v51 = vld [vmem:[#allocation11 + $0x468] sm:$0xff]  ;;  %v6875_v58 = vld [vmem:[#allocation11 + $0x70] sm:$0xff]  ;;  %v15497_v60 = vcombine.low %v6879_v35, %v6883_v9 }
 0x517   :  { %10303 = vmatprep.subr.bf16.mxu0 %v15538_v6  ;;  %v15623_v6 = vcombine.low %v7006_v46, %v7010_v31  ;;  %v15616_v54 = vcombine.high %v6998_v45, %v7002_v51  ;;  %v15490_v2 = vcombine.high %v6871_v50, %v6875_v58  ;;  %v7086_v9 = vld [vmem:[#allocation11 + $0x708] sm:$0xff] }
 0x518   :  { %10130 = vmatprep.mubr.bf16.mxu1 %v17256_v3 }
 0x519   :  { %10254 = vmatmul.mubr.bf16.vlgmr.msra.gmra.mxu0 %v17231_v5  ;;  %10131 = vmatmul.mubr.bf16.vlgmr.msra.gmra.mxu1 %v17258_v4 }
 0x51a   :  { %10181 = vmatpush1.bf16.msra.mxu1 %v15663_v41  ;;  %10304 = vmatpush1.bf16.msra.mxu0 %v15537_v42  ;;  %v15514_v41 = vcombine.high %v6895_v14, %v6899_v20  ;;  %v6863_v42 = vld [vmem:[#allocation11 + $0x10] sm:$0xff]  ;;  %v7102_v20 = vld [vmem:[#allocation11 + $0x788] sm:$0xff] }
 0x51b   :  { %10335 = vmatprep.mubr.bf16.mxu0 %v17170_v18  ;;  %10212 = vmatprep.mubr.bf16.mxu1 %v17197_v44  ;;  %v15482_v40 = vcombine.high %v6863_v42, %v6867_v37  ;;  %v15481_v7 = vcombine.low %v6863_v42, %v6867_v37  ;;  %v7070_v37 = vld [vmem:[#allocation11 + $0x688] sm:$0xff] }
 0x51c   :  { %10182 = vmatprep.subr.bf16.mxu1 %v15656_v16  ;;  %10305 = vmatprep.subr.bf16.mxu0 %v15530_v49  ;;  %v15615_v16 = vcombine.low %v6998_v45, %v7002_v51  ;;  %v15489_v49 = vcombine.low %v6871_v50, %v6875_v58  ;;  %v7078_v58 = vld [vmem:[#allocation11 + $0x6c8] sm:$0xff] }
 0x51e   :  { %10183 = vmatpush1.bf16.msra.mxu1 %v15655_v43  ;;  %10306 = vmatpush1.bf16.msra.mxu0 %v15529_v11  ;;  %v7114_v43 = vld [vmem:[#allocation11 + $0x7e8] sm:$0xff]  ;;  %v6983_v11 = vld [vmem:[#allocation11 + $0x3d0] sm:$0xff] }
 0x51f   :  { %10184 = vmatprep.subr.bf16.mxu1 %v15648_v28  ;;  %10307 = vmatprep.subr.bf16.mxu0 %v15522_v48  ;;  %v6987_v28 = vld [vmem:[#allocation11 + $0x3f0] sm:$0xff]  ;;  %v15607_v48 = vcombine.low %v6990_v13, %v6994_v33  ;;  %v15728_v1 = vcombine.high %v7110_v57, %v7114_v43 }
 0x520   :  { %v15602_v14 = vcombine.high %v6983_v11, %v6987_v28  ;;  %v15601_v52 = vcombine.low %v6983_v11, %v6987_v28 }
 0x522   :  { %10185 = vmatpush1.bf16.msra.mxu1 %v15647_v61  ;;  %10308 = vmatpush1.bf16.msra.mxu0 %v15521_v10  ;;  %v7106_v61 = vld [vmem:[#allocation11 + $0x7a8] sm:$0xff]  ;;  %v6975_v10 = vld [vmem:[#allocation11 + $0x390] sm:$0xff] }
 0x523   :  { %10186 = vmatprep.subr.bf16.mxu1 %v15640_v12  ;;  %10309 = vmatprep.subr.bf16.mxu0 %v15514_v41  ;;  %v6979_v12 = vld [vmem:[#allocation11 + $0x3b0] sm:$0xff]  ;;  %v15727_v41 = vcombine.low %v7110_v57, %v7114_v43  ;;  %v15720_v59 = vcombine.high %v7102_v20, %v7106_v61 }
 0x524   :  { %v15594_v32 = vcombine.high %v6975_v10, %v6979_v12  ;;  %v15593_v46 = vcombine.low %v6975_v10, %v6979_v12 }
 0x526   :  { %10187 = vmatpush1.bf16.msra.mxu1 %v15639_v25  ;;  %10310 = vmatpush1.bf16.msra.mxu0 %v15513_v27  ;;  %v7098_v25 = vld [vmem:[#allocation11 + $0x768] sm:$0xff]  ;;  %v6967_v27 = vld [vmem:[#allocation11 + $0x350] sm:$0xff] }
 0x527   :  { %10188 = vmatprep.subr.bf16.mxu1 %v15632_v34  ;;  %10311 = vmatprep.subr.bf16.mxu0 %v15506_v29  ;;  %v6971_v34 = vld [vmem:[#allocation11 + $0x370] sm:$0xff]  ;;  %v15719_v29 = vcombine.low %v7102_v20, %v7106_v61  ;;  %v15712_v31 = vcombine.high %v7094_v24, %v7098_v25 }
 0x528   :  { %v15586_v35 = vcombine.high %v6967_v27, %v6971_v34  ;;  %v15585_v45 = vcombine.low %v6967_v27, %v6971_v34  ;;  %v6939_v20 = vld [vmem:[#allocation11 + $0x270] sm:$0xff] }
 0x529   :  { %v6931_v27 = vld [vmem:[#allocation11 + $0x230] sm:$0xff] }
 0x52a   :  { %10189 = vmatpush1.bf16.msra.mxu1 %v15631_v55  ;;  %10312 = vmatpush1.bf16.msra.mxu0 %v15505_v36  ;;  %v7090_v55 = vld [vmem:[#allocation11 + $0x728] sm:$0xff]  ;;  %v6959_v36 = vld [vmem:[#allocation11 + $0x310] sm:$0xff] }
 0x52b   :  { %10190 = vmatprep.subr.bf16.mxu1 %v15624_v63  ;;  %10313 = vmatprep.subr.bf16.mxu0 %v15498_v62  ;;  %v6963_v63 = vld [vmem:[#allocation11 + $0x330] sm:$0xff]  ;;  %v15711_v62 = vcombine.low %v7094_v24, %v7098_v25  ;;  %v15704_v51 = vcombine.high %v7086_v9, %v7090_v55  ;;  %v7058_v24 = vld [vmem:[#allocation11 + $0x628] sm:$0xff] }
 0x52c   :  { %v15578_v50 = vcombine.high %v6959_v36, %v6963_v63  ;;  %v15577_v13 = vcombine.low %v6959_v36, %v6963_v63  ;;  %v6927_v25 = vld [vmem:[#allocation11 + $0x210] sm:$0xff]  ;;  %v7302_v63 = vld [vmem:[#allocation11 + $0xdc8] sm:$0xff] }
 0x52d   :  { %v15546_v36 = vcombine.high %v6927_v25, %v6931_v27 }
 0x52e   :  { %10191 = vmatpush1.bf16.msra.mxu1 %v15623_v6  ;;  %10314 = vmatpush1.bf16.msra.mxu0 %v15497_v60  ;;  %v7082_v6 = vld [vmem:[#allocation11 + $0x6e8] sm:$0xff]  ;;  %v6951_v60 = vld [vmem:[#allocation11 + $0x2d0] sm:$0xff] }
 0x52f   :  { %10192 = vmatprep.subr.bf16.mxu1 %v15616_v54  ;;  %10315 = vmatprep.subr.bf16.mxu0 %v15490_v2  ;;  %v6955_v54 = vld [vmem:[#allocation11 + $0x2f0] sm:$0xff]  ;;  %v15703_v2 = vcombine.low %v7086_v9, %v7090_v55  ;;  %v15696_v33 = vcombine.high %v7078_v58, %v7082_v6  ;;  %v15695_v57 = vcombine.low %v7078_v58, %v7082_v6 }
 0x530   :  { %v15570_v42 = vcombine.high %v6951_v60, %v6955_v54  ;;  %v15569_v43 = vcombine.low %v6951_v60, %v6955_v54  ;;  %v15545_v6 = vcombine.low %v6927_v25, %v6931_v27 }
 0x532   :  { %10193 = vmatpush1.bf16.msra.mxu1 %v15615_v16  ;;  %10316 = vmatpush1.bf16.msra.mxu0 %v15489_v49  ;;  %v7074_v16 = vld [vmem:[#allocation11 + $0x6a8] sm:$0xff]  ;;  %v6943_v49 = vld [vmem:[#allocation11 + $0x290] sm:$0xff] }
 0x533   :  { %10194 = vmatprep.subr.bf16.mxu1 %v15608_v23  ;;  %10317 = vmatprep.subr.bf16.mxu0 %v15482_v40  ;;  %v6947_v23 = vld [vmem:[#allocation11 + $0x2b0] sm:$0xff]  ;;  %v7373_v40 = vld [vmem:[#allocation13] sm:$0xff]  ;;  %v15688_v11 = vcombine.high %v7070_v37, %v7074_v16  ;;  %v15687_v10 = vcombine.low %v7070_v37, %v7074_v16 }
 0x534   :  { %v15562_v28 = vcombine.high %v6943_v49, %v6947_v23  ;;  %v7382_v61 = vrot.slane %v7373_v40, %v16988_v21  ;;  %v15561_v12 = vcombine.low %v6943_v49, %v6947_v23 }
 0x536   :  { %10195 = vmatpush1.bf16.msra.mxu1 %v15607_v48  ;;  %10318 = vmatpush1.bf16.msra.mxu0 %v15481_v7  ;;  %v7062_v48 = vld [vmem:[#allocation11 + $0x648] sm:$0xff]  ;;  %v7378_v7 = vrot.slane %v7373_v40, %v16983_v15 }
 0x537   :  { %10196 = vmatprep.subr.bf16.mxu1 %v15728_v1  ;;  %10319 = vmatprep.subr.bf16.mxu0 %v15602_v14  ;;  %v7066_v1 = vld [vmem:[#allocation11 + $0x668] sm:$0xff]  ;;  %v6935_v14 = vld [vmem:[#allocation11 + $0x250] sm:$0xff] }
 0x538   :  { %v7286_v40 = vld [vmem:[#allocation11 + $0xd48] sm:$0xff] }
 0x53a   :  { %10197 = vmatpush2.bf16.msra.mxu1 %v15727_v41  ;;  %10320 = vmatpush2.bf16.msra.mxu0 %v15601_v52  ;;  %v15680_v41 = vcombine.high %v7062_v48, %v7066_v1  ;;  %v15554_v52 = vcombine.high %v6935_v14, %v6939_v20 }
 0x53b   :  { %10198 = vmatprep.subr.bf16.mxu1 %v15720_v59  ;;  %10321 = vmatprep.subr.bf16.mxu0 %v15594_v32  ;;  %v7054_v59 = vld [vmem:[#allocation11 + $0x608] sm:$0xff]  ;;  %v10010_v32 = vadd.f32 %v17250_v8, %v7378_v7  ;;  %v7175_v8 = vld [vmem:[#allocation11 + $0x9d0] sm:$0xff] }
 0x53c   :  { %v15672_v55 = vcombine.high %v7054_v59, %v7058_v24  ;;  %v15671_v58 = vcombine.low %v7054_v59, %v7058_v24  ;;  %v7151_v59 = vld [vmem:[#allocation11 + $0x910] sm:$0xff] }
 0x53e   :  { %10199 = vmatpush2.bf16.msra.mxu1 %v15719_v29  ;;  %10322 = vmatpush2.bf16.msra.mxu0 %v15593_v46  ;;  %v15679_v29 = vcombine.low %v7062_v48, %v7066_v1  ;;  %v10012_v46 = vadd.f32 %v17252_v19, %v7382_v61 }
 0x53f   :  { %10200 = vmatprep.subr.bf16.mxu1 %v15712_v31  ;;  %10323 = vmatprep.subr.bf16.mxu0 %v15586_v35  ;;  %v15553_v35 = vcombine.low %v6935_v14, %v6939_v20 }
 0x542   :  { %10201 = vmatpush2.bf16.msra.mxu1 %v15711_v62  ;;  %10324 = vmatpush2.bf16.msra.mxu0 %v15585_v45  ;;  %v7306_v45 = vld [vmem:[#allocation11 + $0xde8] sm:$0xff] }
 0x543   :  { %10202 = vmatprep.subr.bf16.mxu1 %v15704_v51  ;;  %10325 = vmatprep.subr.bf16.mxu0 %v15578_v50  ;;  %v7179_v51 = vld [vmem:[#allocation11 + $0x9f0] sm:$0xff]  ;;  %v15920_v60 = vcombine.high %v7302_v63, %v7306_v45  ;;  %v15919_v37 = vcombine.low %v7302_v63, %v7306_v45  ;;  %v7262_v45 = vld [vmem:[#allocation11 + $0xc88] sm:$0xff] }
 0x544   :  { %v15794_v54 = vcombine.high %v7175_v8, %v7179_v51  ;;  %v15793_v16 = vcombine.low %v7175_v8, %v7179_v51  ;;  %v7266_v8 = vld [vmem:[#allocation11 + $0xca8] sm:$0xff]  ;;  %v7135_v51 = vld [vmem:[#allocation11 + $0x890] sm:$0xff] }
 0x546   :  { %10203 = vmatpush2.bf16.msra.mxu1 %v15703_v2  ;;  %10326 = vmatpush2.bf16.msra.mxu0 %v15577_v13  ;;  %v7294_v2 = vld [vmem:[#allocation11 + $0xd88] sm:$0xff] }
 0x547   :  { %10204 = vmatprep.subr.bf16.mxu1 %v15696_v33  ;;  %10327 = vmatprep.subr.bf16.mxu0 %v15570_v42  ;;  %v7298_v13 = vld [vmem:[#allocation11 + $0xda8] sm:$0xff]  ;;  %v7167_v33 = vld [vmem:[#allocation11 + $0x990] sm:$0xff] }
 0x548   :  { %v7171_v42 = vld [vmem:[#allocation11 + $0x9b0] sm:$0xff]  ;;  %v15912_v49 = vcombine.high %v7294_v2, %v7298_v13  ;;  %v15911_v7 = vcombine.low %v7294_v2, %v7298_v13  ;;  %v7258_v2 = vld [vmem:[#allocation11 + $0xc68] sm:$0xff] }
 0x549   :  { %v15786_v23 = vcombine.high %v7167_v33, %v7171_v42  ;;  %v15785_v14 = vcombine.low %v7167_v33, %v7171_v42  ;;  %v7127_v13 = vld [vmem:[#allocation11 + $0x850] sm:$0xff]  ;;  %v15879_v42 = vcombine.low %v7262_v45, %v7266_v8 }
 0x54a   :  { %10205 = vmatpush2.bf16.msra.mxu1 %v15695_v57  ;;  %10328 = vmatpush2.bf16.msra.mxu0 %v15569_v43  ;;  %v7290_v57 = vld [vmem:[#allocation11 + $0xd68] sm:$0xff]  ;;  %v7131_v33 = vld [vmem:[#allocation11 + $0x870] sm:$0xff] }
 0x54b   :  { %10206 = vmatprep.subr.bf16.mxu1 %v15688_v11  ;;  %10329 = vmatprep.subr.bf16.mxu0 %v15562_v28  ;;  %v7159_v11 = vld [vmem:[#allocation11 + $0x950] sm:$0xff]  ;;  %v15904_v20 = vcombine.high %v7286_v40, %v7290_v57  ;;  %v15903_v24 = vcombine.low %v7286_v40, %v7290_v57  ;;  %v7250_v40 = vld [vmem:[#allocation11 + $0xc28] sm:$0xff] }
 0x54c   :  { %v7163_v28 = vld [vmem:[#allocation11 + $0x970] sm:$0xff] }
 0x54d   :  { %v10050_v34 = vpop.f32.mrf.mxu1  ;;  %v15777_v27 = vcombine.low %v7159_v11, %v7163_v28  ;;  %v7119_v57 = vld [vmem:[#allocation11 + $0x810] sm:$0xff] }
 0x54e   :  { %v10051_v31 = vadd.f32 %v10050_v34, %v10010_v32  ;;  %10207 = vmatpush2.bf16.msra.mxu1 %v15687_v10  ;;  %10330 = vmatpush2.bf16.msra.mxu0 %v15561_v12  ;;  %v15778_v10 = vcombine.high %v7159_v11, %v7163_v28  ;;  %v7278_v12 = vld [vmem:[#allocation11 + $0xd08] sm:$0xff]  ;;  %v7155_v32 = vld [vmem:[#allocation11 + $0x930] sm:$0xff]  ;;  %v15745_v28 = vcombine.low %v7127_v13, %v7131_v33 }
 0x54f   :  { %v10052_v9 = vpop.f32.mrf.mxu1  ;;  %10208 = vmatprep.subr.bf16.mxu1 %v15680_v41  ;;  %10331 = vmatprep.subr.bf16.mxu0 %v15554_v52  ;;  %v7282_v41 = vld [vmem:[#allocation11 + $0xd28] sm:$0xff] }
 0x550   :  { %v10053_v62 = vadd.f32 %v10052_v9, %v10012_v46  ;;  %v15896_v34 = vcombine.high %v7278_v12, %v7282_v41  ;;  %v7270_v46 = vld [vmem:[#allocation11 + $0xcc8] sm:$0xff]  ;;  %v7147_v9 = vld [vmem:[#allocation11 + $0x8f0] sm:$0xff] }
 0x551   :  { %v10054_v50 = vpop.f32.mrf.mxu1 }
 0x552   :  { %10209 = vmatpush2.bf16.msra.mxu1 %v15679_v29  ;;  %10332 = vmatpush2.bf16.msra.mxu0 %v15553_v35  ;;  %v15770_v29 = vcombine.high %v7151_v59, %v7155_v32  ;;  %v7143_v35 = vld [vmem:[#allocation11 + $0x8d0] sm:$0xff] }
 0x553   :  { %v10055_v19 = vpop.f32.mrf.mxu1  ;;  %10210 = vmatprep.subr.bf16.mxu1 %v15672_v55  ;;  %10333 = vmatprep.subr.bf16.mxu0 %v15546_v36  ;;  %v15895_v55 = vcombine.low %v7278_v12, %v7282_v41  ;;  %v15769_v36 = vcombine.low %v7151_v59, %v7155_v32  ;;  %v7139_v50 = vld [vmem:[#allocation11 + $0x8b0] sm:$0xff] }
 0x554   :  { %v15880_v19 = vcombine.high %v7262_v45, %v7266_v8  ;;  %v7243_v12 = vld [vmem:[#allocation11 + $0xbf0] sm:$0xff] }
 0x556   :  { %10211 = vmatpush2.bf16.msra.mxu1 %v15671_v58  ;;  %10334 = vmatpush2.bf16.msra.mxu0 %v15545_v6  ;;  %v15761_v6 = vcombine.low %v7143_v35, %v7147_v9 }
 0x557   :  { %10262 = vmatprep.subr.bf16.mxu1 %v15920_v60  ;;  %10385 = vmatprep.subr.bf16.mxu0 %v15794_v54  ;;  %v15754_v60 = vcombine.high %v7135_v51, %v7139_v50  ;;  %v7254_v54 = vld [vmem:[#allocation11 + $0xc48] sm:$0xff] }
 0x558   :  { %v15871_v11 = vcombine.low %v7254_v54, %v7258_v2 }
 0x559   :  { %10213 = vmatmul.mubr.bf16.vlgmr.msra.gmra.mxu1 %v17216_v39  ;;  %10336 = vmatmul.mubr.bf16.vlgmr.msra.gmra.mxu0 %v17189_v47  ;;  %v10091_v43 = vpop.f32.mrf.mxu0 }
 0x55a   :  { %v17274_v48 = vadd.f32 %v10091_v43, %v10051_v31  ;;  %10263 = vmatpush1.bf16.msra.mxu1 %v15919_v37  ;;  %10294 = vmatprep.mubr.bf16.mxu1 %v17256_v3  ;;  %v7274_v31 = vld [vmem:[#allocation11 + $0xce8] sm:$0xff]  ;;  %v15753_v37 = vcombine.low %v7135_v51, %v7139_v50  ;;  %v7123_v43 = vld [vmem:[#allocation11 + $0x830] sm:$0xff] }
 0x55b   :  { %10386 = vmatpush1.bf16.msra.mxu0 %v15793_v16  ;;  %10417 = vmatprep.mubr.bf16.mxu0 %v17223_v17  ;;  %v10093_v1 = vpop.f32.mrf.mxu0  ;;  %v15888_v63 = vcombine.high %v7270_v46, %v7274_v31  ;;  %v15887_v58 = vcombine.low %v7270_v46, %v7274_v31  ;;  %v15872_v16 = vcombine.high %v7254_v54, %v7258_v2  ;;  %v7342_v50 = vld [vmem:[#allocation11 + $0xf08] sm:$0xff] }
 0x55c   :  { %v17278_v61 = vadd.f32 %v10093_v1, %v10053_v62  ;;  %10264 = vmatprep.subr.bf16.mxu1 %v15912_v49  ;;  %10387 = vmatprep.subr.bf16.mxu0 %v15786_v23  ;;  %v15762_v62 = vcombine.high %v7143_v35, %v7147_v9  ;;  %v15746_v49 = vcombine.high %v7127_v13, %v7131_v33  ;;  %v7246_v23 = vld [vmem:[#allocation11 + $0xc08] sm:$0xff] }
 0x55d   :  { %v10095_v52 = vpop.f32.mrf.mxu0  ;;  %v15738_v1 = vcombine.high %v7119_v57, %v7123_v43  ;;  %v15863_v41 = vcombine.low %v7246_v23, %v7250_v40  ;;  %v7350_v9 = vld [vmem:[#allocation11 + $0xf48] sm:$0xff] }
 0x55e   :  { %10265 = vmatpush1.bf16.msra.mxu1 %v15911_v7  ;;  %v15864_v7 = vcombine.high %v7246_v23, %v7250_v40  ;;  %v15737_v52 = vcombine.low %v7119_v57, %v7123_v43  ;;  %v7334_v33 = vld [vmem:[#allocation11 + $0xec8] sm:$0xff] }
 0x55f   :  { %10388 = vmatpush1.bf16.msra.mxu0 %v15785_v14  ;;  %v10096_v25 = vpop.f32.mrf.mxu0  ;;  %10266 = vmatprep.subr.bf16.mxu1 %v15904_v20  ;;  %v7366_v14 = vld [vmem:[#allocation11 + $0xfc8] sm:$0xff] }
 0x560   :  { %10389 = vmatprep.subr.bf16.mxu0 %v15778_v10  ;;  %v7370_v20 = vld [vmem:[#allocation11 + $0xfe8] sm:$0xff]  ;;  %v7239_v10 = vld [vmem:[#allocation11 + $0xbd0] sm:$0xff] }
 0x561   :  { %v15984_v59 = vcombine.high %v7366_v14, %v7370_v20  ;;  %v15858_v32 = vcombine.high %v7239_v10, %v7243_v12  ;;  %v7362_v25 = vld [vmem:[#allocation11 + $0xfa8] sm:$0xff]  ;;  %v15857_v46 = vcombine.low %v7239_v10, %v7243_v12 }
 0x562   :  { %10267 = vmatpush1.bf16.msra.mxu1 %v15903_v24  ;;  %v7358_v24 = vld [vmem:[#allocation11 + $0xf88] sm:$0xff] }
 0x563   :  { %10390 = vmatpush1.bf16.msra.mxu0 %v15777_v27  ;;  %10268 = vmatprep.subr.bf16.mxu1 %v15896_v34  ;;  %v7231_v27 = vld [vmem:[#allocation11 + $0xb90] sm:$0xff]  ;;  %v15976_v31 = vcombine.high %v7358_v24, %v7362_v25  ;;  %v7326_v43 = vld [vmem:[#allocation11 + $0xe88] sm:$0xff] }
 0x564   :  { %10391 = vmatprep.subr.bf16.mxu0 %v15770_v29  ;;  %v7235_v34 = vld [vmem:[#allocation11 + $0xbb0] sm:$0xff]  ;;  %v15983_v29 = vcombine.low %v7366_v14, %v7370_v20  ;;  %v7318_v12 = vld [vmem:[#allocation11 + $0xe48] sm:$0xff] }
 0x565   :  { %v15850_v35 = vcombine.high %v7231_v27, %v7235_v34  ;;  %v15849_v45 = vcombine.low %v7231_v27, %v7235_v34  ;;  %v7310_v34 = vld [vmem:[#allocation11 + $0xe08] sm:$0xff] }
 0x566   :  { %10269 = vmatpush1.bf16.msra.mxu1 %v15895_v55  ;;  %v7354_v55 = vld [vmem:[#allocation11 + $0xf68] sm:$0xff] }
 0x567   :  { %10392 = vmatpush1.bf16.msra.mxu0 %v15769_v36  ;;  %10270 = vmatprep.subr.bf16.mxu1 %v15888_v63  ;;  %v7223_v36 = vld [vmem:[#allocation11 + $0xb50] sm:$0xff]  ;;  %v15968_v8 = vcombine.high %v7350_v9, %v7354_v55 }
 0x568   :  { %10393 = vmatprep.subr.bf16.mxu0 %v15762_v62  ;;  %v7227_v63 = vld [vmem:[#allocation11 + $0xb70] sm:$0xff]  ;;  %v15975_v62 = vcombine.low %v7358_v24, %v7362_v25 }
 0x569   :  { %v15842_v51 = vcombine.high %v7223_v36, %v7227_v63  ;;  %v15841_v54 = vcombine.low %v7223_v36, %v7227_v63  ;;  %v7047_v63 = vld [vmem:[#allocation11 + $0x5d0] sm:$0xff] }
 0x56a   :  { %10271 = vmatpush1.bf16.msra.mxu1 %v15887_v58  ;;  %v7346_v58 = vld [vmem:[#allocation11 + $0xf28] sm:$0xff] }
 0x56b   :  { %10394 = vmatpush1.bf16.msra.mxu0 %v15761_v6  ;;  %10272 = vmatprep.subr.bf16.mxu1 %v15880_v19  ;;  %v7215_v6 = vld [vmem:[#allocation11 + $0xb10] sm:$0xff]  ;;  %v15960_v2 = vcombine.high %v7342_v50, %v7346_v58 }
 0x56c   :  { %10395 = vmatprep.subr.bf16.mxu0 %v15754_v60  ;;  %v7219_v19 = vld [vmem:[#allocation11 + $0xb30] sm:$0xff]  ;;  %v15967_v60 = vcombine.low %v7350_v9, %v7354_v55 }
 0x56d   :  { %v15834_v13 = vcombine.high %v7215_v6, %v7219_v19  ;;  %v15833_v23 = vcombine.low %v7215_v6, %v7219_v19  ;;  %v7039_v19 = vld [vmem:[#allocation11 + $0x590] sm:$0xff] }
 0x56e   :  { %10273 = vmatpush1.bf16.msra.mxu1 %v15879_v42  ;;  %v7338_v42 = vld [vmem:[#allocation11 + $0xee8] sm:$0xff] }
 0x56f   :  { %10396 = vmatpush1.bf16.msra.mxu0 %v15753_v37  ;;  %10274 = vmatprep.subr.bf16.mxu1 %v15872_v16  ;;  %v7207_v37 = vld [vmem:[#allocation11 + $0xad0] sm:$0xff]  ;;  %v15952_v40 = vcombine.high %v7334_v33, %v7338_v42 }
 0x570   :  { %10397 = vmatprep.subr.bf16.mxu0 %v15746_v49  ;;  %v7211_v16 = vld [vmem:[#allocation11 + $0xaf0] sm:$0xff]  ;;  %v15959_v49 = vcombine.low %v7342_v50, %v7346_v58 }
 0x571   :  { %v15826_v57 = vcombine.high %v7207_v37, %v7211_v16  ;;  %v15825_v14 = vcombine.low %v7207_v37, %v7211_v16  ;;  %v7031_v37 = vld [vmem:[#allocation11 + $0x550] sm:$0xff] }
 0x572   :  { %10275 = vmatpush1.bf16.msra.mxu1 %v15871_v11  ;;  %v7330_v11 = vld [vmem:[#allocation11 + $0xea8] sm:$0xff]  ;;  %v7035_v16 = vld [vmem:[#allocation11 + $0x570] sm:$0xff] }
 0x573   :  { %10398 = vmatpush1.bf16.msra.mxu0 %v15745_v28  ;;  %10276 = vmatprep.subr.bf16.mxu1 %v15864_v7  ;;  %v7199_v28 = vld [vmem:[#allocation11 + $0xa90] sm:$0xff]  ;;  %v15944_v20 = vcombine.high %v7326_v43, %v7330_v11 }
 0x574   :  { %10399 = vmatprep.subr.bf16.mxu0 %v15738_v1  ;;  %v7203_v7 = vld [vmem:[#allocation11 + $0xab0] sm:$0xff]  ;;  %v15951_v1 = vcombine.low %v7334_v33, %v7338_v42 }
 0x575   :  { %v15818_v10 = vcombine.high %v7199_v28, %v7203_v7  ;;  %v15817_v24 = vcombine.low %v7199_v28, %v7203_v7  ;;  %v15650_v7 = vcombine.high %v7031_v37, %v7035_v16 }
 0x576   :  { %10277 = vmatpush1.bf16.msra.mxu1 %v15863_v41  ;;  %v7322_v41 = vld [vmem:[#allocation11 + $0xe68] sm:$0xff] }
 0x577   :  { %10400 = vmatpush1.bf16.msra.mxu0 %v15737_v52  ;;  %10278 = vmatprep.subr.bf16.mxu1 %v15984_v59  ;;  %v7191_v52 = vld [vmem:[#allocation11 + $0xa50] sm:$0xff]  ;;  %v15936_v25 = vcombine.high %v7318_v12, %v7322_v41 }
 0x578   :  { %10401 = vmatprep.subr.bf16.mxu0 %v15858_v32  ;;  %v7195_v59 = vld [vmem:[#allocation11 + $0xa70] sm:$0xff]  ;;  %v15943_v32 = vcombine.low %v7326_v43, %v7330_v11 }
 0x579   :  { %v15810_v27 = vcombine.high %v7191_v52, %v7195_v59  ;;  %v15809_v9 = vcombine.low %v7191_v52, %v7195_v59  ;;  %v15649_v52 = vcombine.low %v7031_v37, %v7035_v16  ;;  %v6995_v37 = vld [vmem:[#allocation11 + $0x430] sm:$0xff]  ;;  %v6864_v16 = vld [vmem:[#allocation11 + $0x18] sm:$0xff] }
 0x57a   :  { %10279 = vmatpush2.bf16.msra.mxu1 %v15983_v29  ;;  %v7314_v29 = vld [vmem:[#allocation11 + $0xe28] sm:$0xff] }
 0x57b   :  { %10402 = vmatpush2.bf16.msra.mxu0 %v15857_v46  ;;  %10280 = vmatprep.subr.bf16.mxu1 %v15976_v31  ;;  %v7183_v46 = vld [vmem:[#allocation11 + $0xa10] sm:$0xff]  ;;  %v15928_v55 = vcombine.high %v7310_v34, %v7314_v29 }
 0x57c   :  { %10403 = vmatprep.subr.bf16.mxu0 %v15850_v35  ;;  %v7187_v31 = vld [vmem:[#allocation11 + $0xa30] sm:$0xff]  ;;  %v15935_v35 = vcombine.low %v7318_v12, %v7322_v41  ;;  %v6896_v12 = vld [vmem:[#allocation11 + $0x118] sm:$0xff] }
 0x57d   :  { %v15802_v36 = vcombine.high %v7183_v46, %v7187_v31  ;;  %v15801_v50 = vcombine.low %v7183_v46, %v7187_v31  ;;  %v6900_v41 = vld [vmem:[#allocation11 + $0x138] sm:$0xff] }
 0x57e   :  { %10281 = vmatpush2.bf16.msra.mxu1 %v15975_v62  ;;  %v7051_v62 = vld [vmem:[#allocation11 + $0x5f0] sm:$0xff]  ;;  %v15515_v31 = vcombine.low %v6896_v12, %v6900_v41 }
 0x57f   :  { %10404 = vmatpush2.bf16.msra.mxu0 %v15849_v45  ;;  %10282 = vmatprep.subr.bf16.mxu1 %v15968_v8  ;;  %v6920_v45 = vld [vmem:[#allocation11 + $0x1d8] sm:$0xff]  ;;  %v15666_v58 = vcombine.high %v7047_v63, %v7051_v62 }
 0x580   :  { %10405 = vmatprep.subr.bf16.mxu0 %v15842_v51  ;;  %v6924_v8 = vld [vmem:[#allocation11 + $0x1f8] sm:$0xff]  ;;  %v15927_v51 = vcombine.low %v7310_v34, %v7314_v29  ;;  %v7019_v34 = vld [vmem:[#allocation11 + $0x4f0] sm:$0xff] }
 0x581   :  { %v15540_v6 = vcombine.high %v6920_v45, %v6924_v8  ;;  %v15539_v33 = vcombine.low %v6920_v45, %v6924_v8  ;;  %v6892_v29 = vld [vmem:[#allocation11 + $0xf8] sm:$0xff] }
 0x582   :  { %10283 = vmatpush2.bf16.msra.mxu1 %v15967_v60  ;;  %v7043_v60 = vld [vmem:[#allocation11 + $0x5b0] sm:$0xff] }
 0x583   :  { %10406 = vmatpush2.bf16.msra.mxu0 %v15841_v54  ;;  %10284 = vmatprep.subr.bf16.mxu1 %v15960_v2  ;;  %v15665_v54 = vcombine.low %v7047_v63, %v7051_v62  ;;  %v6912_v2 = vld [vmem:[#allocation11 + $0x198] sm:$0xff]  ;;  %v15658_v42 = vcombine.high %v7039_v19, %v7043_v60  ;;  %v15657_v43 = vcombine.low %v7039_v19, %v7043_v60 }
 0x584   :  { %10407 = vmatprep.subr.bf16.mxu0 %v15834_v13  ;;  %v6916_v13 = vld [vmem:[#allocation11 + $0x1b8] sm:$0xff] }
 0x585   :  { %v15531_v28 = vcombine.low %v6912_v2, %v6916_v13  ;;  %v6880_v63 = vld [vmem:[#allocation11 + $0x98] sm:$0xff] }
 0x586   :  { %10285 = vmatpush2.bf16.msra.mxu1 %v15959_v49  ;;  %v6884_v62 = vld [vmem:[#allocation11 + $0xb8] sm:$0xff] }
 0x587   :  { %10408 = vmatpush2.bf16.msra.mxu0 %v15833_v23  ;;  %10286 = vmatprep.subr.bf16.mxu1 %v15952_v40  ;;  %v15532_v23 = vcombine.high %v6912_v2, %v6916_v13  ;;  %v6904_v40 = vld [vmem:[#allocation11 + $0x158] sm:$0xff]  ;;  %v15499_v2 = vcombine.low %v6880_v63, %v6884_v62 }
 0x588   :  { %10409 = vmatprep.subr.bf16.mxu0 %v15826_v57  ;;  %v6908_v57 = vld [vmem:[#allocation11 + $0x178] sm:$0xff] }
 0x589   :  { %v6872_v19 = vld [vmem:[#allocation11 + $0x58] sm:$0xff] }
 0x58a   :  { %10287 = vmatpush2.bf16.msra.mxu1 %v15951_v1  ;;  %v15524_v1 = vcombine.high %v6904_v40, %v6908_v57  ;;  %v6876_v60 = vld [vmem:[#allocation11 + $0x78] sm:$0xff] }
 0x58b   :  { %10410 = vmatpush2.bf16.msra.mxu0 %v15825_v14  ;;  %10288 = vmatprep.subr.bf16.mxu1 %v15944_v20  ;;  %v7023_v14 = vld [vmem:[#allocation11 + $0x510] sm:$0xff] }
 0x58c   :  { %10411 = vmatprep.subr.bf16.mxu0 %v15818_v10  ;;  %v7027_v20 = vld [vmem:[#allocation11 + $0x530] sm:$0xff] }
 0x58d   :  { %v15641_v46 = vcombine.low %v7023_v14, %v7027_v20 }
 0x58e   :  { %10289 = vmatpush2.bf16.msra.mxu1 %v15943_v32  ;;  %v15523_v32 = vcombine.low %v6904_v40, %v6908_v57  ;;  %v15491_v57 = vcombine.low %v6872_v19, %v6876_v60 }
 0x58f   :  { %10412 = vmatpush2.bf16.msra.mxu0 %v15817_v24  ;;  %10290 = vmatprep.subr.bf16.mxu1 %v15936_v25  ;;  %v15642_v24 = vcombine.high %v7023_v14, %v7027_v20  ;;  %v15516_v25 = vcombine.high %v6896_v12, %v6900_v41  ;;  %v6984_v14 = vld [vmem:[#allocation11 + $0x3d8] sm:$0xff] }
 0x590   :  { %10413 = vmatprep.subr.bf16.mxu0 %v15810_v27  ;;  %v7015_v27 = vld [vmem:[#allocation11 + $0x4d0] sm:$0xff]  ;;  %v6988_v20 = vld [vmem:[#allocation11 + $0x3f8] sm:$0xff] }
 0x591   :  { %v15633_v45 = vcombine.low %v7015_v27, %v7019_v34 }
 0x592   :  { %10291 = vmatpush2.bf16.msra.mxu1 %v15935_v35  ;;  %v15634_v35 = vcombine.high %v7015_v27, %v7019_v34  ;;  %v15603_v34 = vcombine.low %v6984_v14, %v6988_v20 }
 0x593   :  { %10414 = vmatpush2.bf16.msra.mxu0 %v15809_v9  ;;  %10292 = vmatprep.subr.bf16.mxu1 %v15928_v55  ;;  %v7007_v55 = vld [vmem:[#allocation11 + $0x490] sm:$0xff] }
 0x594   :  { %10415 = vmatprep.subr.bf16.mxu0 %v15802_v36  ;;  %v7011_v36 = vld [vmem:[#allocation11 + $0x4b0] sm:$0xff] }
 0x596   :  { %10293 = vmatpush2.bf16.msra.mxu1 %v15927_v51  ;;  %v15626_v51 = vcombine.high %v7007_v55, %v7011_v36 }
 0x597   :  { %10416 = vmatpush2.bf16.msra.mxu0 %v15801_v50  ;;  %10344 = vmatprep.subr.bf16.mxu1 %v15666_v58  ;;  %v15500_v50 = vcombine.high %v6880_v63, %v6884_v62  ;;  %v6999_v58 = vld [vmem:[#allocation11 + $0x450] sm:$0xff] }
 0x598   :  { %10467 = vmatprep.subr.bf16.mxu0 %v15540_v6  ;;  %v7003_v6 = vld [vmem:[#allocation11 + $0x470] sm:$0xff] }
 0x599   :  { %v17280_v49 = vpop.f32.mrf.mxu0  ;;  %10295 = vmatmul.mubr.bf16.vlgmr.msra.gmra.mxu1 %v17258_v4  ;;  %v15618_v13 = vcombine.high %v6999_v58, %v7003_v6  ;;  %v15617_v40 = vcombine.low %v6999_v58, %v7003_v6 }
 0x59a   :  { %10418 = vmatmul.mubr.bf16.vlgmr.msra.gmra.mxu0 %v17231_v5  ;;  %10345 = vmatpush1.bf16.msra.mxu1 %v15665_v54  ;;  %v15625_v54 = vcombine.low %v7007_v55, %v7011_v36 }
 0x59b   :  { %10376 = vmatprep.mubr.bf16.mxu1 %v17197_v44  ;;  %10468 = vmatpush1.bf16.msra.mxu0 %v15539_v33  ;;  %v17285_v11 = vpop.f32.mrf.mxu0  ;;  %v15492_v33 = vcombine.high %v6872_v19, %v6876_v60 }
 0x59c   :  { %10499 = vmatprep.mubr.bf16.mxu0 %v17170_v18  ;;  %10346 = vmatprep.subr.bf16.mxu1 %v15658_v42  ;;  %v6888_v18 = vld [vmem:[#allocation11 + $0xd8] sm:$0xff]  ;;  %v6991_v42 = vld [vmem:[#allocation11 + $0x410] sm:$0xff] }
 0x59d   :  { %v10177_v10 = vpop.f32.mrf.mxu0  ;;  %10469 = vmatprep.subr.bf16.mxu0 %v15532_v23  ;;  %v15508_v9 = vcombine.high %v6888_v18, %v6892_v29  ;;  %v15507_v8 = vcombine.low %v6888_v18, %v6892_v29  ;;  %v6868_v23 = vld [vmem:[#allocation11 + $0x38] sm:$0xff] }
 0x59e   :  { %10347 = vmatpush1.bf16.msra.mxu1 %v15657_v43  ;;  %v15610_v43 = vcombine.high %v6991_v42, %v6995_v37  ;;  %v15609_v10 = vcombine.low %v6991_v42, %v6995_v37  ;;  %v15483_v12 = vcombine.low %v6864_v16, %v6868_v23 }
 0x59f   :  { %10470 = vmatpush1.bf16.msra.mxu0 %v15531_v28  ;;  %v10178_v59 = vpop.f32.mrf.mxu0  ;;  %10348 = vmatprep.subr.bf16.mxu1 %v15650_v7  ;;  %v15484_v28 = vcombine.high %v6864_v16, %v6868_v23  ;;  %v7111_v7 = vld [vmem:[#allocation11 + $0x7d0] sm:$0xff] }
 0x5a0   :  { %10471 = vmatprep.subr.bf16.mxu0 %v15524_v1  ;;  %v7115_v1 = vld [vmem:[#allocation11 + $0x7f0] sm:$0xff] }
 0x5a1   :  { %v15730_v41 = vcombine.high %v7111_v7, %v7115_v1  ;;  %v7103_v59 = vld [vmem:[#allocation11 + $0x790] sm:$0xff]  ;;  %v15729_v27 = vcombine.low %v7111_v7, %v7115_v1 }
 0x5a2   :  { %10349 = vmatpush1.bf16.msra.mxu1 %v15649_v52  ;;  %v15604_v52 = vcombine.high %v6984_v14, %v6988_v20 }
 0x5a3   :  { %10472 = vmatpush1.bf16.msra.mxu0 %v15523_v32  ;;  %10350 = vmatprep.subr.bf16.mxu1 %v15642_v24  ;;  %v7107_v32 = vld [vmem:[#allocation11 + $0x7b0] sm:$0xff]  ;;  %v6976_v24 = vld [vmem:[#allocation11 + $0x398] sm:$0xff] }
 0x5a4   :  { %10473 = vmatprep.subr.bf16.mxu0 %v15516_v25  ;;  %v6980_v25 = vld [vmem:[#allocation11 + $0x3b8] sm:$0xff]  ;;  %v15722_v18 = vcombine.high %v7103_v59, %v7107_v32  ;;  %v15721_v55 = vcombine.low %v7103_v59, %v7107_v32 }
 0x5a5   :  { %v15596_v29 = vcombine.high %v6976_v24, %v6980_v25  ;;  %v15595_v36 = vcombine.low %v6976_v24, %v6980_v25 }
 0x5a6   :  { %10351 = vmatpush1.bf16.msra.mxu1 %v15641_v46  ;;  %v7095_v46 = vld [vmem:[#allocation11 + $0x750] sm:$0xff] }
 0x5a7   :  { %10474 = vmatpush1.bf16.msra.mxu0 %v15515_v31  ;;  %10352 = vmatprep.subr.bf16.mxu1 %v15634_v35  ;;  %v7099_v31 = vld [vmem:[#allocation11 + $0x770] sm:$0xff]  ;;  %v6968_v35 = vld [vmem:[#allocation11 + $0x358] sm:$0xff] }
 0x5a8   :  { %10475 = vmatprep.subr.bf16.mxu0 %v15508_v9  ;;  %v6972_v9 = vld [vmem:[#allocation11 + $0x378] sm:$0xff]  ;;  %v15714_v63 = vcombine.high %v7095_v46, %v7099_v31  ;;  %v15713_v58 = vcombine.low %v7095_v46, %v7099_v31 }
 0x5a9   :  { %v15588_v62 = vcombine.high %v6968_v35, %v6972_v9  ;;  %v15587_v6 = vcombine.low %v6968_v35, %v6972_v9 }
 0x5aa   :  { %10353 = vmatpush1.bf16.msra.mxu1 %v15633_v45  ;;  %v7087_v45 = vld [vmem:[#allocation11 + $0x710] sm:$0xff] }
 0x5ab   :  { %10476 = vmatpush1.bf16.msra.mxu0 %v15507_v8  ;;  %10354 = vmatprep.subr.bf16.mxu1 %v15626_v51  ;;  %v7091_v8 = vld [vmem:[#allocation11 + $0x730] sm:$0xff]  ;;  %v6960_v51 = vld [vmem:[#allocation11 + $0x318] sm:$0xff] }
 0x5ac   :  { %10477 = vmatprep.subr.bf16.mxu0 %v15500_v50  ;;  %v6964_v50 = vld [vmem:[#allocation11 + $0x338] sm:$0xff]  ;;  %v15706_v19 = vcombine.high %v7087_v45, %v7091_v8  ;;  %v15705_v42 = vcombine.low %v7087_v45, %v7091_v8 }
 0x5ad   :  { %v15580_v60 = vcombine.high %v6960_v51, %v6964_v50  ;;  %v15579_v37 = vcombine.low %v6960_v51, %v6964_v50 }
 0x5ae   :  { %10355 = vmatpush1.bf16.msra.mxu1 %v15625_v54  ;;  %v7079_v54 = vld [vmem:[#allocation11 + $0x6d0] sm:$0xff] }
 0x5af   :  { %10478 = vmatpush1.bf16.msra.mxu0 %v15499_v2  ;;  %10356 = vmatprep.subr.bf16.mxu1 %v15618_v13  ;;  %v7083_v2 = vld [vmem:[#allocation11 + $0x6f0] sm:$0xff]  ;;  %v6952_v13 = vld [vmem:[#allocation11 + $0x2d8] sm:$0xff] }
 0x5b0   :  { %10479 = vmatprep.subr.bf16.mxu0 %v15492_v33  ;;  %v6956_v33 = vld [vmem:[#allocation11 + $0x2f8] sm:$0xff]  ;;  %v15698_v16 = vcombine.high %v7079_v54, %v7083_v2  ;;  %v15697_v7 = vcombine.low %v7079_v54, %v7083_v2 }
 0x5b1   :  { %v15572_v23 = vcombine.high %v6952_v13, %v6956_v33  ;;  %v15571_v1 = vcombine.low %v6952_v13, %v6956_v33  ;;  %v7172_v54 = vld [vmem:[#allocation11 + $0x9b8] sm:$0xff]  ;;  %v7287_v33 = vld [vmem:[#allocation11 + $0xd50] sm:$0xff] }
 0x5b2   :  { %10357 = vmatpush1.bf16.msra.mxu1 %v15617_v40  ;;  %v7071_v40 = vld [vmem:[#allocation11 + $0x690] sm:$0xff] }
 0x5b3   :  { %10480 = vmatpush1.bf16.msra.mxu0 %v15491_v57  ;;  %10358 = vmatprep.subr.bf16.mxu1 %v15610_v43  ;;  %v7075_v57 = vld [vmem:[#allocation11 + $0x6b0] sm:$0xff]  ;;  %v6944_v43 = vld [vmem:[#allocation11 + $0x298] sm:$0xff] }
 0x5b4   :  { %10481 = vmatprep.subr.bf16.mxu0 %v15484_v28  ;;  %v6948_v28 = vld [vmem:[#allocation11 + $0x2b8] sm:$0xff]  ;;  %v15690_v14 = vcombine.high %v7071_v40, %v7075_v57  ;;  %v15689_v59 = vcombine.low %v7071_v40, %v7075_v57 }
 0x5b5   :  { %v15564_v20 = vcombine.high %v6944_v43, %v6948_v28  ;;  %v15563_v32 = vcombine.low %v6944_v43, %v6948_v28  ;;  %v7160_v40 = vld [vmem:[#allocation11 + $0x958] sm:$0xff] }
 0x5b6   :  { %10359 = vmatpush1.bf16.msra.mxu1 %v15609_v10  ;;  %v7063_v10 = vld [vmem:[#allocation11 + $0x650] sm:$0xff]  ;;  %v7164_v57 = vld [vmem:[#allocation11 + $0x978] sm:$0xff] }
 0x5b7   :  { %10482 = vmatpush1.bf16.msra.mxu0 %v15483_v12  ;;  %10360 = vmatprep.subr.bf16.mxu1 %v15730_v41  ;;  %v7067_v12 = vld [vmem:[#allocation11 + $0x670] sm:$0xff]  ;;  %v6936_v41 = vld [vmem:[#allocation11 + $0x258] sm:$0xff] }
 0x5b8   :  { %10483 = vmatprep.subr.bf16.mxu0 %v15604_v52  ;;  %v6940_v52 = vld [vmem:[#allocation11 + $0x278] sm:$0xff]  ;;  %v15682_v24 = vcombine.high %v7063_v10, %v7067_v12  ;;  %v15681_v46 = vcombine.low %v7063_v10, %v7067_v12  ;;  %v15780_v10 = vcombine.high %v7160_v40, %v7164_v57  ;;  %v7279_v12 = vld [vmem:[#allocation11 + $0xd10] sm:$0xff] }
 0x5b9   :  { %v15556_v25 = vcombine.high %v6936_v41, %v6940_v52  ;;  %v15555_v31 = vcombine.low %v6936_v41, %v6940_v52  ;;  %v7152_v52 = vld [vmem:[#allocation11 + $0x918] sm:$0xff] }
 0x5ba   :  { %10361 = vmatpush2.bf16.msra.mxu1 %v15729_v27  ;;  %v7055_v27 = vld [vmem:[#allocation11 + $0x610] sm:$0xff] }
 0x5bb   :  { %10484 = vmatpush2.bf16.msra.mxu0 %v15603_v34  ;;  %10362 = vmatprep.subr.bf16.mxu1 %v15722_v18  ;;  %v7059_v34 = vld [vmem:[#allocation11 + $0x630] sm:$0xff]  ;;  %v6928_v18 = vld [vmem:[#allocation11 + $0x218] sm:$0xff] }
 0x5bc   :  { %10485 = vmatprep.subr.bf16.mxu0 %v15596_v29  ;;  %v6932_v29 = vld [vmem:[#allocation11 + $0x238] sm:$0xff]  ;;  %v15674_v35 = vcombine.high %v7055_v27, %v7059_v34  ;;  %v15673_v45 = vcombine.low %v7055_v27, %v7059_v34  ;;  %v15779_v27 = vcombine.low %v7160_v40, %v7164_v57  ;;  %v7251_v40 = vld [vmem:[#allocation11 + $0xc30] sm:$0xff] }
 0x5bd   :  { %v15548_v9 = vcombine.high %v6928_v18, %v6932_v29  ;;  %v15547_v8 = vcombine.low %v6928_v18, %v6932_v29  ;;  %v7275_v29 = vld [vmem:[#allocation11 + $0xcf0] sm:$0xff]  ;;  %v7120_v57 = vld [vmem:[#allocation11 + $0x818] sm:$0xff] }
 0x5be   :  { %10363 = vmatpush2.bf16.msra.mxu1 %v15721_v55  ;;  %v7303_v55 = vld [vmem:[#allocation11 + $0xdd0] sm:$0xff] }
 0x5bf   :  { %10486 = vmatpush2.bf16.msra.mxu0 %v15595_v36  ;;  %10364 = vmatprep.subr.bf16.mxu1 %v15714_v63  ;;  %v7307_v36 = vld [vmem:[#allocation11 + $0xdf0] sm:$0xff]  ;;  %v7176_v63 = vld [vmem:[#allocation11 + $0x9d8] sm:$0xff] }
 0x5c0   :  { %10487 = vmatprep.subr.bf16.mxu0 %v15588_v62  ;;  %v7180_v62 = vld [vmem:[#allocation11 + $0x9f8] sm:$0xff]  ;;  %v15922_v51 = vcombine.high %v7303_v55, %v7307_v36 }
 0x5c1   :  { %v15796_v50 = vcombine.high %v7176_v63, %v7180_v62  ;;  %v15795_v2 = vcombine.low %v7176_v63, %v7180_v62  ;;  %v7263_v63 = vld [vmem:[#allocation11 + $0xc90] sm:$0xff] }
 0x5c2   :  { %10365 = vmatpush2.bf16.msra.mxu1 %v15713_v58  ;;  %v7295_v58 = vld [vmem:[#allocation11 + $0xd90] sm:$0xff] }
 0x5c3   :  { %10488 = vmatpush2.bf16.msra.mxu0 %v15587_v6  ;;  %10366 = vmatprep.subr.bf16.mxu1 %v15706_v19  ;;  %v7299_v6 = vld [vmem:[#allocation11 + $0xdb0] sm:$0xff]  ;;  %v15921_v19 = vcombine.low %v7303_v55, %v7307_v36 }
 0x5c4   :  { %10489 = vmatprep.subr.bf16.mxu0 %v15580_v60  ;;  %v7168_v60 = vld [vmem:[#allocation11 + $0x998] sm:$0xff]  ;;  %v15914_v13 = vcombine.high %v7295_v58, %v7299_v6  ;;  %v15913_v28 = vcombine.low %v7295_v58, %v7299_v6  ;;  %v7267_v62 = vld [vmem:[#allocation11 + $0xcb0] sm:$0xff] }
 0x5c5   :  { %v15882_v58 = vcombine.high %v7263_v63, %v7267_v62 }
 0x5c6   :  { %10367 = vmatpush2.bf16.msra.mxu1 %v15705_v42  ;;  %v7291_v42 = vld [vmem:[#allocation11 + $0xd70] sm:$0xff] }
 0x5c7   :  { %10490 = vmatpush2.bf16.msra.mxu0 %v15579_v37  ;;  %10368 = vmatprep.subr.bf16.mxu1 %v15698_v16 }
 0x5c8   :  { %10491 = vmatprep.subr.bf16.mxu0 %v15572_v23  ;;  %v15788_v23 = vcombine.high %v7168_v60, %v7172_v54 }
 0x5ca   :  { %10369 = vmatpush2.bf16.msra.mxu1 %v15697_v7 }
 0x5cb   :  { %10492 = vmatpush2.bf16.msra.mxu0 %v15571_v1  ;;  %10370 = vmatprep.subr.bf16.mxu1 %v15690_v14  ;;  %v15787_v14 = vcombine.low %v7168_v60, %v7172_v54  ;;  %v7259_v60 = vld [vmem:[#allocation11 + $0xc70] sm:$0xff]  ;;  %v7128_v54 = vld [vmem:[#allocation11 + $0x858] sm:$0xff] }
 0x5cc   :  { %10493 = vmatprep.subr.bf16.mxu0 %v15564_v20  ;;  %v15906_v20 = vcombine.high %v7287_v33, %v7291_v42 }
 0x5ce   :  { %10371 = vmatpush2.bf16.msra.mxu1 %v15689_v59  ;;  %v7156_v59 = vld [vmem:[#allocation11 + $0x938] sm:$0xff] }
 0x5cf   :  { %10494 = vmatpush2.bf16.msra.mxu0 %v15563_v32  ;;  %10372 = vmatprep.subr.bf16.mxu1 %v15682_v24  ;;  %v15905_v32 = vcombine.low %v7287_v33, %v7291_v42  ;;  %v15772_v18 = vcombine.high %v7152_v52, %v7156_v59 }
 0x5d0   :  { %10495 = vmatprep.subr.bf16.mxu0 %v15556_v25 }
 0x5d2   :  { %10373 = vmatpush2.bf16.msra.mxu1 %v15681_v46  ;;  %v7144_v46 = vld [vmem:[#allocation11 + $0x8d8] sm:$0xff] }
 0x5d3   :  { %10496 = vmatpush2.bf16.msra.mxu0 %v15555_v31  ;;  %10374 = vmatprep.subr.bf16.mxu1 %v15674_v35  ;;  %v7148_v31 = vld [vmem:[#allocation11 + $0x8f8] sm:$0xff] }
 0x5d4   :  { %10497 = vmatprep.subr.bf16.mxu0 %v15548_v9  ;;  %v15771_v9 = vcombine.low %v7152_v52, %v7156_v59  ;;  %v15764_v36 = vcombine.high %v7144_v46, %v7148_v31  ;;  %v7244_v52 = vld [vmem:[#allocation11 + $0xbf8] sm:$0xff] }
 0x5d6   :  { %10375 = vmatpush2.bf16.msra.mxu1 %v15673_v45  ;;  %v7136_v45 = vld [vmem:[#allocation11 + $0x898] sm:$0xff] }
 0x5d7   :  { %10498 = vmatpush2.bf16.msra.mxu0 %v15547_v8  ;;  %10426 = vmatprep.subr.bf16.mxu1 %v15922_v51  ;;  %v7140_v8 = vld [vmem:[#allocation11 + $0x8b8] sm:$0xff] }
 0x5d8   :  { %10549 = vmatprep.subr.bf16.mxu0 %v15796_v50  ;;  %v15763_v50 = vcombine.low %v7144_v46, %v7148_v31  ;;  %v15756_v6 = vcombine.high %v7136_v45, %v7140_v8  ;;  %v15755_v33 = vcombine.low %v7136_v45, %v7140_v8 }
 0x5d9   :  { %v17288_v37 = vpop.f32.mrf.mxu0  ;;  %10377 = vmatmul.mubr.bf16.vlgmr.msra.gmra.mxu1 %v17216_v39  ;;  %v10132_v16 = vpop.f32.mrf.mxu1 }
 0x5da   :  { %10500 = vmatmul.mubr.bf16.vlgmr.msra.gmra.mxu0 %v17189_v47  ;;  %v17293_v43 = vadd.f32 %v10132_v16, %v17274_v48  ;;  %10427 = vmatpush1.bf16.msra.mxu1 %v15921_v19  ;;  %v7283_v47 = vld [vmem:[#allocation11 + $0xd30] sm:$0xff] }
 0x5db   :  { %10458 = vmatprep.mubr.bf16.mxu1 %v17256_v3  ;;  %10550 = vmatpush1.bf16.msra.mxu0 %v15795_v2  ;;  %v17296_v7 = vpop.f32.mrf.mxu0  ;;  %v17298_v1 = vpop.f32.mrf.mxu1  ;;  %v15898_v34 = vcombine.high %v7279_v12, %v7283_v47  ;;  %v15897_v35 = vcombine.low %v7279_v12, %v7283_v47  ;;  %v7255_v19 = vld [vmem:[#allocation11 + $0xc50] sm:$0xff]  ;;  %v7132_v2 = vld [vmem:[#allocation11 + $0x878] sm:$0xff] }
 0x5dc   :  { %10581 = vmatprep.mubr.bf16.mxu0 %v17223_v17  ;;  %10428 = vmatprep.subr.bf16.mxu1 %v15914_v13  ;;  %v7271_v17 = vld [vmem:[#allocation11 + $0xcd0] sm:$0xff]  ;;  %v15881_v13 = vcombine.low %v7263_v63, %v7267_v62  ;;  %v15874_v42 = vcombine.high %v7255_v19, %v7259_v60  ;;  %v15748_v16 = vcombine.high %v7128_v54, %v7132_v2  ;;  %v7228_v63 = vld [vmem:[#allocation11 + $0xb78] sm:$0xff] }
 0x5dd   :  { %v10259_v41 = vpop.f32.mrf.mxu0  ;;  %10551 = vmatprep.subr.bf16.mxu0 %v15788_v23  ;;  %v10136_v48 = vpop.f32.mrf.mxu1  ;;  %v15890_v55 = vcombine.high %v7271_v17, %v7275_v29  ;;  %v15889_v51 = vcombine.low %v7271_v17, %v7275_v29  ;;  %v7247_v23 = vld [vmem:[#allocation11 + $0xc10] sm:$0xff]  ;;  %v7236_v17 = vld [vmem:[#allocation11 + $0xbb8] sm:$0xff] }
 0x5de   :  { %10429 = vmatpush1.bf16.msra.mxu1 %v15913_v28  ;;  %v7124_v28 = vld [vmem:[#allocation11 + $0x838] sm:$0xff]  ;;  %v7367_v47 = vld [vmem:[#allocation11 + $0xfd0] sm:$0xff]  ;;  %v15865_v59 = vcombine.low %v7247_v23, %v7251_v40 }
 0x5df   :  { %10552 = vmatpush1.bf16.msra.mxu0 %v15787_v14  ;;  %v10260_v24 = vpop.f32.mrf.mxu0  ;;  %v10137_v25 = vpop.f32.mrf.mxu1  ;;  %10430 = vmatprep.subr.bf16.mxu1 %v15906_v20  ;;  %v15873_v14 = vcombine.low %v7255_v19, %v7259_v60  ;;  %v15747_v20 = vcombine.low %v7128_v54, %v7132_v2  ;;  %v15740_v12 = vcombine.high %v7120_v57, %v7124_v28  ;;  %v7371_v41 = vld [vmem:[#allocation11 + $0xff0] sm:$0xff]  ;;  %v7240_v48 = vld [vmem:[#allocation11 + $0xbd8] sm:$0xff] }
 0x5e0   :  { %10553 = vmatprep.subr.bf16.mxu0 %v15780_v10  ;;  %v15866_v10 = vcombine.high %v7247_v23, %v7251_v40  ;;  %v15986_v24 = vcombine.high %v7367_v47, %v7371_v41  ;;  %v15860_v25 = vcombine.high %v7240_v48, %v7244_v52  ;;  %v15985_v29 = vcombine.low %v7367_v47, %v7371_v41  ;;  %v7220_v19 = vld [vmem:[#allocation11 + $0xb38] sm:$0xff] }
 0x5e1   :  { %v15859_v46 = vcombine.low %v7240_v48, %v7244_v52  ;;  %v7212_v23 = vld [vmem:[#allocation11 + $0xaf8] sm:$0xff] }
 0x5e2   :  { %10431 = vmatpush1.bf16.msra.mxu1 %v15905_v32  ;;  %v15739_v32 = vcombine.low %v7120_v57, %v7124_v28  ;;  %v7204_v47 = vld [vmem:[#allocation11 + $0xab8] sm:$0xff] }
 0x5e3   :  { %10554 = vmatpush1.bf16.msra.mxu0 %v15779_v27  ;;  %10432 = vmatprep.subr.bf16.mxu1 %v15898_v34  ;;  %v7359_v27 = vld [vmem:[#allocation11 + $0xf90] sm:$0xff] }
 0x5e4   :  { %10555 = vmatprep.subr.bf16.mxu0 %v15772_v18  ;;  %v7363_v34 = vld [vmem:[#allocation11 + $0xfb0] sm:$0xff]  ;;  %v7232_v18 = vld [vmem:[#allocation11 + $0xb98] sm:$0xff] }
 0x5e5   :  { %v15978_v31 = vcombine.high %v7359_v27, %v7363_v34  ;;  %v15977_v62 = vcombine.low %v7359_v27, %v7363_v34  ;;  %v15851_v45 = vcombine.low %v7232_v18, %v7236_v17  ;;  %v7196_v27 = vld [vmem:[#allocation11 + $0xa78] sm:$0xff] }
 0x5e6   :  { %10433 = vmatpush1.bf16.msra.mxu1 %v15897_v35  ;;  %v15852_v35 = vcombine.high %v7232_v18, %v7236_v17 }
 0x5e7   :  { %10556 = vmatpush1.bf16.msra.mxu0 %v15771_v9  ;;  %10434 = vmatprep.subr.bf16.mxu1 %v15890_v55  ;;  %v7351_v9 = vld [vmem:[#allocation11 + $0xf50] sm:$0xff] }
 0x5e8   :  { %10557 = vmatprep.subr.bf16.mxu0 %v15764_v36  ;;  %v7355_v55 = vld [vmem:[#allocation11 + $0xf70] sm:$0xff]  ;;  %v7224_v36 = vld [vmem:[#allocation11 + $0xb58] sm:$0xff] }
 0x5e9   :  { %v15970_v8 = vcombine.high %v7351_v9, %v7355_v55  ;;  %v15969_v60 = vcombine.low %v7351_v9, %v7355_v55  ;;  %v15843_v54 = vcombine.low %v7224_v36, %v7228_v63  ;;  %v7188_v9 = vld [vmem:[#allocation11 + $0xa38] sm:$0xff]  ;;  %v10135_v55 = vadd.f32 %v17298_v1, %v17278_v61  ;;  %v17303_v61 = vld [vmem:[#allocation13] sm:$0xff] }
 0x5ea   :  { %10435 = vmatpush1.bf16.msra.mxu1 %v15889_v51  ;;  %v15844_v51 = vcombine.high %v7224_v36, %v7228_v63  ;;  %v7386_v1 = vrot.slane %v17303_v61, %v17036_v30 }
 0x5eb   :  { %10558 = vmatpush1.bf16.msra.mxu0 %v15763_v50  ;;  %10436 = vmatprep.subr.bf16.mxu1 %v15882_v58  ;;  %v7343_v50 = vld [vmem:[#allocation11 + $0xf10] sm:$0xff] }
 0x5ec   :  { %10559 = vmatprep.subr.bf16.mxu0 %v15756_v6  ;;  %v7347_v58 = vld [vmem:[#allocation11 + $0xf30] sm:$0xff]  ;;  %v7216_v6 = vld [vmem:[#allocation11 + $0xb18] sm:$0xff] }
 0x5ed   :  { %v15962_v2 = vcombine.high %v7343_v50, %v7347_v58  ;;  %v15961_v40 = vcombine.low %v7343_v50, %v7347_v58  ;;  %v15835_v57 = vcombine.low %v7216_v6, %v7220_v19  ;;  %v10711_v50 = vld [vmem:[#allocation14 + $0x1c0] sm:$0xff] }
 0x5ee   :  { %10437 = vmatpush1.bf16.msra.mxu1 %v15881_v13  ;;  %v15836_v13 = vcombine.high %v7216_v6, %v7220_v19  ;;  %v10715_v58 = vld [vmem:[#allocation14 + $0x1e0] sm:$0xff]  ;;  %v10632_v6 = vmul.f32 0.2, %v10135_v55 }
 0x5ef   :  { %10560 = vmatpush1.bf16.msra.mxu0 %v15755_v33  ;;  %10438 = vmatprep.subr.bf16.mxu1 %v15874_v42  ;;  %v7335_v33 = vld [vmem:[#allocation11 + $0xed0] sm:$0xff] }
 0x5f0   :  { %10561 = vmatprep.subr.bf16.mxu0 %v15748_v16  ;;  %v7339_v42 = vld [vmem:[#allocation11 + $0xef0] sm:$0xff]  ;;  %v7208_v16 = vld [vmem:[#allocation11 + $0xad8] sm:$0xff] }
 0x5f1   :  { %v15954_v28 = vcombine.high %v7335_v33, %v7339_v42  ;;  %v15953_v41 = vcombine.low %v7335_v33, %v7339_v42  ;;  %v15827_v48 = vcombine.low %v7208_v16, %v7212_v23  ;;  %v7040_v33 = vld [vmem:[#allocation11 + $0x598] sm:$0xff] }
 0x5f2   :  { %10439 = vmatpush1.bf16.msra.mxu1 %v15873_v14  ;;  %v15828_v14 = vcombine.high %v7208_v16, %v7212_v23  ;;  %v7044_v42 = vld [vmem:[#allocation11 + $0x5b8] sm:$0xff]  ;;  %v10640_v16 = vmax.f32 %v10135_v55, %v10632_v6  ;;  %v10691_v55 = vld [vmem:[#allocation14 + $0x120] sm:$0xff] }
 0x5f3   :  { %10562 = vmatpush1.bf16.msra.mxu0 %v15747_v20  ;;  %10440 = vmatprep.subr.bf16.mxu1 %v15866_v10  ;;  %v7327_v20 = vld [vmem:[#allocation11 + $0xe90] sm:$0xff]  ;;  %v10683_v6 = vld [vmem:[#allocation14 + $0xe0] sm:$0xff] }
 0x5f4   :  { %10563 = vmatprep.subr.bf16.mxu0 %v15740_v12  ;;  %v7331_v10 = vld [vmem:[#allocation11 + $0xeb0] sm:$0xff]  ;;  %v7200_v12 = vld [vmem:[#allocation11 + $0xa98] sm:$0xff] }
 0x5f5   :  { %v15946_v52 = vcombine.high %v7327_v20, %v7331_v10  ;;  %v15945_v34 = vcombine.low %v7327_v20, %v7331_v10  ;;  %v15819_v18 = vcombine.low %v7200_v12, %v7204_v47  ;;  %v15660_v20 = vcombine.high %v7040_v33, %v7044_v42  ;;  %v7032_v10 = vld [vmem:[#allocation11 + $0x558] sm:$0xff] }
 0x5f6   :  { %10441 = vmatpush1.bf16.msra.mxu1 %v15865_v59  ;;  %v15820_v59 = vcombine.high %v7200_v12, %v7204_v47  ;;  %v7036_v12 = vld [vmem:[#allocation11 + $0x578] sm:$0xff] }
 0x5f7   :  { %10564 = vmatpush1.bf16.msra.mxu0 %v15739_v32  ;;  %10442 = vmatprep.subr.bf16.mxu1 %v15986_v24  ;;  %v7319_v32 = vld [vmem:[#allocation11 + $0xe50] sm:$0xff] }
 0x5f8   :  { %10565 = vmatprep.subr.bf16.mxu0 %v15860_v25  ;;  %v7323_v24 = vld [vmem:[#allocation11 + $0xe70] sm:$0xff]  ;;  %v7192_v25 = vld [vmem:[#allocation11 + $0xa58] sm:$0xff] }
 0x5f9   :  { %v15938_v17 = vcombine.high %v7319_v32, %v7323_v24  ;;  %v15937_v36 = vcombine.low %v7319_v32, %v7323_v24  ;;  %v15811_v63 = vcombine.low %v7192_v25, %v7196_v27  ;;  %v10699_v32 = vld [vmem:[#allocation14 + $0x160] sm:$0xff]  ;;  %v17314_v24 = vpack.c.bf16 %v10640_v16, %v10640_v16 }
 0x5fa   :  { %10443 = vmatpush2.bf16.msra.mxu1 %v15985_v29  ;;  %v15812_v29 = vcombine.high %v7192_v25, %v7196_v27 }
 0x5fb   :  { %10566 = vmatpush2.bf16.msra.mxu0 %v15859_v46  ;;  %10444 = vmatprep.subr.bf16.mxu1 %v15978_v31  ;;  %v7311_v46 = vld [vmem:[#allocation11 + $0xe10] sm:$0xff] }
 0x5fc   :  { %10567 = vmatprep.subr.bf16.mxu0 %v15852_v35  ;;  %v7315_v31 = vld [vmem:[#allocation11 + $0xe30] sm:$0xff]  ;;  %v7184_v35 = vld [vmem:[#allocation11 + $0xa18] sm:$0xff] }
 0x5fd   :  { %v15929_v19 = vcombine.low %v7311_v46, %v7315_v31 }
 0x5fe   :  { %10445 = vmatpush2.bf16.msra.mxu1 %v15977_v62  ;;  %v15930_v62 = vcombine.high %v7311_v46, %v7315_v31  ;;  %v7024_v46 = vld [vmem:[#allocation11 + $0x518] sm:$0xff] }
 0x5ff   :  { %10568 = vmatpush2.bf16.msra.mxu0 %v15851_v45  ;;  %10446 = vmatprep.subr.bf16.mxu1 %v15970_v8  ;;  %v15804_v45 = vcombine.high %v7184_v35, %v7188_v9  ;;  %v7048_v8 = vld [vmem:[#allocation11 + $0x5d8] sm:$0xff] }
 0x600   :  { %10569 = vmatprep.subr.bf16.mxu0 %v15844_v51  ;;  %v7052_v51 = vld [vmem:[#allocation11 + $0x5f8] sm:$0xff] }
 0x601   :  { %v15667_v23 = vcombine.low %v7048_v8, %v7052_v51  ;;  %v7028_v31 = vld [vmem:[#allocation11 + $0x538] sm:$0xff] }
 0x602   :  { %10447 = vmatpush2.bf16.msra.mxu1 %v15969_v60  ;;  %v15803_v60 = vcombine.low %v7184_v35, %v7188_v9  ;;  %v10687_v9 = vld [vmem:[#allocation14 + $0x100] sm:$0xff] }
 0x603   :  { %10570 = vmatpush2.bf16.msra.mxu0 %v15843_v54  ;;  %10448 = vmatprep.subr.bf16.mxu1 %v15962_v2  ;;  %v15668_v54 = vcombine.high %v7048_v8, %v7052_v51  ;;  %v16046_v2 = vcombine.high %v10711_v50, %v10715_v58  ;;  %v16022_v8 = vcombine.high %v10687_v9, %v10691_v55  ;;  %v7016_v51 = vld [vmem:[#allocation11 + $0x4d8] sm:$0xff] }
 0x604   :  { %10571 = vmatprep.subr.bf16.mxu0 %v15836_v13  ;;  %v7390_v13 = vrot.slane %v17303_v61, %v17018_v38 }
 0x606   :  { %10449 = vmatpush2.bf16.msra.mxu1 %v15961_v40  ;;  %v10703_v40 = vld [vmem:[#allocation14 + $0x180] sm:$0xff]  ;;  %v10176_v47 = vadd.f32 %v17285_v11, %v7390_v13  ;;  %v7012_v13 = vld [vmem:[#allocation11 + $0x4b8] sm:$0xff] }
 0x607   :  { %10572 = vmatpush2.bf16.msra.mxu0 %v15835_v57  ;;  %10450 = vmatprep.subr.bf16.mxu1 %v15954_v28  ;;  %v10707_v57 = vld [vmem:[#allocation14 + $0x1a0] sm:$0xff]  ;;  %v16045_v28 = vcombine.low %v10711_v50, %v10715_v58  ;;  %v7020_v50 = vld [vmem:[#allocation11 + $0x4f8] sm:$0xff] }
 0x608   :  { %10573 = vmatprep.subr.bf16.mxu0 %v15828_v14  ;;  %v10174_v14 = vadd.f32 %v17280_v49, %v7386_v1  ;;  %v15659_v49 = vcombine.low %v7040_v33, %v7044_v42  ;;  %v10679_v58 = vld [vmem:[#allocation14 + $0xc0] sm:$0xff]  ;;  %v15635_v16 = vcombine.low %v7016_v51, %v7020_v50 }
 0x609   :  { %v16014_v1 = vcombine.high %v10679_v58, %v10683_v6  ;;  %v10671_v33 = vld [vmem:[#allocation14 + $0x80] sm:$0xff] }
 0x60a   :  { %10451 = vmatpush2.bf16.msra.mxu1 %v15953_v41  ;;  %v10675_v42 = vld [vmem:[#allocation14 + $0xa0] sm:$0xff] }
 0x60b   :  { %10574 = vmatpush2.bf16.msra.mxu0 %v15827_v48  ;;  %10452 = vmatprep.subr.bf16.mxu1 %v15946_v52  ;;  %v16038_v52 = vcombine.high %v10703_v40, %v10707_v57 }
 0x60c   :  { %10575 = vmatprep.subr.bf16.mxu0 %v15820_v59  ;;  %v10695_v59 = vld [vmem:[#allocation14 + $0x140] sm:$0xff] }
 0x60e   :  { %10453 = vmatpush2.bf16.msra.mxu1 %v15945_v34  ;;  %v16037_v34 = vcombine.low %v10703_v40, %v10707_v57  ;;  %v16006_v57 = vcombine.high %v10671_v33, %v10675_v42 }
 0x60f   :  { %10576 = vmatpush2.bf16.msra.mxu0 %v15819_v18  ;;  %10454 = vmatprep.subr.bf16.mxu1 %v15938_v17  ;;  %v15652_v18 = vcombine.high %v7032_v10, %v7036_v12 }
 0x610   :  { %10577 = vmatprep.subr.bf16.mxu0 %v15812_v29  ;;  %v16030_v29 = vcombine.high %v10695_v59, %v10699_v32 }
 0x612   :  { %10455 = vmatpush2.bf16.msra.mxu1 %v15937_v36 }
 0x613   :  { %10578 = vmatpush2.bf16.msra.mxu0 %v15811_v63  ;;  %10456 = vmatprep.subr.bf16.mxu1 %v15930_v62  ;;  %v16029_v62 = vcombine.low %v10695_v59, %v10699_v32  ;;  %v6992_v59 = vld [vmem:[#allocation11 + $0x418] sm:$0xff] }
 0x614   :  { %10579 = vmatprep.subr.bf16.mxu0 %v15804_v45  ;;  %v15644_v45 = vcombine.high %v7024_v46, %v7028_v31  ;;  %v6996_v32 = vld [vmem:[#allocation11 + $0x438] sm:$0xff] }
 0x616   :  { %10457 = vmatpush2.bf16.msra.mxu1 %v15929_v19  ;;  %v15643_v19 = vcombine.low %v7024_v46, %v7028_v31  ;;  %v7112_v31 = vld [vmem:[#allocation11 + $0x7d8] sm:$0xff] }
 0x617   :  { %10580 = vmatpush2.bf16.msra.mxu0 %v15803_v60  ;;  %10508 = vmatprep.subr.bf16.mxu1 %v15668_v54  ;;  %v16021_v60 = vcombine.low %v10687_v9, %v10691_v55  ;;  %v15636_v54 = vcombine.high %v7016_v51, %v7020_v50  ;;  %v10779_v9 = vld [vmem:[#allocation14 + $0x3e0] sm:$0xff]  ;;  %v15611_v55 = vcombine.low %v6992_v59, %v6996_v32 }
 0x618   :  { %13769 = vmatprep.subr.bf16.mxu0 %v16046_v2  ;;  %v7008_v2 = vld [vmem:[#allocation11 + $0x498] sm:$0xff]  ;;  %v10771_v51 = vld [vmem:[#allocation14 + $0x3a0] sm:$0xff] }
 0x619   :  { %v10214_v41 = vpop.f32.mrf.mxu1  ;;  %v17311_v48 = vpop.f32.mrf.mxu0  ;;  %10459 = vmatmul.mubr.bf16.vlgmr.msra.gmra.mxu1 %v17258_v4  ;;  %v15628_v40 = vcombine.high %v7008_v2, %v7012_v13 }
 0x61a   :  { %v17316_v25 = vadd.f32 %v10214_v41, %v10174_v14  ;;  %10582 = vmatmul.mubr.bf16.vlgmr.msra.gmra.mxu0 %v17231_v5  ;;  %10509 = vmatpush1.bf16.msra.mxu1 %v15667_v23  ;;  %v16013_v23 = vcombine.low %v10679_v58, %v10683_v6  ;;  %v7004_v14 = vld [vmem:[#allocation11 + $0x478] sm:$0xff] }
 0x61b   :  { %10540 = vmatprep.mubr.bf16.mxu1 %v17197_v44  ;;  %13770 = vmatpush1.bf16.msra.mxu0 %v16045_v28  ;;  %v10216_v11 = vpop.f32.mrf.mxu1  ;;  %v17320_v27 = vpop.f32.mrf.mxu0  ;;  %v15651_v44 = vcombine.low %v7032_v10, %v7036_v12  ;;  %v7000_v28 = vld [vmem:[#allocation11 + $0x458] sm:$0xff]  ;;  %v10667_v10 = vld [vmem:[#allocation14 + $0x60] sm:$0xff]  ;;  %v15627_v12 = vcombine.low %v7008_v2, %v7012_v13 }
 0x61c   :  { %13801 = vmatprep.mubr.bf16.mxu0 %v17314_v24  ;;  %v17323_v17 = vadd.f32 %v10216_v11, %v10176_v47  ;;  %10510 = vmatprep.subr.bf16.mxu1 %v15660_v20  ;;  %v10663_v20 = vld [vmem:[#allocation14 + $0x40] sm:$0xff]  ;;  %v16005_v47 = vcombine.low %v10671_v33, %v10675_v42  ;;  %v15620_v41 = vcombine.high %v7000_v28, %v7004_v14 }
 0x61d   :  { %v10218_v35 = vpop.f32.mrf.mxu1  ;;  %v10341_v5 = vpop.f32.mrf.mxu0  ;;  %13771 = vmatprep.subr.bf16.mxu0 %v16038_v52  ;;  %v15998_v52 = vcombine.high %v10663_v20, %v10667_v10  ;;  %v10659_v11 = vld [vmem:[#allocation14 + $0x20] sm:$0xff] }
 0x61e   :  { %10511 = vmatpush1.bf16.msra.mxu1 %v15659_v49  ;;  %v10655_v49 = vld [vmem:[#allocation14] sm:$0xff]  ;;  %v7116_v35 = vld [vmem:[#allocation11 + $0x7f8] sm:$0xff] }
 0x61f   :  { %13772 = vmatpush1.bf16.msra.mxu0 %v16037_v34  ;;  %v10219_v36 = vpop.f32.mrf.mxu1  ;;  %v10342_v63 = vpop.f32.mrf.mxu0  ;;  %10512 = vmatprep.subr.bf16.mxu1 %v15652_v18  ;;  %v15619_v34 = vcombine.low %v7000_v28, %v7004_v14  ;;  %v15997_v18 = vcombine.low %v10663_v20, %v10667_v10  ;;  %v15990_v46 = vcombine.high %v10655_v49, %v10659_v11  ;;  %v10775_v5 = vld [vmem:[#allocation14 + $0x3c0] sm:$0xff] }
 0x620   :  { %13773 = vmatprep.subr.bf16.mxu0 %v16030_v29  ;;  %v15612_v29 = vcombine.high %v6992_v59, %v6996_v32  ;;  %v15732_v36 = vcombine.high %v7112_v31, %v7116_v35  ;;  %v16110_v63 = vcombine.high %v10775_v5, %v10779_v9  ;;  %v15731_v50 = vcombine.low %v7112_v31, %v7116_v35  ;;  %v10763_v2 = vld [vmem:[#allocation14 + $0x360] sm:$0xff] }
 0x621   :  { %v16109_v58 = vcombine.low %v10775_v5, %v10779_v9  ;;  %v10755_v28 = vld [vmem:[#allocation14 + $0x320] sm:$0xff] }
 0x622   :  { %10513 = vmatpush1.bf16.msra.mxu1 %v15651_v44  ;;  %v15989_v44 = vcombine.low %v10655_v49, %v10659_v11  ;;  %v10747_v59 = vld [vmem:[#allocation14 + $0x2e0] sm:$0xff] }
 0x623   :  { %13774 = vmatpush1.bf16.msra.mxu0 %v16029_v62  ;;  %10514 = vmatprep.subr.bf16.mxu1 %v15644_v45  ;;  %v7104_v62 = vld [vmem:[#allocation11 + $0x798] sm:$0xff]  ;;  %v10739_v31 = vld [vmem:[#allocation14 + $0x2a0] sm:$0xff] }
 0x624   :  { %13775 = vmatprep.subr.bf16.mxu0 %v16022_v8  ;;  %v7108_v45 = vld [vmem:[#allocation11 + $0x7b8] sm:$0xff]  ;;  %v10767_v8 = vld [vmem:[#allocation14 + $0x380] sm:$0xff] }
 0x625   :  { %v15724_v6 = vcombine.high %v7104_v62, %v7108_v45  ;;  %v15723_v13 = vcombine.low %v7104_v62, %v7108_v45  ;;  %v16101_v33 = vcombine.low %v10767_v8, %v10771_v51  ;;  %v10731_v62 = vld [vmem:[#allocation14 + $0x260] sm:$0xff] }
 0x626   :  { %10515 = vmatpush1.bf16.msra.mxu1 %v15643_v19  ;;  %v16102_v19 = vcombine.high %v10767_v8, %v10771_v51 }
 0x627   :  { %13776 = vmatpush1.bf16.msra.mxu0 %v16021_v60  ;;  %10516 = vmatprep.subr.bf16.mxu1 %v15636_v54  ;;  %v7096_v60 = vld [vmem:[#allocation11 + $0x758] sm:$0xff] }
 0x628   :  { %13777 = vmatprep.subr.bf16.mxu0 %v16014_v1  ;;  %v7100_v54 = vld [vmem:[#allocation11 + $0x778] sm:$0xff]  ;;  %v10759_v1 = vld [vmem:[#allocation14 + $0x340] sm:$0xff] }
 0x629   :  { %v15716_v42 = vcombine.high %v7096_v60, %v7100_v54  ;;  %v15715_v14 = vcombine.low %v7096_v60, %v7100_v54  ;;  %v16093_v20 = vcombine.low %v10759_v1, %v10763_v2  ;;  %v10723_v60 = vld [vmem:[#allocation14 + $0x220] sm:$0xff] }
 0x62a   :  { %10517 = vmatpush1.bf16.msra.mxu1 %v15635_v16  ;;  %v16094_v16 = vcombine.high %v10759_v1, %v10763_v2 }
 0x62b   :  { %13778 = vmatpush1.bf16.msra.mxu0 %v16013_v23  ;;  %10518 = vmatprep.subr.bf16.mxu1 %v15628_v40  ;;  %v7088_v23 = vld [vmem:[#allocation11 + $0x718] sm:$0xff] }
 0x62c   :  { %13779 = vmatprep.subr.bf16.mxu0 %v16006_v57  ;;  %v7092_v40 = vld [vmem:[#allocation11 + $0x738] sm:$0xff]  ;;  %v10751_v57 = vld [vmem:[#allocation14 + $0x300] sm:$0xff] }
 0x62d   :  { %v15708_v10 = vcombine.high %v7088_v23, %v7092_v40  ;;  %v15707_v32 = vcombine.low %v7088_v23, %v7092_v40  ;;  %v16085_v49 = vcombine.low %v10751_v57, %v10755_v28  ;;  %v10967_v23 = vld [vmem:[#allocation14 + $0x9c0] sm:$0xff] }
 0x62e   :  { %10519 = vmatpush1.bf16.msra.mxu1 %v15627_v12  ;;  %v16086_v12 = vcombine.high %v10751_v57, %v10755_v28  ;;  %v10971_v40 = vld [vmem:[#allocation14 + $0x9e0] sm:$0xff] }
 0x62f   :  { %13780 = vmatpush1.bf16.msra.mxu0 %v16005_v47  ;;  %10520 = vmatprep.subr.bf16.mxu1 %v15620_v41  ;;  %v7080_v47 = vld [vmem:[#allocation11 + $0x6d8] sm:$0xff] }
 0x630   :  { %13781 = vmatprep.subr.bf16.mxu0 %v15998_v52  ;;  %v7084_v41 = vld [vmem:[#allocation11 + $0x6f8] sm:$0xff]  ;;  %v10743_v52 = vld [vmem:[#allocation14 + $0x2c0] sm:$0xff] }
 0x631   :  { %v15700_v11 = vcombine.high %v7080_v47, %v7084_v41  ;;  %v15699_v35 = vcombine.low %v7080_v47, %v7084_v41  ;;  %v16077_v5 = vcombine.low %v10743_v52, %v10747_v59  ;;  %v16302_v47 = vcombine.high %v10967_v23, %v10971_v40 }
 0x632   :  { %10521 = vmatpush1.bf16.msra.mxu1 %v15619_v34  ;;  %v16078_v34 = vcombine.high %v10743_v52, %v10747_v59  ;;  %v10959_v52 = vld [vmem:[#allocation14 + $0x980] sm:$0xff] }
 0x633   :  { %13782 = vmatpush1.bf16.msra.mxu0 %v15997_v18  ;;  %10522 = vmatprep.subr.bf16.mxu1 %v15612_v29  ;;  %v7072_v18 = vld [vmem:[#allocation11 + $0x698] sm:$0xff]  ;;  %v10963_v59 = vld [vmem:[#allocation14 + $0x9a0] sm:$0xff] }
 0x634   :  { %13783 = vmatprep.subr.bf16.mxu0 %v15990_v46  ;;  %v7076_v29 = vld [vmem:[#allocation11 + $0x6b8] sm:$0xff]  ;;  %v10735_v46 = vld [vmem:[#allocation14 + $0x280] sm:$0xff] }
 0x635   :  { %v15692_v9 = vcombine.high %v7072_v18, %v7076_v29  ;;  %v15691_v45 = vcombine.low %v7072_v18, %v7076_v29  ;;  %v16069_v8 = vcombine.low %v10735_v46, %v10739_v31  ;;  %v7292_v18 = vld [vmem:[#allocation11 + $0xd78] sm:$0xff]  ;;  %v16301_v29 = vcombine.low %v10967_v23, %v10971_v40  ;;  %v17342_v23 = vld [vmem:[#allocation14 + $0x1c8] sm:$0xff] }
 0x636   :  { %10523 = vmatpush1.bf16.msra.mxu1 %v15611_v55  ;;  %v16070_v55 = vcombine.high %v10735_v46, %v10739_v31  ;;  %v16294_v46 = vcombine.high %v10959_v52, %v10963_v59  ;;  %v17344_v40 = vld [vmem:[#allocation14 + $0x1e8] sm:$0xff] }
 0x637   :  { %13784 = vmatpush1.bf16.msra.mxu0 %v15989_v44  ;;  %10524 = vmatprep.subr.bf16.mxu1 %v15732_v36  ;;  %v7064_v44 = vld [vmem:[#allocation11 + $0x658] sm:$0xff] }
 0x638   :  { %13785 = vmatprep.subr.bf16.mxu0 %v16110_v63  ;;  %v7068_v36 = vld [vmem:[#allocation11 + $0x678] sm:$0xff]  ;;  %v10727_v63 = vld [vmem:[#allocation14 + $0x240] sm:$0xff] }
 0x639   :  { %v15684_v51 = vcombine.high %v7064_v44, %v7068_v36  ;;  %v15683_v54 = vcombine.low %v7064_v44, %v7068_v36  ;;  %v16061_v1 = vcombine.low %v10727_v63, %v10731_v62  ;;  %v7284_v36 = vld [vmem:[#allocation11 + $0xd38] sm:$0xff] }
 0x63a   :  { %10525 = vmatpush2.bf16.msra.mxu1 %v15731_v50  ;;  %v16062_v50 = vcombine.high %v10727_v63, %v10731_v62  ;;  %v16293_v63 = vcombine.low %v10959_v52, %v10963_v59  ;;  %v7256_v59 = vld [vmem:[#allocation11 + $0xc58] sm:$0xff] }
 0x63b   :  { %13786 = vmatpush2.bf16.msra.mxu0 %v16109_v58  ;;  %10526 = vmatprep.subr.bf16.mxu1 %v15724_v6  ;;  %v7056_v58 = vld [vmem:[#allocation11 + $0x618] sm:$0xff] }
 0x63c   :  { %13787 = vmatprep.subr.bf16.mxu0 %v16102_v19  ;;  %v7060_v6 = vld [vmem:[#allocation11 + $0x638] sm:$0xff]  ;;  %v10719_v19 = vld [vmem:[#allocation14 + $0x200] sm:$0xff] }
 0x63d   :  { %v15676_v2 = vcombine.high %v7056_v58, %v7060_v6  ;;  %v15675_v57 = vcombine.low %v7056_v58, %v7060_v6  ;;  %v16053_v28 = vcombine.low %v10719_v19, %v10723_v60  ;;  %v10947_v58 = vld [vmem:[#allocation14 + $0x920] sm:$0xff] }
 0x63e   :  { %10527 = vmatpush2.bf16.msra.mxu1 %v15723_v13  ;;  %v10631_v13 = vmul.f32 0.2, %v17293_v43 }
 0x63f   :  { %13788 = vmatpush2.bf16.msra.mxu0 %v16101_v33  ;;  %10528 = vmatprep.subr.bf16.mxu1 %v15716_v42  ;;  %v16054_v33 = vcombine.high %v10719_v19, %v10723_v60  ;;  %v7304_v42 = vld [vmem:[#allocation11 + $0xdd8] sm:$0xff] }
 0x640   :  { %13789 = vmatprep.subr.bf16.mxu0 %v16094_v16  ;;  %v7308_v16 = vld [vmem:[#allocation11 + $0xdf8] sm:$0xff] }
 0x641   :  { %v15923_v41 = vcombine.low %v7304_v42, %v7308_v16  ;;  %v7272_v60 = vld [vmem:[#allocation11 + $0xcd8] sm:$0xff] }
 0x642   :  { %10529 = vmatpush2.bf16.msra.mxu1 %v15715_v14  ;;  %v15924_v14 = vcombine.high %v7304_v42, %v7308_v16  ;;  %v10939_v42 = vld [vmem:[#allocation14 + $0x8e0] sm:$0xff] }
 0x643   :  { %13790 = vmatpush2.bf16.msra.mxu0 %v16093_v20  ;;  %10530 = vmatprep.subr.bf16.mxu1 %v15708_v10  ;;  %v10639_v20 = vmax.f32 %v17293_v43, %v10631_v13  ;;  %v7296_v10 = vld [vmem:[#allocation11 + $0xd98] sm:$0xff] }
 0x644   :  { %13791 = vmatprep.subr.bf16.mxu0 %v16086_v12  ;;  %v7300_v12 = vld [vmem:[#allocation11 + $0xdb8] sm:$0xff] }
 0x646   :  { %10531 = vmatpush2.bf16.msra.mxu1 %v15707_v32  ;;  %v15916_v32 = vcombine.high %v7296_v10, %v7300_v12 }
 0x647   :  { %13792 = vmatpush2.bf16.msra.mxu0 %v16085_v49  ;;  %10532 = vmatprep.subr.bf16.mxu1 %v15700_v11  ;;  %v17327_v49 = vpack.c.bf16 %v10639_v20, %v10639_v20  ;;  %v10256_v11 = vadd.f32 %v17288_v37, %v17316_v25  ;;  %v16047_v20 = vcombine.low %v17342_v23, %v17344_v40 }
 0x648   :  { %13793 = vmatprep.subr.bf16.mxu0 %v16078_v34  ;;  %v7288_v34 = vld [vmem:[#allocation11 + $0xd58] sm:$0xff] }
 0x649   :  { %v15908_v25 = vcombine.high %v7288_v34, %v7292_v18 }
 0x64a   :  { %10533 = vmatpush2.bf16.msra.mxu1 %v15699_v35 }
 0x64b   :  { %13794 = vmatpush2.bf16.msra.mxu0 %v16077_v5  ;;  %10534 = vmatprep.subr.bf16.mxu1 %v15692_v9  ;;  %v15915_v5 = vcombine.low %v7296_v10, %v7300_v12  ;;  %v10951_v9 = vld [vmem:[#allocation14 + $0x940] sm:$0xff] }
 0x64c   :  { %13795 = vmatprep.subr.bf16.mxu0 %v16070_v55  ;;  %v10955_v55 = vld [vmem:[#allocation14 + $0x960] sm:$0xff] }
 0x64e   :  { %10535 = vmatpush2.bf16.msra.mxu1 %v15691_v45  ;;  %v16286_v45 = vcombine.high %v10951_v9, %v10955_v55 }
 0x64f   :  { %13796 = vmatpush2.bf16.msra.mxu0 %v16069_v8  ;;  %10536 = vmatprep.subr.bf16.mxu1 %v15684_v51  ;;  %v15907_v51 = vcombine.low %v7288_v34, %v7292_v18 }
 0x650   :  { %13797 = vmatprep.subr.bf16.mxu0 %v16062_v50  ;;  %v10943_v50 = vld [vmem:[#allocation14 + $0x900] sm:$0xff] }
 0x652   :  { %10537 = vmatpush2.bf16.msra.mxu1 %v15683_v54  ;;  %v7276_v54 = vld [vmem:[#allocation11 + $0xcf8] sm:$0xff] }
 0x653   :  { %13798 = vmatpush2.bf16.msra.mxu0 %v16061_v1  ;;  %10538 = vmatprep.subr.bf16.mxu1 %v15676_v2  ;;  %v16285_v1 = vcombine.low %v10951_v9, %v10955_v55  ;;  %v16278_v2 = vcombine.high %v10943_v50, %v10947_v58  ;;  %v15892_v16 = vcombine.high %v7272_v60, %v7276_v54  ;;  %v7252_v9 = vld [vmem:[#allocation11 + $0xc38] sm:$0xff] }
 0x654   :  { %13799 = vmatprep.subr.bf16.mxu0 %v16054_v33  ;;  %v10935_v33 = vld [vmem:[#allocation14 + $0x8c0] sm:$0xff]  ;;  %v15891_v12 = vcombine.low %v7272_v60, %v7276_v54  ;;  %v7360_v60 = vld [vmem:[#allocation11 + $0xf98] sm:$0xff] }
 0x655   :  { %v16270_v10 = vcombine.high %v10935_v33, %v10939_v42  ;;  %v7364_v54 = vld [vmem:[#allocation11 + $0xfb8] sm:$0xff] }
 0x656   :  { %10539 = vmatpush2.bf16.msra.mxu1 %v15675_v57  ;;  %v7264_v57 = vld [vmem:[#allocation11 + $0xc98] sm:$0xff] }
 0x657   :  { %13800 = vmatpush2.bf16.msra.mxu0 %v16053_v28  ;;  %10590 = vmatprep.subr.bf16.mxu1 %v15924_v14  ;;  %v7268_v28 = vld [vmem:[#allocation11 + $0xcb8] sm:$0xff]  ;;  %v16277_v14 = vcombine.low %v10943_v50, %v10947_v58 }
 0x658   :  { %13851 = vmatprep.subr.bf16.mxu0 %v16302_v47  ;;  %v10927_v47 = vld [vmem:[#allocation14 + $0x880] sm:$0xff]  ;;  %v15884_v52 = vcombine.high %v7264_v57, %v7268_v28  ;;  %v15883_v18 = vcombine.low %v7264_v57, %v7268_v28  ;;  %v7352_v57 = vld [vmem:[#allocation11 + $0xf58] sm:$0xff] }
 0x659   :  { %v10296_v43 = vpop.f32.mrf.mxu1  ;;  %10541 = vmatmul.mubr.bf16.vlgmr.msra.gmra.mxu1 %v17216_v39  ;;  %v7280_v39 = vld [vmem:[#allocation11 + $0xd18] sm:$0xff] }
 0x65a   :  { %v17332_v31 = vadd.f32 %v10296_v43, %v10256_v11  ;;  %v17334_v35 = vpop.f32.mrf.mxu0  ;;  %13802 = vmatmul.mubr.bf16.vlgmr.msra.gmra.mxu0 %v17327_v49  ;;  %10591 = vmatpush1.bf16.msra.mxu1 %v15923_v41  ;;  %v15899_v13 = vcombine.low %v7280_v39, %v7284_v36  ;;  %v10931_v41 = vld [vmem:[#allocation14 + $0x8a0] sm:$0xff]  ;;  %v16269_v11 = vcombine.low %v10935_v33, %v10939_v42  ;;  %v7356_v28 = vld [vmem:[#allocation11 + $0xf78] sm:$0xff] }
 0x65b   :  { %10622 = vmatprep.mubr.bf16.mxu1 %v17256_v3  ;;  %v17338_v37 = vpop.f32.mrf.mxu1  ;;  %10592 = vmatprep.subr.bf16.mxu1 %v15916_v32  ;;  %v15900_v3 = vcombine.high %v7280_v39, %v7284_v36  ;;  %v7260_v32 = vld [vmem:[#allocation11 + $0xc78] sm:$0xff]  ;;  %v16262_v34 = vcombine.high %v10927_v47, %v10931_v41  ;;  %v10923_v43 = vld [vmem:[#allocation14 + $0x860] sm:$0xff]  ;;  %v16261_v55 = vcombine.low %v10927_v47, %v10931_v41 }
 0x65c   :  { %v17340_v44 = vpop.f32.mrf.mxu0  ;;  %13852 = vmatpush1.bf16.msra.mxu0 %v16301_v29  ;;  %v10919_v29 = vld [vmem:[#allocation14 + $0x840] sm:$0xff]  ;;  %v15875_v39 = vcombine.low %v7256_v59, %v7260_v32 }
 0x65d   :  { %v10300_v62 = vpop.f32.mrf.mxu1  ;;  %13853 = vmatprep.subr.bf16.mxu0 %v16294_v46  ;;  %v15876_v46 = vcombine.high %v7256_v59, %v7260_v32  ;;  %v10911_v36 = vld [vmem:[#allocation14 + $0x800] sm:$0xff]  ;;  %v7344_v59 = vld [vmem:[#allocation11 + $0xf18] sm:$0xff] }
 0x65e   :  { %v10423_v8 = vpop.f32.mrf.mxu0  ;;  %10593 = vmatpush1.bf16.msra.mxu1 %v15915_v5  ;;  %v7248_v5 = vld [vmem:[#allocation11 + $0xc18] sm:$0xff]  ;;  %v11023_v33 = vld [vmem:[#allocation14 + $0xb80] sm:$0xff] }
 0x65f   :  { %v10301_v6 = vpop.f32.mrf.mxu1  ;;  %10594 = vmatprep.subr.bf16.mxu1 %v15908_v25  ;;  %v16254_v25 = vcombine.high %v10919_v29, %v10923_v43  ;;  %v15868_v62 = vcombine.high %v7248_v5, %v7252_v9  ;;  %v7372_v8 = vld [vmem:[#allocation11 + $0xff8] sm:$0xff]  ;;  %v15867_v58 = vcombine.low %v7248_v5, %v7252_v9  ;;  %v11027_v42 = vld [vmem:[#allocation14 + $0xba0] sm:$0xff] }
 0x660   :  { %v10424_v19 = vpop.f32.mrf.mxu0  ;;  %13854 = vmatpush1.bf16.msra.mxu0 %v16293_v63  ;;  %v10915_v63 = vld [vmem:[#allocation14 + $0x820] sm:$0xff]  ;;  %v7348_v32 = vld [vmem:[#allocation11 + $0xf38] sm:$0xff] }
 0x661   :  { %13855 = vmatprep.subr.bf16.mxu0 %v16286_v45  ;;  %v7368_v45 = vld [vmem:[#allocation11 + $0xfd8] sm:$0xff]  ;;  %v16246_v50 = vcombine.high %v10911_v36, %v10915_v63  ;;  %v11031_v6 = vld [vmem:[#allocation14 + $0xbc0] sm:$0xff] }
 0x662   :  { %10595 = vmatpush1.bf16.msra.mxu1 %v15907_v51  ;;  %v16253_v51 = vcombine.low %v10919_v29, %v10923_v43  ;;  %v15988_v19 = vcombine.high %v7368_v45, %v7372_v8  ;;  %v11015_v47 = vld [vmem:[#allocation14 + $0xb40] sm:$0xff]  ;;  %v7336_v5 = vld [vmem:[#allocation11 + $0xed8] sm:$0xff] }
 0x663   :  { %10596 = vmatprep.subr.bf16.mxu1 %v15900_v3  ;;  %v11035_v3 = vld [vmem:[#allocation14 + $0xbe0] sm:$0xff]  ;;  %v7340_v9 = vld [vmem:[#allocation11 + $0xef8] sm:$0xff] }
 0x664   :  { %13856 = vmatpush1.bf16.msra.mxu0 %v16285_v1  ;;  %v16245_v1 = vcombine.low %v10911_v36, %v10915_v63  ;;  %v11019_v41 = vld [vmem:[#allocation14 + $0xb60] sm:$0xff] }
 0x665   :  { %13857 = vmatprep.subr.bf16.mxu0 %v16278_v2  ;;  %v16366_v2 = vcombine.high %v11031_v6, %v11035_v3  ;;  %v11007_v29 = vld [vmem:[#allocation14 + $0xb00] sm:$0xff] }
 0x666   :  { %10597 = vmatpush1.bf16.msra.mxu1 %v15899_v13  ;;  %v15987_v13 = vcombine.low %v7368_v45, %v7372_v8  ;;  %v11011_v43 = vld [vmem:[#allocation14 + $0xb20] sm:$0xff]  ;;  %v7328_v45 = vld [vmem:[#allocation11 + $0xe98] sm:$0xff] }
 0x667   :  { %10598 = vmatprep.subr.bf16.mxu1 %v15892_v16  ;;  %v15980_v16 = vcombine.high %v7360_v60, %v7364_v54  ;;  %v10999_v36 = vld [vmem:[#allocation14 + $0xac0] sm:$0xff]  ;;  %v7332_v8 = vld [vmem:[#allocation11 + $0xeb8] sm:$0xff] }
 0x668   :  { %13858 = vmatpush1.bf16.msra.mxu0 %v16277_v14  ;;  %v16365_v14 = vcombine.low %v11031_v6, %v11035_v3  ;;  %v11003_v63 = vld [vmem:[#allocation14 + $0xae0] sm:$0xff] }
 0x669   :  { %13859 = vmatprep.subr.bf16.mxu0 %v16270_v10  ;;  %v16358_v10 = vcombine.high %v11023_v33, %v11027_v42  ;;  %v10991_v6 = vld [vmem:[#allocation14 + $0xa80] sm:$0xff] }
 0x66a   :  { %10599 = vmatpush1.bf16.msra.mxu1 %v15891_v12  ;;  %v15979_v12 = vcombine.low %v7360_v60, %v7364_v54  ;;  %v10995_v3 = vld [vmem:[#allocation14 + $0xaa0] sm:$0xff]  ;;  %v7320_v60 = vld [vmem:[#allocation11 + $0xe58] sm:$0xff] }
 0x66b   :  { %10600 = vmatprep.subr.bf16.mxu1 %v15884_v52  ;;  %v15972_v52 = vcombine.high %v7352_v57, %v7356_v28  ;;  %v7324_v54 = vld [vmem:[#allocation11 + $0xe78] sm:$0xff] }
 0x66c   :  { %13860 = vmatpush1.bf16.msra.mxu0 %v16269_v11  ;;  %v16357_v11 = vcombine.low %v11023_v33, %v11027_v42  ;;  %v15947_v33 = vcombine.low %v7328_v45, %v7332_v8  ;;  %v10983_v42 = vld [vmem:[#allocation14 + $0xa40] sm:$0xff] }
 0x66d   :  { %13861 = vmatprep.subr.bf16.mxu0 %v16262_v34  ;;  %v16350_v34 = vcombine.high %v11015_v47, %v11019_v41 }
 0x66e   :  { %10601 = vmatpush1.bf16.msra.mxu1 %v15883_v18  ;;  %v15971_v18 = vcombine.low %v7352_v57, %v7356_v28  ;;  %v15940_v57 = vcombine.high %v7320_v60, %v7324_v54 }
 0x66f   :  { %10602 = vmatprep.subr.bf16.mxu1 %v15876_v46  ;;  %v15964_v46 = vcombine.high %v7344_v59, %v7348_v32 }
 0x670   :  { %13862 = vmatpush1.bf16.msra.mxu0 %v16261_v55  ;;  %v16349_v55 = vcombine.low %v11015_v47, %v11019_v41  ;;  %v15939_v41 = vcombine.low %v7320_v60, %v7324_v54 }
 0x671   :  { %13863 = vmatprep.subr.bf16.mxu0 %v16254_v25  ;;  %v16342_v25 = vcombine.high %v11007_v29, %v11011_v43 }
 0x672   :  { %10603 = vmatpush1.bf16.msra.mxu1 %v15875_v39  ;;  %v15963_v39 = vcombine.low %v7344_v59, %v7348_v32  ;;  %v10979_v59 = vld [vmem:[#allocation14 + $0xa20] sm:$0xff] }
 0x673   :  { %10604 = vmatprep.subr.bf16.mxu1 %v15868_v62  ;;  %v15956_v62 = vcombine.high %v7336_v5, %v7340_v9  ;;  %v10839_v32 = vld [vmem:[#allocation14 + $0x5c0] sm:$0xff] }
 0x674   :  { %13864 = vmatpush1.bf16.msra.mxu0 %v16253_v51  ;;  %v16341_v51 = vcombine.low %v11007_v29, %v11011_v43  ;;  %v7394_v43 = vrot.slane %v17303_v61, %v17068_v0 }
 0x675   :  { %13865 = vmatprep.subr.bf16.mxu0 %v16246_v50  ;;  %v16334_v50 = vcombine.high %v10999_v36, %v11003_v63 }
 0x676   :  { %10605 = vmatpush1.bf16.msra.mxu1 %v15867_v58  ;;  %v15955_v58 = vcombine.low %v7336_v5, %v7340_v9  ;;  %v10831_v5 = vld [vmem:[#allocation14 + $0x580] sm:$0xff] }
 0x677   :  { %10606 = vmatprep.subr.bf16.mxu1 %v15988_v19  ;;  %v15948_v19 = vcombine.high %v7328_v45, %v7332_v8  ;;  %v10835_v9 = vld [vmem:[#allocation14 + $0x5a0] sm:$0xff] }
 0x678   :  { %13866 = vmatpush1.bf16.msra.mxu0 %v16245_v1  ;;  %v16333_v1 = vcombine.low %v10999_v36, %v11003_v63  ;;  %v16166_v63 = vcombine.high %v10831_v5, %v10835_v9  ;;  %v10823_v8 = vld [vmem:[#allocation14 + $0x540] sm:$0xff] }
 0x679   :  { %13867 = vmatprep.subr.bf16.mxu0 %v16366_v2  ;;  %v16326_v2 = vcombine.high %v10991_v6, %v10995_v3 }
 0x67a   :  { %10607 = vmatpush2.bf16.msra.mxu1 %v15987_v13  ;;  %v10258_v13 = vadd.f32 %v17296_v7, %v17323_v17 }
 0x67b   :  { %10608 = vmatprep.subr.bf16.mxu1 %v15980_v16  ;;  %v10987_v16 = vld [vmem:[#allocation14 + $0xa60] sm:$0xff] }
 0x67c   :  { %13868 = vmatpush2.bf16.msra.mxu0 %v16365_v14  ;;  %v10299_v28 = vadd.f32 %v17338_v37, %v10258_v13  ;;  %v7312_v14 = vld [vmem:[#allocation11 + $0xe18] sm:$0xff]  ;;  %v16318_v47 = vcombine.high %v10983_v42, %v10987_v16 }
 0x67d   :  { %13869 = vmatprep.subr.bf16.mxu0 %v16358_v10  ;;  %v7316_v10 = vld [vmem:[#allocation11 + $0xe38] sm:$0xff] }
 0x67e   :  { %10609 = vmatpush2.bf16.msra.mxu1 %v15979_v12  ;;  %v16325_v12 = vcombine.low %v10991_v6, %v10995_v3  ;;  %v15932_v7 = vcombine.high %v7312_v14, %v7316_v10  ;;  %v10634_v17 = vmul.f32 0.2, %v10299_v28  ;;  %v15931_v37 = vcombine.low %v7312_v14, %v7316_v10  ;;  %v10807_v14 = vld [vmem:[#allocation14 + $0x4c0] sm:$0xff] }
 0x67f   :  { %10610 = vmatprep.subr.bf16.mxu1 %v15972_v52  ;;  %v10975_v52 = vld [vmem:[#allocation14 + $0xa00] sm:$0xff] }
 0x680   :  { %13870 = vmatpush2.bf16.msra.mxu0 %v16357_v11  ;;  %v10843_v11 = vld [vmem:[#allocation14 + $0x5e0] sm:$0xff] }
 0x681   :  { %13871 = vmatprep.subr.bf16.mxu0 %v16350_v34  ;;  %v16317_v34 = vcombine.low %v10983_v42, %v10987_v16  ;;  %v16174_v29 = vcombine.high %v10839_v32, %v10843_v11  ;;  %v16173_v36 = vcombine.low %v10839_v32, %v10843_v11  ;;  %v10811_v10 = vld [vmem:[#allocation14 + $0x4e0] sm:$0xff] }
 0x682   :  { %10611 = vmatpush2.bf16.msra.mxu1 %v15971_v18  ;;  %v16310_v18 = vcombine.high %v10975_v52, %v10979_v59  ;;  %v10783_v11 = vld [vmem:[#allocation14 + $0x400] sm:$0xff] }
 0x683   :  { %10612 = vmatprep.subr.bf16.mxu1 %v15964_v46  ;;  %v10642_v46 = vmax.f32 %v10299_v28, %v10634_v17  ;;  %v10795_v17 = vld [vmem:[#allocation14 + $0x460] sm:$0xff] }
 0x684   :  { %13872 = vmatpush2.bf16.msra.mxu0 %v16349_v55  ;;  %v16309_v55 = vcombine.low %v10975_v52, %v10979_v59  ;;  %v16141_v52 = vcombine.low %v10807_v14, %v10811_v10 }
 0x685   :  { %13873 = vmatprep.subr.bf16.mxu0 %v16342_v25  ;;  %v16048_v25 = vcombine.high %v17342_v23, %v17344_v40  ;;  %v17358_v45 = vpack.c.bf16 %v10642_v46, %v10642_v46  ;;  %v10680_v40 = vld [vmem:[#allocation14 + $0xc8] sm:$0xff] }
 0x686   :  { %10613 = vmatpush2.bf16.msra.mxu1 %v15963_v39  ;;  %v7398_v39 = vrot.slane %v17303_v61, %v17071_v26  ;;  %v16165_v61 = vcombine.low %v10831_v5, %v10835_v9  ;;  %v10895_v9 = vld [vmem:[#allocation14 + $0x780] sm:$0xff] }
 0x687   :  { %10614 = vmatprep.subr.bf16.mxu1 %v15956_v62  ;;  %v10338_v62 = vadd.f32 %v17311_v48, %v7394_v43  ;;  %v10907_v43 = vld [vmem:[#allocation14 + $0x7e0] sm:$0xff] }
 0x688   :  { %13874 = vmatpush2.bf16.msra.mxu0 %v16341_v51  ;;  %v10827_v51 = vld [vmem:[#allocation14 + $0x560] sm:$0xff] }
 0x689   :  { %13875 = vmatprep.subr.bf16.mxu0 %v16334_v50  ;;  %v16158_v48 = vcombine.high %v10823_v8, %v10827_v51 }
 0x68a   :  { %10615 = vmatpush2.bf16.msra.mxu1 %v15955_v58  ;;  %v10340_v58 = vadd.f32 %v17320_v27, %v7398_v39 }
 0x68b   :  { %10616 = vmatprep.subr.bf16.mxu1 %v15948_v19 }
 0x68c   :  { %13876 = vmatpush2.bf16.msra.mxu0 %v16333_v1  ;;  %v10815_v1 = vld [vmem:[#allocation14 + $0x500] sm:$0xff] }
 0x68d   :  { %13877 = vmatprep.subr.bf16.mxu0 %v16326_v2  ;;  %v10819_v2 = vld [vmem:[#allocation14 + $0x520] sm:$0xff] }
 0x68e   :  { %10617 = vmatpush2.bf16.msra.mxu1 %v15947_v33  ;;  %v16157_v33 = vcombine.low %v10823_v8, %v10827_v51  ;;  %v10879_v51 = vld [vmem:[#allocation14 + $0x700] sm:$0xff] }
 0x68f   :  { %10618 = vmatprep.subr.bf16.mxu1 %v15940_v57  ;;  %v16150_v57 = vcombine.high %v10815_v1, %v10819_v2 }
 0x690   :  { %13878 = vmatpush2.bf16.msra.mxu0 %v16325_v12  ;;  %v16149_v12 = vcombine.low %v10815_v1, %v10819_v2  ;;  %v10863_v1 = vld [vmem:[#allocation14 + $0x680] sm:$0xff] }
 0x691   :  { %13879 = vmatprep.subr.bf16.mxu0 %v16318_v47  ;;  %v16142_v47 = vcombine.high %v10807_v14, %v10811_v10  ;;  %v10867_v2 = vld [vmem:[#allocation14 + $0x6a0] sm:$0xff] }
 0x692   :  { %10619 = vmatpush2.bf16.msra.mxu1 %v15939_v41  ;;  %v10799_v41 = vld [vmem:[#allocation14 + $0x480] sm:$0xff] }
 0x693   :  { %10620 = vmatprep.subr.bf16.mxu1 %v15932_v7  ;;  %v10791_v7 = vld [vmem:[#allocation14 + $0x440] sm:$0xff] }
 0x694   :  { %13880 = vmatpush2.bf16.msra.mxu0 %v16317_v34  ;;  %v16126_v32 = vcombine.high %v10791_v7, %v10795_v17  ;;  %v10787_v34 = vld [vmem:[#allocation14 + $0x420] sm:$0xff] }
 0x695   :  { %13881 = vmatprep.subr.bf16.mxu0 %v16310_v18  ;;  %v16125_v18 = vcombine.low %v10791_v7, %v10795_v17  ;;  %v16117_v46 = vcombine.low %v10783_v11, %v10787_v34  ;;  %v10847_v14 = vld [vmem:[#allocation14 + $0x600] sm:$0xff] }
 0x696   :  { %10621 = vmatpush2.bf16.msra.mxu1 %v15931_v37  ;;  %v16118_v37 = vcombine.high %v10783_v11, %v10787_v34  ;;  %v10851_v10 = vld [vmem:[#allocation14 + $0x620] sm:$0xff] }
 0x697   :  { %13810 = vmatprep.subr.bf16.mxu1 %v16174_v29  ;;  %v10903_v29 = vld [vmem:[#allocation14 + $0x7c0] sm:$0xff] }
 0x698   :  { %13882 = vmatpush2.bf16.msra.mxu0 %v16309_v55  ;;  %v16238_v5 = vcombine.high %v10903_v29, %v10907_v43  ;;  %v10899_v55 = vld [vmem:[#allocation14 + $0x7a0] sm:$0xff] }
 0x699   :  { %v10378_v50 = vpop.f32.mrf.mxu1  ;;  %10623 = vmatmul.mubr.bf16.vlgmr.msra.gmra.mxu1 %v17258_v4  ;;  %13933 = vmatprep.subr.bf16.mxu0 %v16048_v25  ;;  %v16237_v25 = vcombine.low %v10903_v29, %v10907_v43  ;;  %v16230_v39 = vcombine.high %v10895_v9, %v10899_v55  ;;  %v11083_v29 = vld [vmem:[#allocation14 + $0xd60] sm:$0xff] }
 0x69a   :  { %v10379_v6 = vadd.f32 %v10378_v50, %v10338_v62  ;;  %v17362_v3 = vpop.f32.mrf.mxu0  ;;  %13811 = vmatpush1.bf16.msra.mxu1 %v16173_v36  ;;  %13842 = vmatprep.mubr.bf16.mxu1 %v17358_v45  ;;  %v10887_v36 = vld [vmem:[#allocation14 + $0x740] sm:$0xff]  ;;  %v16229_v62 = vcombine.low %v10895_v9, %v10899_v55 }
 0x69b   :  { %v10380_v19 = vpop.f32.mrf.mxu1  ;;  %13812 = vmatprep.subr.bf16.mxu1 %v16166_v63  ;;  %v10891_v63 = vld [vmem:[#allocation14 + $0x760] sm:$0xff] }
 0x69c   :  { %v10381_v60 = vadd.f32 %v10380_v19, %v10340_v58  ;;  %v17365_v54 = vpop.f32.mrf.mxu0  ;;  %v17368_v4 = vadd.f32 %v17334_v35, %v10379_v6  ;;  %v10803_v35 = vld [vmem:[#allocation14 + $0x4a0] sm:$0xff]  ;;  %v16222_v8 = vcombine.high %v10887_v36, %v10891_v63  ;;  %v16221_v58 = vcombine.low %v10887_v36, %v10891_v63 }
 0x69d   :  { %v10382_v13 = vpop.f32.mrf.mxu1  ;;  %v16134_v59 = vcombine.high %v10799_v41, %v10803_v35  ;;  %v10883_v50 = vld [vmem:[#allocation14 + $0x720] sm:$0xff] }
 0x69e   :  { %v10505_v27 = vpop.f32.mrf.mxu0  ;;  %13813 = vmatpush1.bf16.msra.mxu1 %v16165_v61  ;;  %v17371_v42 = vadd.f32 %v17340_v44, %v10381_v60  ;;  %v16133_v44 = vcombine.low %v10799_v41, %v10803_v35  ;;  %v16214_v6 = vcombine.high %v10879_v51, %v10883_v50  ;;  %v10871_v61 = vld [vmem:[#allocation14 + $0x6c0] sm:$0xff]  ;;  %v16182_v41 = vcombine.high %v10847_v14, %v10851_v10 }
 0x69f   :  { %v10383_v16 = vpop.f32.mrf.mxu1  ;;  %13814 = vmatprep.subr.bf16.mxu1 %v16158_v48  ;;  %v10875_v19 = vld [vmem:[#allocation14 + $0x6e0] sm:$0xff]  ;;  %v16213_v48 = vcombine.low %v10879_v51, %v10883_v50  ;;  %v16198_v27 = vcombine.high %v10863_v1, %v10867_v2 }
 0x6a0   :  { %v10506_v28 = vpop.f32.mrf.mxu0  ;;  %v16206_v60 = vcombine.high %v10871_v61, %v10875_v19  ;;  %v16205_v13 = vcombine.low %v10871_v61, %v10875_v19  ;;  %v10859_v16 = vld [vmem:[#allocation14 + $0x660] sm:$0xff] }
 0x6a1   :  { %v11095_v35 = vld [vmem:[#allocation14 + $0xdc0] sm:$0xff] }
 0x6a2   :  { %13815 = vmatpush1.bf16.msra.mxu1 %v16157_v33  ;;  %v10855_v33 = vld [vmem:[#allocation14 + $0x640] sm:$0xff] }
 0x6a3   :  { %13816 = vmatprep.subr.bf16.mxu1 %v16150_v57  ;;  %v16197_v57 = vcombine.low %v10863_v1, %v10867_v2  ;;  %v16190_v28 = vcombine.high %v10855_v33, %v10859_v16  ;;  %v11071_v63 = vld [vmem:[#allocation14 + $0xd00] sm:$0xff]  ;;  %v10708_v1 = vld [vmem:[#allocation14 + $0x1a8] sm:$0xff] }
 0x6a4   :  { %v11063_v2 = vld [vmem:[#allocation14 + $0xcc0] sm:$0xff] }
 0x6a6   :  { %13817 = vmatpush1.bf16.msra.mxu1 %v16149_v12  ;;  %v16189_v12 = vcombine.low %v10855_v33, %v10859_v16 }
 0x6a7   :  { %13818 = vmatprep.subr.bf16.mxu1 %v16142_v47  ;;  %v10633_v47 = vmul.f32 0.2, %v17332_v31 }
 0x6a9   :  { %v10641_v7 = vmax.f32 %v17332_v31, %v10633_v47 }
 0x6aa   :  { %13819 = vmatpush1.bf16.msra.mxu1 %v16141_v52  ;;  %v11099_v52 = vld [vmem:[#allocation14 + $0xde0] sm:$0xff] }
 0x6ab   :  { %13820 = vmatprep.subr.bf16.mxu1 %v16134_v59  ;;  %v16181_v59 = vcombine.low %v10847_v14, %v10851_v10  ;;  %v16430_v17 = vcombine.high %v11095_v35, %v11099_v52  ;;  %v16429_v11 = vcombine.low %v11095_v35, %v11099_v52  ;;  %v17375_v34 = vpack.c.bf16 %v10641_v7, %v10641_v7  ;;  %v10696_v14 = vld [vmem:[#allocation14 + $0x148] sm:$0xff]  ;;  %v11059_v35 = vld [vmem:[#allocation14 + $0xca0] sm:$0xff] }
 0x6ac   :  { %v10700_v10 = vld [vmem:[#allocation14 + $0x168] sm:$0xff] }
 0x6ae   :  { %13821 = vmatpush1.bf16.msra.mxu1 %v16133_v44  ;;  %v11087_v44 = vld [vmem:[#allocation14 + $0xd80] sm:$0xff] }
 0x6af   :  { %13822 = vmatprep.subr.bf16.mxu1 %v16126_v32  ;;  %v11091_v32 = vld [vmem:[#allocation14 + $0xda0] sm:$0xff] }
 0x6b0   :  { %v16421_v31 = vcombine.low %v11087_v44, %v11091_v32 }
 0x6b2   :  { %13823 = vmatpush1.bf16.msra.mxu1 %v16125_v18  ;;  %v16422_v18 = vcombine.high %v11087_v44, %v11091_v32  ;;  %v10692_v44 = vld [vmem:[#allocation14 + $0x128] sm:$0xff] }
 0x6b3   :  { %13824 = vmatprep.subr.bf16.mxu1 %v16118_v37  ;;  %v11079_v37 = vld [vmem:[#allocation14 + $0xd40] sm:$0xff] }
 0x6b4   :  { %v16414_v55 = vcombine.high %v11079_v37, %v11083_v29 }
 0x6b6   :  { %13825 = vmatpush1.bf16.msra.mxu1 %v16117_v46 }
 0x6b7   :  { %13826 = vmatprep.subr.bf16.mxu1 %v16238_v5 }
 0x6ba   :  { %13827 = vmatpush2.bf16.msra.mxu1 %v16237_v25 }
 0x6bb   :  { %13828 = vmatprep.subr.bf16.mxu1 %v16230_v39 }
 0x6be   :  { %13829 = vmatpush2.bf16.msra.mxu1 %v16229_v62  ;;  %v11075_v62 = vld [vmem:[#allocation14 + $0xd20] sm:$0xff] }
 0x6bf   :  { %13830 = vmatprep.subr.bf16.mxu1 %v16222_v8  ;;  %v16406_v61 = vcombine.high %v11071_v63, %v11075_v62  ;;  %v16405_v16 = vcombine.low %v11071_v63, %v11075_v62  ;;  %v10676_v63 = vld [vmem:[#allocation14 + $0xa8] sm:$0xff] }
 0x6c2   :  { %13831 = vmatpush2.bf16.msra.mxu1 %v16221_v58  ;;  %v16413_v58 = vcombine.low %v11079_v37, %v11083_v29  ;;  %v16031_v37 = vcombine.low %v10696_v14, %v10700_v10 }
 0x6c3   :  { %13832 = vmatprep.subr.bf16.mxu1 %v16214_v6 }
 0x6c6   :  { %13833 = vmatpush2.bf16.msra.mxu1 %v16213_v48 }
 0x6c7   :  { %13834 = vmatprep.subr.bf16.mxu1 %v16206_v60  ;;  %v10704_v60 = vld [vmem:[#allocation14 + $0x188] sm:$0xff] }
 0x6c8   :  { %v16040_v33 = vcombine.high %v10704_v60, %v10708_v1  ;;  %v16039_v52 = vcombine.low %v10704_v60, %v10708_v1  ;;  %v11155_v60 = vld [vmem:[#allocation14 + $0xfa0] sm:$0xff] }
 0x6ca   :  { %13835 = vmatpush2.bf16.msra.mxu1 %v16205_v13  ;;  %v11067_v13 = vld [vmem:[#allocation14 + $0xce0] sm:$0xff] }
 0x6cb   :  { %13836 = vmatprep.subr.bf16.mxu1 %v16198_v27  ;;  %v16397_v7 = vcombine.low %v11063_v2, %v11067_v13 }
 0x6ce   :  { %13837 = vmatpush2.bf16.msra.mxu1 %v16197_v57  ;;  %v17388_v57 = vld [vmem:[#allocation14 + $0x5c8] sm:$0xff] }
 0x6cf   :  { %13838 = vmatprep.subr.bf16.mxu1 %v16190_v28  ;;  %v17390_v28 = vld [vmem:[#allocation14 + $0x5e8] sm:$0xff] }
 0x6d0   :  { %v16175_v47 = vcombine.low %v17388_v57, %v17390_v28 }
 0x6d2   :  { %13839 = vmatpush2.bf16.msra.mxu1 %v16189_v12  ;;  %v16398_v12 = vcombine.high %v11063_v2, %v11067_v13 }
 0x6d3   :  { %13840 = vmatprep.subr.bf16.mxu1 %v16182_v41  ;;  %v11055_v41 = vld [vmem:[#allocation14 + $0xc80] sm:$0xff] }
 0x6d4   :  { %v16390_v32 = vcombine.high %v11055_v41, %v11059_v35  ;;  %v16389_v23 = vcombine.low %v11055_v41, %v11059_v35 }
 0x6d6   :  { %13841 = vmatpush2.bf16.msra.mxu1 %v16181_v59  ;;  %v16032_v59 = vcombine.high %v10696_v14, %v10700_v10  ;;  %v11143_v10 = vld [vmem:[#allocation14 + $0xf40] sm:$0xff] }
 0x6d7   :  { %13892 = vmatprep.subr.bf16.mxu1 %v16430_v17  ;;  %v10688_v17 = vld [vmem:[#allocation14 + $0x108] sm:$0xff] }
 0x6d8   :  { %v16024_v29 = vcombine.high %v10688_v17, %v10692_v44 }
 0x6d9   :  { %v10460_v43 = vpop.f32.mrf.mxu1  ;;  %13843 = vmatmul.mubr.bf16.vlgmr.msra.gmra.mxu1 %v17375_v34 }
 0x6da   :  { %v10461_v46 = vadd.f32 %v10460_v43, %v17368_v4  ;;  %v17379_v5 = vpop.f32.mrf.mxu0  ;;  %13893 = vmatpush1.bf16.msra.mxu1 %v16429_v11  ;;  %v11047_v11 = vld [vmem:[#allocation14 + $0xc40] sm:$0xff] }
 0x6db   :  { %v10462_v9 = vpop.f32.mrf.mxu1  ;;  %13894 = vmatprep.subr.bf16.mxu1 %v16422_v18  ;;  %v11051_v18 = vld [vmem:[#allocation14 + $0xc60] sm:$0xff] }
 0x6dc   :  { %v10635_v25 = vmul.f32 0.2, %v10461_v46  ;;  %v10463_v39 = vadd.f32 %v10462_v9, %v17371_v42  ;;  %v17382_v36 = vpop.f32.mrf.mxu0  ;;  %v16382_v43 = vcombine.high %v11047_v11, %v11051_v18  ;;  %v16023_v9 = vcombine.low %v10688_v17, %v10692_v44  ;;  %v11135_v44 = vld [vmem:[#allocation14 + $0xf00] sm:$0xff] }
 0x6dd   :  { %v10464_v8 = vpop.f32.mrf.mxu1 }
 0x6de   :  { %v10636_v51 = vmul.f32 0.2, %v10463_v39  ;;  %v10587_v50 = vpop.f32.mrf.mxu0  ;;  %13895 = vmatpush1.bf16.msra.mxu1 %v16421_v31  ;;  %v10643_v4 = vmax.f32 %v10461_v46, %v10635_v25  ;;  %v11039_v46 = vld [vmem:[#allocation14 + $0xc00] sm:$0xff]  ;;  %v16381_v25 = vcombine.low %v11047_v11, %v11051_v18 }
 0x6df   :  { %v10465_v6 = vpop.f32.mrf.mxu1  ;;  %13896 = vmatprep.subr.bf16.mxu1 %v16414_v55  ;;  %v11043_v31 = vld [vmem:[#allocation14 + $0xc20] sm:$0xff] }
 0x6e0   :  { %v10644_v19 = vmax.f32 %v10463_v39, %v10636_v51  ;;  %v10588_v48 = vpop.f32.mrf.mxu0  ;;  %v17386_v27 = vpack.c.bf16 %v10643_v4, %v10643_v4  ;;  %v10672_v39 = vld [vmem:[#allocation14 + $0x88] sm:$0xff]  ;;  %v16374_v62 = vcombine.high %v11039_v46, %v11043_v31  ;;  %v11159_v8 = vld [vmem:[#allocation14 + $0xfc0] sm:$0xff]  ;;  %v16373_v4 = vcombine.low %v11039_v46, %v11043_v31 }
 0x6e1   :  { %v11163_v51 = vld [vmem:[#allocation14 + $0xfe0] sm:$0xff]  ;;  %v10664_v6 = vld [vmem:[#allocation14 + $0x48] sm:$0xff]  ;;  %v16007_v1 = vcombine.low %v10672_v39, %v10676_v63 }
 0x6e2   :  { %v17384_v42 = vpack.c.bf16 %v10644_v19, %v10644_v19  ;;  %13897 = vmatpush1.bf16.msra.mxu1 %v16413_v58  ;;  %v16008_v58 = vcombine.high %v10672_v39, %v10676_v63  ;;  %v16494_v19 = vcombine.high %v11159_v8, %v11163_v51  ;;  %v11151_v48 = vld [vmem:[#allocation14 + $0xf80] sm:$0xff]  ;;  %v16493_v13 = vcombine.low %v11159_v8, %v11163_v51 }
 0x6e3   :  { %13898 = vmatprep.subr.bf16.mxu1 %v16406_v61  ;;  %v10668_v61 = vld [vmem:[#allocation14 + $0x68] sm:$0xff]  ;;  %v16486_v14 = vcombine.high %v11151_v48, %v11155_v60  ;;  %v11119_v63 = vld [vmem:[#allocation14 + $0xe80] sm:$0xff] }
 0x6e4   :  { %13883 = vmatprep.mubr.bf16.mxu0 %v17384_v42  ;;  %v16000_v2 = vcombine.high %v10664_v6, %v10668_v61  ;;  %v15999_v41 = vcombine.low %v10664_v6, %v10668_v61  ;;  %v11111_v61 = vld [vmem:[#allocation14 + $0xe40] sm:$0xff] }
 0x6e5   :  { %13884 = vmatmul.mubr.bf16.vlgmr.msra.gmra.mxu0 %v17386_v27 }
 0x6e6   :  { %13934 = vmatpush1.bf16.msra.mxu0 %v16047_v20  ;;  %13965 = vmatprep.mubr.bf16.mxu0 %v17314_v24  ;;  %v10684_v20 = vld [vmem:[#allocation14 + $0xe8] sm:$0xff] }
 0x6e7   :  { %13935 = vmatprep.subr.bf16.mxu0 %v16040_v33  ;;  %13899 = vmatpush1.bf16.msra.mxu1 %v16405_v16  ;;  %v16016_v55 = vcombine.high %v10680_v40, %v10684_v20  ;;  %v16015_v50 = vcombine.low %v10680_v40, %v10684_v20  ;;  %v10656_v33 = vld [vmem:[#allocation14 + $0x8] sm:$0xff]  ;;  %v11127_v20 = vld [vmem:[#allocation14 + $0xec0] sm:$0xff] }
 0x6e8   :  { %13900 = vmatprep.subr.bf16.mxu1 %v16398_v12  ;;  %v10660_v16 = vld [vmem:[#allocation14 + $0x28] sm:$0xff]  ;;  %v11147_v12 = vld [vmem:[#allocation14 + $0xf60] sm:$0xff] }
 0x6e9   :  { %v15992_v35 = vcombine.high %v10656_v33, %v10660_v16  ;;  %v16478_v17 = vcombine.high %v11143_v10, %v11147_v12  ;;  %v15991_v11 = vcombine.low %v10656_v33, %v10660_v16  ;;  %v11103_v16 = vld [vmem:[#allocation14 + $0xe00] sm:$0xff] }
 0x6ea   :  { %13936 = vmatpush1.bf16.msra.mxu0 %v16039_v52  ;;  %v16485_v52 = vcombine.low %v11151_v48, %v11155_v60 }
 0x6eb   :  { %13937 = vmatprep.subr.bf16.mxu0 %v16032_v59  ;;  %13901 = vmatpush1.bf16.msra.mxu1 %v16397_v7  ;;  %v10776_v59 = vld [vmem:[#allocation14 + $0x3c8] sm:$0xff] }
 0x6ec   :  { %13902 = vmatprep.subr.bf16.mxu1 %v16390_v32  ;;  %v10780_v7 = vld [vmem:[#allocation14 + $0x3e8] sm:$0xff]  ;;  %v11139_v32 = vld [vmem:[#allocation14 + $0xf20] sm:$0xff] }
 0x6ed   :  { %v16112_v18 = vcombine.high %v10776_v59, %v10780_v7  ;;  %v16470_v40 = vcombine.high %v11135_v44, %v11139_v32  ;;  %v16111_v46 = vcombine.low %v10776_v59, %v10780_v7 }
 0x6ee   :  { %13938 = vmatpush1.bf16.msra.mxu0 %v16031_v37  ;;  %v16477_v37 = vcombine.low %v11143_v10, %v11147_v12 }
 0x6ef   :  { %13939 = vmatprep.subr.bf16.mxu0 %v16024_v29  ;;  %13903 = vmatpush1.bf16.msra.mxu1 %v16389_v23  ;;  %v10768_v29 = vld [vmem:[#allocation14 + $0x388] sm:$0xff] }
 0x6f0   :  { %13904 = vmatprep.subr.bf16.mxu1 %v16382_v43  ;;  %v10772_v23 = vld [vmem:[#allocation14 + $0x3a8] sm:$0xff]  ;;  %v11131_v43 = vld [vmem:[#allocation14 + $0xee0] sm:$0xff] }
 0x6f1   :  { %v16104_v31 = vcombine.high %v10768_v29, %v10772_v23  ;;  %v16462_v39 = vcombine.high %v11127_v20, %v11131_v43  ;;  %v16103_v8 = vcombine.low %v10768_v29, %v10772_v23  ;;  %v16176_v29 = vcombine.high %v17388_v57, %v17390_v28 }
 0x6f2   :  { %13940 = vmatpush1.bf16.msra.mxu0 %v16023_v9  ;;  %v16469_v9 = vcombine.low %v11135_v44, %v11139_v32  ;;  %v16530_v32 = vld [vmem:[#allocation13] sm:$0xff] }
 0x6f3   :  { %13941 = vmatprep.subr.bf16.mxu0 %v16016_v55  ;;  %13905 = vmatpush1.bf16.msra.mxu1 %v16381_v25  ;;  %v10760_v55 = vld [vmem:[#allocation14 + $0x348] sm:$0xff]  ;;  %v7406_v23 = vrot.slane %v16530_v32, %v17098_v22 }
 0x6f4   :  { %13906 = vmatprep.subr.bf16.mxu1 %v16374_v62  ;;  %v10764_v25 = vld [vmem:[#allocation14 + $0x368] sm:$0xff]  ;;  %v11123_v62 = vld [vmem:[#allocation14 + $0xea0] sm:$0xff] }
 0x6f5   :  { %v16096_v51 = vcombine.high %v10760_v55, %v10764_v25  ;;  %v16454_v6 = vcombine.high %v11119_v63, %v11123_v62  ;;  %v16095_v48 = vcombine.low %v10760_v55, %v10764_v25  ;;  %v10504_v55 = vadd.f32 %v17365_v54, %v7406_v23  ;;  %v10924_v23 = vld [vmem:[#allocation14 + $0x868] sm:$0xff] }
 0x6f6   :  { %13942 = vmatpush1.bf16.msra.mxu0 %v16015_v50  ;;  %v16461_v50 = vcombine.low %v11127_v20, %v11131_v43 }
 0x6f7   :  { %13943 = vmatprep.subr.bf16.mxu0 %v16008_v58  ;;  %13907 = vmatpush1.bf16.msra.mxu1 %v16373_v4  ;;  %v10752_v58 = vld [vmem:[#allocation14 + $0x308] sm:$0xff] }
 0x6f8   :  { %13908 = vmatprep.subr.bf16.mxu1 %v16494_v19  ;;  %v10756_v4 = vld [vmem:[#allocation14 + $0x328] sm:$0xff]  ;;  %v11115_v19 = vld [vmem:[#allocation14 + $0xe60] sm:$0xff] }
 0x6f9   :  { %v16088_v60 = vcombine.high %v10752_v58, %v10756_v4  ;;  %v16446_v33 = vcombine.high %v11111_v61, %v11115_v19  ;;  %v16087_v10 = vcombine.low %v10752_v58, %v10756_v4  ;;  %v10968_v58 = vld [vmem:[#allocation14 + $0x9c8] sm:$0xff] }
 0x6fa   :  { %13944 = vmatpush1.bf16.msra.mxu0 %v16007_v1  ;;  %v16453_v1 = vcombine.low %v11119_v63, %v11123_v62  ;;  %v10972_v4 = vld [vmem:[#allocation14 + $0x9e8] sm:$0xff] }
 0x6fb   :  { %13945 = vmatprep.subr.bf16.mxu0 %v16000_v2  ;;  %13909 = vmatpush2.bf16.msra.mxu1 %v16493_v13  ;;  %v10744_v2 = vld [vmem:[#allocation14 + $0x2c8] sm:$0xff] }
 0x6fc   :  { %13910 = vmatprep.subr.bf16.mxu1 %v16486_v14  ;;  %v10748_v13 = vld [vmem:[#allocation14 + $0x2e8] sm:$0xff]  ;;  %v11107_v14 = vld [vmem:[#allocation14 + $0xe20] sm:$0xff] }
 0x6fd   :  { %v16080_v12 = vcombine.high %v10744_v2, %v10748_v13  ;;  %v16438_v59 = vcombine.high %v11103_v16, %v11107_v14  ;;  %v16079_v7 = vcombine.low %v10744_v2, %v10748_v13  ;;  %v16437_v44 = vcombine.low %v11103_v16, %v11107_v14  ;;  %v10960_v2 = vld [vmem:[#allocation14 + $0x988] sm:$0xff] }
 0x6fe   :  { %13946 = vmatpush1.bf16.msra.mxu0 %v15999_v41  ;;  %v16445_v41 = vcombine.low %v11111_v61, %v11115_v19  ;;  %v10964_v13 = vld [vmem:[#allocation14 + $0x9a8] sm:$0xff] }
 0x6ff   :  { %13947 = vmatprep.subr.bf16.mxu0 %v15992_v35  ;;  %13911 = vmatpush2.bf16.msra.mxu1 %v16485_v52  ;;  %v10736_v35 = vld [vmem:[#allocation14 + $0x288] sm:$0xff]  ;;  %v16296_v16 = vcombine.high %v10960_v2, %v10964_v13 }
 0x700   :  { %13912 = vmatprep.subr.bf16.mxu1 %v16478_v17  ;;  %v10740_v52 = vld [vmem:[#allocation14 + $0x2a8] sm:$0xff] }
 0x701   :  { %v16072_v17 = vcombine.high %v10736_v35, %v10740_v52  ;;  %v10952_v14 = vld [vmem:[#allocation14 + $0x948] sm:$0xff] }
 0x702   :  { %13948 = vmatpush1.bf16.msra.mxu0 %v15991_v11  ;;  %v7402_v11 = vrot.slane %v16530_v32, %v17095_v56  ;;  %v10928_v32 = vld [vmem:[#allocation14 + $0x888] sm:$0xff] }
 0x703   :  { %13949 = vmatprep.subr.bf16.mxu0 %v16112_v18  ;;  %13913 = vmatpush2.bf16.msra.mxu1 %v16477_v37  ;;  %v10728_v18 = vld [vmem:[#allocation14 + $0x248] sm:$0xff] }
 0x704   :  { %13914 = vmatprep.subr.bf16.mxu1 %v16470_v40  ;;  %v10732_v37 = vld [vmem:[#allocation14 + $0x268] sm:$0xff]  ;;  %v16071_v40 = vcombine.low %v10736_v35, %v10740_v52  ;;  %v10502_v43 = vadd.f32 %v17362_v3, %v7402_v11 }
 0x705   :  { %v16064_v20 = vcombine.high %v10728_v18, %v10732_v37  ;;  %v16063_v63 = vcombine.low %v10728_v18, %v10732_v37  ;;  %v10932_v11 = vld [vmem:[#allocation14 + $0x8a8] sm:$0xff] }
 0x706   :  { %13950 = vmatpush2.bf16.msra.mxu0 %v16111_v46  ;;  %v10720_v46 = vld [vmem:[#allocation14 + $0x208] sm:$0xff]  ;;  %v16264_v37 = vcombine.high %v10928_v32, %v10932_v11 }
 0x707   :  { %13951 = vmatprep.subr.bf16.mxu0 %v16104_v31  ;;  %13915 = vmatpush2.bf16.msra.mxu1 %v16469_v9  ;;  %v10724_v31 = vld [vmem:[#allocation14 + $0x228] sm:$0xff] }
 0x708   :  { %13916 = vmatprep.subr.bf16.mxu1 %v16462_v39  ;;  %v16055_v54 = vcombine.low %v10720_v46, %v10724_v31 }
 0x70a   :  { %13952 = vmatpush2.bf16.msra.mxu0 %v16103_v8  ;;  %v16056_v8 = vcombine.high %v10720_v46, %v10724_v31  ;;  %v10916_v46 = vld [vmem:[#allocation14 + $0x828] sm:$0xff] }
 0x70b   :  { %13953 = vmatprep.subr.bf16.mxu0 %v16096_v51  ;;  %13917 = vmatpush2.bf16.msra.mxu1 %v16461_v50 }
 0x70c   :  { %13918 = vmatprep.subr.bf16.mxu1 %v16454_v6 }
 0x70e   :  { %13954 = vmatpush2.bf16.msra.mxu0 %v16095_v48 }
 0x70f   :  { %13955 = vmatprep.subr.bf16.mxu0 %v16088_v60  ;;  %13919 = vmatpush2.bf16.msra.mxu1 %v16453_v1  ;;  %v16304_v60 = vcombine.high %v10968_v58, %v10972_v4 }
 0x710   :  { %13920 = vmatprep.subr.bf16.mxu1 %v16446_v33  ;;  %v16303_v33 = vcombine.low %v10968_v58, %v10972_v4 }
 0x712   :  { %13956 = vmatpush2.bf16.msra.mxu0 %v16087_v10  ;;  %v16295_v10 = vcombine.low %v10960_v2, %v10964_v13 }
 0x713   :  { %13957 = vmatprep.subr.bf16.mxu0 %v16080_v12  ;;  %13921 = vmatpush2.bf16.msra.mxu1 %v16445_v41  ;;  %v10944_v12 = vld [vmem:[#allocation14 + $0x908] sm:$0xff] }
 0x714   :  { %13922 = vmatprep.subr.bf16.mxu1 %v16438_v59  ;;  %v10948_v41 = vld [vmem:[#allocation14 + $0x928] sm:$0xff] }
 0x715   :  { %v16280_v52 = vcombine.high %v10944_v12, %v10948_v41  ;;  %v10936_v59 = vld [vmem:[#allocation14 + $0x8c8] sm:$0xff] }
 0x716   :  { %13958 = vmatpush2.bf16.msra.mxu0 %v16079_v7  ;;  %v10940_v7 = vld [vmem:[#allocation14 + $0x8e8] sm:$0xff] }
 0x717   :  { %13959 = vmatprep.subr.bf16.mxu0 %v16072_v17  ;;  %13923 = vmatpush2.bf16.msra.mxu1 %v16437_v44  ;;  %v16279_v17 = vcombine.low %v10944_v12, %v10948_v41  ;;  %v16272_v44 = vcombine.high %v10936_v59, %v10940_v7  ;;  %v16271_v18 = vcombine.low %v10936_v59, %v10940_v7 }
 0x718   :  { %13974 = vmatprep.subr.bf16.mxu1 %v16176_v29  ;;  %v10920_v29 = vld [vmem:[#allocation14 + $0x848] sm:$0xff] }
 0x719   :  { %v10542_v9 = vpop.f32.mrf.mxu1  ;;  %v16255_v31 = vcombine.low %v10920_v29, %v10924_v23 }
 0x71a   :  { %v10543_v25 = vadd.f32 %v10542_v9, %v10502_v43  ;;  %v17406_v39 = vpop.f32.mrf.mxu0  ;;  %13960 = vmatpush2.bf16.msra.mxu0 %v16071_v40  ;;  %v16263_v40 = vcombine.low %v10928_v32, %v10932_v11  ;;  %v10912_v43 = vld [vmem:[#allocation14 + $0x808] sm:$0xff] }
 0x71b   :  { %v10544_v62 = vpop.f32.mrf.mxu1  ;;  %13961 = vmatprep.subr.bf16.mxu0 %v16064_v20  ;;  %v16256_v20 = vcombine.high %v10920_v29, %v10924_v23  ;;  %v16248_v9 = vcombine.high %v10912_v43, %v10916_v46 }
 0x71c   :  { %v10545_v51 = vadd.f32 %v10544_v62, %v10504_v55  ;;  %v17408_v50 = vpop.f32.mrf.mxu0  ;;  %v17411_v3 = vadd.f32 %v17379_v5, %v10543_v25  ;;  %v10956_v5 = vld [vmem:[#allocation14 + $0x968] sm:$0xff] }
 0x71d   :  { %v10546_v6 = vpop.f32.mrf.mxu1  ;;  %v16287_v35 = vcombine.low %v10952_v14, %v10956_v5  ;;  %v11032_v55 = vld [vmem:[#allocation14 + $0xbc8] sm:$0xff] }
 0x71e   :  { %v13807_v61 = vpop.f32.mrf.mxu0  ;;  %13962 = vmatpush2.bf16.msra.mxu0 %v16063_v63  ;;  %v17414_v19 = vadd.f32 %v17382_v36, %v10545_v51  ;;  %v16288_v36 = vcombine.high %v10952_v14, %v10956_v5  ;;  %v11036_v25 = vld [vmem:[#allocation14 + $0xbe8] sm:$0xff]  ;;  %v16247_v63 = vcombine.low %v10912_v43, %v10916_v46  ;;  %v10717_v43 = vld [vmem:[#allocation14 + $0x1f0] sm:$0xff] }
 0x71f   :  { %v10547_v48 = vpop.f32.mrf.mxu1  ;;  %13963 = vmatprep.subr.bf16.mxu0 %v16056_v8  ;;  %v16368_v62 = vcombine.high %v11032_v55, %v11036_v25  ;;  %v11024_v8 = vld [vmem:[#allocation14 + $0xb88] sm:$0xff]  ;;  %v16367_v58 = vcombine.low %v11032_v55, %v11036_v25 }
 0x720   :  { %v13808_v1 = vpop.f32.mrf.mxu0  ;;  %v11028_v51 = vld [vmem:[#allocation14 + $0xba8] sm:$0xff] }
 0x721   :  { %v16360_v4 = vcombine.high %v11024_v8, %v11028_v51  ;;  %v11016_v6 = vld [vmem:[#allocation14 + $0xb48] sm:$0xff] }
 0x722   :  { %13964 = vmatpush2.bf16.msra.mxu0 %v16055_v54  ;;  %v11020_v61 = vld [vmem:[#allocation14 + $0xb68] sm:$0xff]  ;;  %v16359_v54 = vcombine.low %v11024_v8, %v11028_v51  ;;  %v10705_v51 = vld [vmem:[#allocation14 + $0x190] sm:$0xff] }
 0x723   :  { %14015 = vmatprep.subr.bf16.mxu0 %v16304_v60  ;;  %v16352_v48 = vcombine.high %v11016_v6, %v11020_v61  ;;  %v11008_v60 = vld [vmem:[#allocation14 + $0xb08] sm:$0xff]  ;;  %v16351_v2 = vcombine.low %v11016_v6, %v11020_v61 }
 0x724   :  { %v11012_v1 = vld [vmem:[#allocation14 + $0xb28] sm:$0xff] }
 0x725   :  { %13966 = vmatmul.mubr.bf16.vlgmr.msra.gmra.mxu0 %v17327_v49  ;;  %v16344_v13 = vcombine.high %v11008_v60, %v11012_v1  ;;  %v16343_v14 = vcombine.low %v11008_v60, %v11012_v1  ;;  %v10836_v8 = vld [vmem:[#allocation14 + $0x5a8] sm:$0xff]  ;;  %v10697_v1 = vld [vmem:[#allocation14 + $0x150] sm:$0xff] }
 0x726   :  { %14016 = vmatpush1.bf16.msra.mxu0 %v16303_v33  ;;  %14047 = vmatprep.mubr.bf16.mxu0 %v17384_v42  ;;  %v11000_v33 = vld [vmem:[#allocation14 + $0xac8] sm:$0xff] }
 0x727   :  { %14017 = vmatprep.subr.bf16.mxu0 %v16296_v16  ;;  %v11004_v16 = vld [vmem:[#allocation14 + $0xae8] sm:$0xff] }
 0x728   :  { %v16336_v5 = vcombine.high %v11000_v33, %v11004_v16  ;;  %v16335_v12 = vcombine.low %v11000_v33, %v11004_v16  ;;  %v10824_v61 = vld [vmem:[#allocation14 + $0x548] sm:$0xff] }
 0x729   :  { %v10828_v60 = vld [vmem:[#allocation14 + $0x568] sm:$0xff] }
 0x72a   :  { %14018 = vmatpush1.bf16.msra.mxu0 %v16295_v10  ;;  %v10992_v10 = vld [vmem:[#allocation14 + $0xa88] sm:$0xff]  ;;  %v16160_v16 = vcombine.high %v10824_v61, %v10828_v60 }
 0x72b   :  { %14019 = vmatprep.subr.bf16.mxu0 %v16288_v36  ;;  %v10996_v36 = vld [vmem:[#allocation14 + $0xaa8] sm:$0xff] }
 0x72c   :  { %v16328_v41 = vcombine.high %v10992_v10, %v10996_v36  ;;  %v16327_v59 = vcombine.low %v10992_v10, %v10996_v36  ;;  %v10820_v10 = vld [vmem:[#allocation14 + $0x528] sm:$0xff]  ;;  %v10689_v36 = vld [vmem:[#allocation14 + $0x110] sm:$0xff] }
 0x72e   :  { %14020 = vmatpush1.bf16.msra.mxu0 %v16287_v35  ;;  %v10984_v35 = vld [vmem:[#allocation14 + $0xa48] sm:$0xff] }
 0x72f   :  { %14021 = vmatprep.subr.bf16.mxu0 %v16280_v52  ;;  %v10988_v52 = vld [vmem:[#allocation14 + $0xa68] sm:$0xff] }
 0x730   :  { %v16320_v7 = vcombine.high %v10984_v35, %v10988_v52 }
 0x732   :  { %14022 = vmatpush1.bf16.msra.mxu0 %v16279_v17  ;;  %v10976_v17 = vld [vmem:[#allocation14 + $0xa08] sm:$0xff] }
 0x733   :  { %14023 = vmatprep.subr.bf16.mxu0 %v16272_v44  ;;  %v10980_v44 = vld [vmem:[#allocation14 + $0xa28] sm:$0xff] }
 0x734   :  { %v16312_v29 = vcombine.high %v10976_v17, %v10980_v44 }
 0x736   :  { %14024 = vmatpush1.bf16.msra.mxu0 %v16271_v18  ;;  %v16319_v18 = vcombine.low %v10984_v35, %v10988_v52  ;;  %v10808_v35 = vld [vmem:[#allocation14 + $0x4c8] sm:$0xff] }
 0x737   :  { %14025 = vmatprep.subr.bf16.mxu0 %v16264_v37  ;;  %v10812_v52 = vld [vmem:[#allocation14 + $0x4e8] sm:$0xff] }
 0x73a   :  { %14026 = vmatpush1.bf16.msra.mxu0 %v16263_v40 }
 0x73b   :  { %14027 = vmatprep.subr.bf16.mxu0 %v16256_v20  ;;  %v10713_v20 = vld [vmem:[#allocation14 + $0x1d0] sm:$0xff] }
 0x73c   :  { %v16049_v6 = vcombine.low %v10713_v20, %v10717_v43 }
 0x73e   :  { %14028 = vmatpush1.bf16.msra.mxu0 %v16255_v31 }
 0x73f   :  { %14029 = vmatprep.subr.bf16.mxu0 %v16248_v9  ;;  %v16311_v9 = vcombine.low %v10976_v17, %v10980_v44 }
 0x742   :  { %14030 = vmatpush1.bf16.msra.mxu0 %v16247_v63  ;;  %v16050_v63 = vcombine.high %v10713_v20, %v10717_v43 }
 0x743   :  { %14031 = vmatprep.subr.bf16.mxu0 %v16368_v62 }
 0x746   :  { %14032 = vmatpush2.bf16.msra.mxu0 %v16367_v58  ;;  %v10709_v58 = vld [vmem:[#allocation14 + $0x1b0] sm:$0xff] }
 0x747   :  { %14033 = vmatprep.subr.bf16.mxu0 %v16360_v4  ;;  %v16041_v33 = vcombine.low %v10705_v51, %v10709_v58 }
 0x74a   :  { %14034 = vmatpush2.bf16.msra.mxu0 %v16359_v54 }
 0x74b   :  { %14035 = vmatprep.subr.bf16.mxu0 %v16352_v48  ;;  %v16042_v48 = vcombine.high %v10705_v51, %v10709_v58  ;;  %v10784_v51 = vld [vmem:[#allocation14 + $0x408] sm:$0xff] }
 0x74c   :  { %v10788_v58 = vld [vmem:[#allocation14 + $0x428] sm:$0xff] }
 0x74e   :  { %14036 = vmatpush2.bf16.msra.mxu0 %v16351_v2  ;;  %v10701_v2 = vld [vmem:[#allocation14 + $0x170] sm:$0xff] }
 0x74f   :  { %14037 = vmatprep.subr.bf16.mxu0 %v16344_v13  ;;  %v16033_v57 = vcombine.low %v10697_v1, %v10701_v2 }
 0x752   :  { %14038 = vmatpush2.bf16.msra.mxu0 %v16343_v14  ;;  %v16034_v14 = vcombine.high %v10697_v1, %v10701_v2  ;;  %v10904_v2 = vld [vmem:[#allocation14 + $0x7c8] sm:$0xff] }
 0x753   :  { %14039 = vmatprep.subr.bf16.mxu0 %v16336_v5  ;;  %v10816_v5 = vld [vmem:[#allocation14 + $0x508] sm:$0xff] }
 0x754   :  { %v16152_v28 = vcombine.high %v10816_v5, %v10820_v10  ;;  %v16151_v17 = vcombine.low %v10816_v5, %v10820_v10 }
 0x756   :  { %14040 = vmatpush2.bf16.msra.mxu0 %v16335_v12  ;;  %v10693_v12 = vld [vmem:[#allocation14 + $0x130] sm:$0xff] }
 0x757   :  { %14041 = vmatprep.subr.bf16.mxu0 %v16328_v41  ;;  %v16159_v41 = vcombine.low %v10824_v61, %v10828_v60  ;;  %v16025_v44 = vcombine.low %v10689_v36, %v10693_v12  ;;  %v10661_v61 = vld [vmem:[#allocation14 + $0x30] sm:$0xff]  ;;  %v16120_v60 = vcombine.high %v10784_v51, %v10788_v58 }
 0x759   :  { %v10624_v32 = vpop.f32.mrf.mxu1 }
 0x75a   :  { %v10625_v11 = vadd.f32 %v10624_v32, %v17411_v3  ;;  %14042 = vmatpush2.bf16.msra.mxu0 %v16327_v59  ;;  %v10832_v3 = vld [vmem:[#allocation14 + $0x588] sm:$0xff]  ;;  %v10681_v59 = vld [vmem:[#allocation14 + $0xd0] sm:$0xff]  ;;  %v16144_v32 = vcombine.high %v10808_v35, %v10812_v52 }
 0x75b   :  { %v10626_v37 = vpop.f32.mrf.mxu1  ;;  %14043 = vmatprep.subr.bf16.mxu0 %v16320_v7  ;;  %v16168_v54 = vcombine.high %v10832_v3, %v10836_v8  ;;  %v16167_v13 = vcombine.low %v10832_v3, %v10836_v8  ;;  %v10685_v7 = vld [vmem:[#allocation14 + $0xf0] sm:$0xff] }
 0x75c   :  { %v10637_v23 = vmul.f32 0.2, %v10625_v11  ;;  %v10627_v40 = vadd.f32 %v10626_v37, %v17414_v19  ;;  %v10804_v37 = vld [vmem:[#allocation14 + $0x4a8] sm:$0xff]  ;;  %v16017_v20 = vcombine.low %v10681_v59, %v10685_v7 }
 0x75d   :  { %v10628_v46 = vpop.f32.mrf.mxu1 }
 0x75e   :  { %v10638_v31 = vmul.f32 0.2, %v10627_v40  ;;  %14044 = vmatpush2.bf16.msra.mxu0 %v16319_v18  ;;  %v10645_v55 = vmax.f32 %v10625_v11, %v10637_v23  ;;  %v16018_v11 = vcombine.high %v10681_v59, %v10685_v7  ;;  %v10800_v18 = vld [vmem:[#allocation14 + $0x488] sm:$0xff]  ;;  %v10677_v23 = vld [vmem:[#allocation14 + $0xb0] sm:$0xff] }
 0x75f   :  { %v10629_v25 = vpop.f32.mrf.mxu1  ;;  %14045 = vmatprep.subr.bf16.mxu0 %v16312_v29  ;;  %v10673_v29 = vld [vmem:[#allocation14 + $0x90] sm:$0xff]  ;;  %v16136_v43 = vcombine.high %v10800_v18, %v10804_v37  ;;  %v10888_v7 = vld [vmem:[#allocation14 + $0x748] sm:$0xff] }
 0x760   :  { %v10646_v62 = vmax.f32 %v10627_v40, %v10638_v31  ;;  %v17422_v19 = vpack.c.bf16 %v10645_v55, %v10645_v55  ;;  %v16143_v40 = vcombine.low %v10808_v35, %v10812_v52  ;;  %v16010_v46 = vcombine.high %v10673_v29, %v10677_v23  ;;  %v10792_v31 = vld [vmem:[#allocation14 + $0x448] sm:$0xff]  ;;  %v10665_v55 = vld [vmem:[#allocation14 + $0x50] sm:$0xff] }
 0x761   :  { %v10669_v25 = vld [vmem:[#allocation14 + $0x70] sm:$0xff] }
 0x762   :  { %v17420_v4 = vpack.c.bf16 %v10646_v62, %v10646_v62  ;;  %14046 = vmatpush2.bf16.msra.mxu0 %v16311_v9  ;;  %v10796_v9 = vld [vmem:[#allocation14 + $0x468] sm:$0xff]  ;;  %v16009_v62 = vcombine.low %v10673_v29, %v10677_v23  ;;  %v16002_v8 = vcombine.high %v10665_v55, %v10669_v25 }
 0x763   :  { %14097 = vmatprep.subr.bf16.mxu0 %v16050_v63  ;;  %v16135_v63 = vcombine.low %v10800_v18, %v10804_v37  ;;  %v16128_v3 = vcombine.high %v10792_v31, %v10796_v9  ;;  %v10880_v23 = vld [vmem:[#allocation14 + $0x708] sm:$0xff] }
 0x764   :  { %13924 = vmatprep.mubr.bf16.mxu1 %v17420_v4 }
 0x765   :  { %14048 = vmatmul.mubr.bf16.vlgmr.msra.gmra.mxu0 %v17386_v27  ;;  %13925 = vmatmul.mubr.bf16.vlgmr.msra.gmra.mxu1 %v17422_v19 }
 0x766   :  { %13975 = vmatpush1.bf16.msra.mxu1 %v16175_v47  ;;  %14098 = vmatpush1.bf16.msra.mxu0 %v16049_v6  ;;  %v16026_v47 = vcombine.high %v10689_v36, %v10693_v12  ;;  %v10657_v6 = vld [vmem:[#allocation14 + $0x10] sm:$0xff]  ;;  %v10896_v12 = vld [vmem:[#allocation14 + $0x788] sm:$0xff] }
 0x767   :  { %14129 = vmatprep.mubr.bf16.mxu0 %v17314_v24  ;;  %14006 = vmatprep.mubr.bf16.mxu1 %v17358_v45  ;;  %v15994_v1 = vcombine.high %v10657_v6, %v10661_v61  ;;  %v15993_v5 = vcombine.low %v10657_v6, %v10661_v61  ;;  %v10864_v61 = vld [vmem:[#allocation14 + $0x688] sm:$0xff] }
 0x768   :  { %13976 = vmatprep.subr.bf16.mxu1 %v16168_v54  ;;  %14099 = vmatprep.subr.bf16.mxu0 %v16042_v48  ;;  %v16127_v54 = vcombine.low %v10792_v31, %v10796_v9  ;;  %v16001_v48 = vcombine.low %v10665_v55, %v10669_v25  ;;  %v10872_v25 = vld [vmem:[#allocation14 + $0x6c8] sm:$0xff] }
 0x76a   :  { %13977 = vmatpush1.bf16.msra.mxu1 %v16167_v13  ;;  %14100 = vmatpush1.bf16.msra.mxu0 %v16041_v33  ;;  %v10908_v13 = vld [vmem:[#allocation14 + $0x7e8] sm:$0xff]  ;;  %v10777_v33 = vld [vmem:[#allocation14 + $0x3d0] sm:$0xff] }
 0x76b   :  { %13978 = vmatprep.subr.bf16.mxu1 %v16160_v16  ;;  %14101 = vmatprep.subr.bf16.mxu0 %v16034_v14  ;;  %v10781_v16 = vld [vmem:[#allocation14 + $0x3f0] sm:$0xff]  ;;  %v16119_v14 = vcombine.low %v10784_v51, %v10788_v58  ;;  %v16240_v10 = vcombine.high %v10904_v2, %v10908_v13 }
 0x76c   :  { %v16114_v36 = vcombine.high %v10777_v33, %v10781_v16  ;;  %v16113_v35 = vcombine.low %v10777_v33, %v10781_v16 }
 0x76e   :  { %13979 = vmatpush1.bf16.msra.mxu1 %v16159_v41  ;;  %14102 = vmatpush1.bf16.msra.mxu0 %v16033_v57  ;;  %v10900_v41 = vld [vmem:[#allocation14 + $0x7a8] sm:$0xff]  ;;  %v10769_v57 = vld [vmem:[#allocation14 + $0x390] sm:$0xff] }
 0x76f   :  { %13980 = vmatprep.subr.bf16.mxu1 %v16152_v28  ;;  %14103 = vmatprep.subr.bf16.mxu0 %v16026_v47  ;;  %v10773_v28 = vld [vmem:[#allocation14 + $0x3b0] sm:$0xff]  ;;  %v16239_v47 = vcombine.low %v10904_v2, %v10908_v13  ;;  %v16232_v52 = vcombine.high %v10896_v12, %v10900_v41 }
 0x770   :  { %v16106_v59 = vcombine.high %v10769_v57, %v10773_v28  ;;  %v16105_v18 = vcombine.low %v10769_v57, %v10773_v28 }
 0x772   :  { %13981 = vmatpush1.bf16.msra.mxu1 %v16151_v17  ;;  %14104 = vmatpush1.bf16.msra.mxu0 %v16025_v44  ;;  %v10892_v17 = vld [vmem:[#allocation14 + $0x768] sm:$0xff]  ;;  %v10761_v44 = vld [vmem:[#allocation14 + $0x350] sm:$0xff] }
 0x773   :  { %13982 = vmatprep.subr.bf16.mxu1 %v16144_v32  ;;  %14105 = vmatprep.subr.bf16.mxu0 %v16018_v11  ;;  %v10765_v32 = vld [vmem:[#allocation14 + $0x370] sm:$0xff]  ;;  %v16231_v11 = vcombine.low %v10896_v12, %v10900_v41  ;;  %v16224_v37 = vcombine.high %v10888_v7, %v10892_v17 }
 0x774   :  { %v16098_v29 = vcombine.high %v10761_v44, %v10765_v32  ;;  %v16097_v31 = vcombine.low %v10761_v44, %v10765_v32  ;;  %v10733_v12 = vld [vmem:[#allocation14 + $0x270] sm:$0xff] }
 0x775   :  { %v10725_v44 = vld [vmem:[#allocation14 + $0x230] sm:$0xff] }
 0x776   :  { %13983 = vmatpush1.bf16.msra.mxu1 %v16143_v40  ;;  %14106 = vmatpush1.bf16.msra.mxu0 %v16017_v20  ;;  %v10884_v40 = vld [vmem:[#allocation14 + $0x728] sm:$0xff]  ;;  %v10753_v20 = vld [vmem:[#allocation14 + $0x310] sm:$0xff] }
 0x777   :  { %13984 = vmatprep.subr.bf16.mxu1 %v16136_v43  ;;  %14107 = vmatprep.subr.bf16.mxu0 %v16010_v46  ;;  %v10757_v43 = vld [vmem:[#allocation14 + $0x330] sm:$0xff]  ;;  %v16223_v46 = vcombine.low %v10888_v7, %v10892_v17  ;;  %v16216_v9 = vcombine.high %v10880_v23, %v10884_v40  ;;  %v10852_v7 = vld [vmem:[#allocation14 + $0x628] sm:$0xff] }
 0x778   :  { %v16090_v55 = vcombine.high %v10753_v20, %v10757_v43  ;;  %v16089_v51 = vcombine.low %v10753_v20, %v10757_v43  ;;  %v10721_v17 = vld [vmem:[#allocation14 + $0x210] sm:$0xff]  ;;  %v11100_v43 = vld [vmem:[#allocation14 + $0xde8] sm:$0xff] }
 0x77a   :  { %13985 = vmatpush1.bf16.msra.mxu1 %v16135_v63  ;;  %14108 = vmatpush1.bf16.msra.mxu0 %v16009_v62  ;;  %v10876_v63 = vld [vmem:[#allocation14 + $0x6e8] sm:$0xff]  ;;  %v10745_v62 = vld [vmem:[#allocation14 + $0x2d0] sm:$0xff] }
 0x77b   :  { %13986 = vmatprep.subr.bf16.mxu1 %v16128_v3  ;;  %14109 = vmatprep.subr.bf16.mxu0 %v16002_v8  ;;  %v10749_v3 = vld [vmem:[#allocation14 + $0x2f0] sm:$0xff]  ;;  %v16215_v8 = vcombine.low %v10880_v23, %v10884_v40  ;;  %v16208_v58 = vcombine.high %v10872_v25, %v10876_v63  ;;  %v16207_v2 = vcombine.low %v10872_v25, %v10876_v63  ;;  %v11096_v40 = vld [vmem:[#allocation14 + $0xdc8] sm:$0xff] }
 0x77c   :  { %v16082_v6 = vcombine.high %v10745_v62, %v10749_v3  ;;  %v16081_v13 = vcombine.low %v10745_v62, %v10749_v3  ;;  %v16058_v23 = vcombine.high %v10721_v17, %v10725_v44  ;;  %v16432_v25 = vcombine.high %v11096_v40, %v11100_v43  ;;  %v11088_v62 = vld [vmem:[#allocation14 + $0xd88] sm:$0xff] }
 0x77d   :  { %v11092_v3 = vld [vmem:[#allocation14 + $0xda8] sm:$0xff] }
 0x77e   :  { %13987 = vmatpush1.bf16.msra.mxu1 %v16127_v54  ;;  %14110 = vmatpush1.bf16.msra.mxu0 %v16001_v48  ;;  %v10868_v54 = vld [vmem:[#allocation14 + $0x6a8] sm:$0xff]  ;;  %v10737_v48 = vld [vmem:[#allocation14 + $0x290] sm:$0xff] }
 0x77f   :  { %13988 = vmatprep.subr.bf16.mxu1 %v16120_v60  ;;  %14111 = vmatprep.subr.bf16.mxu0 %v15994_v1  ;;  %v10741_v60 = vld [vmem:[#allocation14 + $0x2b0] sm:$0xff]  ;;  %v11167_v1 = vld [vmem:[#allocation16] sm:$0xff]  ;;  %v16200_v33 = vcombine.high %v10864_v61, %v10868_v54  ;;  %v16199_v57 = vcombine.low %v10864_v61, %v10868_v54  ;;  %v16424_v61 = vcombine.high %v11088_v62, %v11092_v3 }
 0x780   :  { %v16074_v16 = vcombine.high %v10737_v48, %v10741_v60  ;;  %v11176_v41 = vrot.slane %v11167_v1, %v16988_v21  ;;  %v16073_v28 = vcombine.low %v10737_v48, %v10741_v60  ;;  %v11080_v48 = vld [vmem:[#allocation14 + $0xd48] sm:$0xff] }
 0x781   :  { %v11084_v60 = vld [vmem:[#allocation14 + $0xd68] sm:$0xff] }
 0x782   :  { %13989 = vmatpush1.bf16.msra.mxu1 %v16119_v14  ;;  %14112 = vmatpush1.bf16.msra.mxu0 %v15993_v5  ;;  %v10856_v14 = vld [vmem:[#allocation14 + $0x648] sm:$0xff]  ;;  %v11172_v5 = vrot.slane %v11167_v1, %v16983_v15 }
 0x783   :  { %13990 = vmatprep.subr.bf16.mxu1 %v16240_v10  ;;  %14113 = vmatprep.subr.bf16.mxu0 %v16114_v36  ;;  %v10860_v10 = vld [vmem:[#allocation14 + $0x668] sm:$0xff]  ;;  %v10729_v36 = vld [vmem:[#allocation14 + $0x250] sm:$0xff] }
 0x784   :  { %v16191_v32 = vcombine.low %v10856_v14, %v10860_v10  ;;  %v16065_v21 = vcombine.low %v10729_v36, %v10733_v12 }
 0x786   :  { %13991 = vmatpush2.bf16.msra.mxu1 %v16239_v47  ;;  %14114 = vmatpush2.bf16.msra.mxu0 %v16113_v35  ;;  %v16192_v47 = vcombine.high %v10856_v14, %v10860_v10  ;;  %v16066_v35 = vcombine.high %v10729_v36, %v10733_v12  ;;  %v16416_v10 = vcombine.high %v11080_v48, %v11084_v60 }
 0x787   :  { %13992 = vmatprep.subr.bf16.mxu1 %v16232_v52  ;;  %14115 = vmatprep.subr.bf16.mxu0 %v16106_v59  ;;  %v10848_v52 = vld [vmem:[#allocation14 + $0x608] sm:$0xff]  ;;  %v13804_v59 = vadd.f32 %v17406_v39, %v11172_v5  ;;  %v10969_v39 = vld [vmem:[#allocation14 + $0x9d0] sm:$0xff] }
 0x78a   :  { %13993 = vmatpush2.bf16.msra.mxu1 %v16231_v11  ;;  %14116 = vmatpush2.bf16.msra.mxu0 %v16105_v18  ;;  %v13806_v11 = vadd.f32 %v17408_v50, %v11176_v41  ;;  %v11072_v41 = vld [vmem:[#allocation14 + $0xd08] sm:$0xff] }
 0x78b   :  { %13994 = vmatprep.subr.bf16.mxu1 %v16224_v37  ;;  %14117 = vmatprep.subr.bf16.mxu0 %v16098_v29  ;;  %v16184_v29 = vcombine.high %v10848_v52, %v10852_v7 }
 0x78e   :  { %13995 = vmatpush2.bf16.msra.mxu1 %v16223_v46  ;;  %14118 = vmatpush2.bf16.msra.mxu0 %v16097_v31  ;;  %v10973_v46 = vld [vmem:[#allocation14 + $0x9f0] sm:$0xff] }
 0x78f   :  { %13996 = vmatprep.subr.bf16.mxu1 %v16216_v9  ;;  %14119 = vmatprep.subr.bf16.mxu0 %v16090_v55  ;;  %v16183_v9 = vcombine.low %v10848_v52, %v10852_v7  ;;  %v16057_v55 = vcombine.low %v10721_v17, %v10725_v44  ;;  %v16306_v63 = vcombine.high %v10969_v39, %v10973_v46 }
 0x790   :  { %v16415_v52 = vcombine.low %v11080_v48, %v11084_v60  ;;  %v10917_v48 = vld [vmem:[#allocation14 + $0x830] sm:$0xff] }
 0x792   :  { %13997 = vmatpush2.bf16.msra.mxu1 %v16215_v8  ;;  %14120 = vmatpush2.bf16.msra.mxu0 %v16089_v51  ;;  %v10961_v8 = vld [vmem:[#allocation14 + $0x990] sm:$0xff] }
 0x793   :  { %13998 = vmatprep.subr.bf16.mxu1 %v16208_v58  ;;  %14121 = vmatprep.subr.bf16.mxu0 %v16082_v6  ;;  %v10965_v51 = vld [vmem:[#allocation14 + $0x9b0] sm:$0xff]  ;;  %v16431_v58 = vcombine.low %v11096_v40, %v11100_v43  ;;  %v16305_v6 = vcombine.low %v10969_v39, %v10973_v46  ;;  %v11056_v40 = vld [vmem:[#allocation14 + $0xc88] sm:$0xff] }
 0x794   :  { %v16298_v54 = vcombine.high %v10961_v8, %v10965_v51  ;;  %v16297_v5 = vcombine.low %v10961_v8, %v10965_v51  ;;  %v10929_v43 = vld [vmem:[#allocation14 + $0x890] sm:$0xff] }
 0x795   :  { %v10933_v39 = vld [vmem:[#allocation14 + $0x8b0] sm:$0xff] }
 0x796   :  { %13999 = vmatpush2.bf16.msra.mxu1 %v16207_v2  ;;  %14122 = vmatpush2.bf16.msra.mxu0 %v16081_v13  ;;  %v10953_v2 = vld [vmem:[#allocation14 + $0x950] sm:$0xff]  ;;  %v16265_v8 = vcombine.low %v10929_v43, %v10933_v39 }
 0x797   :  { %14000 = vmatprep.subr.bf16.mxu1 %v16200_v33  ;;  %14123 = vmatprep.subr.bf16.mxu0 %v16074_v16  ;;  %v10957_v13 = vld [vmem:[#allocation14 + $0x970] sm:$0xff]  ;;  %v16423_v16 = vcombine.low %v11088_v62, %v11092_v3 }
 0x798   :  { %v16290_v12 = vcombine.high %v10953_v2, %v10957_v13  ;;  %v16289_v7 = vcombine.low %v10953_v2, %v10957_v13  ;;  %v10925_v62 = vld [vmem:[#allocation14 + $0x870] sm:$0xff] }
 0x799   :  { %v13844_v15 = vpop.f32.mrf.mxu1 }
 0x79a   :  { %v13845_v18 = vadd.f32 %v13844_v15, %v13804_v59  ;;  %14001 = vmatpush2.bf16.msra.mxu1 %v16199_v57  ;;  %14124 = vmatpush2.bf16.msra.mxu0 %v16073_v28  ;;  %v11076_v57 = vld [vmem:[#allocation14 + $0xd28] sm:$0xff] }
 0x79b   :  { %v13846_v37 = vpop.f32.mrf.mxu1  ;;  %14002 = vmatprep.subr.bf16.mxu1 %v16192_v47  ;;  %14125 = vmatprep.subr.bf16.mxu0 %v16066_v35  ;;  %v10945_v47 = vld [vmem:[#allocation14 + $0x910] sm:$0xff]  ;;  %v16408_v17 = vcombine.high %v11072_v41, %v11076_v57  ;;  %v11064_v15 = vld [vmem:[#allocation14 + $0xcc8] sm:$0xff] }
 0x79c   :  { %v13847_v20 = vadd.f32 %v13846_v37, %v13806_v11  ;;  %v10949_v35 = vld [vmem:[#allocation14 + $0x930] sm:$0xff] }
 0x79d   :  { %v13848_v31 = vpop.f32.mrf.mxu1  ;;  %v16282_v44 = vcombine.high %v10945_v47, %v10949_v35  ;;  %v10937_v11 = vld [vmem:[#allocation14 + $0x8d0] sm:$0xff]  ;;  %v16281_v37 = vcombine.low %v10945_v47, %v10949_v35  ;;  %v11152_v47 = vld [vmem:[#allocation14 + $0xf88] sm:$0xff] }
 0x79e   :  { %14003 = vmatpush2.bf16.msra.mxu1 %v16191_v32  ;;  %14126 = vmatpush2.bf16.msra.mxu0 %v16065_v21  ;;  %v11068_v32 = vld [vmem:[#allocation14 + $0xce8] sm:$0xff]  ;;  %v16407_v21 = vcombine.low %v11072_v41, %v11076_v57 }
 0x79f   :  { %v13849_v50 = vpop.f32.mrf.mxu1  ;;  %14004 = vmatprep.subr.bf16.mxu1 %v16184_v29  ;;  %14127 = vmatprep.subr.bf16.mxu0 %v16058_v23  ;;  %v16400_v29 = vcombine.high %v11064_v15, %v11068_v32  ;;  %v16399_v46 = vcombine.low %v11064_v15, %v11068_v32  ;;  %v11156_v35 = vld [vmem:[#allocation14 + $0xfa8] sm:$0xff] }
 0x7a0   :  { %v11048_v50 = vld [vmem:[#allocation14 + $0xc48] sm:$0xff] }
 0x7a1   :  { %v11144_v32 = vld [vmem:[#allocation14 + $0xf48] sm:$0xff] }
 0x7a2   :  { %14005 = vmatpush2.bf16.msra.mxu1 %v16183_v9  ;;  %14128 = vmatpush2.bf16.msra.mxu0 %v16057_v55  ;;  %v16266_v55 = vcombine.high %v10929_v43, %v10933_v39  ;;  %v11140_v43 = vld [vmem:[#allocation14 + $0xf28] sm:$0xff]  ;;  %v11009_v39 = vld [vmem:[#allocation14 + $0xb10] sm:$0xff] }
 0x7a3   :  { %14056 = vmatprep.subr.bf16.mxu1 %v16432_v25  ;;  %14179 = vmatprep.subr.bf16.mxu0 %v16306_v63  ;;  %v11052_v25 = vld [vmem:[#allocation14 + $0xc68] sm:$0xff]  ;;  %v10921_v63 = vld [vmem:[#allocation14 + $0x850] sm:$0xff] }
 0x7a4   :  { %v16384_v51 = vcombine.high %v11048_v50, %v11052_v25  ;;  %v16383_v60 = vcombine.low %v11048_v50, %v11052_v25  ;;  %v11128_v25 = vld [vmem:[#allocation14 + $0xec8] sm:$0xff] }
 0x7a5   :  { %14007 = vmatmul.mubr.bf16.vlgmr.msra.gmra.mxu1 %v17375_v34  ;;  %14130 = vmatmul.mubr.bf16.vlgmr.msra.gmra.mxu0 %v17327_v49  ;;  %v13885_v1 = vpop.f32.mrf.mxu0 }
 0x7a6   :  { %v17438_v33 = vadd.f32 %v13885_v1, %v13845_v18  ;;  %14057 = vmatpush1.bf16.msra.mxu1 %v16431_v58  ;;  %14088 = vmatprep.mubr.bf16.mxu1 %v17420_v4  ;;  %v10941_v18 = vld [vmem:[#allocation14 + $0x8f0] sm:$0xff]  ;;  %v16258_v58 = vcombine.high %v10921_v63, %v10925_v62  ;;  %v16257_v1 = vcombine.low %v10921_v63, %v10925_v62  ;;  %v11132_v63 = vld [vmem:[#allocation14 + $0xee8] sm:$0xff] }
 0x7a7   :  { %14180 = vmatpush1.bf16.msra.mxu0 %v16305_v6  ;;  %14211 = vmatprep.mubr.bf16.mxu0 %v17384_v42  ;;  %v13887_v14 = vpop.f32.mrf.mxu0  ;;  %v16274_v23 = vcombine.high %v10937_v11, %v10941_v18  ;;  %v16273_v31 = vcombine.low %v10937_v11, %v10941_v18  ;;  %v11040_v6 = vld [vmem:[#allocation14 + $0xc08] sm:$0xff]  ;;  %v11017_v18 = vld [vmem:[#allocation14 + $0xb50] sm:$0xff] }
 0x7a8   :  { %v17442_v36 = vadd.f32 %v13887_v14, %v13847_v20  ;;  %14058 = vmatprep.subr.bf16.mxu1 %v16424_v61  ;;  %14181 = vmatprep.subr.bf16.mxu0 %v16298_v54  ;;  %v11060_v20 = vld [vmem:[#allocation14 + $0xca8] sm:$0xff]  ;;  %v10913_v54 = vld [vmem:[#allocation14 + $0x810] sm:$0xff] }
 0x7a9   :  { %v13889_v28 = vpop.f32.mrf.mxu0  ;;  %v16392_v9 = vcombine.high %v11056_v40, %v11060_v20  ;;  %v16391_v3 = vcombine.low %v11056_v40, %v11060_v20  ;;  %v11044_v61 = vld [vmem:[#allocation14 + $0xc28] sm:$0xff]  ;;  %v16250_v13 = vcombine.high %v10913_v54, %v10917_v48  ;;  %v16249_v41 = vcombine.low %v10913_v54, %v10917_v48  ;;  %v11001_v62 = vld [vmem:[#allocation14 + $0xad0] sm:$0xff] }
 0x7aa   :  { %14059 = vmatpush1.bf16.msra.mxu1 %v16423_v16  ;;  %v16376_v2 = vcombine.high %v11040_v6, %v11044_v61  ;;  %v11160_v16 = vld [vmem:[#allocation14 + $0xfc8] sm:$0xff]  ;;  %v10993_v48 = vld [vmem:[#allocation14 + $0xa90] sm:$0xff] }
 0x7ab   :  { %14182 = vmatpush1.bf16.msra.mxu0 %v16297_v5  ;;  %v13890_v59 = vpop.f32.mrf.mxu0  ;;  %14060 = vmatprep.subr.bf16.mxu1 %v16416_v10  ;;  %v11164_v14 = vld [vmem:[#allocation14 + $0xfe8] sm:$0xff]  ;;  %v11033_v5 = vld [vmem:[#allocation14 + $0xbd0] sm:$0xff] }
 0x7ac   :  { %14183 = vmatprep.subr.bf16.mxu0 %v16290_v12  ;;  %v11037_v10 = vld [vmem:[#allocation14 + $0xbf0] sm:$0xff]  ;;  %v16375_v12 = vcombine.low %v11040_v6, %v11044_v61  ;;  %v16496_v57 = vcombine.high %v11160_v16, %v11164_v14  ;;  %v11148_v11 = vld [vmem:[#allocation14 + $0xf68] sm:$0xff] }
 0x7ad   :  { %v16370_v28 = vcombine.high %v11033_v5, %v11037_v10  ;;  %v11029_v59 = vld [vmem:[#allocation14 + $0xbb0] sm:$0xff]  ;;  %v11136_v20 = vld [vmem:[#allocation14 + $0xf08] sm:$0xff] }
 0x7ae   :  { %14061 = vmatpush1.bf16.msra.mxu1 %v16415_v52  ;;  %v11025_v52 = vld [vmem:[#allocation14 + $0xb90] sm:$0xff]  ;;  %v11120_v61 = vld [vmem:[#allocation14 + $0xe88] sm:$0xff] }
 0x7af   :  { %14184 = vmatpush1.bf16.msra.mxu0 %v16289_v7  ;;  %14062 = vmatprep.subr.bf16.mxu1 %v16408_v17  ;;  %v16495_v7 = vcombine.low %v11160_v16, %v11164_v14  ;;  %v16369_v17 = vcombine.low %v11033_v5, %v11037_v10  ;;  %v16362_v15 = vcombine.high %v11025_v52, %v11029_v59  ;;  %v11124_v54 = vld [vmem:[#allocation14 + $0xea8] sm:$0xff]  ;;  %v10985_v10 = vld [vmem:[#allocation14 + $0xa50] sm:$0xff] }
 0x7b0   :  { %14185 = vmatprep.subr.bf16.mxu0 %v16282_v44  ;;  %v16488_v44 = vcombine.high %v11152_v47, %v11156_v35  ;;  %v11112_v14 = vld [vmem:[#allocation14 + $0xe48] sm:$0xff] }
 0x7b1   :  { %v11116_v5 = vld [vmem:[#allocation14 + $0xe68] sm:$0xff] }
 0x7b2   :  { %14063 = vmatpush1.bf16.msra.mxu1 %v16407_v21  ;;  %v11021_v21 = vld [vmem:[#allocation14 + $0xb70] sm:$0xff] }
 0x7b3   :  { %14186 = vmatpush1.bf16.msra.mxu0 %v16281_v37  ;;  %14064 = vmatprep.subr.bf16.mxu1 %v16400_v29  ;;  %v16487_v37 = vcombine.low %v11152_v47, %v11156_v35  ;;  %v16361_v29 = vcombine.low %v11025_v52, %v11029_v59  ;;  %v16354_v40 = vcombine.high %v11017_v18, %v11021_v21  ;;  %v11104_v35 = vld [vmem:[#allocation14 + $0xe08] sm:$0xff]  ;;  %v10977_v59 = vld [vmem:[#allocation14 + $0xa10] sm:$0xff] }
 0x7b4   :  { %14187 = vmatprep.subr.bf16.mxu0 %v16274_v23  ;;  %v16480_v23 = vcombine.high %v11144_v32, %v11148_v11  ;;  %v11108_v52 = vld [vmem:[#allocation14 + $0xe28] sm:$0xff] }
 0x7b6   :  { %14065 = vmatpush1.bf16.msra.mxu1 %v16399_v46  ;;  %v11013_v46 = vld [vmem:[#allocation14 + $0xb30] sm:$0xff] }
 0x7b7   :  { %14188 = vmatpush1.bf16.msra.mxu0 %v16273_v31  ;;  %14066 = vmatprep.subr.bf16.mxu1 %v16392_v9  ;;  %v16479_v31 = vcombine.low %v11144_v32, %v11148_v11  ;;  %v16353_v9 = vcombine.low %v11017_v18, %v11021_v21  ;;  %v16346_v50 = vcombine.high %v11009_v39, %v11013_v46  ;;  %v10841_v11 = vld [vmem:[#allocation14 + $0x5d0] sm:$0xff]  ;;  %v10714_v21 = vld [vmem:[#allocation14 + $0x1d8] sm:$0xff] }
 0x7b8   :  { %14189 = vmatprep.subr.bf16.mxu0 %v16266_v55  ;;  %v16472_v55 = vcombine.high %v11136_v20, %v11140_v43  ;;  %v10845_v18 = vld [vmem:[#allocation14 + $0x5f0] sm:$0xff] }
 0x7ba   :  { %14067 = vmatpush1.bf16.msra.mxu1 %v16391_v3  ;;  %v11005_v3 = vld [vmem:[#allocation14 + $0xaf0] sm:$0xff] }
 0x7bb   :  { %14190 = vmatpush1.bf16.msra.mxu0 %v16265_v8  ;;  %14068 = vmatprep.subr.bf16.mxu1 %v16384_v51  ;;  %v16471_v8 = vcombine.low %v11136_v20, %v11140_v43  ;;  %v16345_v51 = vcombine.low %v11009_v39, %v11013_v46  ;;  %v16338_v6 = vcombine.high %v11001_v62, %v11005_v3  ;;  %v10833_v43 = vld [vmem:[#allocation14 + $0x590] sm:$0xff] }
 0x7bc   :  { %14191 = vmatprep.subr.bf16.mxu0 %v16258_v58  ;;  %v16464_v58 = vcombine.high %v11128_v25, %v11132_v63  ;;  %v10837_v39 = vld [vmem:[#allocation14 + $0x5b0] sm:$0xff]  ;;  %v16177_v46 = vcombine.low %v10841_v11, %v10845_v18 }
 0x7be   :  { %14069 = vmatpush1.bf16.msra.mxu1 %v16383_v60  ;;  %v10997_v60 = vld [vmem:[#allocation14 + $0xab0] sm:$0xff] }
 0x7bf   :  { %14192 = vmatpush1.bf16.msra.mxu0 %v16257_v1  ;;  %14070 = vmatprep.subr.bf16.mxu1 %v16376_v2  ;;  %v16463_v1 = vcombine.low %v11128_v25, %v11132_v63  ;;  %v16337_v2 = vcombine.low %v11001_v62, %v11005_v3  ;;  %v16330_v16 = vcombine.high %v10993_v48, %v10997_v60  ;;  %v10825_v25 = vld [vmem:[#allocation14 + $0x550] sm:$0xff] }
 0x7c0   :  { %14193 = vmatprep.subr.bf16.mxu0 %v16250_v13  ;;  %v16456_v13 = vcombine.high %v11120_v61, %v11124_v54  ;;  %v10829_v63 = vld [vmem:[#allocation14 + $0x570] sm:$0xff] }
 0x7c2   :  { %14071 = vmatpush1.bf16.msra.mxu1 %v16375_v12  ;;  %v10989_v12 = vld [vmem:[#allocation14 + $0xa70] sm:$0xff] }
 0x7c3   :  { %14194 = vmatpush1.bf16.msra.mxu0 %v16249_v41  ;;  %14072 = vmatprep.subr.bf16.mxu1 %v16496_v57  ;;  %v16455_v41 = vcombine.low %v11120_v61, %v11124_v54  ;;  %v16329_v57 = vcombine.low %v10993_v48, %v10997_v60  ;;  %v16322_v47 = vcombine.high %v10985_v10, %v10989_v12  ;;  %v10817_v60 = vld [vmem:[#allocation14 + $0x510] sm:$0xff] }
 0x7c4   :  { %14195 = vmatprep.subr.bf16.mxu0 %v16370_v28  ;;  %v16448_v28 = vcombine.high %v11112_v14, %v11116_v5  ;;  %v16162_v54 = vcombine.high %v10825_v25, %v10829_v63 }
 0x7c6   :  { %14073 = vmatpush2.bf16.msra.mxu1 %v16495_v7  ;;  %v10981_v7 = vld [vmem:[#allocation14 + $0xa30] sm:$0xff] }
 0x7c7   :  { %14196 = vmatpush2.bf16.msra.mxu0 %v16369_v17  ;;  %14074 = vmatprep.subr.bf16.mxu1 %v16488_v44  ;;  %v16447_v17 = vcombine.low %v11112_v14, %v11116_v5  ;;  %v16321_v44 = vcombine.low %v10985_v10, %v10989_v12  ;;  %v16314_v32 = vcombine.high %v10977_v59, %v10981_v7 }
 0x7c8   :  { %14197 = vmatprep.subr.bf16.mxu0 %v16362_v15  ;;  %v16440_v15 = vcombine.high %v11104_v35, %v11108_v52  ;;  %v16161_v14 = vcombine.low %v10825_v25, %v10829_v63  ;;  %v10662_v25 = vld [vmem:[#allocation14 + $0x38] sm:$0xff] }
 0x7ca   :  { %14075 = vmatpush2.bf16.msra.mxu1 %v16487_v37  ;;  %v10718_v37 = vld [vmem:[#allocation14 + $0x1f8] sm:$0xff] }
 0x7cb   :  { %14198 = vmatpush2.bf16.msra.mxu0 %v16361_v29  ;;  %14076 = vmatprep.subr.bf16.mxu1 %v16480_v23  ;;  %v16439_v29 = vcombine.low %v11104_v35, %v11108_v52  ;;  %v16313_v23 = vcombine.low %v10977_v59, %v10981_v7  ;;  %v16052_v20 = vcombine.high %v10714_v21, %v10718_v37 }
 0x7cc   :  { %14199 = vmatprep.subr.bf16.mxu0 %v16354_v40  ;;  %v16178_v40 = vcombine.high %v10841_v11, %v10845_v18 }
 0x7ce   :  { %14077 = vmatpush2.bf16.msra.mxu1 %v16479_v31  ;;  %v10706_v31 = vld [vmem:[#allocation14 + $0x198] sm:$0xff] }
 0x7cf   :  { %14200 = vmatpush2.bf16.msra.mxu0 %v16353_v9  ;;  %14078 = vmatprep.subr.bf16.mxu1 %v16472_v55  ;;  %v10710_v9 = vld [vmem:[#allocation14 + $0x1b8] sm:$0xff]  ;;  %v16051_v55 = vcombine.low %v10714_v21, %v10718_v37 }
 0x7d0   :  { %14201 = vmatprep.subr.bf16.mxu0 %v16346_v50  ;;  %v16170_v50 = vcombine.high %v10833_v43, %v10837_v39  ;;  %v16044_v3 = vcombine.high %v10706_v31, %v10710_v9  ;;  %v16043_v61 = vcombine.low %v10706_v31, %v10710_v9  ;;  %v10785_v9 = vld [vmem:[#allocation14 + $0x410] sm:$0xff] }
 0x7d2   :  { %14079 = vmatpush2.bf16.msra.mxu1 %v16471_v8  ;;  %v10698_v8 = vld [vmem:[#allocation14 + $0x158] sm:$0xff] }
 0x7d3   :  { %14202 = vmatpush2.bf16.msra.mxu0 %v16345_v51  ;;  %14080 = vmatprep.subr.bf16.mxu1 %v16464_v58  ;;  %v10702_v51 = vld [vmem:[#allocation14 + $0x178] sm:$0xff]  ;;  %v16169_v58 = vcombine.low %v10833_v43, %v10837_v39 }
 0x7d4   :  { %14203 = vmatprep.subr.bf16.mxu0 %v16338_v6  ;;  %v16036_v48 = vcombine.high %v10698_v8, %v10702_v51  ;;  %v16035_v10 = vcombine.low %v10698_v8, %v10702_v51 }
 0x7d6   :  { %14081 = vmatpush2.bf16.msra.mxu1 %v16463_v1  ;;  %v10821_v1 = vld [vmem:[#allocation14 + $0x530] sm:$0xff] }
 0x7d7   :  { %14204 = vmatpush2.bf16.msra.mxu0 %v16337_v2  ;;  %14082 = vmatprep.subr.bf16.mxu1 %v16456_v13  ;;  %v10690_v13 = vld [vmem:[#allocation14 + $0x118] sm:$0xff]  ;;  %v16154_v12 = vcombine.high %v10817_v60, %v10821_v1  ;;  %v16153_v35 = vcombine.low %v10817_v60, %v10821_v1 }
 0x7d8   :  { %14205 = vmatprep.subr.bf16.mxu0 %v16330_v16  ;;  %v10694_v16 = vld [vmem:[#allocation14 + $0x138] sm:$0xff] }
 0x7d9   :  { %v16027_v52 = vcombine.low %v10690_v13, %v10694_v16 }
 0x7da   :  { %14083 = vmatpush2.bf16.msra.mxu1 %v16455_v41  ;;  %v16028_v41 = vcombine.high %v10690_v13, %v10694_v16  ;;  %v10897_v16 = vld [vmem:[#allocation14 + $0x790] sm:$0xff] }
 0x7db   :  { %14206 = vmatpush2.bf16.msra.mxu0 %v16329_v57  ;;  %14084 = vmatprep.subr.bf16.mxu1 %v16448_v28  ;;  %v10809_v57 = vld [vmem:[#allocation14 + $0x4d0] sm:$0xff] }
 0x7dc   :  { %14207 = vmatprep.subr.bf16.mxu0 %v16322_v47  ;;  %v10813_v28 = vld [vmem:[#allocation14 + $0x4f0] sm:$0xff]  ;;  %v10686_v47 = vld [vmem:[#allocation14 + $0xf8] sm:$0xff] }
 0x7dd   :  { %v16146_v59 = vcombine.high %v10809_v57, %v10813_v28  ;;  %v16145_v11 = vcombine.low %v10809_v57, %v10813_v28 }
 0x7de   :  { %14085 = vmatpush2.bf16.msra.mxu1 %v16447_v17  ;;  %v10801_v17 = vld [vmem:[#allocation14 + $0x490] sm:$0xff] }
 0x7df   :  { %14208 = vmatpush2.bf16.msra.mxu0 %v16321_v44  ;;  %14086 = vmatprep.subr.bf16.mxu1 %v16440_v15  ;;  %v10805_v44 = vld [vmem:[#allocation14 + $0x4b0] sm:$0xff]  ;;  %v10674_v15 = vld [vmem:[#allocation14 + $0x98] sm:$0xff] }
 0x7e0   :  { %14209 = vmatprep.subr.bf16.mxu0 %v16314_v32  ;;  %v10678_v32 = vld [vmem:[#allocation14 + $0xb8] sm:$0xff]  ;;  %v16138_v21 = vcombine.high %v10801_v17, %v10805_v44  ;;  %v16137_v43 = vcombine.low %v10801_v17, %v10805_v44 }
 0x7e1   :  { %v16012_v37 = vcombine.high %v10674_v15, %v10678_v32  ;;  %v16011_v39 = vcombine.low %v10674_v15, %v10678_v32  ;;  %v10881_v15 = vld [vmem:[#allocation14 + $0x710] sm:$0xff] }
 0x7e2   :  { %14087 = vmatpush2.bf16.msra.mxu1 %v16439_v29  ;;  %v10793_v29 = vld [vmem:[#allocation14 + $0x450] sm:$0xff] }
 0x7e3   :  { %14210 = vmatpush2.bf16.msra.mxu0 %v16313_v23  ;;  %14138 = vmatprep.subr.bf16.mxu1 %v16178_v40  ;;  %v10797_v23 = vld [vmem:[#allocation14 + $0x470] sm:$0xff]  ;;  %v10666_v40 = vld [vmem:[#allocation14 + $0x58] sm:$0xff] }
 0x7e4   :  { %14261 = vmatprep.subr.bf16.mxu0 %v16052_v20  ;;  %v10670_v20 = vld [vmem:[#allocation14 + $0x78] sm:$0xff]  ;;  %v16129_v63 = vcombine.low %v10793_v29, %v10797_v23  ;;  %v10885_v32 = vld [vmem:[#allocation14 + $0x730] sm:$0xff] }
 0x7e5   :  { %v17444_v62 = vpop.f32.mrf.mxu0  ;;  %14089 = vmatmul.mubr.bf16.vlgmr.msra.gmra.mxu1 %v17422_v19  ;;  %v16004_v31 = vcombine.high %v10666_v40, %v10670_v20 }
 0x7e6   :  { %14212 = vmatmul.mubr.bf16.vlgmr.msra.gmra.mxu0 %v17386_v27  ;;  %14139 = vmatpush1.bf16.msra.mxu1 %v16177_v46  ;;  %v16130_v46 = vcombine.high %v10793_v29, %v10797_v23  ;;  %v16218_v29 = vcombine.high %v10881_v15, %v10885_v32 }
 0x7e7   :  { %14170 = vmatprep.mubr.bf16.mxu1 %v17358_v45  ;;  %14262 = vmatpush1.bf16.msra.mxu0 %v16051_v55  ;;  %v17449_v6 = vpop.f32.mrf.mxu0  ;;  %v10789_v55 = vld [vmem:[#allocation14 + $0x430] sm:$0xff] }
 0x7e8   :  { %14293 = vmatprep.mubr.bf16.mxu0 %v17314_v24  ;;  %14140 = vmatprep.subr.bf16.mxu1 %v16170_v50  ;;  %v10682_v24 = vld [vmem:[#allocation14 + $0xd8] sm:$0xff]  ;;  %v16122_v8 = vcombine.high %v10785_v9, %v10789_v55  ;;  %v16121_v60 = vcombine.low %v10785_v9, %v10789_v55 }
 0x7e9   :  { %v13971_v2 = vpop.f32.mrf.mxu0  ;;  %14263 = vmatprep.subr.bf16.mxu0 %v16044_v3  ;;  %v16020_v7 = vcombine.high %v10682_v24, %v10686_v47  ;;  %v16019_v18 = vcombine.low %v10682_v24, %v10686_v47  ;;  %v10658_v50 = vld [vmem:[#allocation14 + $0x18] sm:$0xff]  ;;  %v16003_v3 = vcombine.low %v10666_v40, %v10670_v20  ;;  %v10889_v24 = vld [vmem:[#allocation14 + $0x750] sm:$0xff] }
 0x7ea   :  { %14141 = vmatpush1.bf16.msra.mxu1 %v16169_v58  ;;  %v15996_v51 = vcombine.high %v10658_v50, %v10662_v25  ;;  %v10905_v58 = vld [vmem:[#allocation14 + $0x7d0] sm:$0xff]  ;;  %v15995_v1 = vcombine.low %v10658_v50, %v10662_v25 }
 0x7eb   :  { %14264 = vmatpush1.bf16.msra.mxu0 %v16043_v61  ;;  %v13972_v5 = vpop.f32.mrf.mxu0  ;;  %14142 = vmatprep.subr.bf16.mxu1 %v16162_v54  ;;  %v10909_v61 = vld [vmem:[#allocation14 + $0x7f0] sm:$0xff]  ;;  %v10778_v54 = vld [vmem:[#allocation14 + $0x3d8] sm:$0xff] }
 0x7ec   :  { %14265 = vmatprep.subr.bf16.mxu0 %v16036_v48  ;;  %v10782_v48 = vld [vmem:[#allocation14 + $0x3f8] sm:$0xff]  ;;  %v16242_v2 = vcombine.high %v10905_v58, %v10909_v61  ;;  %v10893_v47 = vld [vmem:[#allocation14 + $0x770] sm:$0xff] }
 0x7ed   :  { %v16116_v13 = vcombine.high %v10778_v54, %v10782_v48  ;;  %v10770_v5 = vld [vmem:[#allocation14 + $0x398] sm:$0xff]  ;;  %v16226_v17 = vcombine.high %v10889_v24, %v10893_v47  ;;  %v10873_v40 = vld [vmem:[#allocation14 + $0x6d0] sm:$0xff] }
 0x7ee   :  { %14143 = vmatpush1.bf16.msra.mxu1 %v16161_v14  ;;  %v10901_v14 = vld [vmem:[#allocation14 + $0x7b0] sm:$0xff] }
 0x7ef   :  { %14266 = vmatpush1.bf16.msra.mxu0 %v16035_v10  ;;  %14144 = vmatprep.subr.bf16.mxu1 %v16154_v12  ;;  %v10774_v10 = vld [vmem:[#allocation14 + $0x3b8] sm:$0xff]  ;;  %v16241_v12 = vcombine.low %v10905_v58, %v10909_v61  ;;  %v16234_v57 = vcombine.high %v10897_v16, %v10901_v14  ;;  %v10877_v20 = vld [vmem:[#allocation14 + $0x6f0] sm:$0xff] }
 0x7f0   :  { %14267 = vmatprep.subr.bf16.mxu0 %v16028_v41  ;;  %v16115_v41 = vcombine.low %v10778_v54, %v10782_v48  ;;  %v16108_v28 = vcombine.high %v10770_v5, %v10774_v10  ;;  %v16210_v9 = vcombine.high %v10873_v40, %v10877_v20  ;;  %v10865_v50 = vld [vmem:[#allocation14 + $0x690] sm:$0xff] }
 0x7f1   :  { %v10869_v25 = vld [vmem:[#allocation14 + $0x6b0] sm:$0xff] }
 0x7f2   :  { %14145 = vmatpush1.bf16.msra.mxu1 %v16153_v35  ;;  %v10762_v35 = vld [vmem:[#allocation14 + $0x358] sm:$0xff]  ;;  %v16202_v58 = vcombine.high %v10865_v50, %v10869_v25  ;;  %v10857_v54 = vld [vmem:[#allocation14 + $0x650] sm:$0xff] }
 0x7f3   :  { %14268 = vmatpush1.bf16.msra.mxu0 %v16027_v52  ;;  %14146 = vmatprep.subr.bf16.mxu1 %v16146_v59  ;;  %v10766_v52 = vld [vmem:[#allocation14 + $0x378] sm:$0xff]  ;;  %v16233_v59 = vcombine.low %v10897_v16, %v10901_v14  ;;  %v10861_v48 = vld [vmem:[#allocation14 + $0x670] sm:$0xff] }
 0x7f4   :  { %14269 = vmatprep.subr.bf16.mxu0 %v16020_v7  ;;  %v16107_v7 = vcombine.low %v10770_v5, %v10774_v10  ;;  %v16100_v44 = vcombine.high %v10762_v35, %v10766_v52  ;;  %v16194_v16 = vcombine.high %v10857_v54, %v10861_v48  ;;  %v10849_v5 = vld [vmem:[#allocation14 + $0x610] sm:$0xff] }
 0x7f5   :  { %v10853_v10 = vld [vmem:[#allocation14 + $0x630] sm:$0xff] }
 0x7f6   :  { %14147 = vmatpush1.bf16.msra.mxu1 %v16145_v11  ;;  %v10754_v11 = vld [vmem:[#allocation14 + $0x318] sm:$0xff] }
 0x7f7   :  { %14270 = vmatpush1.bf16.msra.mxu0 %v16019_v18  ;;  %14148 = vmatprep.subr.bf16.mxu1 %v16138_v21  ;;  %v10758_v18 = vld [vmem:[#allocation14 + $0x338] sm:$0xff]  ;;  %v16225_v21 = vcombine.low %v10889_v24, %v10893_v47  ;;  %v16186_v24 = vcombine.high %v10849_v5, %v10853_v10 }
 0x7f8   :  { %14271 = vmatprep.subr.bf16.mxu0 %v16012_v37  ;;  %v16099_v37 = vcombine.low %v10762_v35, %v10766_v52  ;;  %v16092_v23 = vcombine.high %v10754_v11, %v10758_v18  ;;  %v11097_v35 = vld [vmem:[#allocation14 + $0xdd0] sm:$0xff] }
 0x7f9   :  { %v11101_v52 = vld [vmem:[#allocation14 + $0xdf0] sm:$0xff] }
 0x7fa   :  { %14149 = vmatpush1.bf16.msra.mxu1 %v16137_v43  ;;  %v10746_v43 = vld [vmem:[#allocation14 + $0x2d8] sm:$0xff] }
 0x7fb   :  { %14272 = vmatpush1.bf16.msra.mxu0 %v16011_v39  ;;  %14150 = vmatprep.subr.bf16.mxu1 %v16130_v46  ;;  %v10750_v39 = vld [vmem:[#allocation14 + $0x2f8] sm:$0xff]  ;;  %v16217_v46 = vcombine.low %v10881_v15, %v10885_v32  ;;  %v16434_v15 = vcombine.high %v11097_v35, %v11101_v52 }
 0x7fc   :  { %14273 = vmatprep.subr.bf16.mxu0 %v16004_v31  ;;  %v16091_v31 = vcombine.low %v10754_v11, %v10758_v18  ;;  %v16084_v55 = vcombine.high %v10746_v43, %v10750_v39  ;;  %v11089_v11 = vld [vmem:[#allocation14 + $0xd90] sm:$0xff] }
 0x7fd   :  { %v11093_v18 = vld [vmem:[#allocation14 + $0xdb0] sm:$0xff] }
 0x7fe   :  { %14151 = vmatpush1.bf16.msra.mxu1 %v16129_v63  ;;  %v10738_v63 = vld [vmem:[#allocation14 + $0x298] sm:$0xff] }
 0x7ff   :  { %14274 = vmatpush1.bf16.msra.mxu0 %v16003_v3  ;;  %14152 = vmatprep.subr.bf16.mxu1 %v16122_v8  ;;  %v10742_v3 = vld [vmem:[#allocation14 + $0x2b8] sm:$0xff]  ;;  %v16209_v8 = vcombine.low %v10873_v40, %v10877_v20  ;;  %v16426_v40 = vcombine.high %v11089_v11, %v11093_v18  ;;  %v11081_v20 = vld [vmem:[#allocation14 + $0xd50] sm:$0xff] }
 0x800   :  { %14275 = vmatprep.subr.bf16.mxu0 %v15996_v51  ;;  %v16083_v51 = vcombine.low %v10746_v43, %v10750_v39  ;;  %v16076_v61 = vcombine.high %v10738_v63, %v10742_v3  ;;  %v11085_v43 = vld [vmem:[#allocation14 + $0xd70] sm:$0xff] }
 0x802   :  { %14153 = vmatpush1.bf16.msra.mxu1 %v16121_v60  ;;  %v10730_v60 = vld [vmem:[#allocation14 + $0x258] sm:$0xff] }
 0x803   :  { %14276 = vmatpush1.bf16.msra.mxu0 %v15995_v1  ;;  %14154 = vmatprep.subr.bf16.mxu1 %v16242_v2  ;;  %v10734_v1 = vld [vmem:[#allocation14 + $0x278] sm:$0xff]  ;;  %v16201_v2 = vcombine.low %v10865_v50, %v10869_v25  ;;  %v16425_v25 = vcombine.low %v11089_v11, %v11093_v18  ;;  %v11061_v11 = vld [vmem:[#allocation14 + $0xcb0] sm:$0xff] }
 0x804   :  { %14277 = vmatprep.subr.bf16.mxu0 %v16116_v13  ;;  %v16075_v13 = vcombine.low %v10738_v63, %v10742_v3  ;;  %v16068_v14 = vcombine.high %v10730_v60, %v10734_v1  ;;  %v10930_v18 = vld [vmem:[#allocation14 + $0x898] sm:$0xff] }
 0x806   :  { %14155 = vmatpush2.bf16.msra.mxu1 %v16241_v12  ;;  %v10722_v12 = vld [vmem:[#allocation14 + $0x218] sm:$0xff] }
 0x807   :  { %14278 = vmatpush2.bf16.msra.mxu0 %v16115_v41  ;;  %14156 = vmatprep.subr.bf16.mxu1 %v16234_v57  ;;  %v10726_v41 = vld [vmem:[#allocation14 + $0x238] sm:$0xff]  ;;  %v16193_v57 = vcombine.low %v10857_v54, %v10861_v48  ;;  %v11077_v48 = vld [vmem:[#allocation14 + $0xd30] sm:$0xff] }
 0x808   :  { %14279 = vmatprep.subr.bf16.mxu0 %v16108_v28  ;;  %v16067_v28 = vcombine.low %v10730_v60, %v10734_v1  ;;  %v16060_v47 = vcombine.high %v10722_v12, %v10726_v41  ;;  %v10946_v1 = vld [vmem:[#allocation14 + $0x918] sm:$0xff] }
 0x80a   :  { %14157 = vmatpush2.bf16.msra.mxu1 %v16233_v59  ;;  %v10970_v59 = vld [vmem:[#allocation14 + $0x9d8] sm:$0xff] }
 0x80b   :  { %14280 = vmatpush2.bf16.msra.mxu0 %v16107_v7  ;;  %14158 = vmatprep.subr.bf16.mxu1 %v16226_v17  ;;  %v10974_v7 = vld [vmem:[#allocation14 + $0x9f8] sm:$0xff]  ;;  %v16185_v17 = vcombine.low %v10849_v5, %v10853_v10 }
 0x80c   :  { %14281 = vmatprep.subr.bf16.mxu0 %v16100_v44  ;;  %v16059_v44 = vcombine.low %v10722_v12, %v10726_v41  ;;  %v16308_v32 = vcombine.high %v10970_v59, %v10974_v7 }
 0x80e   :  { %14159 = vmatpush2.bf16.msra.mxu1 %v16225_v21  ;;  %v16433_v21 = vcombine.low %v11097_v35, %v11101_v52 }
 0x80f   :  { %14282 = vmatpush2.bf16.msra.mxu0 %v16099_v37  ;;  %14160 = vmatprep.subr.bf16.mxu1 %v16218_v29  ;;  %v10962_v37 = vld [vmem:[#allocation14 + $0x998] sm:$0xff] }
 0x810   :  { %14283 = vmatprep.subr.bf16.mxu0 %v16092_v23  ;;  %v10966_v29 = vld [vmem:[#allocation14 + $0x9b8] sm:$0xff]  ;;  %v16307_v23 = vcombine.low %v10970_v59, %v10974_v7 }
 0x812   :  { %14161 = vmatpush2.bf16.msra.mxu1 %v16217_v46 }
 0x813   :  { %14284 = vmatpush2.bf16.msra.mxu0 %v16091_v31  ;;  %14162 = vmatprep.subr.bf16.mxu1 %v16210_v9  ;;  %v16300_v31 = vcombine.high %v10962_v37, %v10966_v29  ;;  %v10954_v9 = vld [vmem:[#allocation14 + $0x958] sm:$0xff] }
 0x814   :  { %14285 = vmatprep.subr.bf16.mxu0 %v16084_v55  ;;  %v10958_v55 = vld [vmem:[#allocation14 + $0x978] sm:$0xff] }
 0x815   :  { %v16292_v54 = vcombine.high %v10954_v9, %v10958_v55 }
 0x816   :  { %14163 = vmatpush2.bf16.msra.mxu1 %v16209_v8  ;;  %v16299_v8 = vcombine.low %v10962_v37, %v10966_v29 }
 0x817   :  { %14286 = vmatpush2.bf16.msra.mxu0 %v16083_v51  ;;  %14164 = vmatprep.subr.bf16.mxu1 %v16202_v58  ;;  %v16418_v51 = vcombine.high %v11081_v20, %v11085_v43 }
 0x818   :  { %14287 = vmatprep.subr.bf16.mxu0 %v16076_v61 }
 0x81a   :  { %14165 = vmatpush2.bf16.msra.mxu1 %v16201_v2  ;;  %v10950_v2 = vld [vmem:[#allocation14 + $0x938] sm:$0xff] }
 0x81b   :  { %14288 = vmatpush2.bf16.msra.mxu0 %v16075_v13  ;;  %14166 = vmatprep.subr.bf16.mxu1 %v16194_v16  ;;  %v16284_v41 = vcombine.high %v10946_v1, %v10950_v2  ;;  %v16283_v7 = vcombine.low %v10946_v1, %v10950_v2  ;;  %v11034_v1 = vld [vmem:[#allocation14 + $0xbd8] sm:$0xff] }
 0x81c   :  { %14289 = vmatprep.subr.bf16.mxu0 %v16068_v14  ;;  %v16417_v14 = vcombine.low %v11081_v20, %v11085_v43  ;;  %v11049_v20 = vld [vmem:[#allocation14 + $0xc50] sm:$0xff]  ;;  %v11038_v2 = vld [vmem:[#allocation14 + $0xbf8] sm:$0xff] }
 0x81d   :  { %v11053_v43 = vld [vmem:[#allocation14 + $0xc70] sm:$0xff] }
 0x81e   :  { %14167 = vmatpush2.bf16.msra.mxu1 %v16193_v57  ;;  %v11065_v57 = vld [vmem:[#allocation14 + $0xcd0] sm:$0xff] }
 0x81f   :  { %14290 = vmatpush2.bf16.msra.mxu0 %v16067_v28  ;;  %14168 = vmatprep.subr.bf16.mxu1 %v16186_v24  ;;  %v11069_v28 = vld [vmem:[#allocation14 + $0xcf0] sm:$0xff]  ;;  %v10938_v24 = vld [vmem:[#allocation14 + $0x8d8] sm:$0xff] }
 0x820   :  { %14291 = vmatprep.subr.bf16.mxu0 %v16060_v47  ;;  %v10942_v47 = vld [vmem:[#allocation14 + $0x8f8] sm:$0xff]  ;;  %v16401_v37 = vcombine.low %v11065_v57, %v11069_v28 }
 0x821   :  { %v16275_v29 = vcombine.low %v10938_v24, %v10942_v47 }
 0x822   :  { %14169 = vmatpush2.bf16.msra.mxu1 %v16185_v17  ;;  %v16402_v17 = vcombine.high %v11065_v57, %v11069_v28  ;;  %v16371_v57 = vcombine.low %v11034_v1, %v11038_v2 }
 0x823   :  { %14292 = vmatpush2.bf16.msra.mxu0 %v16059_v44  ;;  %14220 = vmatprep.subr.bf16.mxu1 %v16434_v15  ;;  %v16276_v15 = vcombine.high %v10938_v24, %v10942_v47  ;;  %v11145_v47 = vld [vmem:[#allocation14 + $0xf50] sm:$0xff] }
 0x824   :  { %14343 = vmatprep.subr.bf16.mxu0 %v16308_v32  ;;  %v11057_v32 = vld [vmem:[#allocation14 + $0xc90] sm:$0xff] }
 0x825   :  { %v17452_v39 = vpop.f32.mrf.mxu0  ;;  %14171 = vmatmul.mubr.bf16.vlgmr.msra.gmra.mxu1 %v17375_v34  ;;  %v13926_v46 = vpop.f32.mrf.mxu1 }
 0x826   :  { %14294 = vmatmul.mubr.bf16.vlgmr.msra.gmra.mxu0 %v17327_v49  ;;  %v13927_v50 = vadd.f32 %v13926_v46, %v17438_v33  ;;  %14221 = vmatpush1.bf16.msra.mxu1 %v16433_v21  ;;  %v11073_v49 = vld [vmem:[#allocation14 + $0xd10] sm:$0xff]  ;;  %v10934_v21 = vld [vmem:[#allocation14 + $0x8b8] sm:$0xff] }
 0x827   :  { %14252 = vmatprep.mubr.bf16.mxu1 %v17420_v4  ;;  %14344 = vmatpush1.bf16.msra.mxu0 %v16307_v23  ;;  %v17458_v63 = vpop.f32.mrf.mxu0  ;;  %v13928_v3 = vpop.f32.mrf.mxu1  ;;  %v16410_v12 = vcombine.high %v11073_v49, %v11077_v48  ;;  %v16409_v59 = vcombine.low %v11073_v49, %v11077_v48  ;;  %v16394_v23 = vcombine.high %v11057_v32, %v11061_v11  ;;  %v10922_v46 = vld [vmem:[#allocation14 + $0x858] sm:$0xff] }
 0x828   :  { %v14425_v58 = vmul.f32 0.2, %v13927_v50  ;;  %14375 = vmatprep.mubr.bf16.mxu0 %v17384_v42  ;;  %v13929_v61 = vadd.f32 %v13928_v3, %v17442_v36  ;;  %14222 = vmatprep.subr.bf16.mxu1 %v16426_v40  ;;  %v16291_v42 = vcombine.low %v10954_v9, %v10958_v55  ;;  %v16268_v40 = vcombine.high %v10930_v18, %v10934_v21  ;;  %v11041_v3 = vld [vmem:[#allocation14 + $0xc10] sm:$0xff] }
 0x829   :  { %v14053_v33 = vpop.f32.mrf.mxu0  ;;  %14345 = vmatprep.subr.bf16.mxu0 %v16300_v31  ;;  %v13930_v60 = vpop.f32.mrf.mxu1  ;;  %v10926_v31 = vld [vmem:[#allocation14 + $0x878] sm:$0xff]  ;;  %v16393_v9 = vcombine.low %v11057_v32, %v11061_v11  ;;  %v16267_v55 = vcombine.low %v10930_v18, %v10934_v21  ;;  %v11137_v21 = vld [vmem:[#allocation14 + $0xf10] sm:$0xff] }
 0x82a   :  { %v14433_v13 = vmax.f32 %v13927_v50, %v14425_v58  ;;  %v14426_v16 = vmul.f32 0.2, %v13929_v61  ;;  %14223 = vmatpush1.bf16.msra.mxu1 %v16425_v25  ;;  %v16386_v50 = vcombine.high %v11049_v20, %v11053_v43  ;;  %v16260_v25 = vcombine.high %v10922_v46, %v10926_v31  ;;  %v10918_v58 = vld [vmem:[#allocation14 + $0x838] sm:$0xff]  ;;  %v11161_v33 = vld [vmem:[#allocation14 + $0xfd0] sm:$0xff] }
 0x82b   :  { %14346 = vmatpush1.bf16.msra.mxu0 %v16299_v8  ;;  %v14054_v5 = vpop.f32.mrf.mxu0  ;;  %v13931_v10 = vpop.f32.mrf.mxu1  ;;  %14224 = vmatprep.subr.bf16.mxu1 %v16418_v51  ;;  %v11045_v8 = vld [vmem:[#allocation14 + $0xc30] sm:$0xff]  ;;  %v10914_v51 = vld [vmem:[#allocation14 + $0x818] sm:$0xff] }
 0x82c   :  { %v14434_v36 = vmax.f32 %v13929_v61, %v14426_v16  ;;  %14347 = vmatprep.subr.bf16.mxu0 %v16292_v54  ;;  %v17462_v35 = vmul.f32 1.4142135, %v14433_v13  ;;  %v16385_v61 = vcombine.low %v11049_v20, %v11053_v43  ;;  %v16259_v54 = vcombine.low %v10922_v46, %v10926_v31  ;;  %v11165_v60 = vld [vmem:[#allocation14 + $0xff0] sm:$0xff] }
 0x82d   :  { %v16378_v49 = vcombine.high %v11041_v3, %v11045_v8  ;;  %v16252_v48 = vcombine.high %v10914_v51, %v10918_v58  ;;  %v16377_v13 = vcombine.low %v11041_v3, %v11045_v8  ;;  %v16251_v16 = vcombine.low %v10914_v51, %v10918_v58  ;;  %v11153_v10 = vld [vmem:[#allocation14 + $0xf90] sm:$0xff] }
 0x82e   :  { %v17464_v52 = vmul.f32 1.4142135, %v14434_v36  ;;  %14225 = vmatpush1.bf16.msra.mxu1 %v16417_v14  ;;  %v16498_v14 = vcombine.high %v11161_v33, %v11165_v60  ;;  %v16372_v5 = vcombine.high %v11034_v1, %v11038_v2  ;;  %v11030_v36 = vld [vmem:[#allocation14 + $0xbb8] sm:$0xff]  ;;  %v11129_v31 = vld [vmem:[#allocation14 + $0xed0] sm:$0xff] }
 0x82f   :  { %14348 = vmatpush1.bf16.msra.mxu0 %v16291_v42  ;;  %14226 = vmatprep.subr.bf16.mxu1 %v16410_v12  ;;  %v11157_v42 = vld [vmem:[#allocation14 + $0xfb0] sm:$0xff]  ;;  %v11026_v12 = vld [vmem:[#allocation14 + $0xb98] sm:$0xff] }
 0x830   :  { %v14489_v44 = vcombine.low %v17462_v35, %v17464_v52  ;;  %14349 = vmatprep.subr.bf16.mxu0 %v16284_v41  ;;  %v16497_v41 = vcombine.low %v11161_v33, %v11165_v60  ;;  %v16490_v28 = vcombine.high %v11153_v10, %v11157_v42  ;;  %v16364_v24 = vcombine.high %v11026_v12, %v11030_v36  ;;  %v11121_v58 = vld [vmem:[#allocation14 + $0xe90] sm:$0xff]  ;;  %v11162_v52 = vld [vmem:[#allocation14 + $0xfd8] sm:$0xff] }
 0x831   :  { %v16363_v32 = vcombine.low %v11026_v12, %v11030_v36  ;;  %v11113_v2 = vld [vmem:[#allocation14 + $0xe50] sm:$0xff] }
 0x832   :  { %14227 = vmatpush1.bf16.msra.mxu1 %v16409_v59  ;;  %v11149_v59 = vld [vmem:[#allocation14 + $0xf70] sm:$0xff] }
 0x833   :  { %14350 = vmatpush1.bf16.msra.mxu0 %v16283_v7  ;;  %14228 = vmatprep.subr.bf16.mxu1 %v16402_v17  ;;  %v11018_v7 = vld [vmem:[#allocation14 + $0xb58] sm:$0xff]  ;;  %v16482_v11 = vcombine.high %v11145_v47, %v11149_v59  ;;  %v11105_v36 = vld [vmem:[#allocation14 + $0xe10] sm:$0xff] }
 0x834   :  { %14351 = vmatprep.subr.bf16.mxu0 %v16276_v15  ;;  %v11022_v17 = vld [vmem:[#allocation14 + $0xb78] sm:$0xff]  ;;  %v16489_v15 = vcombine.low %v11153_v10, %v11157_v42 }
 0x835   :  { %v16356_v18 = vcombine.high %v11018_v7, %v11022_v17  ;;  %v16355_v20 = vcombine.low %v11018_v7, %v11022_v17  ;;  %v10842_v17 = vld [vmem:[#allocation14 + $0x5d8] sm:$0xff] }
 0x836   :  { %14229 = vmatpush1.bf16.msra.mxu1 %v16401_v37  ;;  %v11141_v37 = vld [vmem:[#allocation14 + $0xf30] sm:$0xff] }
 0x837   :  { %14352 = vmatpush1.bf16.msra.mxu0 %v16275_v29  ;;  %14230 = vmatprep.subr.bf16.mxu1 %v16394_v23  ;;  %v11010_v29 = vld [vmem:[#allocation14 + $0xb18] sm:$0xff]  ;;  %v16474_v43 = vcombine.high %v11137_v21, %v11141_v37 }
 0x838   :  { %14353 = vmatprep.subr.bf16.mxu0 %v16268_v40  ;;  %v11014_v23 = vld [vmem:[#allocation14 + $0xb38] sm:$0xff]  ;;  %v16481_v40 = vcombine.low %v11145_v47, %v11149_v59 }
 0x839   :  { %v16348_v46 = vcombine.high %v11010_v29, %v11014_v23  ;;  %v16347_v3 = vcombine.low %v11010_v29, %v11014_v23 }
 0x83a   :  { %14231 = vmatpush1.bf16.msra.mxu1 %v16393_v9  ;;  %v11133_v9 = vld [vmem:[#allocation14 + $0xef0] sm:$0xff] }
 0x83b   :  { %14354 = vmatpush1.bf16.msra.mxu0 %v16267_v55  ;;  %14232 = vmatprep.subr.bf16.mxu1 %v16386_v50  ;;  %v11002_v55 = vld [vmem:[#allocation14 + $0xad8] sm:$0xff]  ;;  %v16466_v8 = vcombine.high %v11129_v31, %v11133_v9 }
 0x83c   :  { %14355 = vmatprep.subr.bf16.mxu0 %v16260_v25  ;;  %v11006_v50 = vld [vmem:[#allocation14 + $0xaf8] sm:$0xff]  ;;  %v16473_v25 = vcombine.low %v11137_v21, %v11141_v37 }
 0x83d   :  { %v16340_v51 = vcombine.high %v11002_v55, %v11006_v50  ;;  %v16339_v33 = vcombine.low %v11002_v55, %v11006_v50  ;;  %v10834_v21 = vld [vmem:[#allocation14 + $0x598] sm:$0xff] }
 0x83e   :  { %14233 = vmatpush1.bf16.msra.mxu1 %v16385_v61  ;;  %v11125_v61 = vld [vmem:[#allocation14 + $0xeb0] sm:$0xff]  ;;  %v10838_v37 = vld [vmem:[#allocation14 + $0x5b8] sm:$0xff] }
 0x83f   :  { %14356 = vmatpush1.bf16.msra.mxu0 %v16259_v54  ;;  %14234 = vmatprep.subr.bf16.mxu1 %v16378_v49  ;;  %v10994_v54 = vld [vmem:[#allocation14 + $0xa98] sm:$0xff]  ;;  %v16458_v60 = vcombine.high %v11121_v58, %v11125_v61  ;;  %v16172_v23 = vcombine.high %v10834_v21, %v10838_v37 }
 0x840   :  { %14357 = vmatprep.subr.bf16.mxu0 %v16252_v48  ;;  %v10998_v49 = vld [vmem:[#allocation14 + $0xab8] sm:$0xff]  ;;  %v16465_v48 = vcombine.low %v11129_v31, %v11133_v9  ;;  %v16171_v31 = vcombine.low %v10834_v21, %v10838_v37 }
 0x841   :  { %v16332_v1 = vcombine.high %v10994_v54, %v10998_v49  ;;  %v16331_v10 = vcombine.low %v10994_v54, %v10998_v49  ;;  %v10810_v49 = vld [vmem:[#allocation14 + $0x4d8] sm:$0xff] }
 0x842   :  { %14235 = vmatpush1.bf16.msra.mxu1 %v16377_v13  ;;  %v11117_v13 = vld [vmem:[#allocation14 + $0xe70] sm:$0xff]  ;;  %v10882_v37 = vld [vmem:[#allocation14 + $0x718] sm:$0xff] }
 0x843   :  { %14358 = vmatpush1.bf16.msra.mxu0 %v16251_v16  ;;  %14236 = vmatprep.subr.bf16.mxu1 %v16498_v14  ;;  %v10986_v16 = vld [vmem:[#allocation14 + $0xa58] sm:$0xff]  ;;  %v16450_v42 = vcombine.high %v11113_v2, %v11117_v13 }
 0x844   :  { %14359 = vmatprep.subr.bf16.mxu0 %v16372_v5  ;;  %v10990_v14 = vld [vmem:[#allocation14 + $0xa78] sm:$0xff]  ;;  %v16457_v5 = vcombine.low %v11121_v58, %v11125_v61 }
 0x845   :  { %v16324_v12 = vcombine.high %v10986_v16, %v10990_v14  ;;  %v16323_v47 = vcombine.low %v10986_v16, %v10990_v14  ;;  %v10794_v16 = vld [vmem:[#allocation14 + $0x458] sm:$0xff] }
 0x846   :  { %14237 = vmatpush2.bf16.msra.mxu1 %v16497_v41  ;;  %v11109_v41 = vld [vmem:[#allocation14 + $0xe30] sm:$0xff]  ;;  %v10798_v14 = vld [vmem:[#allocation14 + $0x478] sm:$0xff] }
 0x847   :  { %14360 = vmatpush2.bf16.msra.mxu0 %v16371_v57  ;;  %14238 = vmatprep.subr.bf16.mxu1 %v16490_v28  ;;  %v10978_v57 = vld [vmem:[#allocation14 + $0xa18] sm:$0xff]  ;;  %v16442_v59 = vcombine.high %v11105_v36, %v11109_v41 }
 0x848   :  { %14361 = vmatprep.subr.bf16.mxu0 %v16364_v24  ;;  %v10982_v28 = vld [vmem:[#allocation14 + $0xa38] sm:$0xff]  ;;  %v16449_v24 = vcombine.low %v11113_v2, %v11117_v13 }
 0x849   :  { %v16316_v7 = vcombine.high %v10978_v57, %v10982_v28 }
 0x84a   :  { %14239 = vmatpush2.bf16.msra.mxu1 %v16489_v15  ;;  %v10846_v15 = vld [vmem:[#allocation14 + $0x5f8] sm:$0xff] }
 0x84b   :  { %14362 = vmatpush2.bf16.msra.mxu0 %v16363_v32  ;;  %14240 = vmatprep.subr.bf16.mxu1 %v16482_v11  ;;  %v16441_v32 = vcombine.low %v11105_v36, %v11109_v41  ;;  %v16315_v11 = vcombine.low %v10978_v57, %v10982_v28  ;;  %v16179_v29 = vcombine.low %v10842_v17, %v10846_v15  ;;  %v10906_v57 = vld [vmem:[#allocation14 + $0x7d8] sm:$0xff] }
 0x84c   :  { %14363 = vmatprep.subr.bf16.mxu0 %v16356_v18  ;;  %v16180_v18 = vcombine.high %v10842_v17, %v10846_v15  ;;  %v16131_v36 = vcombine.low %v10794_v16, %v10798_v14  ;;  %v10910_v28 = vld [vmem:[#allocation14 + $0x7f8] sm:$0xff] }
 0x84d   :  { %v16243_v17 = vcombine.low %v10906_v57, %v10910_v28 }
 0x84e   :  { %14241 = vmatpush2.bf16.msra.mxu1 %v16481_v40  ;;  %v10826_v40 = vld [vmem:[#allocation14 + $0x558] sm:$0xff] }
 0x84f   :  { %14364 = vmatpush2.bf16.msra.mxu0 %v16355_v20  ;;  %14242 = vmatprep.subr.bf16.mxu1 %v16474_v43  ;;  %v10830_v20 = vld [vmem:[#allocation14 + $0x578] sm:$0xff] }
 0x850   :  { %14365 = vmatprep.subr.bf16.mxu0 %v16348_v46  ;;  %v16164_v50 = vcombine.high %v10826_v40, %v10830_v20  ;;  %v16163_v58 = vcombine.low %v10826_v40, %v10830_v20  ;;  %v10874_v20 = vld [vmem:[#allocation14 + $0x6d8] sm:$0xff] }
 0x852   :  { %14243 = vmatpush2.bf16.msra.mxu1 %v16473_v25  ;;  %v10818_v25 = vld [vmem:[#allocation14 + $0x518] sm:$0xff] }
 0x853   :  { %14366 = vmatpush2.bf16.msra.mxu0 %v16347_v3  ;;  %14244 = vmatprep.subr.bf16.mxu1 %v16466_v8  ;;  %v10822_v3 = vld [vmem:[#allocation14 + $0x538] sm:$0xff] }
 0x854   :  { %14367 = vmatprep.subr.bf16.mxu0 %v16340_v51 }
 0x856   :  { %14245 = vmatpush2.bf16.msra.mxu1 %v16465_v48  ;;  %v10814_v48 = vld [vmem:[#allocation14 + $0x4f8] sm:$0xff] }
 0x857   :  { %14368 = vmatpush2.bf16.msra.mxu0 %v16339_v33  ;;  %14246 = vmatprep.subr.bf16.mxu1 %v16458_v60  ;;  %v16148_v33 = vcombine.high %v10810_v49, %v10814_v48  ;;  %v10802_v60 = vld [vmem:[#allocation14 + $0x498] sm:$0xff]  ;;  %v16147_v2 = vcombine.low %v10810_v49, %v10814_v48 }
 0x858   :  { %14369 = vmatprep.subr.bf16.mxu0 %v16332_v1  ;;  %v10806_v1 = vld [vmem:[#allocation14 + $0x4b8] sm:$0xff] }
 0x859   :  { %v16140_v13 = vcombine.high %v10802_v60, %v10806_v1  ;;  %v10850_v48 = vld [vmem:[#allocation14 + $0x618] sm:$0xff] }
 0x85a   :  { %14247 = vmatpush2.bf16.msra.mxu1 %v16457_v5  ;;  %v16139_v5 = vcombine.low %v10802_v60, %v10806_v1 }
 0x85b   :  { %14370 = vmatpush2.bf16.msra.mxu0 %v16331_v10  ;;  %14248 = vmatprep.subr.bf16.mxu1 %v16450_v42  ;;  %v16132_v10 = vcombine.high %v10794_v16, %v10798_v14  ;;  %v10786_v42 = vld [vmem:[#allocation14 + $0x418] sm:$0xff] }
 0x85c   :  { %14371 = vmatprep.subr.bf16.mxu0 %v16324_v12  ;;  %v10790_v12 = vld [vmem:[#allocation14 + $0x438] sm:$0xff] }
 0x85d   :  { %v16124_v41 = vcombine.high %v10786_v42, %v10790_v12  ;;  %v11098_v16 = vld [vmem:[#allocation14 + $0xdd8] sm:$0xff] }
 0x85e   :  { %14249 = vmatpush2.bf16.msra.mxu1 %v16449_v24  ;;  %v16123_v24 = vcombine.low %v10786_v42, %v10790_v12  ;;  %v11102_v14 = vld [vmem:[#allocation14 + $0xdf8] sm:$0xff] }
 0x85f   :  { %14372 = vmatpush2.bf16.msra.mxu0 %v16323_v47  ;;  %14250 = vmatprep.subr.bf16.mxu1 %v16442_v59  ;;  %v16244_v47 = vcombine.high %v10906_v57, %v10910_v28  ;;  %v10898_v59 = vld [vmem:[#allocation14 + $0x798] sm:$0xff]  ;;  %v16436_v42 = vcombine.high %v11098_v16, %v11102_v14  ;;  %v16435_v28 = vcombine.low %v11098_v16, %v11102_v14 }
 0x860   :  { %14373 = vmatprep.subr.bf16.mxu0 %v16316_v7  ;;  %v10902_v7 = vld [vmem:[#allocation14 + $0x7b8] sm:$0xff] }
 0x861   :  { %v16236_v15 = vcombine.high %v10898_v59, %v10902_v7 }
 0x862   :  { %14251 = vmatpush2.bf16.msra.mxu1 %v16441_v32  ;;  %v10890_v32 = vld [vmem:[#allocation14 + $0x758] sm:$0xff] }
 0x863   :  { %14374 = vmatpush2.bf16.msra.mxu0 %v16315_v11  ;;  %14302 = vmatprep.subr.bf16.mxu1 %v16180_v18  ;;  %v10894_v11 = vld [vmem:[#allocation14 + $0x778] sm:$0xff]  ;;  %v16235_v18 = vcombine.low %v10898_v59, %v10902_v7 }
 0x864   :  { %v16228_v21 = vcombine.high %v10890_v32, %v10894_v11 }
 0x865   :  { %v17468_v43 = vpop.f32.mrf.mxu1  ;;  %v17470_v46 = vpop.f32.mrf.mxu0  ;;  %14253 = vmatmul.mubr.bf16.vlgmr.msra.gmra.mxu1 %v17422_v19 }
 0x866   :  { %14376 = vmatmul.mubr.bf16.vlgmr.msra.gmra.mxu0 %v17386_v27  ;;  %14303 = vmatpush1.bf16.msra.mxu1 %v16179_v29  ;;  %v16156_v27 = vcombine.high %v10818_v25, %v10822_v3  ;;  %v10886_v29 = vld [vmem:[#allocation14 + $0x738] sm:$0xff] }
 0x867   :  { %14334 = vmatprep.mubr.bf16.mxu1 %v17358_v45  ;;  %v17475_v9 = vpop.f32.mrf.mxu1  ;;  %v17477_v55 = vpop.f32.mrf.mxu0  ;;  %14304 = vmatprep.subr.bf16.mxu1 %v16172_v23  ;;  %v16155_v45 = vcombine.low %v10818_v25, %v10822_v3  ;;  %v16227_v23 = vcombine.low %v10890_v32, %v10894_v11  ;;  %v16220_v40 = vcombine.high %v10882_v37, %v10886_v29  ;;  %v10866_v3 = vld [vmem:[#allocation14 + $0x698] sm:$0xff] }
 0x869   :  { %v14012_v8 = vpop.f32.mrf.mxu1  ;;  %v14135_v51 = vpop.f32.mrf.mxu0 }
 0x86a   :  { %14305 = vmatpush1.bf16.msra.mxu1 %v16171_v31  ;;  %v10878_v31 = vld [vmem:[#allocation14 + $0x6f8] sm:$0xff] }
 0x86b   :  { %v14013_v61 = vpop.f32.mrf.mxu1  ;;  %v14136_v54 = vpop.f32.mrf.mxu0  ;;  %14306 = vmatprep.subr.bf16.mxu1 %v16164_v50  ;;  %v16219_v50 = vcombine.low %v10882_v37, %v10886_v29  ;;  %v16212_v25 = vcombine.high %v10874_v20, %v10878_v31  ;;  %v10870_v8 = vld [vmem:[#allocation14 + $0x6b8] sm:$0xff]  ;;  %v16211_v51 = vcombine.low %v10874_v20, %v10878_v31 }
 0x86c   :  { %v10858_v61 = vld [vmem:[#allocation14 + $0x658] sm:$0xff] }
 0x86d   :  { %v10862_v54 = vld [vmem:[#allocation14 + $0x678] sm:$0xff] }
 0x86e   :  { %14307 = vmatpush1.bf16.msra.mxu1 %v16163_v58  ;;  %v16204_v58 = vcombine.high %v10866_v3, %v10870_v8  ;;  %v16196_v49 = vcombine.high %v10858_v61, %v10862_v54  ;;  %v16195_v1 = vcombine.low %v10858_v61, %v10862_v54  ;;  %v11058_v54 = vld [vmem:[#allocation14 + $0xc98] sm:$0xff] }
 0x86f   :  { %14308 = vmatprep.subr.bf16.mxu1 %v16156_v27  ;;  %v16203_v27 = vcombine.low %v10866_v3, %v10870_v8 }
 0x872   :  { %14309 = vmatpush1.bf16.msra.mxu1 %v16155_v45  ;;  %v10854_v45 = vld [vmem:[#allocation14 + $0x638] sm:$0xff] }
 0x873   :  { %14310 = vmatprep.subr.bf16.mxu1 %v16148_v33  ;;  %v17479_v33 = vld [vmem:[#allocation16] sm:$0xff] }
 0x874   :  { %v11180_v60 = vrot.slane %v17479_v33, %v17036_v30  ;;  %v11090_v30 = vld [vmem:[#allocation14 + $0xd98] sm:$0xff] }
 0x876   :  { %14311 = vmatpush1.bf16.msra.mxu1 %v16147_v2  ;;  %v16188_v2 = vcombine.high %v10850_v48, %v10854_v45 }
 0x877   :  { %14312 = vmatprep.subr.bf16.mxu1 %v16140_v13  ;;  %v11184_v13 = vrot.slane %v17479_v33, %v17018_v38 }
 0x879   :  { %v13970_v12 = vadd.f32 %v17449_v6, %v11184_v13 }
 0x87a   :  { %14313 = vmatpush1.bf16.msra.mxu1 %v16139_v5  ;;  %v13968_v5 = vadd.f32 %v17444_v62, %v11180_v60  ;;  %v11086_v62 = vld [vmem:[#allocation14 + $0xd78] sm:$0xff] }
 0x87b   :  { %14314 = vmatprep.subr.bf16.mxu1 %v16132_v10  ;;  %v16187_v10 = vcombine.low %v10850_v48, %v10854_v45  ;;  %v14011_v57 = vadd.f32 %v17475_v9, %v13970_v12  ;;  %v14497_v48 = vrot.slane %v14489_v44, %v16934_v53  ;;  %v11166_v44 = vld [vmem:[#allocation14 + $0xff8] sm:$0xff] }
 0x87d   :  { %v14052_v6 = vadd.f32 %v17458_v63, %v14011_v57  ;;  %v16499_v57 = vcombine.low %v11162_v52, %v11166_v44 }
 0x87e   :  { %14315 = vmatpush1.bf16.msra.mxu1 %v16131_v36  ;;  %v14009_v36 = vadd.f32 %v17468_v43, %v13968_v5  ;;  %v11042_v5 = vld [vmem:[#allocation14 + $0xc18] sm:$0xff] }
 0x87f   :  { %14316 = vmatprep.subr.bf16.mxu1 %v16124_v41  ;;  %v11094_v41 = vld [vmem:[#allocation14 + $0xdb8] sm:$0xff] }
 0x880   :  { %v16428_v38 = vcombine.high %v11090_v30, %v11094_v41  ;;  %v16427_v43 = vcombine.low %v11090_v30, %v11094_v41  ;;  %v11154_v30 = vld [vmem:[#allocation14 + $0xf98] sm:$0xff] }
 0x881   :  { %v11158_v41 = vld [vmem:[#allocation14 + $0xfb8] sm:$0xff] }
 0x882   :  { %14317 = vmatpush1.bf16.msra.mxu1 %v16123_v24  ;;  %v14050_v24 = vadd.f32 %v17452_v39, %v14009_v36  ;;  %v16500_v36 = vcombine.high %v11162_v52, %v11166_v44 }
 0x883   :  { %14318 = vmatprep.subr.bf16.mxu1 %v16244_v47  ;;  %v11082_v47 = vld [vmem:[#allocation14 + $0xd58] sm:$0xff] }
 0x886   :  { %14319 = vmatpush2.bf16.msra.mxu1 %v16243_v17 }
 0x887   :  { %14320 = vmatprep.subr.bf16.mxu1 %v16236_v15  ;;  %v16420_v15 = vcombine.high %v11082_v47, %v11086_v62 }
 0x88a   :  { %14321 = vmatpush2.bf16.msra.mxu1 %v16235_v18  ;;  %v11074_v18 = vld [vmem:[#allocation14 + $0xd18] sm:$0xff] }
 0x88b   :  { %14322 = vmatprep.subr.bf16.mxu1 %v16228_v21  ;;  %v11078_v21 = vld [vmem:[#allocation14 + $0xd38] sm:$0xff] }
 0x88e   :  { %14323 = vmatpush2.bf16.msra.mxu1 %v16227_v23 }
 0x88f   :  { %14324 = vmatprep.subr.bf16.mxu1 %v16220_v40  ;;  %v16419_v40 = vcombine.low %v11082_v47, %v11086_v62  ;;  %v16491_v47 = vcombine.low %v11154_v30, %v11158_v41 }
 0x892   :  { %14325 = vmatpush2.bf16.msra.mxu1 %v16219_v50  ;;  %v11066_v50 = vld [vmem:[#allocation14 + $0xcd8] sm:$0xff] }
 0x893   :  { %14326 = vmatprep.subr.bf16.mxu1 %v16212_v25  ;;  %v11070_v25 = vld [vmem:[#allocation14 + $0xcf8] sm:$0xff] }
 0x896   :  { %14327 = vmatpush2.bf16.msra.mxu1 %v16211_v51  ;;  %v16411_v51 = vcombine.low %v11074_v18, %v11078_v21 }
 0x897   :  { %14328 = vmatprep.subr.bf16.mxu1 %v16204_v58  ;;  %v16404_v58 = vcombine.high %v11066_v50, %v11070_v25 }
 0x89a   :  { %14329 = vmatpush2.bf16.msra.mxu1 %v16203_v27  ;;  %v11062_v27 = vld [vmem:[#allocation14 + $0xcb8] sm:$0xff] }
 0x89b   :  { %14330 = vmatprep.subr.bf16.mxu1 %v16196_v49  ;;  %v16403_v49 = vcombine.low %v11066_v50, %v11070_v25  ;;  %v16396_v60 = vcombine.high %v11058_v54, %v11062_v27  ;;  %v16395_v16 = vcombine.low %v11058_v54, %v11062_v27 }
 0x89e   :  { %14331 = vmatpush2.bf16.msra.mxu1 %v16195_v1  ;;  %v11050_v1 = vld [vmem:[#allocation14 + $0xc58] sm:$0xff] }
 0x89f   :  { %14332 = vmatprep.subr.bf16.mxu1 %v16188_v2  ;;  %v11054_v2 = vld [vmem:[#allocation14 + $0xc78] sm:$0xff] }
 0x8a0   :  { %v16388_v14 = vcombine.high %v11050_v1, %v11054_v2 }
 0x8a2   :  { %14333 = vmatpush2.bf16.msra.mxu1 %v16187_v10  ;;  %v11046_v10 = vld [vmem:[#allocation14 + $0xc38] sm:$0xff] }
 0x8a3   :  { %14384 = vmatprep.subr.bf16.mxu1 %v16436_v42  ;;  %v16387_v42 = vcombine.low %v11050_v1, %v11054_v2  ;;  %v16380_v35 = vcombine.high %v11042_v5, %v11046_v10  ;;  %v16379_v12 = vcombine.low %v11042_v5, %v11046_v10 }
 0x8a5   :  { %v14090_v59 = vpop.f32.mrf.mxu1  ;;  %14335 = vmatmul.mubr.bf16.vlgmr.msra.gmra.mxu1 %v17375_v34 }
 0x8a6   :  { %v14091_v7 = vadd.f32 %v14090_v59, %v14050_v24  ;;  %v17491_v17 = vpop.f32.mrf.mxu0  ;;  %14385 = vmatpush1.bf16.msra.mxu1 %v16435_v28  ;;  %14416 = vmatprep.mubr.bf16.mxu1 %v17420_v4  ;;  %v16412_v4 = vcombine.high %v11074_v18, %v11078_v21  ;;  %v16492_v28 = vcombine.high %v11154_v30, %v11158_v41  ;;  %v11150_v24 = vld [vmem:[#allocation14 + $0xf78] sm:$0xff] }
 0x8a7   :  { %v14092_v9 = vpop.f32.mrf.mxu1  ;;  %14386 = vmatprep.subr.bf16.mxu1 %v16428_v38  ;;  %v11146_v38 = vld [vmem:[#allocation14 + $0xf58] sm:$0xff] }
 0x8a8   :  { %v14427_v32 = vmul.f32 0.2, %v14091_v7  ;;  %v14093_v11 = vadd.f32 %v14092_v9, %v14052_v6  ;;  %v17495_v39 = vpop.f32.mrf.mxu0  ;;  %v16484_v62 = vcombine.high %v11146_v38, %v11150_v24  ;;  %v11138_v59 = vld [vmem:[#allocation14 + $0xf18] sm:$0xff]  ;;  %v16483_v6 = vcombine.low %v11146_v38, %v11150_v24 }
 0x8a9   :  { %v14094_v37 = vpop.f32.mrf.mxu1  ;;  %v11130_v9 = vld [vmem:[#allocation14 + $0xed8] sm:$0xff] }
 0x8aa   :  { %v14435_v34 = vmax.f32 %v14091_v7, %v14427_v32  ;;  %v14428_v29 = vmul.f32 0.2, %v14093_v11  ;;  %v14217_v23 = vpop.f32.mrf.mxu0  ;;  %14387 = vmatpush1.bf16.msra.mxu1 %v16427_v43  ;;  %v11142_v7 = vld [vmem:[#allocation14 + $0xf38] sm:$0xff] }
 0x8ab   :  { %v14095_v20 = vpop.f32.mrf.mxu1  ;;  %14388 = vmatprep.subr.bf16.mxu1 %v16420_v15  ;;  %v16476_v43 = vcombine.high %v11138_v59, %v11142_v7  ;;  %v11134_v15 = vld [vmem:[#allocation14 + $0xef8] sm:$0xff]  ;;  %v16475_v32 = vcombine.low %v11138_v59, %v11142_v7 }
 0x8ac   :  { %v14436_v63 = vmax.f32 %v14093_v11, %v14428_v29  ;;  %v14218_v31 = vpop.f32.mrf.mxu0  ;;  %v14443_v3 = vmul.f32 1.4142135, %v14435_v34  ;;  %v16468_v11 = vcombine.high %v11130_v9, %v11134_v15  ;;  %v11122_v18 = vld [vmem:[#allocation14 + $0xe98] sm:$0xff]  ;;  %v16467_v37 = vcombine.low %v11130_v9, %v11134_v15 }
 0x8ad   :  { %v11126_v21 = vld [vmem:[#allocation14 + $0xeb8] sm:$0xff] }
 0x8ae   :  { %v14444_v8 = vmul.f32 1.4142135, %v14436_v63  ;;  %14389 = vmatpush1.bf16.msra.mxu1 %v16419_v40  ;;  %v16460_v34 = vcombine.high %v11122_v18, %v11126_v21  ;;  %v11114_v29 = vld [vmem:[#allocation14 + $0xe58] sm:$0xff]  ;;  %v16459_v40 = vcombine.low %v11122_v18, %v11126_v21 }
 0x8af   :  { %14390 = vmatprep.subr.bf16.mxu1 %v16412_v4  ;;  %v11118_v23 = vld [vmem:[#allocation14 + $0xe78] sm:$0xff] }
 0x8b0   :  { %v14490_v61 = vcombine.low %v14443_v3, %v14444_v8  ;;  %v16452_v20 = vcombine.high %v11114_v29, %v11118_v23  ;;  %v11106_v4 = vld [vmem:[#allocation14 + $0xe18] sm:$0xff]  ;;  %v16451_v31 = vcombine.low %v11114_v29, %v11118_v23  ;;  %v11188_v3 = vrot.slane %v17479_v33, %v17068_v0 }
 0x8b1   :  { %v11110_v63 = vld [vmem:[#allocation14 + $0xe38] sm:$0xff]  ;;  %v11192_v8 = vrot.slane %v17479_v33, %v17071_v26 }
 0x8b2   :  { %14391 = vmatpush1.bf16.msra.mxu1 %v16411_v51  ;;  %v14504_v45 = vrot.slane %v14490_v61, %v16934_v53  ;;  %v16444_v50 = vcombine.high %v11106_v4, %v11110_v63  ;;  %v16443_v25 = vcombine.low %v11106_v4, %v11110_v63  ;;  %v14132_v51 = vadd.f32 %v17470_v46, %v11188_v3 }
 0x8b3   :  { %14392 = vmatprep.subr.bf16.mxu1 %v16404_v58  ;;  %v14134_v61 = vadd.f32 %v17477_v55, %v11192_v8 }
 0x8b4   :  { %v17502_v13 = vcombine.low %v14497_v48, %v14504_v45 }
 0x8b6   :  { %14393 = vmatpush1.bf16.msra.mxu1 %v16403_v49  ;;  %14509 = vst [vmem:[#allocation20] sm:$0xff] %v17502_v13 }
 0x8b7   :  { %14394 = vmatprep.subr.bf16.mxu1 %v16396_v60 }
 0x8ba   :  { %14395 = vmatpush1.bf16.msra.mxu1 %v16395_v16 }
 0x8bb   :  { %14396 = vmatprep.subr.bf16.mxu1 %v16388_v14 }
 0x8be   :  { %14397 = vmatpush1.bf16.msra.mxu1 %v16387_v42 }
 0x8bf   :  { %14398 = vmatprep.subr.bf16.mxu1 %v16380_v35 }
 0x8c2   :  { %14399 = vmatpush1.bf16.msra.mxu1 %v16379_v12 }
 0x8c3   :  { %14400 = vmatprep.subr.bf16.mxu1 %v16500_v36 }
 0x8c6   :  { %14401 = vmatpush2.bf16.msra.mxu1 %v16499_v57 }
 0x8c7   :  { %14402 = vmatprep.subr.bf16.mxu1 %v16492_v28 }
 0x8ca   :  { %14403 = vmatpush2.bf16.msra.mxu1 %v16491_v47 }
 0x8cb   :  { %14404 = vmatprep.subr.bf16.mxu1 %v16484_v62 }
 0x8ce   :  { %14405 = vmatpush2.bf16.msra.mxu1 %v16483_v6 }
 0x8cf   :  { %14406 = vmatprep.subr.bf16.mxu1 %v16476_v43 }
 0x8d2   :  { %14407 = vmatpush2.bf16.msra.mxu1 %v16475_v32 }
 0x8d3   :  { %14408 = vmatprep.subr.bf16.mxu1 %v16468_v11 }
 0x8d6   :  { %14409 = vmatpush2.bf16.msra.mxu1 %v16467_v37 }
 0x8d7   :  { %14410 = vmatprep.subr.bf16.mxu1 %v16460_v34 }
 0x8da   :  { %14411 = vmatpush2.bf16.msra.mxu1 %v16459_v40 }
 0x8db   :  { %14412 = vmatprep.subr.bf16.mxu1 %v16452_v20 }
 0x8de   :  { %14413 = vmatpush2.bf16.msra.mxu1 %v16451_v31 }
 0x8df   :  { %14414 = vmatprep.subr.bf16.mxu1 %v16444_v50 }
 0x8e2   :  { %14415 = vmatpush2.bf16.msra.mxu1 %v16443_v25 }
 0x8e5   :  { %v14172_v58 = vpop.f32.mrf.mxu1  ;;  %14417 = vmatmul.mubr.bf16.vlgmr.msra.gmra.mxu1 %v17422_v19 }
 0x8e6   :  { %v14173_v54 = vadd.f32 %v14172_v58, %v14132_v51  ;;  %v14295_v27 = vpop.f32.mrf.mxu0 }
 0x8e7   :  { %v14174_v49 = vpop.f32.mrf.mxu1 }
 0x8e8   :  { %v14175_v48 = vadd.f32 %v14174_v49, %v14134_v61  ;;  %v14297_v45 = vpop.f32.mrf.mxu0  ;;  %v14214_v60 = vadd.f32 %v17491_v17, %v14173_v54 }
 0x8e9   :  { %v14176_v1 = vpop.f32.mrf.mxu1 }
 0x8ea   :  { %v14299_v0 = vpop.f32.mrf.mxu0  ;;  %v14216_v2 = vadd.f32 %v17495_v39, %v14175_v48 }
 0x8eb   :  { %v14177_v26 = vpop.f32.mrf.mxu1 }
 0x8ec   :  { %v14300_v16 = vpop.f32.mrf.mxu0 }
 0x925   :  { %v14254_v14 = vpop.f32.mrf.mxu1 }
 0x926   :  { %v14255_v46 = vadd.f32 %v14254_v14, %v14214_v60  ;;  %v14377_v5 = vpop.f32.mrf.mxu0 }
 0x927   :  { %v14256_v10 = vpop.f32.mrf.mxu1 }
 0x928   :  { %v14429_v19 = vmul.f32 0.2, %v14255_v46  ;;  %v14257_v42 = vadd.f32 %v14256_v10, %v14216_v2  ;;  %v14379_v55 = vpop.f32.mrf.mxu0 }
 0x929   :  { %v14258_v35 = vpop.f32.mrf.mxu1 }
 0x92a   :  { %v14437_v52 = vmax.f32 %v14255_v46, %v14429_v19  ;;  %v14430_v44 = vmul.f32 0.2, %v14257_v42  ;;  %v14381_v12 = vpop.f32.mrf.mxu0 }
 0x92b   :  { %v14259_v36 = vpop.f32.mrf.mxu1 }
 0x92c   :  { %v14445_v30 = vmul.f32 1.4142135, %v14437_v52  ;;  %v14438_v17 = vmax.f32 %v14257_v42, %v14430_v44  ;;  %v14382_v41 = vpop.f32.mrf.mxu0 }
 0x92e   :  { %v14449_v57 = vmul.f32 0.5, %v14445_v30  ;;  %v14446_v28 = vmul.f32 1.4142135, %v14438_v17 }
 0x930   :  { %v14453_v39 = vmul.f32 1.442695, %v14449_v57  ;;  %v14450_v38 = vmul.f32 0.5, %v14446_v28  ;;  %v14514_v24 = vcombine.low %v14445_v30, %v14446_v28 }
 0x932   :  { %v14455_v47 = vmul.f32 1.442695, %v14450_v38  ;;  %16518 = vpow2.f32 %v14453_v39 }
 0x934   :  { %16520 = vpow2.f32 %v14455_v47 }
 0x935   :  { %16743 = shalt.err (!%p16740_p12)
}
 0x936   :  { %14552 = dma.vmem_to_hbm [thread:$0]  %s14550_s9, 128, %s17543_s11, [#allocation21]   ;;  %v11196_v6 = vrot.slane %v17479_v33, %v17095_v56  ;;  %v11200_v43 = vrot.slane %v17479_v33, %v17098_v22 }
 0x937   :  { %s16822_s11 = smov [#allocation22]  }
 0x938   :  { %v14296_v9 = vadd.f32 %v14295_v27, %v11196_v6  ;;  %v14298_v32 = vadd.f32 %v14297_v45, %v11200_v43  ;;  %s14559_s13 = sshll.u32 %s16822_s11, 4  ;;  %v14522_v27 = vrot.slane %v14514_v24, %v16934_v53  ;;  %s14560_s13 = int_to_ptr.vmem [resolvable:$true] %s14559_s13 }
 0x939   :  { %s16752_s14 = scalar_lea.vmem %s14560_s13, 128  ;;  %p16757_p0 = scmp.lt.s32.totalorder %s14560_s13, %s14560_s13 }
 0x93a   :  { %p16753_p13 = scmp.ne.s32.totalorder %s14560_s13, %s16752_s14  ;;  %p16758_p1 = scmp.lt.s32.totalorder %s16752_s14, %s16752_s14 }
 0x93c   :  { %p16759_p2 = por %p16758_p1, %p16757_p0 }
 0x93e   :  { %p16760_p3 = pnand %p16759_p2, %p16753_p13 }
 0x93f   :  { %v16519_v62 = vpop.eup %16518 }
 0x941   :  { %v16521_v59 = vpop.eup %16520 }
 0x942   :  { %v14466_v7 = vcombine.low %v16519_v62, %v16521_v59 }
 0x965   :  { %v14336_v15 = vpop.f32.mrf.mxu1 }
 0x966   :  { %v14337_v11 = vadd.f32 %v14336_v15, %v14296_v9 }
 0x967   :  { %v14338_v18 = vpop.f32.mrf.mxu1 }
 0x968   :  { %v14339_v21 = vadd.f32 %v14338_v18, %v14298_v32  ;;  %v14378_v37 = vadd.f32 %v14377_v5, %v14337_v11 }
 0x969   :  { %v14340_v34 = vpop.f32.mrf.mxu1 }
 0x96a   :  { %v14380_v29 = vadd.f32 %v14379_v55, %v14339_v21 }
 0x96b   :  { %v14341_v23 = vpop.f32.mrf.mxu1 }
 0x9a5   :  { %v14418_v40 = vpop.f32.mrf.mxu1 }
 0x9a6   :  { %v14419_v20 = vadd.f32 %v14418_v40, %v14378_v37 }
 0x9a7   :  { %v14420_v4 = vpop.f32.mrf.mxu1 }
 0x9a8   :  { %v14431_v63 = vmul.f32 0.2, %v14419_v20  ;;  %v14421_v31 = vadd.f32 %v14420_v4, %v14380_v29 }
 0x9a9   :  { %v14422_v50 = vpop.f32.mrf.mxu1 }
 0x9aa   :  { %v14439_v56 = vmax.f32 %v14419_v20, %v14431_v63  ;;  %v14432_v25 = vmul.f32 0.2, %v14421_v31 }
 0x9ab   :  { %v14423_v3 = vpop.f32.mrf.mxu1 }
 0x9ac   :  { %v14447_v22 = vmul.f32 1.4142135, %v14439_v56  ;;  %v14440_v33 = vmax.f32 %v14421_v31, %v14432_v25 }
 0x9ae   :  { %v14451_v8 = vmul.f32 0.5, %v14447_v22  ;;  %v14448_v51 = vmul.f32 1.4142135, %v14440_v33 }
 0x9b0   :  { %v14457_v58 = vmul.f32 1.442695, %v14451_v8  ;;  %v14452_v61 = vmul.f32 0.5, %v14448_v51  ;;  %v14515_v54 = vcombine.low %v14447_v22, %v14448_v51 }
 0x9b2   :  { %v14459_v49 = vmul.f32 1.442695, %v14452_v61  ;;  %v14529_v48 = vrot.slane %v14515_v54, %v16934_v53  ;;  %16522 = vpow2.f32 %v14457_v58 }
 0x9b4   :  { %16524 = vpow2.f32 %v14459_v49  ;;  %v14530_v45 = vcombine.low %v14522_v27, %v14529_v48 }
 0x9b6   :  { %14532 = vst [vmem:[#allocation22] sm:$0xff] %v14530_v45 }
 0x9b7   :  { %16763 = shalt.err (!%p16760_p3)
}
 0x9b8   :  { %14562 = dma.vmem_to_hbm [thread:$0]  %s14560_s13, 128, %s17544_s12, [#allocation21]   ;;  %v14474_v2 = vrot.slane %v14466_v7, %v16934_v53  ;;  %v14461_v16 = vld [vmem:[#allocation17] sm:$0xff] }
 0x9b9   :  { %s16823_s24 = smov [#allocation19]  }
 0x9ba   :  { %s14539_s25 = sshll.u32 %s16823_s24, 4  ;;  %s14540_s25 = int_to_ptr.vmem [resolvable:$true] %s14539_s25 }
 0x9bb   :  { %s16772_s0 = scalar_lea.vmem %s14540_s25, 128  ;;  %p16777_p5 = scmp.lt.s32.totalorder %s14540_s25, %s14540_s25 }
 0x9bc   :  { %p16773_p4 = scmp.ne.s32.totalorder %s14540_s25, %s16772_s0  ;;  %p16778_p6 = scmp.lt.s32.totalorder %s16772_s0, %s16772_s0 }
 0x9be   :  { %p16779_p7 = por %p16778_p6, %p16777_p5 }
 0x9bf   :  { %v16523_v60 = vpop.eup %16522 }
 0x9c0   :  { %p16780_p8 = pnand %p16779_p7, %p16773_p4 }
 0x9c1   :  { %v16525_v1 = vpop.eup %16524 }
 0x9c2   :  { %v14467_v0 = vcombine.low %v16523_v60, %v16525_v1 }
 0x9c4   :  { %v14481_v26 = vrot.slane %v14467_v0, %v16934_v53 }
 0x9c6   :  { %v14482_v14 = vcombine.low %v14474_v2, %v14481_v26 }
 0x9c8   :  { %v14484_v46 = vmul.f32 %v14482_v14, %v14461_v16 }
 0x9ca   :  { %v14507_v5 = vadd.f32 %v17502_v13, %v14484_v46 }
 0x9cc   :  { %14508 = vst [vmem:[#allocation19] sm:$0xff] %v14507_v5 }
 0x9cd   :  { %16783 = shalt.err (!%p16780_p8)
}
 0x9ce   :  { %14542 = dma.vmem_to_hbm [thread:$0]  %s14540_s25, 128, %s17542_s10, [#allocation4]  }
 0x9cf   :  { %16804 = dma.done.wait [#allocation4], 128  }
 0x9d0   :  { %16805 = vsyncadd [#allocation4], 4294967168 }
 0x9d1   :  { %16806 = dma.done.wait [#allocation21], 256  }
 0x9d2   :  { %16807 = vsyncadd [#allocation21], 4294967040 }
 0x9d3   :  { %14572 = vsyncpa [#allocation3], 1 }
 0x9d4   :  { %14573 = vsyncpa [#allocation6], 1 }
 0x9d5   :  { %14574 = vsyncpa [#allocation9], 1 }
 0x9d6   :  { %14575 = vsyncpa [#allocation12], 1 }
 0x9d7   :  { %14576 = vsyncpa [#allocation15], 1 }
 0x9d8   :  { %14577 = vsyncpa [#allocation18], 1 }
 0x9d9   :  { %14578 = vsyncpa [#allocation4], 1 }
 0x9da   :  { %14579 = vsyncpa [#allocation21], 1 }

</bundles_post_ra>
